<compile_context>
chip_gen: v6e
topology: v6e:2x2x1
jax: 0.10.0
libtpu: 0.0.40
codegen_flags: <defaults>
</compile_context>

<pallas_src>
import functools

import jax
import jax.numpy as jnp
from jax.experimental import pallas as pl
from jax.experimental.pallas import tpu as pltpu


# ---------------------------------------------------------------------------
# Fused kernel: conv1 + ReLU + maxpool + conv2 + ReLU + GAP + logit
# One grid step handles a batch tile of Bt samples.
# ---------------------------------------------------------------------------
def _fused_kernel(x_ref, w1_ref, b1_ref, w2_ref, b2_ref, wl_ref, bl_ref,
                  o_ref, xp_ref, p2_ref, *, H, W, Cin, C1, C2):
    Bt = x_ref.shape[0]
    H2, W2 = H // 2, W // 2
    M1 = Bt * H * W
    M2 = Bt * H2 * W2

    # Zero the padded scratch buffers once; only their interiors are written
    # afterwards, so the zero borders persist across grid steps.
    # (Grid axis is marked "arbitrary", so this is safe even for >1 step.)
    @pl.when(pl.program_id(0) == 0)
    def _init():
        xp_ref[...] = jnp.zeros_like(xp_ref)
        p2_ref[...] = jnp.zeros_like(p2_ref)

    # In-kernel "same" padding (replaces the wrapper-side jnp.pad copy).
    xp_ref[:, 1:H + 1, 1:W + 1, :] = x_ref[...]

    # ---- conv1: 3x3, pad=1 -> 9 shifted matmuls accumulated in f32 on MXU
    acc1 = jnp.zeros((M1, C1), jnp.float32)
    for t in range(9):
        dy, dx = t // 3, t % 3
        patch = xp_ref[:, dy:dy + H, dx:dx + W, :].reshape(M1, Cin)
        acc1 += jnp.dot(patch, w1_ref[t], preferred_element_type=jnp.float32)
    acc1 = jnp.maximum(acc1 + b1_ref[...], 0.0)

    # ---- maxpool 2x2 stride 2 (rows are ordered (b, h, w))
    y = acc1.reshape(Bt * H * W2, 2, C1).max(axis=1)      # pool along W
    y = y.reshape(Bt * H2, 2, W2, C1).max(axis=1)         # pool along H
    p2_ref[:, 1:H2 + 1, 1:W2 + 1, :] = y.reshape(Bt, H2, W2, C1)

    # ---- conv2: 3x3, pad=1
    acc2 = jnp.zeros((M2, C2), jnp.float32)
    for t in range(9):
        dy, dx = t // 3, t % 3
        patch = p2_ref[:, dy:dy + H2, dx:dx + W2, :].reshape(M2, C1)
        acc2 += jnp.dot(patch, w2_ref[t], preferred_element_type=jnp.float32)
    acc2 = jnp.maximum(acc2 + b2_ref[...], 0.0)

    # ---- global average pool -> (Bt, C2) features
    feats = jnp.mean(acc2.reshape(Bt, H2 * W2, C2), axis=1)

    # ---- fused logit layer; concat((f, f)) already folded into wl_ref
    o_ref[...] = (jnp.dot(feats, wl_ref[...],
                          preferred_element_type=jnp.float32) + bl_ref[...])


def server_forward_fused(x_nchw, params, *, batch_tile=None):
    """x_nchw: (B, Cin, H, W) f32 -> (B, num_features) f32 logits."""
    B, Cin, H, W = x_nchw.shape
    assert H % 2 == 0 and W % 2 == 0, "even spatial dims required for 2x2 pool"
    C1 = params["conv1_w"].shape[-1]
    C2 = params["conv2_w"].shape[-1]
    F = params["logit_w_fold"].shape[-1]

    Bt = B if batch_tile is None else batch_tile
    assert B % Bt == 0
    num_tiles = B // Bt
    H2, W2 = H // 2, W // 2

    # NCHW -> NHWC so channels sit on the TPU lane dimension (cheap glue).
    x = jnp.transpose(x_nchw, (0, 2, 3, 1))

    kern = functools.partial(_fused_kernel, H=H, W=W, Cin=Cin, C1=C1, C2=C2)

    # VMEM footprint per step is tiny (<1 MiB at these sizes); if Bt is ever
    # pushed very high (esp. v7x's 64 MiB physical VMEM), set vmem_limit_bytes
    # in CompilerParams and re-check 2x(input block)+scratch headroom.
    return pl.pallas_call(
        kern,
        out_shape=jax.ShapeDtypeStruct((B, F), jnp.float32),
        grid_spec=pltpu.PrefetchScalarGridSpec(
            num_scalar_prefetch=0,
            grid=(num_tiles,),
            in_specs=[
                pl.BlockSpec((Bt, H, W, Cin), lambda i: (i, 0, 0, 0)),
                pl.BlockSpec((9, Cin, C1), lambda i: (0, 0, 0)),
                pl.BlockSpec((1, C1), lambda i: (0, 0)),
                pl.BlockSpec((9, C1, C2), lambda i: (0, 0, 0)),
                pl.BlockSpec((1, C2), lambda i: (0, 0)),
                pl.BlockSpec((C2, F), lambda i: (0, 0)),
                pl.BlockSpec((1, F), lambda i: (0, 0)),
            ],
            out_specs=pl.BlockSpec((Bt, F), lambda i: (i, 0)),
            scratch_shapes=[
                pltpu.VMEM((Bt, H + 2, W + 2, Cin), jnp.float32),   # padded in
                pltpu.VMEM((Bt, H2 + 2, W2 + 2, C1), jnp.float32),  # padded pool
            ],
        ),
        # "arbitrary": scratch borders are zeroed only at program_id==0, which
        # must run on the (single) core that executes the whole grid.  With
        # Bt = B the grid is (1,) so megacore sharding is moot anyway.
        compiler_params=pltpu.CompilerParams(
            dimension_semantics=("arbitrary",)),
    )(x, params["conv1_w"], params["conv1_b"],
      params["conv2_w"], params["conv2_b"],
      params["logit_w_fold"], params["logit_b"])


# ---------------------------------------------------------------------------
# server_model.forward
# ---------------------------------------------------------------------------
@jax.jit
def server_model_forward(x, params):
    # fd_model -> concat(x, x) -> view -> logit, with concat folded into the
    # logit weights and everything fused into one pallas_call.
    return server_forward_fused(x, params)


def init_params(in_channel, num_features, key, C1=32, C2=64):
    k1, k2, k3, k4, k5, k6 = jax.random.split(key, 6)
    # PyTorch layouts: conv weight (Cout, Cin, 3, 3), Linear weight (out, in)
    w1_pt = jax.random.normal(k1, (C1, in_channel, 3, 3), jnp.float32) * 0.1
    w2_pt = jax.random.normal(k2, (C2, C1, 3, 3), jnp.float32) * 0.05
    logit_w = jax.random.normal(k3, (num_features, 2 * C2), jnp.float32) * 0.05
    b1 = jax.random.normal(k4, (C1,), jnp.float32) * 0.05
    b2 = jax.random.normal(k5, (C2,), jnp.float32) * 0.05
    logit_b = jax.random.normal(k6, (num_features,), jnp.float32) * 0.05
    return {
        # conv weights tap-major: (kh, kw, Cin, Cout) -> (9, Cin, Cout)
        "conv1_w": jnp.transpose(w1_pt, (2, 3, 1, 0)).reshape(9, in_channel, C1),
        "conv1_b": b1.reshape(1, C1),
        "conv2_w": jnp.transpose(w2_pt, (2, 3, 1, 0)).reshape(9, C1, C2),
        "conv2_b": b2.reshape(1, C2),
        # concat((f, f)) @ W.T == f @ (W[:, :C2] + W[:, C2:]).T  (exact fold)
        "logit_w_fold": (logit_w[:, :C2] + logit_w[:, C2:]).T,   # (C2, F)
        "logit_b": logit_b.reshape(1, num_features),
    }


if __name__ == "__main__":
    B, Cin, H, W = 2, 4, 16, 16
    num_features = 10

    key = jax.random.PRNGKey(0)
    kx, kp = jax.random.split(key)
    x = jax.random.normal(kx, (B, Cin, H, W), jnp.float32)
    params = init_params(Cin, num_features, kp)

    out = server_model_forward(x, params)
    out = jax.block_until_ready(out)
    assert out.shape == (B, num_features)
    print("KERNEL_OK")
</pallas_src>

<mosaic_0001>
module attributes {stable_mosaic.version = 11 : i64} {
  func.func @_fused_kernel(%arg0: i32, %arg1: memref<2x16x16x4xf32, #tpu.memory_space<vmem>>, %arg2: memref<9x4x32xf32, #tpu.memory_space<vmem>>, %arg3: memref<1x32xf32, #tpu.memory_space<vmem>>, %arg4: memref<9x32x64xf32, #tpu.memory_space<vmem>>, %arg5: memref<1x64xf32, #tpu.memory_space<vmem>>, %arg6: memref<64x10xf32, #tpu.memory_space<vmem>>, %arg7: memref<1x10xf32, #tpu.memory_space<vmem>>, %arg8: memref<2x10xf32, #tpu.memory_space<vmem>>, %arg9: memref<2x18x18x4xf32, #tpu.memory_space<vmem>>, %arg10: memref<2x10x10x32xf32, #tpu.memory_space<vmem>>) attributes {dimension_semantics = [#tpu.dimension_semantics<arbitrary>], iteration_bounds = array<i64: 1>, scalar_prefetch = 0 : i64, scratch_operands = 2 : i64, tpu.core_type = #tpu.core_type<tc>, window_params = [{transform_indices = @transform_0, window_bounds = array<i64: 2, 16, 16, 4>}, {pipeline_mode = #tpu.pipeline_mode<synchronous>, transform_indices = @transform_1, window_bounds = array<i64: 9, 4, 32>}, {pipeline_mode = #tpu.pipeline_mode<synchronous>, transform_indices = @transform_2, window_bounds = array<i64: 1, 32>}, {pipeline_mode = #tpu.pipeline_mode<synchronous>, transform_indices = @transform_3, window_bounds = array<i64: 9, 32, 64>}, {pipeline_mode = #tpu.pipeline_mode<synchronous>, transform_indices = @transform_4, window_bounds = array<i64: 1, 64>}, {pipeline_mode = #tpu.pipeline_mode<synchronous>, transform_indices = @transform_5, window_bounds = array<i64: 64, 10>}, {pipeline_mode = #tpu.pipeline_mode<synchronous>, transform_indices = @transform_6, window_bounds = array<i64: 1, 10>}, {transform_indices = @transform_7, window_bounds = array<i64: 2, 10>}]} {
    %c0_i32 = arith.constant 0 : i32
    %0 = arith.cmpi eq, %arg0, %c0_i32 : i32
    %1 = arith.extui %0 : i1 to i32
    %c0_i32_0 = arith.constant 0 : i32
    %2 = arith.cmpi ne, %1, %c0_i32_0 : i32
    scf.if %2 {
      %cst_166 = arith.constant 0.000000e+00 : f32
      %141 = vector.broadcast %cst_166 : f32 to vector<2x18x18x4xf32>
      %c0_167 = arith.constant 0 : index
      %c0_168 = arith.constant 0 : index
      %c0_169 = arith.constant 0 : index
      %c0_170 = arith.constant 0 : index
      %142 = vector.load %arg9[%c0_167, %c0_168, %c0_169, %c0_170] : memref<2x18x18x4xf32, #tpu.memory_space<vmem>>, vector<2x18x18x4xf32>
      tpu.vector_store %arg9[%c0_167, %c0_168, %c0_169, %c0_170], %141 {strides = array<i32>} : memref<2x18x18x4xf32, #tpu.memory_space<vmem>>, vector<2x18x18x4xf32>,
      %cst_171 = arith.constant 0.000000e+00 : f32
      %143 = vector.broadcast %cst_171 : f32 to vector<2x10x10x32xf32>
      %c0_172 = arith.constant 0 : index
      %c0_173 = arith.constant 0 : index
      %c0_174 = arith.constant 0 : index
      %c0_175 = arith.constant 0 : index
      %144 = vector.load %arg10[%c0_172, %c0_173, %c0_174, %c0_175] : memref<2x10x10x32xf32, #tpu.memory_space<vmem>>, vector<2x10x10x32xf32>
      tpu.vector_store %arg10[%c0_172, %c0_173, %c0_174, %c0_175], %143 {strides = array<i32>} : memref<2x10x10x32xf32, #tpu.memory_space<vmem>>, vector<2x10x10x32xf32>,
    } else {
    }
    %c0 = arith.constant 0 : index
    %c0_1 = arith.constant 0 : index
    %c0_2 = arith.constant 0 : index
    %c0_3 = arith.constant 0 : index
    %3 = vector.load %arg1[%c0, %c0_1, %c0_2, %c0_3] : memref<2x16x16x4xf32, #tpu.memory_space<vmem>>, vector<2x16x16x4xf32>
    %c0_4 = arith.constant 0 : index
    %c1 = arith.constant 1 : index
    %c1_5 = arith.constant 1 : index
    %c0_6 = arith.constant 0 : index
    %4 = vector.load %arg9[%c0_4, %c1, %c1_5, %c0_6] : memref<2x18x18x4xf32, #tpu.memory_space<vmem>>, vector<2x16x16x4xf32>
    tpu.vector_store %arg9[%c0_4, %c1, %c1_5, %c0_6], %3 {strides = array<i32>} : memref<2x18x18x4xf32, #tpu.memory_space<vmem>>, vector<2x16x16x4xf32>,
    %cst = arith.constant 0.000000e+00 : f32
    %5 = vector.broadcast %cst : f32 to vector<512x32xf32>
    %c0_7 = arith.constant 0 : index
    %c0_8 = arith.constant 0 : index
    %c0_9 = arith.constant 0 : index
    %c0_10 = arith.constant 0 : index
    %6 = vector.load %arg9[%c0_7, %c0_8, %c0_9, %c0_10] : memref<2x18x18x4xf32, #tpu.memory_space<vmem>>, vector<2x16x16x4xf32>
    %7 = vector.shape_cast %6 : vector<2x16x16x4xf32> to vector<512x4xf32>
    %c0_11 = arith.constant 0 : index
    %c0_12 = arith.constant 0 : index
    %c0_13 = arith.constant 0 : index
    %8 = vector.load %arg2[%c0_11, %c0_12, %c0_13] : memref<9x4x32xf32, #tpu.memory_space<vmem>>, vector<1x4x32xf32>
    %9 = vector.shape_cast %8 : vector<1x4x32xf32> to vector<4x32xf32>
    %cst_14 = arith.constant dense<0.000000e+00> : vector<512x32xf32>
    %10 = tpu.matmul %7, %9, %cst_14 {dimension_numbers = #tpu.dot_dimension_numbers<[1], [0], [0], [1], [0, 0, 1, 1], [], []>} : vector<512x4xf32>, vector<4x32xf32>, vector<512x32xf32> -> vector<512x32xf32>
    %11 = arith.addf %5, %10 : vector<512x32xf32>
    %c0_15 = arith.constant 0 : index
    %c0_16 = arith.constant 0 : index
    %c1_17 = arith.constant 1 : index
    %c0_18 = arith.constant 0 : index
    %12 = vector.load %arg9[%c0_15, %c0_16, %c1_17, %c0_18] : memref<2x18x18x4xf32, #tpu.memory_space<vmem>>, vector<2x16x16x4xf32>
    %13 = vector.shape_cast %12 : vector<2x16x16x4xf32> to vector<512x4xf32>
    %c1_19 = arith.constant 1 : index
    %c0_20 = arith.constant 0 : index
    %c0_21 = arith.constant 0 : index
    %14 = vector.load %arg2[%c1_19, %c0_20, %c0_21] : memref<9x4x32xf32, #tpu.memory_space<vmem>>, vector<1x4x32xf32>
    %15 = vector.shape_cast %14 : vector<1x4x32xf32> to vector<4x32xf32>
    %cst_22 = arith.constant dense<0.000000e+00> : vector<512x32xf32>
    %16 = tpu.matmul %13, %15, %cst_22 {dimension_numbers = #tpu.dot_dimension_numbers<[1], [0], [0], [1], [0, 0, 1, 1], [], []>} : vector<512x4xf32>, vector<4x32xf32>, vector<512x32xf32> -> vector<512x32xf32>
    %17 = arith.addf %11, %16 : vector<512x32xf32>
    %c0_23 = arith.constant 0 : index
    %c0_24 = arith.constant 0 : index
    %c2 = arith.constant 2 : index
    %c0_25 = arith.constant 0 : index
    %18 = vector.load %arg9[%c0_23, %c0_24, %c2, %c0_25] : memref<2x18x18x4xf32, #tpu.memory_space<vmem>>, vector<2x16x16x4xf32>
    %19 = vector.shape_cast %18 : vector<2x16x16x4xf32> to vector<512x4xf32>
    %c2_26 = arith.constant 2 : index
    %c0_27 = arith.constant 0 : index
    %c0_28 = arith.constant 0 : index
    %20 = vector.load %arg2[%c2_26, %c0_27, %c0_28] : memref<9x4x32xf32, #tpu.memory_space<vmem>>, vector<1x4x32xf32>
    %21 = vector.shape_cast %20 : vector<1x4x32xf32> to vector<4x32xf32>
    %cst_29 = arith.constant dense<0.000000e+00> : vector<512x32xf32>
    %22 = tpu.matmul %19, %21, %cst_29 {dimension_numbers = #tpu.dot_dimension_numbers<[1], [0], [0], [1], [0, 0, 1, 1], [], []>} : vector<512x4xf32>, vector<4x32xf32>, vector<512x32xf32> -> vector<512x32xf32>
    %23 = arith.addf %17, %22 : vector<512x32xf32>
    %c0_30 = arith.constant 0 : index
    %c1_31 = arith.constant 1 : index
    %c0_32 = arith.constant 0 : index
    %c0_33 = arith.constant 0 : index
    %24 = vector.load %arg9[%c0_30, %c1_31, %c0_32, %c0_33] : memref<2x18x18x4xf32, #tpu.memory_space<vmem>>, vector<2x16x16x4xf32>
    %25 = vector.shape_cast %24 : vector<2x16x16x4xf32> to vector<512x4xf32>
    %c3 = arith.constant 3 : index
    %c0_34 = arith.constant 0 : index
    %c0_35 = arith.constant 0 : index
    %26 = vector.load %arg2[%c3, %c0_34, %c0_35] : memref<9x4x32xf32, #tpu.memory_space<vmem>>, vector<1x4x32xf32>
    %27 = vector.shape_cast %26 : vector<1x4x32xf32> to vector<4x32xf32>
    %cst_36 = arith.constant dense<0.000000e+00> : vector<512x32xf32>
    %28 = tpu.matmul %25, %27, %cst_36 {dimension_numbers = #tpu.dot_dimension_numbers<[1], [0], [0], [1], [0, 0, 1, 1], [], []>} : vector<512x4xf32>, vector<4x32xf32>, vector<512x32xf32> -> vector<512x32xf32>
    %29 = arith.addf %23, %28 : vector<512x32xf32>
    %c0_37 = arith.constant 0 : index
    %c1_38 = arith.constant 1 : index
    %c1_39 = arith.constant 1 : index
    %c0_40 = arith.constant 0 : index
    %30 = vector.load %arg9[%c0_37, %c1_38, %c1_39, %c0_40] : memref<2x18x18x4xf32, #tpu.memory_space<vmem>>, vector<2x16x16x4xf32>
    %31 = vector.shape_cast %30 : vector<2x16x16x4xf32> to vector<512x4xf32>
    %c4 = arith.constant 4 : index
    %c0_41 = arith.constant 0 : index
    %c0_42 = arith.constant 0 : index
    %32 = vector.load %arg2[%c4, %c0_41, %c0_42] : memref<9x4x32xf32, #tpu.memory_space<vmem>>, vector<1x4x32xf32>
    %33 = vector.shape_cast %32 : vector<1x4x32xf32> to vector<4x32xf32>
    %cst_43 = arith.constant dense<0.000000e+00> : vector<512x32xf32>
    %34 = tpu.matmul %31, %33, %cst_43 {dimension_numbers = #tpu.dot_dimension_numbers<[1], [0], [0], [1], [0, 0, 1, 1], [], []>} : vector<512x4xf32>, vector<4x32xf32>, vector<512x32xf32> -> vector<512x32xf32>
    %35 = arith.addf %29, %34 : vector<512x32xf32>
    %c0_44 = arith.constant 0 : index
    %c1_45 = arith.constant 1 : index
    %c2_46 = arith.constant 2 : index
    %c0_47 = arith.constant 0 : index
    %36 = vector.load %arg9[%c0_44, %c1_45, %c2_46, %c0_47] : memref<2x18x18x4xf32, #tpu.memory_space<vmem>>, vector<2x16x16x4xf32>
    %37 = vector.shape_cast %36 : vector<2x16x16x4xf32> to vector<512x4xf32>
    %c5 = arith.constant 5 : index
    %c0_48 = arith.constant 0 : index
    %c0_49 = arith.constant 0 : index
    %38 = vector.load %arg2[%c5, %c0_48, %c0_49] : memref<9x4x32xf32, #tpu.memory_space<vmem>>, vector<1x4x32xf32>
    %39 = vector.shape_cast %38 : vector<1x4x32xf32> to vector<4x32xf32>
    %cst_50 = arith.constant dense<0.000000e+00> : vector<512x32xf32>
    %40 = tpu.matmul %37, %39, %cst_50 {dimension_numbers = #tpu.dot_dimension_numbers<[1], [0], [0], [1], [0, 0, 1, 1], [], []>} : vector<512x4xf32>, vector<4x32xf32>, vector<512x32xf32> -> vector<512x32xf32>
    %41 = arith.addf %35, %40 : vector<512x32xf32>
    %c0_51 = arith.constant 0 : index
    %c2_52 = arith.constant 2 : index
    %c0_53 = arith.constant 0 : index
    %c0_54 = arith.constant 0 : index
    %42 = vector.load %arg9[%c0_51, %c2_52, %c0_53, %c0_54] : memref<2x18x18x4xf32, #tpu.memory_space<vmem>>, vector<2x16x16x4xf32>
    %43 = vector.shape_cast %42 : vector<2x16x16x4xf32> to vector<512x4xf32>
    %c6 = arith.constant 6 : index
    %c0_55 = arith.constant 0 : index
    %c0_56 = arith.constant 0 : index
    %44 = vector.load %arg2[%c6, %c0_55, %c0_56] : memref<9x4x32xf32, #tpu.memory_space<vmem>>, vector<1x4x32xf32>
    %45 = vector.shape_cast %44 : vector<1x4x32xf32> to vector<4x32xf32>
    %cst_57 = arith.constant dense<0.000000e+00> : vector<512x32xf32>
    %46 = tpu.matmul %43, %45, %cst_57 {dimension_numbers = #tpu.dot_dimension_numbers<[1], [0], [0], [1], [0, 0, 1, 1], [], []>} : vector<512x4xf32>, vector<4x32xf32>, vector<512x32xf32> -> vector<512x32xf32>
    %47 = arith.addf %41, %46 : vector<512x32xf32>
    %c0_58 = arith.constant 0 : index
    %c2_59 = arith.constant 2 : index
    %c1_60 = arith.constant 1 : index
    %c0_61 = arith.constant 0 : index
    %48 = vector.load %arg9[%c0_58, %c2_59, %c1_60, %c0_61] : memref<2x18x18x4xf32, #tpu.memory_space<vmem>>, vector<2x16x16x4xf32>
    %49 = vector.shape_cast %48 : vector<2x16x16x4xf32> to vector<512x4xf32>
    %c7 = arith.constant 7 : index
    %c0_62 = arith.constant 0 : index
    %c0_63 = arith.constant 0 : index
    %50 = vector.load %arg2[%c7, %c0_62, %c0_63] : memref<9x4x32xf32, #tpu.memory_space<vmem>>, vector<1x4x32xf32>
    %51 = vector.shape_cast %50 : vector<1x4x32xf32> to vector<4x32xf32>
    %cst_64 = arith.constant dense<0.000000e+00> : vector<512x32xf32>
    %52 = tpu.matmul %49, %51, %cst_64 {dimension_numbers = #tpu.dot_dimension_numbers<[1], [0], [0], [1], [0, 0, 1, 1], [], []>} : vector<512x4xf32>, vector<4x32xf32>, vector<512x32xf32> -> vector<512x32xf32>
    %53 = arith.addf %47, %52 : vector<512x32xf32>
    %c0_65 = arith.constant 0 : index
    %c2_66 = arith.constant 2 : index
    %c2_67 = arith.constant 2 : index
    %c0_68 = arith.constant 0 : index
    %54 = vector.load %arg9[%c0_65, %c2_66, %c2_67, %c0_68] : memref<2x18x18x4xf32, #tpu.memory_space<vmem>>, vector<2x16x16x4xf32>
    %55 = vector.shape_cast %54 : vector<2x16x16x4xf32> to vector<512x4xf32>
    %c8 = arith.constant 8 : index
    %c0_69 = arith.constant 0 : index
    %c0_70 = arith.constant 0 : index
    %56 = vector.load %arg2[%c8, %c0_69, %c0_70] : memref<9x4x32xf32, #tpu.memory_space<vmem>>, vector<1x4x32xf32>
    %57 = vector.shape_cast %56 : vector<1x4x32xf32> to vector<4x32xf32>
    %cst_71 = arith.constant dense<0.000000e+00> : vector<512x32xf32>
    %58 = tpu.matmul %55, %57, %cst_71 {dimension_numbers = #tpu.dot_dimension_numbers<[1], [0], [0], [1], [0, 0, 1, 1], [], []>} : vector<512x4xf32>, vector<4x32xf32>, vector<512x32xf32> -> vector<512x32xf32>
    %59 = arith.addf %53, %58 : vector<512x32xf32>
    %c0_72 = arith.constant 0 : index
    %c0_73 = arith.constant 0 : index
    %60 = vector.load %arg3[%c0_72, %c0_73] : memref<1x32xf32, #tpu.memory_space<vmem>>, vector<1x32xf32>
    %61 = vector.broadcast %60 : vector<1x32xf32> to vector<512x32xf32>
    %62 = arith.addf %59, %61 : vector<512x32xf32>
    %cst_74 = arith.constant 0.000000e+00 : f32
    %63 = vector.broadcast %cst_74 : f32 to vector<512x32xf32>
    %64 = arith.maximumf %62, %63 : vector<512x32xf32>
    %65 = vector.shape_cast %64 : vector<512x32xf32> to vector<256x2x32xf32>
    %cst_75 = arith.constant dense<0xFF800000> : vector<256x32xf32>
    %66 = vector.multi_reduction <maximumf>, %65, %cst_75 [1] : vector<256x2x32xf32> to vector<256x32xf32>
    %67 = vector.shape_cast %66 : vector<256x32xf32> to vector<16x2x8x32xf32>
    %cst_76 = arith.constant dense<0xFF800000> : vector<16x8x32xf32>
    %68 = vector.multi_reduction <maximumf>, %67, %cst_76 [1] : vector<16x2x8x32xf32> to vector<16x8x32xf32>
    %69 = vector.shape_cast %68 : vector<16x8x32xf32> to vector<2x8x8x32xf32>
    %c0_77 = arith.constant 0 : index
    %c1_78 = arith.constant 1 : index
    %c1_79 = arith.constant 1 : index
    %c0_80 = arith.constant 0 : index
    %70 = vector.load %arg10[%c0_77, %c1_78, %c1_79, %c0_80] : memref<2x10x10x32xf32, #tpu.memory_space<vmem>>, vector<2x8x8x32xf32>
    tpu.vector_store %arg10[%c0_77, %c1_78, %c1_79, %c0_80], %69 {strides = array<i32>} : memref<2x10x10x32xf32, #tpu.memory_space<vmem>>, vector<2x8x8x32xf32>,
    %cst_81 = arith.constant 0.000000e+00 : f32
    %71 = vector.broadcast %cst_81 : f32 to vector<128x64xf32>
    %c0_82 = arith.constant 0 : index
    %c0_83 = arith.constant 0 : index
    %c0_84 = arith.constant 0 : index
    %c0_85 = arith.constant 0 : index
    %72 = vector.load %arg10[%c0_82, %c0_83, %c0_84, %c0_85] : memref<2x10x10x32xf32, #tpu.memory_space<vmem>>, vector<2x8x8x32xf32>
    %73 = vector.shape_cast %72 : vector<2x8x8x32xf32> to vector<128x32xf32>
    %c0_86 = arith.constant 0 : index
    %c0_87 = arith.constant 0 : index
    %c0_88 = arith.constant 0 : index
    %74 = vector.load %arg4[%c0_86, %c0_87, %c0_88] : memref<9x32x64xf32, #tpu.memory_space<vmem>>, vector<1x32x64xf32>
    %75 = vector.shape_cast %74 : vector<1x32x64xf32> to vector<32x64xf32>
    %cst_89 = arith.constant dense<0.000000e+00> : vector<128x64xf32>
    %76 = tpu.matmul %73, %75, %cst_89 {dimension_numbers = #tpu.dot_dimension_numbers<[1], [0], [0], [1], [0, 0, 1, 1], [], []>} : vector<128x32xf32>, vector<32x64xf32>, vector<128x64xf32> -> vector<128x64xf32>
    %77 = arith.addf %71, %76 : vector<128x64xf32>
    %c0_90 = arith.constant 0 : index
    %c0_91 = arith.constant 0 : index
    %c1_92 = arith.constant 1 : index
    %c0_93 = arith.constant 0 : index
    %78 = vector.load %arg10[%c0_90, %c0_91, %c1_92, %c0_93] : memref<2x10x10x32xf32, #tpu.memory_space<vmem>>, vector<2x8x8x32xf32>
    %79 = vector.shape_cast %78 : vector<2x8x8x32xf32> to vector<128x32xf32>
    %c1_94 = arith.constant 1 : index
    %c0_95 = arith.constant 0 : index
    %c0_96 = arith.constant 0 : index
    %80 = vector.load %arg4[%c1_94, %c0_95, %c0_96] : memref<9x32x64xf32, #tpu.memory_space<vmem>>, vector<1x32x64xf32>
    %81 = vector.shape_cast %80 : vector<1x32x64xf32> to vector<32x64xf32>
    %cst_97 = arith.constant dense<0.000000e+00> : vector<128x64xf32>
    %82 = tpu.matmul %79, %81, %cst_97 {dimension_numbers = #tpu.dot_dimension_numbers<[1], [0], [0], [1], [0, 0, 1, 1], [], []>} : vector<128x32xf32>, vector<32x64xf32>, vector<128x64xf32> -> vector<128x64xf32>
    %83 = arith.addf %77, %82 : vector<128x64xf32>
    %c0_98 = arith.constant 0 : index
    %c0_99 = arith.constant 0 : index
    %c2_100 = arith.constant 2 : index
    %c0_101 = arith.constant 0 : index
    %84 = vector.load %arg10[%c0_98, %c0_99, %c2_100, %c0_101] : memref<2x10x10x32xf32, #tpu.memory_space<vmem>>, vector<2x8x8x32xf32>
    %85 = vector.shape_cast %84 : vector<2x8x8x32xf32> to vector<128x32xf32>
    %c2_102 = arith.constant 2 : index
    %c0_103 = arith.constant 0 : index
    %c0_104 = arith.constant 0 : index
    %86 = vector.load %arg4[%c2_102, %c0_103, %c0_104] : memref<9x32x64xf32, #tpu.memory_space<vmem>>, vector<1x32x64xf32>
    %87 = vector.shape_cast %86 : vector<1x32x64xf32> to vector<32x64xf32>
    %cst_105 = arith.constant dense<0.000000e+00> : vector<128x64xf32>
    %88 = tpu.matmul %85, %87, %cst_105 {dimension_numbers = #tpu.dot_dimension_numbers<[1], [0], [0], [1], [0, 0, 1, 1], [], []>} : vector<128x32xf32>, vector<32x64xf32>, vector<128x64xf32> -> vector<128x64xf32>
    %89 = arith.addf %83, %88 : vector<128x64xf32>
    %c0_106 = arith.constant 0 : index
    %c1_107 = arith.constant 1 : index
    %c0_108 = arith.constant 0 : index
    %c0_109 = arith.constant 0 : index
    %90 = vector.load %arg10[%c0_106, %c1_107, %c0_108, %c0_109] : memref<2x10x10x32xf32, #tpu.memory_space<vmem>>, vector<2x8x8x32xf32>
    %91 = vector.shape_cast %90 : vector<2x8x8x32xf32> to vector<128x32xf32>
    %c3_110 = arith.constant 3 : index
    %c0_111 = arith.constant 0 : index
    %c0_112 = arith.constant 0 : index
    %92 = vector.load %arg4[%c3_110, %c0_111, %c0_112] : memref<9x32x64xf32, #tpu.memory_space<vmem>>, vector<1x32x64xf32>
    %93 = vector.shape_cast %92 : vector<1x32x64xf32> to vector<32x64xf32>
    %cst_113 = arith.constant dense<0.000000e+00> : vector<128x64xf32>
    %94 = tpu.matmul %91, %93, %cst_113 {dimension_numbers = #tpu.dot_dimension_numbers<[1], [0], [0], [1], [0, 0, 1, 1], [], []>} : vector<128x32xf32>, vector<32x64xf32>, vector<128x64xf32> -> vector<128x64xf32>
    %95 = arith.addf %89, %94 : vector<128x64xf32>
    %c0_114 = arith.constant 0 : index
    %c1_115 = arith.constant 1 : index
    %c1_116 = arith.constant 1 : index
    %c0_117 = arith.constant 0 : index
    %96 = vector.load %arg10[%c0_114, %c1_115, %c1_116, %c0_117] : memref<2x10x10x32xf32, #tpu.memory_space<vmem>>, vector<2x8x8x32xf32>
    %97 = vector.shape_cast %96 : vector<2x8x8x32xf32> to vector<128x32xf32>
    %c4_118 = arith.constant 4 : index
    %c0_119 = arith.constant 0 : index
    %c0_120 = arith.constant 0 : index
    %98 = vector.load %arg4[%c4_118, %c0_119, %c0_120] : memref<9x32x64xf32, #tpu.memory_space<vmem>>, vector<1x32x64xf32>
    %99 = vector.shape_cast %98 : vector<1x32x64xf32> to vector<32x64xf32>
    %cst_121 = arith.constant dense<0.000000e+00> : vector<128x64xf32>
    %100 = tpu.matmul %97, %99, %cst_121 {dimension_numbers = #tpu.dot_dimension_numbers<[1], [0], [0], [1], [0, 0, 1, 1], [], []>} : vector<128x32xf32>, vector<32x64xf32>, vector<128x64xf32> -> vector<128x64xf32>
    %101 = arith.addf %95, %100 : vector<128x64xf32>
    %c0_122 = arith.constant 0 : index
    %c1_123 = arith.constant 1 : index
    %c2_124 = arith.constant 2 : index
    %c0_125 = arith.constant 0 : index
    %102 = vector.load %arg10[%c0_122, %c1_123, %c2_124, %c0_125] : memref<2x10x10x32xf32, #tpu.memory_space<vmem>>, vector<2x8x8x32xf32>
    %103 = vector.shape_cast %102 : vector<2x8x8x32xf32> to vector<128x32xf32>
    %c5_126 = arith.constant 5 : index
    %c0_127 = arith.constant 0 : index
    %c0_128 = arith.constant 0 : index
    %104 = vector.load %arg4[%c5_126, %c0_127, %c0_128] : memref<9x32x64xf32, #tpu.memory_space<vmem>>, vector<1x32x64xf32>
    %105 = vector.shape_cast %104 : vector<1x32x64xf32> to vector<32x64xf32>
    %cst_129 = arith.constant dense<0.000000e+00> : vector<128x64xf32>
    %106 = tpu.matmul %103, %105, %cst_129 {dimension_numbers = #tpu.dot_dimension_numbers<[1], [0], [0], [1], [0, 0, 1, 1], [], []>} : vector<128x32xf32>, vector<32x64xf32>, vector<128x64xf32> -> vector<128x64xf32>
    %107 = arith.addf %101, %106 : vector<128x64xf32>
    %c0_130 = arith.constant 0 : index
    %c2_131 = arith.constant 2 : index
    %c0_132 = arith.constant 0 : index
    %c0_133 = arith.constant 0 : index
    %108 = vector.load %arg10[%c0_130, %c2_131, %c0_132, %c0_133] : memref<2x10x10x32xf32, #tpu.memory_space<vmem>>, vector<2x8x8x32xf32>
    %109 = vector.shape_cast %108 : vector<2x8x8x32xf32> to vector<128x32xf32>
    %c6_134 = arith.constant 6 : index
    %c0_135 = arith.constant 0 : index
    %c0_136 = arith.constant 0 : index
    %110 = vector.load %arg4[%c6_134, %c0_135, %c0_136] : memref<9x32x64xf32, #tpu.memory_space<vmem>>, vector<1x32x64xf32>
    %111 = vector.shape_cast %110 : vector<1x32x64xf32> to vector<32x64xf32>
    %cst_137 = arith.constant dense<0.000000e+00> : vector<128x64xf32>
    %112 = tpu.matmul %109, %111, %cst_137 {dimension_numbers = #tpu.dot_dimension_numbers<[1], [0], [0], [1], [0, 0, 1, 1], [], []>} : vector<128x32xf32>, vector<32x64xf32>, vector<128x64xf32> -> vector<128x64xf32>
    %113 = arith.addf %107, %112 : vector<128x64xf32>
    %c0_138 = arith.constant 0 : index
    %c2_139 = arith.constant 2 : index
    %c1_140 = arith.constant 1 : index
    %c0_141 = arith.constant 0 : index
    %114 = vector.load %arg10[%c0_138, %c2_139, %c1_140, %c0_141] : memref<2x10x10x32xf32, #tpu.memory_space<vmem>>, vector<2x8x8x32xf32>
    %115 = vector.shape_cast %114 : vector<2x8x8x32xf32> to vector<128x32xf32>
    %c7_142 = arith.constant 7 : index
    %c0_143 = arith.constant 0 : index
    %c0_144 = arith.constant 0 : index
    %116 = vector.load %arg4[%c7_142, %c0_143, %c0_144] : memref<9x32x64xf32, #tpu.memory_space<vmem>>, vector<1x32x64xf32>
    %117 = vector.shape_cast %116 : vector<1x32x64xf32> to vector<32x64xf32>
    %cst_145 = arith.constant dense<0.000000e+00> : vector<128x64xf32>
    %118 = tpu.matmul %115, %117, %cst_145 {dimension_numbers = #tpu.dot_dimension_numbers<[1], [0], [0], [1], [0, 0, 1, 1], [], []>} : vector<128x32xf32>, vector<32x64xf32>, vector<128x64xf32> -> vector<128x64xf32>
    %119 = arith.addf %113, %118 : vector<128x64xf32>
    %c0_146 = arith.constant 0 : index
    %c2_147 = arith.constant 2 : index
    %c2_148 = arith.constant 2 : index
    %c0_149 = arith.constant 0 : index
    %120 = vector.load %arg10[%c0_146, %c2_147, %c2_148, %c0_149] : memref<2x10x10x32xf32, #tpu.memory_space<vmem>>, vector<2x8x8x32xf32>
    %121 = vector.shape_cast %120 : vector<2x8x8x32xf32> to vector<128x32xf32>
    %c8_150 = arith.constant 8 : index
    %c0_151 = arith.constant 0 : index
    %c0_152 = arith.constant 0 : index
    %122 = vector.load %arg4[%c8_150, %c0_151, %c0_152] : memref<9x32x64xf32, #tpu.memory_space<vmem>>, vector<1x32x64xf32>
    %123 = vector.shape_cast %122 : vector<1x32x64xf32> to vector<32x64xf32>
    %cst_153 = arith.constant dense<0.000000e+00> : vector<128x64xf32>
    %124 = tpu.matmul %121, %123, %cst_153 {dimension_numbers = #tpu.dot_dimension_numbers<[1], [0], [0], [1], [0, 0, 1, 1], [], []>} : vector<128x32xf32>, vector<32x64xf32>, vector<128x64xf32> -> vector<128x64xf32>
    %125 = arith.addf %119, %124 : vector<128x64xf32>
    %c0_154 = arith.constant 0 : index
    %c0_155 = arith.constant 0 : index
    %126 = vector.load %arg5[%c0_154, %c0_155] : memref<1x64xf32, #tpu.memory_space<vmem>>, vector<1x64xf32>
    %127 = vector.broadcast %126 : vector<1x64xf32> to vector<128x64xf32>
    %128 = arith.addf %125, %127 : vector<128x64xf32>
    %cst_156 = arith.constant 0.000000e+00 : f32
    %129 = vector.broadcast %cst_156 : f32 to vector<128x64xf32>
    %130 = arith.maximumf %128, %129 : vector<128x64xf32>
    %131 = vector.shape_cast %130 : vector<128x64xf32> to vector<2x64x64xf32>
    %cst_157 = arith.constant dense<0.000000e+00> : vector<2x64xf32>
    %132 = vector.multi_reduction <add>, %131, %cst_157 [1] : vector<2x64x64xf32> to vector<2x64xf32>
    %cst_158 = arith.constant 6.400000e+01 : f32
    %133 = vector.broadcast %cst_158 : f32 to vector<2x64xf32>
    %134 = arith.divf %132, %133 : vector<2x64xf32>
    %c0_159 = arith.constant 0 : index
    %c0_160 = arith.constant 0 : index
    %135 = vector.load %arg6[%c0_159, %c0_160] : memref<64x10xf32, #tpu.memory_space<vmem>>, vector<64x10xf32>
    %cst_161 = arith.constant dense<0.000000e+00> : vector<2x10xf32>
    %136 = tpu.matmul %134, %135, %cst_161 {dimension_numbers = #tpu.dot_dimension_numbers<[1], [0], [0], [1], [0, 0, 1, 1], [], []>} : vector<2x64xf32>, vector<64x10xf32>, vector<2x10xf32> -> vector<2x10xf32>
    %c0_162 = arith.constant 0 : index
    %c0_163 = arith.constant 0 : index
    %137 = vector.load %arg7[%c0_162, %c0_163] : memref<1x10xf32, #tpu.memory_space<vmem>>, vector<1x10xf32>
    %138 = vector.broadcast %137 : vector<1x10xf32> to vector<2x10xf32>
    %139 = arith.addf %136, %138 : vector<2x10xf32>
    %c0_164 = arith.constant 0 : index
    %c0_165 = arith.constant 0 : index
    %140 = vector.load %arg8[%c0_164, %c0_165] : memref<2x10xf32, #tpu.memory_space<vmem>>, vector<2x10xf32>
    tpu.vector_store %arg8[%c0_164, %c0_165], %139 {strides = array<i32>} : memref<2x10xf32, #tpu.memory_space<vmem>>, vector<2x10xf32>,
    return
  }
  func.func @transform_0(%arg0: i32) -> (i32, i32, i32, i32) {
    %c0_i32 = arith.constant 0 : i32
    %c0_i32_0 = arith.constant 0 : i32
    %c0_i32_1 = arith.constant 0 : i32
    %c0_i32_2 = arith.constant 0 : i32
    return %arg0, %c0_i32, %c0_i32_0, %c0_i32_1 : i32, i32, i32, i32
  }
  func.func @transform_1(%arg0: i32) -> (i32, i32, i32) {
    %c0_i32 = arith.constant 0 : i32
    %c0_i32_0 = arith.constant 0 : i32
    %c0_i32_1 = arith.constant 0 : i32
    %c0_i32_2 = arith.constant 0 : i32
    return %c0_i32, %c0_i32_0, %c0_i32_1 : i32, i32, i32
  }
  func.func @transform_2(%arg0: i32) -> (i32, i32) {
    %c0_i32 = arith.constant 0 : i32
    %c0_i32_0 = arith.constant 0 : i32
    %c0_i32_1 = arith.constant 0 : i32
    return %c0_i32, %c0_i32_0 : i32, i32
  }
  func.func @transform_3(%arg0: i32) -> (i32, i32, i32) {
    %c0_i32 = arith.constant 0 : i32
    %c0_i32_0 = arith.constant 0 : i32
    %c0_i32_1 = arith.constant 0 : i32
    %c0_i32_2 = arith.constant 0 : i32
    return %c0_i32, %c0_i32_0, %c0_i32_1 : i32, i32, i32
  }
  func.func @transform_4(%arg0: i32) -> (i32, i32) {
    %c0_i32 = arith.constant 0 : i32
    %c0_i32_0 = arith.constant 0 : i32
    %c0_i32_1 = arith.constant 0 : i32
    return %c0_i32, %c0_i32_0 : i32, i32
  }
  func.func @transform_5(%arg0: i32) -> (i32, i32) {
    %c0_i32 = arith.constant 0 : i32
    %c0_i32_0 = arith.constant 0 : i32
    %c0_i32_1 = arith.constant 0 : i32
    return %c0_i32, %c0_i32_0 : i32, i32
  }
  func.func @transform_6(%arg0: i32) -> (i32, i32) {
    %c0_i32 = arith.constant 0 : i32
    %c0_i32_0 = arith.constant 0 : i32
    %c0_i32_1 = arith.constant 0 : i32
    return %c0_i32, %c0_i32_0 : i32, i32
  }
  func.func @transform_7(%arg0: i32) -> (i32, i32) {
    %c0_i32 = arith.constant 0 : i32
    %c0_i32_0 = arith.constant 0 : i32
    return %arg0, %c0_i32 : i32, i32
  }
}

</mosaic_0001>

<bundles_post_ra>
// kernel: server_model_forward.1
= control target key start
LH: loop header
LB: loop body
LE: loop exit
PB: predicated region body
PF: predicated region fallthrough
CT: control target
= control target key end

     0   :  { %vm636_vm0 = vcmask 1043456   ;;  %vm31_vm1 = vcmask 31744   ;;  %vm34_vm2 = vcmask 25600   ;;  %v21045_v1 = vmov 0.0   ;;  %s21037_s0 = inlined_call_operand.vmem [shape: f32[2,16,16,4], index: 0, kind: input, shape index: {}]   ;;  %s21038_s1 = inlined_call_operand.vmem [shape: f32[9,4,32], index: 1, kind: input, shape index: {}]   ;;  %s21039_s2 = inlined_call_operand.vmem [shape: f32[1,32], index: 2, kind: input, shape index: {}]   ;;  %s21040_s3 = inlined_call_operand.vmem [shape: f32[9,32,64], index: 3, kind: input, shape index: {}]   ;;  %s21041_s4 = inlined_call_operand.vmem [shape: f32[1,64], index: 4, kind: input, shape index: {}]   ;;  %s21042_s5 = inlined_call_operand.vmem [shape: f32[64,10], index: 5, kind: input, shape index: {}]   ;;  %s21043_s6 = inlined_call_operand.vmem [shape: f32[1,10], index: 6, kind: input, shape index: {}]   ;;  %s21044_s7 = inlined_call_operand.hbm [shape: f32[2,10], index: 7, kind: output, shape index: {}]  }
   0x1   :  { %v15627_v0 = vld [vmem:[%s21038_s1 + $0x4] sm:$0xf]  ;;  %32 = vst.msk [vmem:[#allocation2] sm:$0xff] %vm31_vm1, %v21045_v1  ;;  %33 = vst.msk [vmem:[#allocation2 + $0x8] sm:$0xff] %vm31_vm1, %v21045_v1  ;;  %v15780_v2 = vld [vmem:[%s21038_s1 + $0x8] sm:$0xf] }
   0x2   :  { %14353 = vmatprep.subr.msk.mxu0 %vm636_vm0, %v15627_v0  ;;  %15542 = vmatprep.subr.msk.mxu1 %vm636_vm0, %v15627_v0  ;;  %36 = vst.msk [vmem:[#allocation2 + $0x18] sm:$0xff] %vm31_vm1, %v21045_v1  ;;  %37 = vst.msk [vmem:[#allocation2 + $0x20] sm:$0xff] %vm31_vm1, %v21045_v1  ;;  %v239_v3 = vld [vmem:[%s21037_s0 + $0x1c0] sm:$0xff]  ;;  %v240_v4 = vld [vmem:[%s21037_s0 + $0x1c8] sm:$0xff] }
   0x3   :  { %39 = vst.msk [vmem:[#allocation2 + $0x30] sm:$0xff] %vm31_vm1, %v21045_v1  ;;  %40 = vst.msk [vmem:[#allocation2 + $0x38] sm:$0xff] %vm31_vm1, %v21045_v1  ;;  %14354 = vmatpush3.msk.msra.mxu0 %vm636_vm0, %v15627_v0  ;;  %15543 = vmatpush3.msk.msra.mxu1 %vm636_vm0, %v15627_v0  ;;  %v183_v5 = vld [vmem:[%s21037_s0] sm:$0xff]  ;;  %v184_v6 = vld [vmem:[%s21037_s0 + $0x8] sm:$0xff] }
   0x4   :  { %42 = vst.msk [vmem:[#allocation2 + $0x48] sm:$0xff] %vm31_vm1, %v21045_v1  ;;  %43 = vst.msk [vmem:[#allocation2 + $0x50] sm:$0xff] %vm31_vm1, %v21045_v1  ;;  %v241_v7 = vld [vmem:[%s21037_s0 + $0x1d0] sm:$0xff]  ;;  %14549 = vmatprep.subr.msk.mxu0 %vm636_vm0, %v15780_v2  ;;  %v242_v8 = vld [vmem:[%s21037_s0 + $0x1d8] sm:$0xff] }
   0x5   :  { %45 = vst.msk [vmem:[#allocation2 + $0x60] sm:$0xff] %vm31_vm1, %v21045_v1  ;;  %46 = vst.msk [vmem:[#allocation2 + $0x68] sm:$0xff] %vm31_vm1, %v21045_v1  ;;  %v185_v9 = vld [vmem:[%s21037_s0 + $0x10] sm:$0xff]  ;;  %v186_v10 = vld [vmem:[%s21037_s0 + $0x18] sm:$0xff] }
   0x6   :  { %48 = vst.msk [vmem:[#allocation2 + $0x78] sm:$0xff] %vm31_vm1, %v21045_v1  ;;  %49 = vst.msk [vmem:[#allocation2 + $0x80] sm:$0xff] %vm31_vm1, %v21045_v1  ;;  %v243_v11 = vld [vmem:[%s21037_s0 + $0x1e0] sm:$0xff]  ;;  %v244_v12 = vld [vmem:[%s21037_s0 + $0x1e8] sm:$0xff] }
   0x7   :  { %51 = vst.msk [vmem:[#allocation2 + $0x90] sm:$0xff] %vm31_vm1, %v21045_v1  ;;  %52 = vst.msk [vmem:[#allocation2 + $0x98] sm:$0xff] %vm31_vm1, %v21045_v1  ;;  %v187_v13 = vld [vmem:[%s21037_s0 + $0x20] sm:$0xff]  ;;  %v188_v15 = vld [vmem:[%s21037_s0 + $0x28] sm:$0xff] }
   0x8   :  { %54 = vst.msk [vmem:[#allocation2 + $0xa8] sm:$0xff] %vm31_vm1, %v21045_v1  ;;  %55 = vst.msk [vmem:[#allocation2 + $0xb0] sm:$0xff] %vm31_vm1, %v21045_v1  ;;  %v377_v14 = vld [vmem:[%s21038_s1] sm:$0xf]  ;;  %v189_v16 = vld [vmem:[%s21037_s0 + $0x30] sm:$0xff] }
   0x9   :  { %57 = vst.msk [vmem:[#allocation2 + $0xc0] sm:$0xff] %vm31_vm1, %v21045_v1  ;;  %58 = vst.msk [vmem:[#allocation2 + $0xc8] sm:$0xff] %vm31_vm1, %v21045_v1  ;;  %14451 = vmatprep.subr.msk.mxu1 %vm636_vm0, %v377_v14  ;;  %v190_v17 = vld [vmem:[%s21037_s0 + $0x38] sm:$0xff]  ;;  %v191_v18 = vld [vmem:[%s21037_s0 + $0x40] sm:$0xff] }
   0xa   :  { %60 = vst.msk [vmem:[#allocation2 + $0xd8] sm:$0xff] %vm31_vm1, %v21045_v1  ;;  %61 = vst.msk [vmem:[#allocation2 + $0xe0] sm:$0xff] %vm31_vm1, %v21045_v1  ;;  %v192_v19 = vld [vmem:[%s21037_s0 + $0x48] sm:$0xff]  ;;  %v193_v20 = vld [vmem:[%s21037_s0 + $0x50] sm:$0xff] }
   0xb   :  { %63 = vst.msk [vmem:[#allocation2 + $0xf0] sm:$0xff] %vm31_vm1, %v21045_v1  ;;  %64 = vst.msk [vmem:[#allocation2 + $0xf8] sm:$0xff] %vm31_vm1, %v21045_v1  ;;  %v194_v21 = vld [vmem:[%s21037_s0 + $0x58] sm:$0xff]  ;;  %v195_v22 = vld [vmem:[%s21037_s0 + $0x60] sm:$0xff] }
   0xc   :  { %66 = vst.msk [vmem:[#allocation2 + $0x108] sm:$0xff] %vm31_vm1, %v21045_v1  ;;  %67 = vst.msk [vmem:[#allocation2 + $0x110] sm:$0xff] %vm31_vm1, %v21045_v1  ;;  %v378_v23 = vld [vmem:[#allocation2 + $0x1] sm:$0xff]  ;;  %v197_v39 = vld [vmem:[%s21037_s0 + $0x70] sm:$0xff] }
   0xd   :  { %69 = vst.msk [vmem:[#allocation2 + $0x120] sm:$0xff] %vm31_vm1, %v21045_v1  ;;  %70 = vst.msk [vmem:[#allocation2 + $0x128] sm:$0xff] %vm31_vm1, %v21045_v1  ;;  %14355 = vmatprep.mubr.msk.f32.mxu0 %vm31_vm1, %v378_v23  ;;  %v313_v36 = vld [vmem:[#allocation2] sm:$0xff]  ;;  %v196_v37 = vld [vmem:[%s21037_s0 + $0x68] sm:$0xff] }
   0xe   :  { %72 = vst.msk [vmem:[#allocation2 + $0x138] sm:$0xff] %vm31_vm1, %v21045_v1  ;;  %73 = vst.msk [vmem:[#allocation2 + $0x140] sm:$0xff] %vm31_vm1, %v21045_v1  ;;  %v314_v38 = vld [vmem:[#allocation2 + $0x8] sm:$0xff]  ;;  %v198_v42 = vld [vmem:[%s21037_s0 + $0x78] sm:$0xff] }
   0xf   :  { %75 = vst.msk [vmem:[#allocation2 + $0x150] sm:$0xff] %vm31_vm1, %v21045_v1  ;;  %76 = vst.msk [vmem:[#allocation2 + $0x158] sm:$0xff] %vm31_vm1, %v21045_v1  ;;  %v199_v44 = vld [vmem:[%s21037_s0 + $0x80] sm:$0xff]  ;;  %v200_v45 = vld [vmem:[%s21037_s0 + $0x88] sm:$0xff] }
  0x10   :  { %78 = vst.msk [vmem:[#allocation2 + $0x168] sm:$0xff] %vm31_vm1, %v21045_v1  ;;  %79 = vst.msk [vmem:[#allocation2 + $0x170] sm:$0xff] %vm31_vm1, %v21045_v1  ;;  %v201_v47 = vld [vmem:[%s21037_s0 + $0x90] sm:$0xff]  ;;  %v202_v48 = vld [vmem:[%s21037_s0 + $0x98] sm:$0xff] }
  0x11   :  { %81 = vst.msk [vmem:[#allocation2 + $0x180] sm:$0xff] %vm31_vm1, %v21045_v1  ;;  %82 = vst.msk [vmem:[#allocation2 + $0x188] sm:$0xff] %vm31_vm1, %v21045_v1  ;;  %v203_v51 = vld [vmem:[%s21037_s0 + $0xa0] sm:$0xff]  ;;  %v204_v52 = vld [vmem:[%s21037_s0 + $0xa8] sm:$0xff] }
  0x12   :  { %84 = vst.msk [vmem:[#allocation2 + $0x198] sm:$0xff] %vm31_vm1, %v21045_v1  ;;  %85 = vst.msk [vmem:[#allocation2 + $0x1a0] sm:$0xff] %vm31_vm1, %v21045_v1  ;;  %v205_v53 = vld [vmem:[%s21037_s0 + $0xb0] sm:$0xff]  ;;  %v206_v54 = vld [vmem:[%s21037_s0 + $0xb8] sm:$0xff] }
  0x13   :  { %87 = vst.msk [vmem:[#allocation2 + $0x1b0] sm:$0xff] %vm31_vm1, %v21045_v1  ;;  %88 = vst.msk [vmem:[#allocation2 + $0x1b8] sm:$0xff] %vm31_vm1, %v21045_v1  ;;  %v207_v55 = vld [vmem:[%s21037_s0 + $0xc0] sm:$0xff]  ;;  %v208_v56 = vld [vmem:[%s21037_s0 + $0xc8] sm:$0xff] }
  0x14   :  { %90 = vst.msk [vmem:[#allocation2 + $0x1c8] sm:$0xff] %vm31_vm1, %v21045_v1  ;;  %91 = vst.msk [vmem:[#allocation2 + $0x1d0] sm:$0xff] %vm31_vm1, %v21045_v1  ;;  %v209_v57 = vld [vmem:[%s21037_s0 + $0xd0] sm:$0xff]  ;;  %v210_v58 = vld [vmem:[%s21037_s0 + $0xd8] sm:$0xff] }
  0x15   :  { %93 = vst.msk [vmem:[#allocation2 + $0x1e0] sm:$0xff] %vm31_vm1, %v21045_v1  ;;  %94 = vst.msk [vmem:[#allocation2 + $0x1e8] sm:$0xff] %vm31_vm1, %v21045_v1  ;;  %v211_v60 = vld [vmem:[%s21037_s0 + $0xe0] sm:$0xff]  ;;  %v212_v61 = vld [vmem:[%s21037_s0 + $0xe8] sm:$0xff] }
  0x16   :  { %96 = vst.msk [vmem:[#allocation2 + $0x1f8] sm:$0xff] %vm31_vm1, %v21045_v1  ;;  %97 = vst.msk [vmem:[#allocation2 + $0x200] sm:$0xff] %vm31_vm1, %v21045_v1 }
  0x17   :  { %99 = vst.msk [vmem:[#allocation2 + $0x210] sm:$0xff] %vm31_vm1, %v21045_v1  ;;  %100 = vst.msk [vmem:[#allocation2 + $0x218] sm:$0xff] %vm31_vm1, %v21045_v1 }
  0x18   :  { %102 = vst.msk [vmem:[#allocation2 + $0x228] sm:$0xff] %vm31_vm1, %v21045_v1  ;;  %103 = vst.msk [vmem:[#allocation2 + $0x230] sm:$0xff] %vm31_vm1, %v21045_v1 }
  0x19   :  { %105 = vst.msk [vmem:[#allocation2 + $0x240] sm:$0xff] %vm31_vm1, %v21045_v1  ;;  %106 = vst.msk [vmem:[#allocation2 + $0x248] sm:$0xff] %vm31_vm1, %v21045_v1 }
  0x1a   :  { %108 = vst.msk [vmem:[#allocation2 + $0x258] sm:$0xff] %vm31_vm1, %v21045_v1  ;;  %109 = vst.msk [vmem:[#allocation2 + $0x260] sm:$0xff] %vm31_vm1, %v21045_v1 }
  0x1b   :  { %111 = vst.msk [vmem:[#allocation2 + $0x270] sm:$0xff] %vm31_vm1, %v21045_v1  ;;  %112 = vst.msk [vmem:[#allocation2 + $0x278] sm:$0xff] %vm31_vm1, %v21045_v1 }
  0x1c   :  { %114 = vst.msk [vmem:[#allocation2 + $0x288] sm:$0xff] %vm31_vm1, %v21045_v1  ;;  %115 = vst.msk [vmem:[#allocation2 + $0x290] sm:$0xff] %vm31_vm1, %v21045_v1 }
  0x1d   :  { %117 = vst.msk [vmem:[#allocation2 + $0x2a0] sm:$0xff] %vm31_vm1, %v21045_v1  ;;  %118 = vst.msk [vmem:[#allocation2 + $0x2a8] sm:$0xff] %vm31_vm1, %v21045_v1 }
  0x1e   :  { %120 = vst.msk [vmem:[#allocation2 + $0x2b8] sm:$0xff] %vm31_vm1, %v21045_v1  ;;  %121 = vst.msk [vmem:[#allocation2 + $0x2c0] sm:$0xff] %vm31_vm1, %v21045_v1 }
  0x1f   :  { %123 = vst.msk [vmem:[#allocation2 + $0x2d0] sm:$0xff] %vm31_vm1, %v21045_v1  ;;  %124 = vst.msk [vmem:[#allocation2 + $0x2d8] sm:$0xff] %vm31_vm1, %v21045_v1 }
  0x20   :  { %126 = vst.msk [vmem:[#allocation2 + $0x2e8] sm:$0xff] %vm31_vm1, %v21045_v1  ;;  %127 = vst.msk [vmem:[#allocation2 + $0x2f0] sm:$0xff] %vm31_vm1, %v21045_v1 }
  0x21   :  { %129 = vst.msk [vmem:[#allocation2 + $0x300] sm:$0xff] %vm31_vm1, %v21045_v1  ;;  %130 = vst.msk [vmem:[#allocation2 + $0x308] sm:$0xff] %vm31_vm1, %v21045_v1 }
  0x22   :  { %132 = vst.msk [vmem:[#allocation2 + $0x318] sm:$0xff] %vm31_vm1, %v21045_v1  ;;  %133 = vst.msk [vmem:[#allocation2 + $0x320] sm:$0xff] %vm31_vm1, %v21045_v1 }
  0x23   :  { %135 = vst.msk [vmem:[#allocation2 + $0x330] sm:$0xff] %vm31_vm1, %v21045_v1  ;;  %136 = vst.msk [vmem:[#allocation2 + $0x338] sm:$0xff] %vm31_vm1, %v21045_v1 }
  0x24   :  { %138 = vst.msk [vmem:[#allocation2 + $0x348] sm:$0xff] %vm31_vm1, %v21045_v1  ;;  %139 = vst.msk [vmem:[#allocation2 + $0x350] sm:$0xff] %vm31_vm1, %v21045_v1 }
  0x25   :  { %35 = vst.msk [vmem:[#allocation2 + $0x10] sm:$0x3] %vm34_vm2, %v21045_v1  ;;  %38 = vst.msk [vmem:[#allocation2 + $0x28] sm:$0x3] %vm34_vm2, %v21045_v1 }
  0x26   :  { %41 = vst.msk [vmem:[#allocation2 + $0x40] sm:$0x3] %vm34_vm2, %v21045_v1  ;;  %44 = vst.msk [vmem:[#allocation2 + $0x58] sm:$0x3] %vm34_vm2, %v21045_v1 }
  0x27   :  { %47 = vst.msk [vmem:[#allocation2 + $0x70] sm:$0x3] %vm34_vm2, %v21045_v1  ;;  %50 = vst.msk [vmem:[#allocation2 + $0x88] sm:$0x3] %vm34_vm2, %v21045_v1 }
  0x28   :  { %53 = vst.msk [vmem:[#allocation2 + $0xa0] sm:$0x3] %vm34_vm2, %v21045_v1  ;;  %56 = vst.msk [vmem:[#allocation2 + $0xb8] sm:$0x3] %vm34_vm2, %v21045_v1 }
  0x29   :  { %59 = vst.msk [vmem:[#allocation2 + $0xd0] sm:$0x3] %vm34_vm2, %v21045_v1  ;;  %62 = vst.msk [vmem:[#allocation2 + $0xe8] sm:$0x3] %vm34_vm2, %v21045_v1 }
  0x2a   :  { %65 = vst.msk [vmem:[#allocation2 + $0x100] sm:$0x3] %vm34_vm2, %v21045_v1  ;;  %68 = vst.msk [vmem:[#allocation2 + $0x118] sm:$0x3] %vm34_vm2, %v21045_v1 }
  0x2b   :  { %71 = vst.msk [vmem:[#allocation2 + $0x130] sm:$0x3] %vm34_vm2, %v21045_v1  ;;  %74 = vst.msk [vmem:[#allocation2 + $0x148] sm:$0x3] %vm34_vm2, %v21045_v1 }
  0x2c   :  { %77 = vst.msk [vmem:[#allocation2 + $0x160] sm:$0x3] %vm34_vm2, %v21045_v1  ;;  %80 = vst.msk [vmem:[#allocation2 + $0x178] sm:$0x3] %vm34_vm2, %v21045_v1  ;;  %v379_v24 = vld [vmem:[#allocation2 + $0x9] sm:$0xff] }
  0x2d   :  { %83 = vst.msk [vmem:[#allocation2 + $0x190] sm:$0x3] %vm34_vm2, %v21045_v1  ;;  %86 = vst.msk [vmem:[#allocation2 + $0x1a8] sm:$0x3] %vm34_vm2, %v21045_v1  ;;  %14356 = vmatmul.mubr.msk.f32.vlgmr.msra.gmra.mxu0 %vm31_vm1, %v379_v24  ;;  %v223_v24 = vld [vmem:[%s21037_s0 + $0x140] sm:$0xff] }
  0x2e   :  { %89 = vst.msk [vmem:[#allocation2 + $0x1c0] sm:$0x3] %vm34_vm2, %v21045_v1  ;;  %92 = vst.msk [vmem:[#allocation2 + $0x1d8] sm:$0x3] %vm34_vm2, %v21045_v1  ;;  %14550 = vmatpush3.msk.msra.mxu0 %vm636_vm0, %v15780_v2 }
  0x2f   :  { %95 = vst.msk [vmem:[#allocation2 + $0x1f0] sm:$0x3] %vm34_vm2, %v21045_v1  ;;  %98 = vst.msk [vmem:[#allocation2 + $0x208] sm:$0x3] %vm34_vm2, %v21045_v1 }
  0x30   :  { %101 = vst.msk [vmem:[#allocation2 + $0x220] sm:$0x3] %vm34_vm2, %v21045_v1  ;;  %104 = vst.msk [vmem:[#allocation2 + $0x238] sm:$0x3] %vm34_vm2, %v21045_v1 }
  0x31   :  { %107 = vst.msk [vmem:[#allocation2 + $0x250] sm:$0x3] %vm34_vm2, %v21045_v1  ;;  %110 = vst.msk [vmem:[#allocation2 + $0x268] sm:$0x3] %vm34_vm2, %v21045_v1 }
  0x32   :  { %113 = vst.msk [vmem:[#allocation2 + $0x280] sm:$0x3] %vm34_vm2, %v21045_v1  ;;  %116 = vst.msk [vmem:[#allocation2 + $0x298] sm:$0x3] %vm34_vm2, %v21045_v1 }
  0x33   :  { %119 = vst.msk [vmem:[#allocation2 + $0x2b0] sm:$0x3] %vm34_vm2, %v21045_v1  ;;  %122 = vst.msk [vmem:[#allocation2 + $0x2c8] sm:$0x3] %vm34_vm2, %v21045_v1 }
  0x34   :  { %125 = vst.msk [vmem:[#allocation2 + $0x2e0] sm:$0x3] %vm34_vm2, %v21045_v1  ;;  %128 = vst.msk [vmem:[#allocation2 + $0x2f8] sm:$0x3] %vm34_vm2, %v21045_v1 }
  0x35   :  { %131 = vst.msk [vmem:[#allocation2 + $0x310] sm:$0x3] %vm34_vm2, %v21045_v1  ;;  %134 = vst.msk [vmem:[#allocation2 + $0x328] sm:$0x3] %vm34_vm2, %v21045_v1 }
  0x36   :  { %137 = vst.msk [vmem:[#allocation2 + $0x340] sm:$0x3] %vm34_vm2, %v21045_v1  ;;  %140 = vst.msk [vmem:[#allocation2 + $0x358] sm:$0x3] %vm34_vm2, %v21045_v1 }
  0x37   :  { %305 = vst.msk [vmem:[#allocation2 + $0x2e9] sm:$0xff] %vm31_vm1, %v239_v3  ;;  %306 = vst.msk [vmem:[#allocation2 + $0x2f1] sm:$0xff] %vm31_vm1, %v240_v4 }
  0x38   :  { %249 = vst.msk [vmem:[#allocation2 + $0x19] sm:$0xff] %vm31_vm1, %v183_v5  ;;  %250 = vst.msk [vmem:[#allocation2 + $0x21] sm:$0xff] %vm31_vm1, %v184_v6 }
  0x39   :  { %307 = vst.msk [vmem:[#allocation2 + $0x301] sm:$0xff] %vm31_vm1, %v241_v7  ;;  %308 = vst.msk [vmem:[#allocation2 + $0x309] sm:$0xff] %vm31_vm1, %v242_v8 }
  0x3a   :  { %251 = vst.msk [vmem:[#allocation2 + $0x31] sm:$0xff] %vm31_vm1, %v185_v9  ;;  %252 = vst.msk [vmem:[#allocation2 + $0x39] sm:$0xff] %vm31_vm1, %v186_v10  ;;  %v215_v10 = vld [vmem:[%s21037_s0 + $0x100] sm:$0xff] }
  0x3b   :  { %309 = vst.msk [vmem:[#allocation2 + $0x319] sm:$0xff] %vm31_vm1, %v243_v11  ;;  %310 = vst.msk [vmem:[#allocation2 + $0x321] sm:$0xff] %vm31_vm1, %v244_v12  ;;  %v216_v11 = vld [vmem:[%s21037_s0 + $0x108] sm:$0xff] }
  0x3c   :  { %253 = vst.msk [vmem:[#allocation2 + $0x49] sm:$0xff] %vm31_vm1, %v187_v13  ;;  %254 = vst.msk [vmem:[#allocation2 + $0x51] sm:$0xff] %vm31_vm1, %v188_v15  ;;  %v217_v13 = vld [vmem:[%s21037_s0 + $0x110] sm:$0xff]  ;;  %v218_v15 = vld [vmem:[%s21037_s0 + $0x118] sm:$0xff] }
  0x3d   :  { %255 = vst.msk [vmem:[#allocation2 + $0x61] sm:$0xff] %vm31_vm1, %v189_v16  ;;  %256 = vst.msk [vmem:[#allocation2 + $0x69] sm:$0xff] %vm31_vm1, %v190_v17 }
  0x3e   :  { %257 = vst.msk [vmem:[#allocation2 + $0x79] sm:$0xff] %vm31_vm1, %v191_v18  ;;  %258 = vst.msk [vmem:[#allocation2 + $0x81] sm:$0xff] %vm31_vm1, %v192_v19  ;;  %v436_v25 = vld [vmem:[#allocation2 + $0x2e9] sm:$0xff]  ;;  %v437_v26 = vld [vmem:[#allocation2 + $0x2f1] sm:$0xff] }
  0x3f   :  { %259 = vst.msk [vmem:[#allocation2 + $0x91] sm:$0xff] %vm31_vm1, %v193_v20  ;;  %260 = vst.msk [vmem:[#allocation2 + $0x99] sm:$0xff] %vm31_vm1, %v194_v21  ;;  %14442 = vmatprep.mubr.msk.f32.mxu1 %vm31_vm1, %v436_v25  ;;  %v380_v27 = vld [vmem:[#allocation2 + $0x19] sm:$0xff]  ;;  %v381_v29 = vld [vmem:[#allocation2 + $0x21] sm:$0xff] }
  0x40   :  { %261 = vst.msk [vmem:[#allocation2 + $0xa9] sm:$0xff] %vm31_vm1, %v195_v22  ;;  %v438_v28 = vld [vmem:[#allocation2 + $0x301] sm:$0xff]  ;;  %14443 = vmatmul.mubr.msk.f32.vlgmr.msra.gmra.mxu1 %vm31_vm1, %v437_v26  ;;  %14358 = vmatprep.mubr.msk.f32.mxu0 %vm31_vm1, %v380_v27  ;;  %v439_v30 = vld [vmem:[#allocation2 + $0x309] sm:$0xff]  ;;  %262 = vst.msk [vmem:[#allocation2 + $0xb1] sm:$0xff] %vm31_vm1, %v196_v37 }
  0x41   :  { %14445 = vmatprep.mubr.msk.f32.mxu1 %vm31_vm1, %v438_v28  ;;  %v382_v31 = vld [vmem:[#allocation2 + $0x31] sm:$0xff]  ;;  %14452 = vmatpush3.msk.msra.mxu1 %vm636_vm0, %v377_v14  ;;  %v383_v33 = vld [vmem:[#allocation2 + $0x39] sm:$0xff]  ;;  %263 = vst.msk [vmem:[#allocation2 + $0xc1] sm:$0xff] %vm31_vm1, %v197_v39  ;;  %264 = vst.msk [vmem:[#allocation2 + $0xc9] sm:$0xff] %vm31_vm1, %v198_v42 }
  0x42   :  { %v440_v32 = vld [vmem:[#allocation2 + $0x319] sm:$0xff]  ;;  %14359 = vmatmul.mubr.msk.f32.gmra.mxu0 %vm31_vm1, %v381_v29  ;;  %v441_v34 = vld [vmem:[#allocation2 + $0x321] sm:$0xff]  ;;  %265 = vst.msk [vmem:[#allocation2 + $0xd9] sm:$0xff] %vm31_vm1, %v199_v44  ;;  %266 = vst.msk [vmem:[#allocation2 + $0xe1] sm:$0xff] %vm31_vm1, %v200_v45 }
  0x43   :  { %14361 = vmatprep.mubr.msk.f32.mxu0 %vm31_vm1, %v382_v31  ;;  %v384_v35 = vld [vmem:[#allocation2 + $0x49] sm:$0xff]  ;;  %v385_v40 = vld [vmem:[#allocation2 + $0x51] sm:$0xff]  ;;  %v15986_v49 = vld [vmem:[#allocation2 + $0x20] sm:$0xff]  ;;  %267 = vst.msk [vmem:[#allocation2 + $0xf1] sm:$0xff] %vm31_vm1, %v201_v47 }
  0x44   :  { %14446 = vmatmul.mubr.msk.f32.gmra.mxu1 %vm31_vm1, %v439_v30  ;;  %v386_v41 = vld [vmem:[#allocation2 + $0x61] sm:$0xff]  ;;  %v15968_v43 = vld [vmem:[#allocation2 + $0x18] sm:$0xff]  ;;  %v387_v46 = vld [vmem:[#allocation2 + $0x69] sm:$0xff]  ;;  %268 = vst.msk [vmem:[#allocation2 + $0xf9] sm:$0xff] %vm31_vm1, %v202_v48 }
  0x45   :  { %14448 = vmatprep.mubr.msk.f32.mxu1 %vm31_vm1, %v440_v32  ;;  %v388_v50 = vld [vmem:[#allocation2 + $0x79] sm:$0xff]  ;;  %269 = vst.msk [vmem:[#allocation2 + $0x109] sm:$0xff] %vm31_vm1, %v203_v51  ;;  %270 = vst.msk [vmem:[#allocation2 + $0x111] sm:$0xff] %vm31_vm1, %v204_v52  ;;  %v16023_v59 = vld [vmem:[#allocation2 + $0x30] sm:$0xff] }
  0x46   :  { %14362 = vmatmul.mubr.msk.f32.gmra.mxu0 %vm31_vm1, %v383_v33  ;;  %271 = vst.msk [vmem:[#allocation2 + $0x121] sm:$0xff] %vm31_vm1, %v205_v53  ;;  %272 = vst.msk [vmem:[#allocation2 + $0x129] sm:$0xff] %vm31_vm1, %v206_v54  ;;  %v389_v62 = vld [vmem:[#allocation2 + $0x81] sm:$0xff]  ;;  %v16042_v63 = vld [vmem:[#allocation2 + $0x38] sm:$0xff] }
  0x47   :  { %14364 = vmatprep.mubr.msk.f32.mxu0 %vm31_vm1, %v384_v35  ;;  %273 = vst.msk [vmem:[#allocation2 + $0x139] sm:$0xff] %vm31_vm1, %v207_v55  ;;  %274 = vst.msk [vmem:[#allocation2 + $0x141] sm:$0xff] %vm31_vm1, %v208_v56  ;;  %v390_v0 = vld [vmem:[#allocation2 + $0x91] sm:$0xff]  ;;  %v16044_v2 = vld [vmem:[#allocation2 + $0x48] sm:$0xff] }
  0x48   :  { %14449 = vmatmul.mubr.msk.f32.gmra.mxu1 %vm31_vm1, %v441_v34  ;;  %275 = vst.msk [vmem:[#allocation2 + $0x151] sm:$0xff] %vm31_vm1, %v209_v57  ;;  %276 = vst.msk [vmem:[#allocation2 + $0x159] sm:$0xff] %vm31_vm1, %v210_v58  ;;  %v391_v3 = vld [vmem:[#allocation2 + $0x99] sm:$0xff]  ;;  %v16052_v4 = vld [vmem:[#allocation2 + $0x50] sm:$0xff] }
  0x49   :  { %14453 = vmatprep.mubr.msk.f32.mxu1 %vm31_vm1, %v313_v36  ;;  %277 = vst.msk [vmem:[#allocation2 + $0x169] sm:$0xff] %vm31_vm1, %v211_v60  ;;  %278 = vst.msk [vmem:[#allocation2 + $0x171] sm:$0xff] %vm31_vm1, %v212_v61  ;;  %v392_v5 = vld [vmem:[#allocation2 + $0xa9] sm:$0xff]  ;;  %v16054_v6 = vld [vmem:[#allocation2 + $0x60] sm:$0xff] }
  0x4a   :  { %14365 = vmatmul.mubr.msk.f32.gmra.mxu0 %vm31_vm1, %v385_v40  ;;  %v393_v7 = vld [vmem:[#allocation2 + $0xb1] sm:$0xff]  ;;  %v16060_v8 = vld [vmem:[#allocation2 + $0x68] sm:$0xff]  ;;  %281 = vst.msk [vmem:[#allocation2 + $0x1c9] sm:$0xff] %vm31_vm1, %v215_v10  ;;  %282 = vst.msk [vmem:[#allocation2 + $0x1d1] sm:$0xff] %vm31_vm1, %v216_v11 }
  0x4b   :  { %14367 = vmatprep.mubr.msk.f32.mxu0 %vm31_vm1, %v386_v41  ;;  %v394_v9 = vld [vmem:[#allocation2 + $0xc1] sm:$0xff]  ;;  %v16070_v12 = vld [vmem:[#allocation2 + $0x78] sm:$0xff]  ;;  %283 = vst.msk [vmem:[#allocation2 + $0x1e1] sm:$0xff] %vm31_vm1, %v217_v13  ;;  %v395_v16 = vld [vmem:[#allocation2 + $0xc9] sm:$0xff] }
  0x4c   :  { %14454 = vmatmul.mubr.msk.f32.vlgmr.msra.gmra.mxu1 %vm31_vm1, %v314_v38  ;;  %v16078_v14 = vld [vmem:[#allocation2 + $0x80] sm:$0xff]  ;;  %v16087_v17 = vld [vmem:[#allocation2 + $0x90] sm:$0xff]  ;;  %284 = vst.msk [vmem:[#allocation2 + $0x1e9] sm:$0xff] %vm31_vm1, %v218_v15  ;;  %v220_v19 = vld [vmem:[%s21037_s0 + $0x128] sm:$0xff] }
  0x4d   :  { %14456 = vmatprep.mubr.msk.f32.mxu1 %vm31_vm1, %v15968_v43  ;;  %v219_v18 = vld [vmem:[%s21037_s0 + $0x120] sm:$0xff]  ;;  %286 = vst.msk [vmem:[#allocation2 + $0x201] sm:$0xff] %vm31_vm1, %v220_v19  ;;  %v221_v21 = vld [vmem:[%s21037_s0 + $0x130] sm:$0xff]  ;;  %v222_v22 = vld [vmem:[%s21037_s0 + $0x138] sm:$0xff] }
  0x4e   :  { %14368 = vmatmul.mubr.msk.f32.gmra.mxu0 %vm31_vm1, %v387_v46  ;;  %v396_v20 = vld [vmem:[#allocation2 + $0xd9] sm:$0xff]  ;;  %285 = vst.msk [vmem:[#allocation2 + $0x1f9] sm:$0xff] %vm31_vm1, %v219_v18  ;;  %v397_v23 = vld [vmem:[#allocation2 + $0xe1] sm:$0xff]  ;;  %287 = vst.msk [vmem:[#allocation2 + $0x211] sm:$0xff] %vm31_vm1, %v221_v21 }
  0x4f   :  { %14370 = vmatprep.mubr.msk.f32.mxu0 %vm31_vm1, %v388_v50  ;;  %288 = vst.msk [vmem:[#allocation2 + $0x219] sm:$0xff] %vm31_vm1, %v222_v22  ;;  %v224_v25 = vld [vmem:[%s21037_s0 + $0x148] sm:$0xff]  ;;  %v225_v26 = vld [vmem:[%s21037_s0 + $0x150] sm:$0xff]  ;;  %289 = vst.msk [vmem:[#allocation2 + $0x229] sm:$0xff] %vm31_vm1, %v223_v24 }
  0x50   :  { %14457 = vmatmul.mubr.msk.f32.gmra.mxu1 %vm31_vm1, %v15986_v49  ;;  %290 = vst.msk [vmem:[#allocation2 + $0x231] sm:$0xff] %vm31_vm1, %v224_v25  ;;  %291 = vst.msk [vmem:[#allocation2 + $0x241] sm:$0xff] %vm31_vm1, %v225_v26  ;;  %v226_v27 = vld [vmem:[%s21037_s0 + $0x158] sm:$0xff]  ;;  %v227_v28 = vld [vmem:[%s21037_s0 + $0x160] sm:$0xff] }
  0x51   :  { %14459 = vmatprep.mubr.msk.f32.mxu1 %vm31_vm1, %v16023_v59  ;;  %v228_v29 = vld [vmem:[%s21037_s0 + $0x168] sm:$0xff]  ;;  %292 = vst.msk [vmem:[#allocation2 + $0x249] sm:$0xff] %vm31_vm1, %v226_v27  ;;  %293 = vst.msk [vmem:[#allocation2 + $0x259] sm:$0xff] %vm31_vm1, %v227_v28  ;;  %v229_v30 = vld [vmem:[%s21037_s0 + $0x170] sm:$0xff] }
  0x52   :  { %14371 = vmatmul.mubr.msk.f32.gmra.mxu0 %vm31_vm1, %v389_v62  ;;  %294 = vst.msk [vmem:[#allocation2 + $0x261] sm:$0xff] %vm31_vm1, %v228_v29  ;;  %v230_v31 = vld [vmem:[%s21037_s0 + $0x178] sm:$0xff]  ;;  %v231_v32 = vld [vmem:[%s21037_s0 + $0x180] sm:$0xff]  ;;  %295 = vst.msk [vmem:[#allocation2 + $0x271] sm:$0xff] %vm31_vm1, %v229_v30 }
  0x53   :  { %14373 = vmatprep.mubr.msk.f32.mxu0 %vm31_vm1, %v390_v0  ;;  %v16147_v33 = vld [vmem:[#allocation2 + $0x98] sm:$0xff]  ;;  %296 = vst.msk [vmem:[#allocation2 + $0x279] sm:$0xff] %vm31_vm1, %v230_v31  ;;  %297 = vst.msk [vmem:[#allocation2 + $0x289] sm:$0xff] %vm31_vm1, %v231_v32  ;;  %v16152_v35 = vld [vmem:[#allocation2 + $0xa8] sm:$0xff] }
  0x54   :  { %14460 = vmatmul.mubr.msk.f32.gmra.mxu1 %vm31_vm1, %v16042_v63  ;;  %v398_v34 = vld [vmem:[#allocation2 + $0xf1] sm:$0xff]  ;;  %v232_v36 = vld [vmem:[%s21037_s0 + $0x188] sm:$0xff]  ;;  %v399_v37 = vld [vmem:[#allocation2 + $0xf9] sm:$0xff] }
  0x55   :  { %14462 = vmatprep.mubr.msk.f32.mxu1 %vm31_vm1, %v16044_v2  ;;  %298 = vst.msk [vmem:[#allocation2 + $0x291] sm:$0xff] %vm31_vm1, %v232_v36  ;;  %v16164_v38 = vld [vmem:[#allocation2 + $0xb0] sm:$0xff]  ;;  %v16166_v40 = vld [vmem:[#allocation2 + $0xc0] sm:$0xff]  ;;  %v16174_v42 = vld [vmem:[#allocation2 + $0xc8] sm:$0xff] }
  0x56   :  { %14374 = vmatmul.mubr.msk.f32.gmra.mxu0 %vm31_vm1, %v391_v3  ;;  %v400_v39 = vld [vmem:[#allocation2 + $0x109] sm:$0xff]  ;;  %v401_v41 = vld [vmem:[#allocation2 + $0x111] sm:$0xff]  ;;  %v402_v44 = vld [vmem:[#allocation2 + $0x121] sm:$0xff] }
  0x57   :  { %14376 = vmatprep.mubr.msk.f32.mxu0 %vm31_vm1, %v392_v5  ;;  %v16176_v45 = vld [vmem:[#allocation2 + $0xd8] sm:$0xff]  ;;  %v233_v46 = vld [vmem:[%s21037_s0 + $0x190] sm:$0xff]  ;;  %v235_v50 = vld [vmem:[%s21037_s0 + $0x1a0] sm:$0xff] }
  0x58   :  { %14463 = vmatmul.mubr.msk.f32.gmra.mxu1 %vm31_vm1, %v16052_v4  ;;  %v234_v47 = vld [vmem:[%s21037_s0 + $0x198] sm:$0xff]  ;;  %v403_v48 = vld [vmem:[#allocation2 + $0x129] sm:$0xff]  ;;  %299 = vst.msk [vmem:[#allocation2 + $0x2a1] sm:$0xff] %vm31_vm1, %v233_v46  ;;  %v16195_v51 = vld [vmem:[#allocation2 + $0xe0] sm:$0xff] }
  0x59   :  { %14465 = vmatprep.mubr.msk.f32.mxu1 %vm31_vm1, %v16054_v6  ;;  %300 = vst.msk [vmem:[#allocation2 + $0x2a9] sm:$0xff] %vm31_vm1, %v234_v47  ;;  %v404_v52 = vld [vmem:[#allocation2 + $0x139] sm:$0xff]  ;;  %301 = vst.msk [vmem:[#allocation2 + $0x2b9] sm:$0xff] %vm31_vm1, %v235_v50  ;;  %v236_v53 = vld [vmem:[%s21037_s0 + $0x1a8] sm:$0xff] }
  0x5a   :  { %14377 = vmatmul.mubr.msk.f32.gmra.mxu0 %vm31_vm1, %v393_v7  ;;  %v16201_v54 = vld [vmem:[#allocation2 + $0xf0] sm:$0xff]  ;;  %302 = vst.msk [vmem:[#allocation2 + $0x2c1] sm:$0xff] %vm31_vm1, %v236_v53  ;;  %v238_v56 = vld [vmem:[%s21037_s0 + $0x1b8] sm:$0xff]  ;;  %v13003_v57 = vld [vmem:[%s21038_s1 + $0xc] sm:$0xf] }
  0x5b   :  { %14379 = vmatprep.mubr.msk.f32.mxu0 %vm31_vm1, %v394_v9  ;;  %v237_v55 = vld [vmem:[%s21037_s0 + $0x1b0] sm:$0xff]  ;;  %304 = vst.msk [vmem:[#allocation2 + $0x2d9] sm:$0xff] %vm31_vm1, %v238_v56  ;;  %v405_v58 = vld [vmem:[#allocation2 + $0x141] sm:$0xff]  ;;  %v16226_v61 = vld [vmem:[#allocation2 + $0xf8] sm:$0xff]  ;;  %14647 = vmatprep.subr.msk.mxu1 %vm636_vm0, %v13003_v57 }
  0x5c   :  { %14466 = vmatmul.mubr.msk.f32.gmra.mxu1 %vm31_vm1, %v16060_v8  ;;  %303 = vst.msk [vmem:[#allocation2 + $0x2d1] sm:$0xff] %vm31_vm1, %v237_v55  ;;  %v16222_v60 = vld [vmem:[%s21038_s1 + $0x10] sm:$0xf]  ;;  %v16229_v0 = vld [vmem:[#allocation2 + $0x108] sm:$0xff]  ;;  %v407_v3 = vld [vmem:[#allocation2 + $0x159] sm:$0xff] }
  0x5d   :  { %14468 = vmatprep.mubr.msk.f32.mxu1 %vm31_vm1, %v16070_v12  ;;  %v406_v62 = vld [vmem:[#allocation2 + $0x151] sm:$0xff]  ;;  %14648 = vmatpush3.msk.msra.mxu1 %vm636_vm0, %v13003_v57  ;;  %v408_v7 = vld [vmem:[#allocation2 + $0x169] sm:$0xff]  ;;  %v16242_v9 = vld [vmem:[#allocation2 + $0x120] sm:$0xff] }
  0x5e   :  { %14380 = vmatmul.mubr.msk.f32.gmra.mxu0 %vm31_vm1, %v395_v16  ;;  %14745 = vmatprep.subr.msk.mxu0 %vm636_vm0, %v16222_v60  ;;  %v16240_v5 = vld [vmem:[#allocation2 + $0x110] sm:$0xff]  ;;  %v16250_v11 = vld [vmem:[#allocation2 + $0x128] sm:$0xff]  ;;  %v16252_v15 = vld [vmem:[#allocation2 + $0x138] sm:$0xff] }
  0x5f   :  { %14382 = vmatprep.mubr.msk.f32.mxu0 %vm31_vm1, %v396_v20  ;;  %v409_v10 = vld [vmem:[#allocation2 + $0x171] sm:$0xff]  ;;  %v411_v16 = vld [vmem:[#allocation2 + $0x1b9] sm:$0xff]  ;;  %v412_v19 = vld [vmem:[#allocation2 + $0x1c9] sm:$0xff] }
  0x60   :  { %14469 = vmatmul.mubr.msk.f32.gmra.mxu1 %vm31_vm1, %v16078_v14  ;;  %v410_v13 = vld [vmem:[#allocation2 + $0x1b1] sm:$0xff]  ;;  %v16260_v18 = vld [vmem:[#allocation2 + $0x140] sm:$0xff]  ;;  %v16272_v24 = vld [vmem:[#allocation2 + $0x168] sm:$0xff] }
  0x61   :  { %14471 = vmatprep.mubr.msk.f32.mxu1 %vm31_vm1, %v16087_v17  ;;  %v16262_v20 = vld [vmem:[#allocation2 + $0x150] sm:$0xff]  ;;  %v16270_v22 = vld [vmem:[#allocation2 + $0x158] sm:$0xff] }
  0x62   :  { %14383 = vmatmul.mubr.msk.f32.gmra.mxu0 %vm31_vm1, %v397_v23  ;;  %v413_v21 = vld [vmem:[#allocation2 + $0x1d1] sm:$0xff]  ;;  %v414_v23 = vld [vmem:[#allocation2 + $0x1e1] sm:$0xff]  ;;  %v415_v25 = vld [vmem:[#allocation2 + $0x1e9] sm:$0xff] }
  0x63   :  { %14385 = vmatprep.mubr.msk.f32.mxu0 %vm31_vm1, %v398_v34  ;;  %v213_v26 = vld [vmem:[%s21037_s0 + $0xf0] sm:$0xff]  ;;  %v214_v27 = vld [vmem:[%s21037_s0 + $0xf8] sm:$0xff] }
  0x64   :  { %14472 = vmatmul.mubr.msk.f32.gmra.mxu1 %vm31_vm1, %v16147_v33 }
  0x65   :  { %14474 = vmatprep.mubr.msk.f32.mxu1 %vm31_vm1, %v16152_v35 }
  0x66   :  { %14386 = vmatmul.mubr.msk.f32.gmra.mxu0 %vm31_vm1, %v399_v37 }
  0x67   :  { %14388 = vmatprep.mubr.msk.f32.mxu0 %vm31_vm1, %v400_v39 }
  0x68   :  { %14475 = vmatmul.mubr.msk.f32.gmra.mxu1 %vm31_vm1, %v16164_v38 }
  0x69   :  { %14477 = vmatprep.mubr.msk.f32.mxu1 %vm31_vm1, %v16166_v40 }
  0x6a   :  { %14389 = vmatmul.mubr.msk.f32.gmra.mxu0 %vm31_vm1, %v401_v41 }
  0x6b   :  { %14391 = vmatprep.mubr.msk.f32.mxu0 %vm31_vm1, %v402_v44 }
  0x6c   :  { %14478 = vmatmul.mubr.msk.f32.gmra.mxu1 %vm31_vm1, %v16174_v42 }
  0x6d   :  { %14480 = vmatprep.mubr.msk.f32.mxu1 %vm31_vm1, %v16176_v45 }
  0x6e   :  { %14392 = vmatmul.mubr.msk.f32.gmra.mxu0 %vm31_vm1, %v403_v48 }
  0x6f   :  { %14394 = vmatprep.mubr.msk.f32.mxu0 %vm31_vm1, %v404_v52 }
  0x70   :  { %14481 = vmatmul.mubr.msk.f32.gmra.mxu1 %vm31_vm1, %v16195_v51 }
  0x71   :  { %14483 = vmatprep.mubr.msk.f32.mxu1 %vm31_vm1, %v16201_v54 }
  0x72   :  { %14395 = vmatmul.mubr.msk.f32.gmra.mxu0 %vm31_vm1, %v405_v58 }
  0x73   :  { %14397 = vmatprep.mubr.msk.f32.mxu0 %vm31_vm1, %v406_v62 }
  0x74   :  { %14484 = vmatmul.mubr.msk.f32.gmra.mxu1 %vm31_vm1, %v16226_v61 }
  0x75   :  { %14486 = vmatprep.mubr.msk.f32.mxu1 %vm31_vm1, %v16229_v0 }
  0x76   :  { %14398 = vmatmul.mubr.msk.f32.gmra.mxu0 %vm31_vm1, %v407_v3 }
  0x77   :  { %14400 = vmatprep.mubr.msk.f32.mxu0 %vm31_vm1, %v408_v7 }
  0x78   :  { %14487 = vmatmul.mubr.msk.f32.gmra.mxu1 %vm31_vm1, %v16240_v5 }
  0x79   :  { %14489 = vmatprep.mubr.msk.f32.mxu1 %vm31_vm1, %v16242_v9 }
  0x7a   :  { %14401 = vmatmul.mubr.msk.f32.gmra.mxu0 %vm31_vm1, %v409_v10 }
  0x7b   :  { %14403 = vmatprep.mubr.msk.f32.mxu0 %vm31_vm1, %v410_v13 }
  0x7c   :  { %14490 = vmatmul.mubr.msk.f32.gmra.mxu1 %vm31_vm1, %v16250_v11 }
  0x7d   :  { %14492 = vmatprep.mubr.msk.f32.mxu1 %vm31_vm1, %v16252_v15 }
  0x7e   :  { %14404 = vmatmul.mubr.msk.f32.gmra.mxu0 %vm31_vm1, %v411_v16 }
  0x7f   :  { %14406 = vmatprep.mubr.msk.f32.mxu0 %vm31_vm1, %v412_v19 }
  0x80   :  { %14493 = vmatmul.mubr.msk.f32.gmra.mxu1 %vm31_vm1, %v16260_v18 }
  0x81   :  { %14495 = vmatprep.mubr.msk.f32.mxu1 %vm31_vm1, %v16262_v20 }
  0x82   :  { %14407 = vmatmul.mubr.msk.f32.gmra.mxu0 %vm31_vm1, %v413_v21 }
  0x83   :  { %14409 = vmatprep.mubr.msk.f32.mxu0 %vm31_vm1, %v414_v23 }
  0x84   :  { %14496 = vmatmul.mubr.msk.f32.gmra.mxu1 %vm31_vm1, %v16270_v22 }
  0x85   :  { %12 = vsyncpa [#allocation5], 0  ;;  %14498 = vmatprep.mubr.msk.f32.mxu1 %vm31_vm1, %v16272_v24  ;;  %v16286_v28 = vld [vmem:[#allocation2 + $0x170] sm:$0xff]  ;;  %v416_v29 = vld [vmem:[#allocation2 + $0x1f9] sm:$0xff]  ;;  %279 = vst.msk [vmem:[#allocation2 + $0x181] sm:$0xff] %vm31_vm1, %v213_v26  ;;  %vm141_vm3 = vcmask 261120  }
  0x86   :  { %280 = vst.msk [vmem:[#allocation2 + $0x189] sm:$0xff] %vm31_vm1, %v214_v27  ;;  %v345_v30 = vld [vmem:[#allocation2 + $0x1b0] sm:$0xff]  ;;  %14410 = vmatmul.mubr.msk.f32.gmra.mxu0 %vm31_vm1, %v415_v25  ;;  %v417_v31 = vld [vmem:[#allocation2 + $0x201] sm:$0xff]  ;;  %v346_v32 = vld [vmem:[#allocation2 + $0x1b8] sm:$0xff]  ;;  %vm143_vm4 = vcmask 254976   ;;  %vm10425_vm5 = vcmask 1041409  }
  0x87   :  { %14412 = vmatprep.mubr.msk.f32.mxu0 %vm31_vm1, %v416_v29  ;;  %v418_v34 = vld [vmem:[#allocation2 + $0x211] sm:$0xff]  ;;  %v16295_v36 = vld [vmem:[#allocation2 + $0x1c8] sm:$0xff]  ;;  %v419_v37 = vld [vmem:[#allocation2 + $0x219] sm:$0xff]  ;;  %vm10427_vm6 = vcmask 1042434   ;;  %vm10429_vm7 = vcmask 1043459   ;;  %vm10431_vm8 = vcmask 1044484  }
  0x88   :  { %14499 = vmatmul.mubr.msk.f32.gmra.mxu1 %vm31_vm1, %v16286_v28  ;;  %v16302_v39 = vld [vmem:[#allocation2 + $0x1d0] sm:$0xff]  ;;  %v16304_v44 = vld [vmem:[#allocation2 + $0x1e0] sm:$0xff]  ;;  %v16312_v47 = vld [vmem:[#allocation2 + $0x1e8] sm:$0xff]  ;;  %vm10433_vm9 = vcmask 1045509   ;;  %vm10435_vm10 = vcmask 1046534   ;;  %vm10437_vm11 = vcmask 1047559  }
  0x89   :  { %14501 = vmatprep.mubr.msk.f32.mxu1 %vm31_vm1, %v345_v30  ;;  %v420_v41 = vld [vmem:[#allocation2 + $0x229] sm:$0xff]  ;;  %v421_v46 = vld [vmem:[#allocation2 + $0x231] sm:$0xff]  ;;  %v422_v48 = vld [vmem:[#allocation2 + $0x241] sm:$0xff]  ;;  %vm15582_vm12 = vmmov 0   ;;  %vm12654_vm13 = vcmask 523264   ;;  %s15583_s29 = smov [#allocation4]  }
  0x8a   :  { %14413 = vmatmul.mubr.msk.f32.gmra.mxu0 %vm31_vm1, %v417_v31  ;;  %v16314_v50 = vld [vmem:[#allocation2 + $0x1f8] sm:$0xff]  ;;  %v423_v52 = vld [vmem:[#allocation2 + $0x249] sm:$0xff]  ;;  %v16322_v53 = vld [vmem:[#allocation2 + $0x200] sm:$0xff]  ;;  %s12798_s30 = sshll.u32 %s15583_s29, 4  ;;  %vm12790_vm14 = vcmask 74752   ;;  %s12799_s30 = int_to_ptr.vmem [resolvable:$true] %s12798_s30 }
  0x8b   :  { %14415 = vmatprep.mubr.msk.f32.mxu0 %vm31_vm1, %v418_v34  ;;  %v424_v55 = vld [vmem:[#allocation2 + $0x259] sm:$0xff]  ;;  %v16324_v56 = vld [vmem:[#allocation2 + $0x210] sm:$0xff]  ;;  %v425_v57 = vld [vmem:[#allocation2 + $0x261] sm:$0xff]  ;;  %p15563_p1 = scmp.lt.s32.totalorder %s12799_s30, %s12799_s30 }
  0x8c   :  { %14502 = vmatmul.mubr.msk.f32.gmra.mxu1 %vm31_vm1, %v346_v32  ;;  %v16332_v58 = vld [vmem:[#allocation2 + $0x218] sm:$0xff]  ;;  %v16334_v3 = vld [vmem:[#allocation2 + $0x228] sm:$0xff]  ;;  %v16342_v10 = vld [vmem:[#allocation2 + $0x230] sm:$0xff] }
  0x8d   :  { %14504 = vmatprep.mubr.msk.f32.mxu1 %vm31_vm1, %v16295_v36  ;;  %v426_v62 = vld [vmem:[#allocation2 + $0x271] sm:$0xff]  ;;  %v427_v7 = vld [vmem:[#allocation2 + $0x279] sm:$0xff]  ;;  %v428_v13 = vld [vmem:[#allocation2 + $0x289] sm:$0xff] }
  0x8e   :  { %14416 = vmatmul.mubr.msk.f32.gmra.mxu0 %vm31_vm1, %v419_v37  ;;  %v16344_v16 = vld [vmem:[#allocation2 + $0x240] sm:$0xff]  ;;  %v429_v19 = vld [vmem:[#allocation2 + $0x291] sm:$0xff]  ;;  %v16352_v21 = vld [vmem:[#allocation2 + $0x248] sm:$0xff] }
  0x8f   :  { %14418 = vmatprep.mubr.msk.f32.mxu0 %vm31_vm1, %v420_v41  ;;  %v430_v23 = vld [vmem:[#allocation2 + $0x2a1] sm:$0xff]  ;;  %v16354_v25 = vld [vmem:[#allocation2 + $0x258] sm:$0xff]  ;;  %v431_v26 = vld [vmem:[#allocation2 + $0x2a9] sm:$0xff] }
  0x90   :  { %14505 = vmatmul.mubr.msk.f32.gmra.mxu1 %vm31_vm1, %v16302_v39  ;;  %v16362_v27 = vld [vmem:[#allocation2 + $0x260] sm:$0xff]  ;;  %v16364_v30 = vld [vmem:[#allocation2 + $0x270] sm:$0xff]  ;;  %v16372_v32 = vld [vmem:[#allocation2 + $0x278] sm:$0xff] }
  0x91   :  { %14507 = vmatprep.mubr.msk.f32.mxu1 %vm31_vm1, %v16304_v44  ;;  %v432_v29 = vld [vmem:[#allocation2 + $0x2b9] sm:$0xff]  ;;  %v433_v31 = vld [vmem:[#allocation2 + $0x2c1] sm:$0xff]  ;;  %v434_v34 = vld [vmem:[#allocation2 + $0x2d1] sm:$0xff] }
  0x92   :  { %14419 = vmatmul.mubr.msk.f32.gmra.mxu0 %vm31_vm1, %v421_v46  ;;  %v16374_v37 = vld [vmem:[#allocation2 + $0x288] sm:$0xff]  ;;  %v435_v41 = vld [vmem:[#allocation2 + $0x2d9] sm:$0xff]  ;;  %v16382_v46 = vld [vmem:[#allocation2 + $0x290] sm:$0xff] }
  0x93   :  { %14421 = vmatprep.mubr.msk.f32.mxu0 %vm31_vm1, %v422_v48  ;;  %v1605_v48 = vld [vmem:[#allocation2 + $0x2] sm:$0xff]  ;;  %v16452_v1 = vld [vmem:[#allocation2 + $0x2f0] sm:$0xff] }
  0x94   :  { %14508 = vmatmul.mubr.msk.f32.gmra.mxu1 %vm31_vm1, %v16312_v47 }
  0x95   :  { %14510 = vmatprep.mubr.msk.f32.mxu1 %vm31_vm1, %v16314_v50 }
  0x96   :  { %14422 = vmatmul.mubr.msk.f32.gmra.mxu0 %vm31_vm1, %v423_v52  ;;  %v16384_v52 = vld [vmem:[#allocation2 + $0x2a0] sm:$0xff] }
  0x97   :  { %14424 = vmatprep.mubr.msk.f32.mxu0 %vm31_vm1, %v424_v55  ;;  %v1606_v55 = vld [vmem:[#allocation2 + $0xa] sm:$0xff] }
  0x98   :  { %14511 = vmatmul.mubr.msk.f32.gmra.mxu1 %vm31_vm1, %v16322_v53 }
  0x99   :  { %14513 = vmatprep.mubr.msk.f32.mxu1 %vm31_vm1, %v16324_v56 }
  0x9a   :  { %14425 = vmatmul.mubr.msk.f32.gmra.mxu0 %vm31_vm1, %v425_v57  ;;  %v16392_v57 = vld [vmem:[#allocation2 + $0x2a8] sm:$0xff] }
  0x9b   :  { %14427 = vmatprep.mubr.msk.f32.mxu0 %vm31_vm1, %v426_v62  ;;  %v13135_v62 = vld [vmem:[%s21038_s1 + $0x14] sm:$0xf] }
  0x9c   :  { %14514 = vmatmul.mubr.msk.f32.gmra.mxu1 %vm31_vm1, %v16332_v58  ;;  %14843 = vmatprep.subr.msk.mxu1 %vm636_vm0, %v13135_v62 }
  0x9d   :  { %14516 = vmatprep.mubr.msk.f32.mxu1 %vm31_vm1, %v16334_v3 }
  0x9e   :  { %14428 = vmatmul.mubr.msk.f32.gmra.mxu0 %vm31_vm1, %v427_v7  ;;  %v16397_v7 = vld [vmem:[#allocation2 + $0x1a] sm:$0xff] }
  0x9f   :  { %14430 = vmatprep.mubr.msk.f32.mxu0 %vm31_vm1, %v428_v13  ;;  %21062 = vst [vmem:[#allocation7_spill] sm:$0xff] %v16397_v7  ;;  %v16399_v13 = vld [vmem:[#allocation2 + $0x2b8] sm:$0xff] }
  0xa0   :  { %14517 = vmatmul.mubr.msk.f32.gmra.mxu1 %vm31_vm1, %v16342_v10 }
  0xa1   :  { %14519 = vmatprep.mubr.msk.f32.mxu1 %vm31_vm1, %v16344_v16 }
  0xa2   :  { %14431 = vmatmul.mubr.msk.f32.gmra.mxu0 %vm31_vm1, %v429_v19  ;;  %v16406_v19 = vld [vmem:[%s21038_s1 + $0x18] sm:$0xf] }
  0xa3   :  { %14433 = vmatprep.mubr.msk.f32.mxu0 %vm31_vm1, %v430_v23  ;;  %v16412_v23 = vld [vmem:[#allocation2 + $0x22] sm:$0xff] }
  0xa4   :  { %14520 = vmatmul.mubr.msk.f32.gmra.mxu1 %vm31_vm1, %v16352_v21  ;;  %21063 = vst [vmem:[#allocation8_spill] sm:$0xff] %v16412_v23 }
  0xa5   :  { %14522 = vmatprep.mubr.msk.f32.mxu1 %vm31_vm1, %v16354_v25 }
  0xa6   :  { %14434 = vmatmul.mubr.msk.f32.gmra.mxu0 %vm31_vm1, %v431_v26  ;;  %v16418_v26 = vld [vmem:[#allocation2 + $0x2c0] sm:$0xff] }
  0xa7   :  { %14436 = vmatprep.mubr.msk.f32.mxu0 %vm31_vm1, %v432_v29  ;;  %v16420_v29 = vld [vmem:[#allocation2 + $0x32] sm:$0xff] }
  0xa8   :  { %14523 = vmatmul.mubr.msk.f32.gmra.mxu1 %vm31_vm1, %v16362_v27  ;;  %21064 = vst [vmem:[#allocation9_spill] sm:$0xff] %v16420_v29 }
  0xa9   :  { %14525 = vmatprep.mubr.msk.f32.mxu1 %vm31_vm1, %v16364_v30 }
  0xaa   :  { %14437 = vmatmul.mubr.msk.f32.gmra.mxu0 %vm31_vm1, %v433_v31  ;;  %v16422_v31 = vld [vmem:[#allocation2 + $0x2d0] sm:$0xff] }
  0xab   :  { %14439 = vmatprep.mubr.msk.f32.mxu0 %vm31_vm1, %v434_v34  ;;  %v16436_v34 = vld [vmem:[#allocation2 + $0x2d8] sm:$0xff] }
  0xac   :  { %14526 = vmatmul.mubr.msk.f32.gmra.mxu1 %vm31_vm1, %v16372_v32 }
  0xad   :  { %14528 = vmatprep.mubr.msk.f32.mxu1 %vm31_vm1, %v16374_v37 }
  0xae   :  { %14440 = vmatmul.mubr.msk.f32.gmra.mxu0 %vm31_vm1, %v435_v41  ;;  %v16438_v41 = vld [vmem:[#allocation2 + $0x4a] sm:$0xff] }
  0xaf   :  { %14551 = vmatprep.mubr.msk.f32.mxu0 %vm31_vm1, %v1605_v48  ;;  %21066 = vst [vmem:[#allocation11_spill] sm:$0xff] %v16438_v41  ;;  %v16440_v48 = vld [vmem:[#allocation2 + $0x2e8] sm:$0xff] }
  0xb0   :  { %14529 = vmatmul.mubr.msk.f32.gmra.mxu1 %vm31_vm1, %v16382_v46  ;;  %21067 = vst [vmem:[#allocation12_spill] sm:$0xff] %v16440_v48 }
  0xb1   :  { %14531 = vmatprep.mubr.msk.f32.mxu1 %vm31_vm1, %v16384_v52 }
  0xb2   :  { %14552 = vmatmul.mubr.msk.f32.vlgmr.msra.gmra.mxu0 %vm31_vm1, %v1606_v55  ;;  %v16448_v55 = vld [vmem:[#allocation2 + $0x52] sm:$0xff] }
  0xb3   :  { %14746 = vmatpush3.msk.msra.mxu0 %vm636_vm0, %v16222_v60  ;;  %14554 = vmatprep.mubr.msk.f32.mxu0 %vm31_vm1, %v16397_v7  ;;  %v16432_v60 = vld [vmem:[#allocation2 + $0x3a] sm:$0xff]  ;;  %21068 = vst [vmem:[#allocation13_spill] sm:$0xff] %v16448_v55  ;;  %v16471_v7 = vld [vmem:[#allocation2 + $0x6a] sm:$0xff] }
  0xb4   :  { %14532 = vmatmul.mubr.msk.f32.gmra.mxu1 %vm31_vm1, %v16392_v57  ;;  %14941 = vmatprep.subr.msk.mxu0 %vm636_vm0, %v16406_v19  ;;  %21065 = vst [vmem:[#allocation10_spill] sm:$0xff] %v16432_v60  ;;  %21071 = vst [vmem:[#allocation16_spill] sm:$0xff] %v16471_v7 }
  0xb5   :  { %14534 = vmatprep.mubr.msk.f32.mxu1 %vm31_vm1, %v16399_v13 }
  0xb6   :  { %14555 = vmatmul.mubr.msk.f32.gmra.mxu0 %vm31_vm1, %v16412_v23  ;;  %v16456_v23 = vld [vmem:[#allocation2 + $0x300] sm:$0xff] }
  0xb7   :  { %14557 = vmatprep.mubr.msk.f32.mxu0 %vm31_vm1, %v16420_v29  ;;  %v16454_v29 = vld [vmem:[#allocation2 + $0x62] sm:$0xff]  ;;  %21070 = vst [vmem:[#allocation15_spill] sm:$0xff] %v16456_v23 }
  0xb8   :  { %14535 = vmatmul.mubr.msk.f32.gmra.mxu1 %vm31_vm1, %v16418_v26  ;;  %21069 = vst [vmem:[#allocation14_spill] sm:$0xff] %v16454_v29 }
  0xb9   :  { %14537 = vmatprep.mubr.msk.f32.mxu1 %vm31_vm1, %v16422_v31 }
  0xba   :  { %14558 = vmatmul.mubr.msk.f32.gmra.mxu0 %vm31_vm1, %v16432_v60  ;;  %v245_v60 = vld [vmem:[%s21037_s0 + $0x1f0] sm:$0xff] }
  0xbb   :  { %14560 = vmatprep.mubr.msk.f32.mxu0 %vm31_vm1, %v16438_v41  ;;  %311 = vst.msk [vmem:[#allocation2 + $0x331] sm:$0xff] %vm31_vm1, %v245_v60  ;;  %v246_v41 = vld [vmem:[%s21037_s0 + $0x1f8] sm:$0xff] }
  0xbc   :  { %14538 = vmatmul.mubr.msk.f32.gmra.mxu1 %vm31_vm1, %v16436_v34  ;;  %312 = vst.msk [vmem:[#allocation2 + $0x339] sm:$0xff] %vm31_vm1, %v246_v41  ;;  %v16478_v60 = vld [vmem:[#allocation2 + $0x7a] sm:$0xff] }
  0xbd   :  { %14540 = vmatprep.mubr.msk.f32.mxu1 %vm31_vm1, %v16440_v48  ;;  %21072 = vst [vmem:[#allocation17_spill] sm:$0xff] %v16478_v60  ;;  %v16480_v48 = vld [vmem:[#allocation2 + $0x318] sm:$0xff]  ;;  %v16492_v41 = vld [vmem:[#allocation2 + $0x320] sm:$0xff] }
  0xbe   :  { %14561 = vmatmul.mubr.msk.f32.gmra.mxu0 %vm31_vm1, %v16448_v55  ;;  %v16476_v55 = vld [vmem:[#allocation2 + $0x308] sm:$0xff] }
  0xbf   :  { %14563 = vmatprep.mubr.msk.f32.mxu0 %vm31_vm1, %v16454_v29  ;;  %v16488_v29 = vld [vmem:[#allocation2 + $0x82] sm:$0xff] }
  0xc0   :  { %14541 = vmatmul.mubr.msk.f32.gmra.mxu1 %vm31_vm1, %v16452_v1  ;;  %21073 = vst [vmem:[#allocation18_spill] sm:$0xff] %v16488_v29 }
  0xc1   :  { %14543 = vmatprep.mubr.msk.f32.mxu1 %vm31_vm1, %v16456_v23  ;;  %v16494_v23 = vld [vmem:[#allocation2 + $0x92] sm:$0xff] }
  0xc2   :  { %14564 = vmatmul.mubr.msk.f32.gmra.mxu0 %vm31_vm1, %v16471_v7  ;;  %21074 = vst [vmem:[#allocation19_spill] sm:$0xff] %v16494_v23  ;;  %v16502_v7 = vld [vmem:[#allocation2 + $0x9a] sm:$0xff] }
  0xc3   :  { %14566 = vmatprep.mubr.msk.f32.mxu0 %vm31_vm1, %v16478_v60  ;;  %v16506_v60 = vld [vmem:[#allocation2 + $0xaa] sm:$0xff] }
  0xc4   :  { %14544 = vmatmul.mubr.msk.f32.gmra.mxu1 %vm31_vm1, %v16476_v55 }
  0xc5   :  { %14546 = vmatprep.mubr.msk.f32.mxu1 %vm31_vm1, %v16480_v48 }
  0xc6   :  { %14567 = vmatmul.mubr.msk.f32.gmra.mxu0 %vm31_vm1, %v16488_v29  ;;  %v16514_v29 = vld [vmem:[#allocation2 + $0xb2] sm:$0xff] }
  0xc7   :  { %14569 = vmatprep.mubr.msk.f32.mxu0 %vm31_vm1, %v16494_v23  ;;  %v16518_v23 = vld [vmem:[#allocation2 + $0xc2] sm:$0xff] }
  0xc8   :  { %14547 = vmatmul.mubr.msk.f32.gmra.mxu1 %vm31_vm1, %v16492_v41 }
  0xc9   :  { %14649 = vmatprep.mubr.msk.f32.mxu1 %vm31_vm1, %v15968_v43  ;;  %v16527_v43 = vld [vmem:[#allocation2 + $0xca] sm:$0xff] }
  0xca   :  { %14570 = vmatmul.mubr.msk.f32.gmra.mxu0 %vm31_vm1, %v16502_v7 }
  0xcb   :  { %14572 = vmatprep.mubr.msk.f32.mxu0 %vm31_vm1, %v16506_v60 }
  0xcc   :  { %14650 = vmatmul.mubr.msk.f32.vlgmr.msra.gmra.mxu1 %vm31_vm1, %v15986_v49  ;;  %v16531_v49 = vld [vmem:[#allocation2 + $0xda] sm:$0xff] }
  0xcd   :  { %14652 = vmatprep.mubr.msk.f32.mxu1 %vm31_vm1, %v16023_v59  ;;  %14844 = vmatpush3.msk.msra.mxu1 %vm636_vm0, %v13135_v62  ;;  %v16539_v59 = vld [vmem:[#allocation2 + $0xe2] sm:$0xff]  ;;  %v1639_v62 = vld [vmem:[#allocation2 + $0x1ca] sm:$0xff] }
  0xce   :  { %14573 = vmatmul.mubr.msk.f32.gmra.mxu0 %vm31_vm1, %v16514_v29 }
  0xcf   :  { %14575 = vmatprep.mubr.msk.f32.mxu0 %vm31_vm1, %v16518_v23 }
  0xd0   :  { %14653 = vmatmul.mubr.msk.f32.gmra.mxu1 %vm31_vm1, %v16042_v63  ;;  %v16543_v63 = vld [vmem:[#allocation2 + $0xf2] sm:$0xff] }
  0xd1   :  { %14655 = vmatprep.mubr.msk.f32.mxu1 %vm31_vm1, %v16044_v2  ;;  %v16551_v2 = vld [vmem:[#allocation2 + $0xfa] sm:$0xff] }
  0xd2   :  { %14576 = vmatmul.mubr.msk.f32.gmra.mxu0 %vm31_vm1, %v16527_v43 }
  0xd3   :  { %14578 = vmatprep.mubr.msk.f32.mxu0 %vm31_vm1, %v16531_v49 }
  0xd4   :  { %14656 = vmatmul.mubr.msk.f32.gmra.mxu1 %vm31_vm1, %v16052_v4  ;;  %v16555_v4 = vld [vmem:[#allocation2 + $0x10a] sm:$0xff] }
  0xd5   :  { %14658 = vmatprep.mubr.msk.f32.mxu1 %vm31_vm1, %v16054_v6  ;;  %v16563_v6 = vld [vmem:[#allocation2 + $0x112] sm:$0xff] }
  0xd6   :  { %14579 = vmatmul.mubr.msk.f32.gmra.mxu0 %vm31_vm1, %v16539_v59 }
  0xd7   :  { %14581 = vmatprep.mubr.msk.f32.mxu0 %vm31_vm1, %v16543_v63 }
  0xd8   :  { %14659 = vmatmul.mubr.msk.f32.gmra.mxu1 %vm31_vm1, %v16060_v8  ;;  %v16567_v8 = vld [vmem:[#allocation2 + $0x122] sm:$0xff] }
  0xd9   :  { %14661 = vmatprep.mubr.msk.f32.mxu1 %vm31_vm1, %v16070_v12  ;;  %v16575_v12 = vld [vmem:[#allocation2 + $0x12a] sm:$0xff] }
  0xda   :  { %14582 = vmatmul.mubr.msk.f32.gmra.mxu0 %vm31_vm1, %v16551_v2 }
  0xdb   :  { %14584 = vmatprep.mubr.msk.f32.mxu0 %vm31_vm1, %v16555_v4 }
  0xdc   :  { %14662 = vmatmul.mubr.msk.f32.gmra.mxu1 %vm31_vm1, %v16078_v14  ;;  %v16579_v14 = vld [vmem:[#allocation2 + $0x13a] sm:$0xff] }
  0xdd   :  { %14664 = vmatprep.mubr.msk.f32.mxu1 %vm31_vm1, %v16087_v17  ;;  %v16587_v17 = vld [vmem:[#allocation2 + $0x142] sm:$0xff] }
  0xde   :  { %14585 = vmatmul.mubr.msk.f32.gmra.mxu0 %vm31_vm1, %v16563_v6 }
  0xdf   :  { %14587 = vmatprep.mubr.msk.f32.mxu0 %vm31_vm1, %v16567_v8 }
  0xe0   :  { %14665 = vmatmul.mubr.msk.f32.gmra.mxu1 %vm31_vm1, %v16147_v33  ;;  %v16591_v33 = vld [vmem:[#allocation2 + $0x152] sm:$0xff] }
  0xe1   :  { %14667 = vmatprep.mubr.msk.f32.mxu1 %vm31_vm1, %v16152_v35  ;;  %v16599_v35 = vld [vmem:[#allocation2 + $0x15a] sm:$0xff] }
  0xe2   :  { %14588 = vmatmul.mubr.msk.f32.gmra.mxu0 %vm31_vm1, %v16575_v12 }
  0xe3   :  { %14590 = vmatprep.mubr.msk.f32.mxu0 %vm31_vm1, %v16579_v14 }
  0xe4   :  { %14668 = vmatmul.mubr.msk.f32.gmra.mxu1 %vm31_vm1, %v16164_v38  ;;  %v1635_v38 = vld [vmem:[#allocation2 + $0x16a] sm:$0xff] }
  0xe5   :  { %14670 = vmatprep.mubr.msk.f32.mxu1 %vm31_vm1, %v16166_v40  ;;  %v1636_v40 = vld [vmem:[#allocation2 + $0x172] sm:$0xff] }
  0xe6   :  { %14591 = vmatmul.mubr.msk.f32.gmra.mxu0 %vm31_vm1, %v16587_v17 }
  0xe7   :  { %14593 = vmatprep.mubr.msk.f32.mxu0 %vm31_vm1, %v16591_v33 }
  0xe8   :  { %14671 = vmatmul.mubr.msk.f32.gmra.mxu1 %vm31_vm1, %v16174_v42  ;;  %v1637_v42 = vld [vmem:[#allocation2 + $0x1b2] sm:$0xff] }
  0xe9   :  { %14673 = vmatprep.mubr.msk.f32.mxu1 %vm31_vm1, %v16176_v45  ;;  %v1638_v45 = vld [vmem:[#allocation2 + $0x1ba] sm:$0xff] }
  0xea   :  { %14594 = vmatmul.mubr.msk.f32.gmra.mxu0 %vm31_vm1, %v16599_v35 }
  0xeb   :  { %14596 = vmatprep.mubr.msk.f32.mxu0 %vm31_vm1, %v1635_v38 }
  0xec   :  { %14674 = vmatmul.mubr.msk.f32.gmra.mxu1 %vm31_vm1, %v16195_v51  ;;  %v1640_v51 = vld [vmem:[#allocation2 + $0x1d2] sm:$0xff] }
  0xed   :  { %14676 = vmatprep.mubr.msk.f32.mxu1 %vm31_vm1, %v16201_v54  ;;  %v1641_v54 = vld [vmem:[#allocation2 + $0x1e2] sm:$0xff] }
  0xee   :  { %14597 = vmatmul.mubr.msk.f32.gmra.mxu0 %vm31_vm1, %v1636_v40 }
  0xef   :  { %14599 = vmatprep.mubr.msk.f32.mxu0 %vm31_vm1, %v1637_v42 }
  0xf0   :  { %14677 = vmatmul.mubr.msk.f32.gmra.mxu1 %vm31_vm1, %v16226_v61  ;;  %v1642_v61 = vld [vmem:[#allocation2 + $0x1ea] sm:$0xff] }
  0xf1   :  { %14679 = vmatprep.mubr.msk.f32.mxu1 %vm31_vm1, %v16229_v0  ;;  %v1643_v0 = vld [vmem:[#allocation2 + $0x1fa] sm:$0xff] }
  0xf2   :  { %14600 = vmatmul.mubr.msk.f32.gmra.mxu0 %vm31_vm1, %v1638_v45 }
  0xf3   :  { %14602 = vmatprep.mubr.msk.f32.mxu0 %vm31_vm1, %v1639_v62 }
  0xf4   :  { %14680 = vmatmul.mubr.msk.f32.gmra.mxu1 %vm31_vm1, %v16240_v5  ;;  %v1644_v5 = vld [vmem:[#allocation2 + $0x202] sm:$0xff] }
  0xf5   :  { %14682 = vmatprep.mubr.msk.f32.mxu1 %vm31_vm1, %v16242_v9  ;;  %v1645_v9 = vld [vmem:[#allocation2 + $0x212] sm:$0xff] }
  0xf6   :  { %14603 = vmatmul.mubr.msk.f32.gmra.mxu0 %vm31_vm1, %v1640_v51 }
  0xf7   :  { %14605 = vmatprep.mubr.msk.f32.mxu0 %vm31_vm1, %v1641_v54  ;;  %v2346_v54 = vld [vmem:[#allocation2 + $0x188] sm:$0xff] }
  0xf8   :  { %14683 = vmatmul.mubr.msk.f32.gmra.mxu1 %vm31_vm1, %v16250_v11  ;;  %v14357_v11 = vpop.f32.mrf.mxu0 }
  0xf9   :  { %14685 = vmatprep.mubr.msk.f32.mxu1 %vm31_vm1, %v16252_v15  ;;  %v1646_v15 = vld [vmem:[#allocation2 + $0x21a] sm:$0xff] }
  0xfa   :  { %14606 = vmatmul.mubr.msk.f32.gmra.mxu0 %vm31_vm1, %v1642_v61  ;;  %v706_v40 = vpop.f32.mrf.mxu0 }
  0xfb   :  { %14608 = vmatprep.mubr.msk.f32.mxu0 %vm31_vm1, %v1643_v0 }
  0xfc   :  { %14686 = vmatmul.mubr.msk.f32.gmra.mxu1 %vm31_vm1, %v16260_v18  ;;  %v1647_v18 = vld [vmem:[#allocation2 + $0x22a] sm:$0xff] }
  0xfd   :  { %14688 = vmatprep.mubr.msk.f32.mxu1 %vm31_vm1, %v16262_v20  ;;  %v2345_v20 = vld [vmem:[#allocation2 + $0x180] sm:$0xff] }
  0xfe   :  { %14609 = vmatmul.mubr.msk.f32.gmra.mxu0 %vm31_vm1, %v1644_v5 }
  0xff   :  { %14611 = vmatprep.mubr.msk.f32.mxu0 %vm31_vm1, %v1645_v9 }
 0x100   :  { %v16635_v38 = vpop.f32.mrf.mxu1  ;;  %14689 = vmatmul.mubr.msk.f32.gmra.mxu1 %vm31_vm1, %v16270_v22  ;;  %v1648_v22 = vld [vmem:[#allocation2 + $0x232] sm:$0xff] }
 0x101   :  { %21075 = vst [vmem:[#allocation20_spill] sm:$0xff] %v16635_v38  ;;  %14691 = vmatprep.mubr.msk.f32.mxu1 %vm31_vm1, %v16272_v24  ;;  %v1649_v24 = vld [vmem:[#allocation2 + $0x242] sm:$0xff] }
 0x102   :  { %v16642_v42 = vpop.f32.mrf.mxu1  ;;  %v14360_v45 = vpop.f32.mrf.mxu0  ;;  %14612 = vmatmul.mubr.msk.f32.gmra.mxu0 %vm31_vm1, %v1646_v15  ;;  %v1651_v15 = vld [vmem:[#allocation2 + $0x25a] sm:$0xff] }
 0x103   :  { %21076 = vst [vmem:[#allocation21_spill] sm:$0xff] %v16642_v42  ;;  %14614 = vmatprep.mubr.msk.f32.mxu0 %vm31_vm1, %v1647_v18  ;;  %v3031_v42 = vld [vmem:[#allocation2 + $0x61] sm:$0xff] }
 0x104   :  { %v16645_v62 = vpop.f32.mrf.mxu1  ;;  %14692 = vmatmul.mubr.msk.f32.gmra.mxu1 %vm31_vm1, %v16286_v28  ;;  %v716_v51 = vpop.f32.mrf.mxu0  ;;  %v1650_v28 = vld [vmem:[#allocation2 + $0x24a] sm:$0xff] }
 0x105   :  { %21077 = vst [vmem:[#allocation22_spill] sm:$0xff] %v16645_v62  ;;  %14694 = vmatprep.mubr.msk.f32.mxu1 %vm31_vm1, %v2345_v20 }
 0x106   :  { %v16651_v61 = vpop.f32.mrf.mxu1  ;;  %v14363_v0 = vpop.f32.mrf.mxu0  ;;  %14615 = vmatmul.mubr.msk.f32.gmra.mxu0 %vm31_vm1, %v1648_v22  ;;  %v1652_v22 = vld [vmem:[#allocation2 + $0x262] sm:$0xff] }
 0x107   :  { %21078 = vst [vmem:[#allocation23_spill] sm:$0xff] %v16651_v61  ;;  %14617 = vmatprep.mubr.msk.f32.mxu0 %vm31_vm1, %v1649_v24 }
 0x108   :  { %v16654_v5 = vpop.f32.mrf.mxu1  ;;  %14695 = vmatmul.mubr.msk.f32.gmra.mxu1 %vm31_vm1, %v2346_v54  ;;  %v726_v9 = vpop.f32.mrf.mxu0 }
 0x109   :  { %21079 = vst [vmem:[#allocation24_spill] sm:$0xff] %v16654_v5  ;;  %14697 = vmatprep.mubr.msk.f32.mxu1 %vm31_vm1, %v16295_v36  ;;  %v1653_v36 = vld [vmem:[#allocation2 + $0x272] sm:$0xff] }
 0x10a   :  { %v16660_v18 = vpop.f32.mrf.mxu1  ;;  %v14366_v20 = vpop.f32.mrf.mxu0  ;;  %14618 = vmatmul.mubr.msk.f32.gmra.mxu0 %vm31_vm1, %v1650_v28 }
 0x10b   :  { %21080 = vst [vmem:[#allocation25_spill] sm:$0xff] %v16660_v18  ;;  %14620 = vmatprep.mubr.msk.f32.mxu0 %vm31_vm1, %v1651_v15 }
 0x10c   :  { %v14455_v61 = vpop.f32.mrf.mxu1  ;;  %14698 = vmatmul.mubr.msk.f32.gmra.mxu1 %vm31_vm1, %v16302_v39  ;;  %v736_v24 = vpop.f32.mrf.mxu0  ;;  %v1654_v39 = vld [vmem:[#allocation2 + $0x27a] sm:$0xff] }
 0x10d   :  { %v16666_v54 = vadd.f32 %v14455_v61, %v14357_v11  ;;  %14700 = vmatprep.mubr.msk.f32.mxu1 %vm31_vm1, %v16304_v44  ;;  %v1655_v44 = vld [vmem:[#allocation2 + $0x28a] sm:$0xff] }
 0x10e   :  { %v1286_v5 = vpop.f32.mrf.mxu1  ;;  %v14369_v18 = vpop.f32.mrf.mxu0  ;;  %14621 = vmatmul.mubr.msk.f32.gmra.mxu0 %vm31_vm1, %v1652_v22 }
 0x10f   :  { %v16670_v62 = vadd.f32 %v1286_v5, %v706_v40  ;;  %14623 = vmatprep.mubr.msk.f32.mxu0 %vm31_vm1, %v1653_v36 }
 0x110   :  { %v14458_v28 = vpop.f32.mrf.mxu1  ;;  %14701 = vmatmul.mubr.msk.f32.gmra.mxu1 %vm31_vm1, %v16312_v47  ;;  %v746_v61 = vpop.f32.mrf.mxu0  ;;  %v1656_v47 = vld [vmem:[#allocation2 + $0x292] sm:$0xff] }
 0x111   :  { %v16676_v11 = vadd.f32 %v14458_v28, %v14360_v45  ;;  %14703 = vmatprep.mubr.msk.f32.mxu1 %vm31_vm1, %v16314_v50  ;;  %v1657_v50 = vld [vmem:[#allocation2 + $0x2a2] sm:$0xff] }
 0x112   :  { %v1296_v15 = vpop.f32.mrf.mxu1  ;;  %v14372_v5 = vpop.f32.mrf.mxu0  ;;  %14624 = vmatmul.mubr.msk.f32.gmra.mxu0 %vm31_vm1, %v1654_v39 }
 0x113   :  { %v16680_v40 = vadd.f32 %v1296_v15, %v716_v51  ;;  %14626 = vmatprep.mubr.msk.f32.mxu0 %vm31_vm1, %v1655_v44 }
 0x114   :  { %v14461_v22 = vpop.f32.mrf.mxu1  ;;  %14704 = vmatmul.mubr.msk.f32.gmra.mxu1 %vm31_vm1, %v16322_v53  ;;  %v756_v36 = vpop.f32.mrf.mxu0  ;;  %v1658_v53 = vld [vmem:[#allocation2 + $0x2aa] sm:$0xff] }
 0x115   :  { %v16686_v45 = vadd.f32 %v14461_v22, %v14363_v0  ;;  %14706 = vmatprep.mubr.msk.f32.mxu1 %vm31_vm1, %v16324_v56  ;;  %v1659_v56 = vld [vmem:[#allocation2 + $0x2ba] sm:$0xff] }
 0x116   :  { %v1306_v28 = vpop.f32.mrf.mxu1  ;;  %v14375_v15 = vpop.f32.mrf.mxu0  ;;  %14627 = vmatmul.mubr.msk.f32.gmra.mxu0 %vm31_vm1, %v1656_v47 }
 0x117   :  { %v16690_v51 = vadd.f32 %v1306_v28, %v726_v9  ;;  %14629 = vmatprep.mubr.msk.f32.mxu0 %vm31_vm1, %v1657_v50 }
 0x118   :  { %v14464_v39 = vpop.f32.mrf.mxu1  ;;  %14707 = vmatmul.mubr.msk.f32.gmra.mxu1 %vm31_vm1, %v16332_v58  ;;  %v766_v44 = vpop.f32.mrf.mxu0  ;;  %v1660_v58 = vld [vmem:[#allocation2 + $0x2c2] sm:$0xff] }
 0x119   :  { %v16696_v0 = vadd.f32 %v14464_v39, %v14366_v20  ;;  %14709 = vmatprep.mubr.msk.f32.mxu1 %vm31_vm1, %v16334_v3  ;;  %v1661_v3 = vld [vmem:[#allocation2 + $0x2d2] sm:$0xff] }
 0x11a   :  { %v1316_v22 = vpop.f32.mrf.mxu1  ;;  %v14378_v28 = vpop.f32.mrf.mxu0  ;;  %14630 = vmatmul.mubr.msk.f32.gmra.mxu0 %vm31_vm1, %v1658_v53 }
 0x11b   :  { %v16700_v9 = vadd.f32 %v1316_v22, %v736_v24  ;;  %14632 = vmatprep.mubr.msk.f32.mxu0 %vm31_vm1, %v1659_v56 }
 0x11c   :  { %v14467_v47 = vpop.f32.mrf.mxu1  ;;  %14710 = vmatmul.mubr.msk.f32.gmra.mxu1 %vm31_vm1, %v16342_v10  ;;  %v776_v50 = vpop.f32.mrf.mxu0  ;;  %v1662_v10 = vld [vmem:[#allocation2 + $0x2da] sm:$0xff] }
 0x11d   :  { %v16706_v20 = vadd.f32 %v14467_v47, %v14369_v18  ;;  %14712 = vmatprep.mubr.msk.f32.mxu1 %vm31_vm1, %v16344_v16  ;;  %v1663_v16 = vld [vmem:[#allocation2 + $0x2ea] sm:$0xff] }
 0x11e   :  { %v1326_v39 = vpop.f32.mrf.mxu1  ;;  %v14381_v22 = vpop.f32.mrf.mxu0  ;;  %14633 = vmatmul.mubr.msk.f32.gmra.mxu0 %vm31_vm1, %v1660_v58 }
 0x11f   :  { %v16710_v24 = vadd.f32 %v1326_v39, %v746_v61  ;;  %14635 = vmatprep.mubr.msk.f32.mxu0 %vm31_vm1, %v1661_v3 }
 0x120   :  { %v14470_v53 = vpop.f32.mrf.mxu1  ;;  %14713 = vmatmul.mubr.msk.f32.gmra.mxu1 %vm31_vm1, %v16352_v21  ;;  %v786_v56 = vpop.f32.mrf.mxu0  ;;  %v1664_v21 = vld [vmem:[#allocation2 + $0x2f2] sm:$0xff] }
 0x121   :  { %v16716_v18 = vadd.f32 %v14470_v53, %v14372_v5  ;;  %14715 = vmatprep.mubr.msk.f32.mxu1 %vm31_vm1, %v16354_v25  ;;  %v1665_v25 = vld [vmem:[#allocation2 + $0x302] sm:$0xff] }
 0x122   :  { %v1336_v47 = vpop.f32.mrf.mxu1  ;;  %v14384_v39 = vpop.f32.mrf.mxu0  ;;  %14636 = vmatmul.mubr.msk.f32.gmra.mxu0 %vm31_vm1, %v1662_v10 }
 0x123   :  { %v16720_v61 = vadd.f32 %v1336_v47, %v756_v36  ;;  %14638 = vmatprep.mubr.msk.f32.mxu0 %vm31_vm1, %v1663_v16 }
 0x124   :  { %v14473_v58 = vpop.f32.mrf.mxu1  ;;  %14716 = vmatmul.mubr.msk.f32.gmra.mxu1 %vm31_vm1, %v16362_v27  ;;  %v796_v3 = vpop.f32.mrf.mxu0  ;;  %v1666_v27 = vld [vmem:[#allocation2 + $0x30a] sm:$0xff] }
 0x125   :  { %v16726_v5 = vadd.f32 %v14473_v58, %v14375_v15  ;;  %14718 = vmatprep.mubr.msk.f32.mxu1 %vm31_vm1, %v16364_v30  ;;  %v1667_v30 = vld [vmem:[#allocation2 + $0x31a] sm:$0xff] }
 0x126   :  { %v1346_v53 = vpop.f32.mrf.mxu1  ;;  %v14387_v47 = vpop.f32.mrf.mxu0  ;;  %14639 = vmatmul.mubr.msk.f32.gmra.mxu0 %vm31_vm1, %v1664_v21 }
 0x127   :  { %v16730_v36 = vadd.f32 %v1346_v53, %v766_v44  ;;  %14641 = vmatprep.mubr.msk.f32.mxu0 %vm31_vm1, %v1665_v25 }
 0x128   :  { %v14476_v10 = vpop.f32.mrf.mxu1  ;;  %14719 = vmatmul.mubr.msk.f32.gmra.mxu1 %vm31_vm1, %v16372_v32  ;;  %v806_v16 = vpop.f32.mrf.mxu0  ;;  %v1668_v32 = vld [vmem:[#allocation2 + $0x322] sm:$0xff] }
 0x129   :  { %v16736_v15 = vadd.f32 %v14476_v10, %v14378_v28  ;;  %14721 = vmatprep.mubr.msk.f32.mxu1 %vm31_vm1, %v16374_v37  ;;  %v3025_v37 = vld [vmem:[#allocation2 + $0x19] sm:$0xff] }
 0x12a   :  { %v1356_v58 = vpop.f32.mrf.mxu1  ;;  %v14390_v53 = vpop.f32.mrf.mxu0  ;;  %14642 = vmatmul.mubr.msk.f32.gmra.mxu0 %vm31_vm1, %v1666_v27 }
 0x12b   :  { %v16740_v44 = vadd.f32 %v1356_v58, %v776_v50  ;;  %14644 = vmatprep.mubr.msk.f32.mxu0 %vm31_vm1, %v1667_v30 }
 0x12c   :  { %v14479_v21 = vpop.f32.mrf.mxu1  ;;  %14722 = vmatmul.mubr.msk.f32.gmra.mxu1 %vm31_vm1, %v16382_v46  ;;  %v816_v25 = vpop.f32.mrf.mxu0  ;;  %v3026_v46 = vld [vmem:[#allocation2 + $0x21] sm:$0xff] }
 0x12d   :  { %v16746_v28 = vadd.f32 %v14479_v21, %v14381_v22  ;;  %14724 = vmatprep.mubr.msk.f32.mxu1 %vm31_vm1, %v16384_v52  ;;  %v16763_v52 = vld [vmem:[%s21038_s1 + $0x1c] sm:$0xf]  ;;  %v3027_v21 = vld [vmem:[#allocation2 + $0x31] sm:$0xff] }
 0x12e   :  { %v1366_v10 = vpop.f32.mrf.mxu1  ;;  %v14393_v58 = vpop.f32.mrf.mxu0  ;;  %14645 = vmatmul.mubr.msk.f32.gmra.mxu0 %vm31_vm1, %v1668_v32  ;;  %15039 = vmatprep.subr.msk.mxu1 %vm636_vm0, %v16763_v52 }
 0x12f   :  { %v16750_v50 = vadd.f32 %v1366_v10, %v786_v56  ;;  %14747 = vmatprep.mubr.msk.f32.mxu0 %vm31_vm1, %v3025_v37  ;;  %v3028_v37 = vld [vmem:[#allocation2 + $0x39] sm:$0xff] }
 0x130   :  { %v14482_v27 = vpop.f32.mrf.mxu1  ;;  %14725 = vmatmul.mubr.msk.f32.gmra.mxu1 %vm31_vm1, %v16392_v57  ;;  %v826_v30 = vpop.f32.mrf.mxu0 }
 0x131   :  { %v16756_v22 = vadd.f32 %v14482_v27, %v14384_v39  ;;  %14727 = vmatprep.mubr.msk.f32.mxu1 %vm31_vm1, %v16399_v13  ;;  %v16773_v39 = vld [vmem:[%s21038_s1 + $0x20] sm:$0xf]  ;;  %v3029_v27 = vld [vmem:[#allocation2 + $0x49] sm:$0xff]  ;;  %s15558_s1 = scalar_lea.vmem %s12799_s30, 32 }
 0x132   :  { %v1376_v56 = vpop.f32.mrf.mxu1  ;;  %v14396_v32 = vpop.f32.mrf.mxu0  ;;  %14748 = vmatmul.mubr.msk.f32.vlgmr.msra.gmra.mxu0 %vm31_vm1, %v3026_v46  ;;  %21081 = vst [vmem:[#allocation26_spill] sm:$0xff] %v16773_v39  ;;  %p15559_p0 = scmp.ne.s32.totalorder %s12799_s30, %s15558_s1  ;;  %p15564_p2 = scmp.lt.s32.totalorder %s15558_s1, %s15558_s1 }
 0x133   :  { %v16767_v57 = vadd.f32 %v1376_v56, %v796_v3  ;;  %14942 = vmatpush3.msk.msra.mxu0 %vm636_vm0, %v16406_v19  ;;  %14750 = vmatprep.mubr.msk.f32.mxu0 %vm31_vm1, %v3027_v21 }
 0x134   :  { %v14485_v13 = vpop.f32.mrf.mxu1  ;;  %14728 = vmatmul.mubr.msk.f32.gmra.mxu1 %vm31_vm1, %v16418_v26  ;;  %v836_v3 = vpop.f32.mrf.mxu0  ;;  %15137 = vmatprep.subr.msk.mxu0 %vm636_vm0, %v16773_v39  ;;  %p15565_p3 = por %p15564_p2, %p15563_p1 }
 0x135   :  { %v16779_v10 = vadd.f32 %v14485_v13, %v14387_v47  ;;  %14730 = vmatprep.mubr.msk.f32.mxu1 %vm31_vm1, %v16422_v31  ;;  %v3030_v47 = vld [vmem:[#allocation2 + $0x51] sm:$0xff] }
 0x136   :  { %v1386_v46 = vpop.f32.mrf.mxu1  ;;  %v14399_v19 = vpop.f32.mrf.mxu0  ;;  %14751 = vmatmul.mubr.msk.f32.gmra.mxu0 %vm31_vm1, %v3028_v37  ;;  %v21082_v13 = vld [vmem:[#allocation12_spill] sm:$0xff]  ;;  %p15566_p4 = pnand %p15565_p3, %p15559_p0 }
 0x137   :  { %v16786_v56 = vadd.f32 %v1386_v46, %v806_v16  ;;  %14753 = vmatprep.mubr.msk.f32.mxu0 %vm31_vm1, %v3029_v27 }
 0x138   :  { %v14488_v26 = vpop.f32.mrf.mxu1  ;;  %14731 = vmatmul.mubr.msk.f32.gmra.mxu1 %vm31_vm1, %v16436_v34  ;;  %v846_v31 = vpop.f32.mrf.mxu0  ;;  %v3032_v34 = vld [vmem:[#allocation2 + $0x69] sm:$0xff] }
 0x139   :  { %v16792_v21 = vadd.f32 %v14488_v26, %v14390_v53  ;;  %14733 = vmatprep.mubr.msk.f32.mxu1 %vm31_vm1, %v21082_v13  ;;  %v21083_v26 = vld [vmem:[#allocation15_spill] sm:$0xff]  ;;  %v3033_v13 = vld [vmem:[#allocation2 + $0x79] sm:$0xff] }
 0x13a   :  { %v1396_v38 = vpop.f32.mrf.mxu1  ;;  %v14402_v46 = vpop.f32.mrf.mxu0  ;;  %14754 = vmatmul.mubr.msk.f32.gmra.mxu0 %vm31_vm1, %v3030_v47 }
 0x13b   :  { %v16796_v16 = vadd.f32 %v1396_v38, %v816_v25  ;;  %14756 = vmatprep.mubr.msk.f32.mxu0 %vm31_vm1, %v3031_v42 }
 0x13c   :  { %v14491_v37 = vpop.f32.mrf.mxu1  ;;  %14734 = vmatmul.mubr.msk.f32.gmra.mxu1 %vm31_vm1, %v16452_v1  ;;  %v856_v27 = vpop.f32.mrf.mxu0  ;;  %v3034_v1 = vld [vmem:[#allocation2 + $0x81] sm:$0xff] }
 0x13d   :  { %v16802_v53 = vadd.f32 %v14491_v37, %v14393_v58  ;;  %14736 = vmatprep.mubr.msk.f32.mxu1 %vm31_vm1, %v21083_v26  ;;  %v3035_v37 = vld [vmem:[#allocation2 + $0x91] sm:$0xff] }
 0x13e   :  { %v1406_v39 = vpop.f32.mrf.mxu1  ;;  %v14405_v25 = vpop.f32.mrf.mxu0  ;;  %14757 = vmatmul.mubr.msk.f32.gmra.mxu0 %vm31_vm1, %v3032_v34 }
 0x13f   :  { %v16806_v38 = vadd.f32 %v1406_v39, %v826_v30  ;;  %14759 = vmatprep.mubr.msk.f32.mxu0 %vm31_vm1, %v3033_v13  ;;  %v2377_v30 = vld [vmem:[#allocation2 + $0x330] sm:$0xff] }
 0x140   :  { %v14494_v47 = vpop.f32.mrf.mxu1  ;;  %14737 = vmatmul.mubr.msk.f32.gmra.mxu1 %vm31_vm1, %v16476_v55  ;;  %v866_v58 = vpop.f32.mrf.mxu0  ;;  %v3036_v55 = vld [vmem:[#allocation2 + $0x99] sm:$0xff] }
 0x141   :  { %21084 = vst [vmem:[#allocation12_spill] sm:$0xff] %v16806_v38  ;;  %v16812_v42 = vadd.f32 %v14494_v47, %v14396_v32  ;;  %14739 = vmatprep.mubr.msk.f32.mxu1 %vm31_vm1, %v16480_v48  ;;  %v2378_v48 = vld [vmem:[#allocation2 + $0x338] sm:$0xff]  ;;  %v3037_v47 = vld [vmem:[#allocation2 + $0xa9] sm:$0xff] }
 0x142   :  { %v1416_v26 = vpop.f32.mrf.mxu1  ;;  %v14408_v38 = vpop.f32.mrf.mxu0  ;;  %14760 = vmatmul.mubr.msk.f32.gmra.mxu0 %vm31_vm1, %v3034_v1 }
 0x143   :  { %21085 = vst [vmem:[#allocation15_spill] sm:$0xff] %v16812_v42  ;;  %v16816_v39 = vadd.f32 %v1416_v26, %v836_v3  ;;  %14762 = vmatprep.mubr.msk.f32.mxu0 %vm31_vm1, %v3035_v37 }
 0x144   :  { %v14497_v34 = vpop.f32.mrf.mxu1  ;;  %14740 = vmatmul.mubr.msk.f32.gmra.mxu1 %vm31_vm1, %v16492_v41  ;;  %v876_v13 = vpop.f32.mrf.mxu0  ;;  %v3038_v41 = vld [vmem:[#allocation2 + $0xb1] sm:$0xff] }
 0x145   :  { %21086 = vst [vmem:[#allocation27_spill] sm:$0xff] %v16816_v39  ;;  %v16822_v32 = vadd.f32 %v14497_v34, %v14399_v19  ;;  %14742 = vmatprep.mubr.msk.f32.mxu1 %vm31_vm1, %v2377_v30  ;;  %v21088_v34 = vld [vmem:[#allocation7_spill] sm:$0xff] }
 0x146   :  { %v1426_v42 = vpop.f32.mrf.mxu1  ;;  %v14411_v26 = vpop.f32.mrf.mxu0  ;;  %14763 = vmatmul.mubr.msk.f32.gmra.mxu0 %vm31_vm1, %v3036_v55  ;;  %v3039_v30 = vld [vmem:[#allocation2 + $0xc1] sm:$0xff]  ;;  %v21090_v55 = vld [vmem:[#allocation8_spill] sm:$0xff] }
 0x147   :  { %21087 = vst [vmem:[#allocation28_spill] sm:$0xff] %v16822_v32  ;;  %v16825_v3 = vadd.f32 %v1426_v42, %v846_v31  ;;  %14765 = vmatprep.mubr.msk.f32.mxu0 %vm31_vm1, %v3037_v47 }
 0x148   :  { %v14500_v1 = vpop.f32.mrf.mxu1  ;;  %14743 = vmatmul.mubr.msk.f32.gmra.mxu1 %vm31_vm1, %v2378_v48  ;;  %v886_v19 = vpop.f32.mrf.mxu0  ;;  %v3040_v48 = vld [vmem:[#allocation2 + $0xc9] sm:$0xff] }
 0x149   :  { %v16830_v37 = vadd.f32 %v14500_v1, %v14402_v46  ;;  %14845 = vmatprep.mubr.msk.f32.mxu1 %vm31_vm1, %v21088_v34  ;;  %v21092_v1 = vld [vmem:[#allocation9_spill] sm:$0xff] }
 0x14a   :  { %v1436_v32 = vpop.f32.mrf.mxu1  ;;  %v14414_v31 = vpop.f32.mrf.mxu0  ;;  %14766 = vmatmul.mubr.msk.f32.gmra.mxu0 %vm31_vm1, %v3038_v41  ;;  %v3041_v34 = vld [vmem:[#allocation2 + $0xd9] sm:$0xff] }
 0x14b   :  { %v16834_v39 = vadd.f32 %v1436_v32, %v856_v27  ;;  %14768 = vmatprep.mubr.msk.f32.mxu0 %vm31_vm1, %v3039_v30 }
 0x14c   :  { %v14503_v42 = vpop.f32.mrf.mxu1  ;;  %14846 = vmatmul.mubr.msk.f32.vlgmr.msra.gmra.mxu1 %vm31_vm1, %v21090_v55  ;;  %v896_v47 = vpop.f32.mrf.mxu0 }
 0x14d   :  { %21089 = vst [vmem:[#allocation7_spill] sm:$0xff] %v16834_v39  ;;  %v16840_v46 = vadd.f32 %v14503_v42, %v14405_v25  ;;  %14848 = vmatprep.mubr.msk.f32.mxu1 %vm31_vm1, %v21092_v1  ;;  %15040 = vmatpush3.msk.msra.mxu1 %vm636_vm0, %v16763_v52  ;;  %v21094_v39 = vld [vmem:[#allocation10_spill] sm:$0xff]  ;;  %v21096_v1 = vld [vmem:[#allocation11_spill] sm:$0xff]  ;;  %v3043_v52 = vld [vmem:[#allocation2 + $0xf1] sm:$0xff] }
 0x14e   :  { %v1446_v27 = vpop.f32.mrf.mxu1  ;;  %v14417_v41 = vpop.f32.mrf.mxu0  ;;  %14769 = vmatmul.mubr.msk.f32.gmra.mxu0 %vm31_vm1, %v3040_v48  ;;  %v3042_v25 = vld [vmem:[#allocation2 + $0xe1] sm:$0xff] }
 0x14f   :  { %21091 = vst [vmem:[#allocation8_spill] sm:$0xff] %v16840_v46  ;;  %v16846_v32 = vadd.f32 %v1446_v27, %v866_v58  ;;  %14771 = vmatprep.mubr.msk.f32.mxu0 %vm31_vm1, %v3041_v34 }
 0x150   :  { %v14506_v55 = vpop.f32.mrf.mxu1  ;;  %14849 = vmatmul.mubr.msk.f32.gmra.mxu1 %vm31_vm1, %v21094_v39  ;;  %v906_v42 = vpop.f32.mrf.mxu0  ;;  %v3044_v39 = vld [vmem:[#allocation2 + $0xf9] sm:$0xff] }
 0x151   :  { %21093 = vst [vmem:[#allocation9_spill] sm:$0xff] %v16846_v32  ;;  %v16852_v30 = vadd.f32 %v14506_v55, %v14408_v38  ;;  %14851 = vmatprep.mubr.msk.f32.mxu1 %vm31_vm1, %v21096_v1  ;;  %v21098_v32 = vld [vmem:[#allocation13_spill] sm:$0xff]  ;;  %v21100_v55 = vld [vmem:[#allocation14_spill] sm:$0xff]  ;;  %v3045_v1 = vld [vmem:[#allocation2 + $0x109] sm:$0xff] }
 0x152   :  { %v1456_v46 = vpop.f32.mrf.mxu1  ;;  %v14420_v27 = vpop.f32.mrf.mxu0  ;;  %14772 = vmatmul.mubr.msk.f32.gmra.mxu0 %vm31_vm1, %v3042_v25 }
 0x153   :  { %21095 = vst [vmem:[#allocation10_spill] sm:$0xff] %v16852_v30  ;;  %v16856_v58 = vadd.f32 %v1456_v46, %v876_v13  ;;  %14774 = vmatprep.mubr.msk.f32.mxu0 %vm31_vm1, %v3043_v52 }
 0x154   :  { %v14509_v48 = vpop.f32.mrf.mxu1  ;;  %14852 = vmatmul.mubr.msk.f32.gmra.mxu1 %vm31_vm1, %v21098_v32  ;;  %v916_v34 = vpop.f32.mrf.mxu0  ;;  %v3046_v32 = vld [vmem:[#allocation2 + $0x111] sm:$0xff] }
 0x155   :  { %21097 = vst [vmem:[#allocation11_spill] sm:$0xff] %v16856_v58  ;;  %v16862_v38 = vadd.f32 %v14509_v48, %v14411_v26  ;;  %14854 = vmatprep.mubr.msk.f32.mxu1 %vm31_vm1, %v21100_v55  ;;  %v21102_v58 = vld [vmem:[#allocation16_spill] sm:$0xff]  ;;  %v21104_v48 = vld [vmem:[#allocation17_spill] sm:$0xff]  ;;  %v3047_v55 = vld [vmem:[#allocation2 + $0x121] sm:$0xff] }
 0x156   :  { %v1466_v30 = vpop.f32.mrf.mxu1  ;;  %v14423_v46 = vpop.f32.mrf.mxu0  ;;  %14775 = vmatmul.mubr.msk.f32.gmra.mxu0 %vm31_vm1, %v3044_v39 }
 0x157   :  { %21099 = vst [vmem:[#allocation13_spill] sm:$0xff] %v16862_v38  ;;  %v16866_v13 = vadd.f32 %v1466_v30, %v886_v19  ;;  %14777 = vmatprep.mubr.msk.f32.mxu0 %vm31_vm1, %v3045_v1 }
 0x158   :  { %v14512_v25 = vpop.f32.mrf.mxu1  ;;  %14855 = vmatmul.mubr.msk.f32.gmra.mxu1 %vm31_vm1, %v21102_v58  ;;  %v926_v52 = vpop.f32.mrf.mxu0  ;;  %v3048_v58 = vld [vmem:[#allocation2 + $0x129] sm:$0xff] }
 0x159   :  { %21101 = vst [vmem:[#allocation14_spill] sm:$0xff] %v16866_v13  ;;  %v16872_v26 = vadd.f32 %v14512_v25, %v14414_v31  ;;  %14857 = vmatprep.mubr.msk.f32.mxu1 %vm31_vm1, %v21104_v48  ;;  %v21105_v13 = vld [vmem:[#allocation18_spill] sm:$0xff]  ;;  %v21106_v25 = vld [vmem:[#allocation19_spill] sm:$0xff] }
 0x15a   :  { %v1476_v38 = vpop.f32.mrf.mxu1  ;;  %v14426_v30 = vpop.f32.mrf.mxu0  ;;  %14778 = vmatmul.mubr.msk.f32.gmra.mxu0 %vm31_vm1, %v3046_v32  ;;  %v3049_v48 = vld [vmem:[#allocation2 + $0x139] sm:$0xff] }
 0x15b   :  { %21103 = vst [vmem:[#allocation16_spill] sm:$0xff] %v16872_v26  ;;  %v16876_v19 = vadd.f32 %v1476_v38, %v896_v47  ;;  %14780 = vmatprep.mubr.msk.f32.mxu0 %vm31_vm1, %v3047_v55 }
 0x15c   :  { %v14515_v39 = vpop.f32.mrf.mxu1  ;;  %14858 = vmatmul.mubr.msk.f32.gmra.mxu1 %vm31_vm1, %v21105_v13  ;;  %v936_v1 = vpop.f32.mrf.mxu0  ;;  %v3050_v13 = vld [vmem:[#allocation2 + $0x141] sm:$0xff] }
 0x15d   :  { %v16882_v31 = vadd.f32 %v14515_v39, %v14417_v41  ;;  %14860 = vmatprep.mubr.msk.f32.mxu1 %vm31_vm1, %v21106_v25  ;;  %v3051_v39 = vld [vmem:[#allocation2 + $0x151] sm:$0xff] }
 0x15e   :  { %v1486_v26 = vpop.f32.mrf.mxu1  ;;  %v14429_v38 = vpop.f32.mrf.mxu0  ;;  %14781 = vmatmul.mubr.msk.f32.gmra.mxu0 %vm31_vm1, %v3048_v58 }
 0x15f   :  { %v16886_v47 = vadd.f32 %v1486_v26, %v906_v42  ;;  %14783 = vmatprep.mubr.msk.f32.mxu0 %vm31_vm1, %v3049_v48 }
 0x160   :  { %v14518_v32 = vpop.f32.mrf.mxu1  ;;  %14861 = vmatmul.mubr.msk.f32.gmra.mxu1 %vm31_vm1, %v16502_v7  ;;  %v946_v55 = vpop.f32.mrf.mxu0  ;;  %v3052_v7 = vld [vmem:[#allocation2 + $0x159] sm:$0xff] }
 0x161   :  { %v16892_v41 = vadd.f32 %v14518_v32, %v14420_v27  ;;  %14863 = vmatprep.mubr.msk.f32.mxu1 %vm31_vm1, %v16506_v60  ;;  %v3053_v60 = vld [vmem:[#allocation2 + $0x169] sm:$0xff] }
 0x162   :  { %v1496_v25 = vpop.f32.mrf.mxu1  ;;  %v14432_v26 = vpop.f32.mrf.mxu0  ;;  %14784 = vmatmul.mubr.msk.f32.gmra.mxu0 %vm31_vm1, %v3050_v13 }
 0x163   :  { %v16896_v42 = vadd.f32 %v1496_v25, %v916_v34  ;;  %14786 = vmatprep.mubr.msk.f32.mxu0 %vm31_vm1, %v3051_v39 }
 0x164   :  { %v14521_v58 = vpop.f32.mrf.mxu1  ;;  %14864 = vmatmul.mubr.msk.f32.gmra.mxu1 %vm31_vm1, %v16514_v29  ;;  %v956_v48 = vpop.f32.mrf.mxu0  ;;  %v3054_v29 = vld [vmem:[#allocation2 + $0x171] sm:$0xff] }
 0x165   :  { %v16902_v27 = vadd.f32 %v14521_v58, %v14423_v46  ;;  %14866 = vmatprep.mubr.msk.f32.mxu1 %vm31_vm1, %v16518_v23  ;;  %v3055_v23 = vld [vmem:[#allocation2 + $0x181] sm:$0xff] }
 0x166   :  { %v1506_v32 = vpop.f32.mrf.mxu1  ;;  %v14435_v25 = vpop.f32.mrf.mxu0  ;;  %14787 = vmatmul.mubr.msk.f32.gmra.mxu0 %vm31_vm1, %v3052_v7 }
 0x167   :  { %v16906_v34 = vadd.f32 %v1506_v32, %v926_v52  ;;  %14789 = vmatprep.mubr.msk.f32.mxu0 %vm31_vm1, %v3053_v60 }
 0x168   :  { %v14524_v13 = vpop.f32.mrf.mxu1  ;;  %14867 = vmatmul.mubr.msk.f32.gmra.mxu1 %vm31_vm1, %v16527_v43  ;;  %v966_v39 = vpop.f32.mrf.mxu0  ;;  %v3056_v43 = vld [vmem:[#allocation2 + $0x189] sm:$0xff] }
 0x169   :  { %v16912_v46 = vadd.f32 %v14524_v13, %v14426_v30  ;;  %14869 = vmatprep.mubr.msk.f32.mxu1 %vm31_vm1, %v16531_v49  ;;  %v3057_v49 = vld [vmem:[#allocation2 + $0x1c9] sm:$0xff] }
 0x16a   :  { %v1516_v58 = vpop.f32.mrf.mxu1  ;;  %v14438_v32 = vpop.f32.mrf.mxu0  ;;  %14790 = vmatmul.mubr.msk.f32.gmra.mxu0 %vm31_vm1, %v3054_v29 }
 0x16b   :  { %v16916_v52 = vadd.f32 %v1516_v58, %v936_v1  ;;  %14792 = vmatprep.mubr.msk.f32.mxu0 %vm31_vm1, %v3055_v23 }
 0x16c   :  { %v14527_v7 = vpop.f32.mrf.mxu1  ;;  %14870 = vmatmul.mubr.msk.f32.gmra.mxu1 %vm31_vm1, %v16539_v59  ;;  %v976_v60 = vpop.f32.mrf.mxu0  ;;  %v3058_v59 = vld [vmem:[#allocation2 + $0x1d1] sm:$0xff] }
 0x16d   :  { %v16922_v30 = vadd.f32 %v14527_v7, %v14429_v38  ;;  %14872 = vmatprep.mubr.msk.f32.mxu1 %vm31_vm1, %v16543_v63  ;;  %v3059_v63 = vld [vmem:[#allocation2 + $0x1e1] sm:$0xff] }
 0x16e   :  { %v1526_v13 = vpop.f32.mrf.mxu1  ;;  %v14441_v58 = vpop.f32.mrf.mxu0  ;;  %14793 = vmatmul.mubr.msk.f32.gmra.mxu0 %vm31_vm1, %v3056_v43 }
 0x16f   :  { %v16926_v1 = vadd.f32 %v1526_v13, %v946_v55  ;;  %14795 = vmatprep.mubr.msk.f32.mxu0 %vm31_vm1, %v3057_v49 }
 0x170   :  { %v14530_v29 = vpop.f32.mrf.mxu1  ;;  %14873 = vmatmul.mubr.msk.f32.gmra.mxu1 %vm31_vm1, %v16551_v2  ;;  %v986_v23 = vpop.f32.mrf.mxu0 }
 0x171   :  { %v16932_v38 = vadd.f32 %v14530_v29, %v14432_v26  ;;  %14875 = vmatprep.mubr.msk.f32.mxu1 %vm31_vm1, %v16555_v4  ;;  %v3060_v26 = vld [vmem:[#allocation2 + $0x1e9] sm:$0xff] }
 0x172   :  { %v1536_v7 = vpop.f32.mrf.mxu1  ;;  %v14553_v13 = vpop.f32.mrf.mxu0  ;;  %14796 = vmatmul.mubr.msk.f32.gmra.mxu0 %vm31_vm1, %v3058_v59 }
 0x173   :  { %v16936_v55 = vadd.f32 %v1536_v7, %v956_v48  ;;  %v16940_v43 = vadd.f32 %v14553_v13, %v16666_v54  ;;  %14798 = vmatprep.mubr.msk.f32.mxu0 %vm31_vm1, %v3059_v63  ;;  %v3061_v48 = vld [vmem:[#allocation2 + $0x1f9] sm:$0xff] }
 0x174   :  { %v14533_v2 = vpop.f32.mrf.mxu1  ;;  %14876 = vmatmul.mubr.msk.f32.gmra.mxu1 %vm31_vm1, %v16563_v6  ;;  %v1932_v4 = vpop.f32.mrf.mxu0 }
 0x175   :  { %v16945_v49 = vadd.f32 %v14533_v2, %v14435_v25  ;;  %14878 = vmatprep.mubr.msk.f32.mxu1 %vm31_vm1, %v16567_v8  ;;  %v16950_v29 = vadd.f32 %v1932_v4, %v16670_v62  ;;  %v3062_v8 = vld [vmem:[#allocation2 + $0x201] sm:$0xff] }
 0x176   :  { %v1546_v59 = vpop.f32.mrf.mxu1  ;;  %v14556_v7 = vpop.f32.mrf.mxu0  ;;  %14799 = vmatmul.mubr.msk.f32.gmra.mxu0 %vm31_vm1, %v3060_v26 }
 0x177   :  { %v16952_v54 = vadd.f32 %v1546_v59, %v966_v39  ;;  %v16956_v6 = vadd.f32 %v14556_v7, %v16676_v11  ;;  %14801 = vmatprep.mubr.msk.f32.mxu0 %vm31_vm1, %v3061_v48  ;;  %v3063_v39 = vld [vmem:[#allocation2 + $0x211] sm:$0xff] }
 0x178   :  { %v14536_v63 = vpop.f32.mrf.mxu1  ;;  %14879 = vmatmul.mubr.msk.f32.gmra.mxu1 %vm31_vm1, %v16575_v12  ;;  %v1942_v62 = vpop.f32.mrf.mxu0 }
 0x179   :  { %v16961_v25 = vadd.f32 %v14536_v63, %v14438_v32  ;;  %14881 = vmatprep.mubr.msk.f32.mxu1 %vm31_vm1, %v16579_v14  ;;  %v16966_v13 = vadd.f32 %v1942_v62, %v16680_v40  ;;  %v3064_v14 = vld [vmem:[#allocation2 + $0x219] sm:$0xff] }
 0x17a   :  { %v1556_v2 = vpop.f32.mrf.mxu1  ;;  %v14559_v26 = vpop.f32.mrf.mxu0  ;;  %14802 = vmatmul.mubr.msk.f32.gmra.mxu0 %vm31_vm1, %v3062_v8  ;;  %v3764_v8 = vld [vmem:[#allocation2 + $0x172] sm:$0xff] }
 0x17b   :  { %v16968_v11 = vadd.f32 %v1556_v2, %v976_v60  ;;  %v16972_v12 = vadd.f32 %v14559_v26, %v16686_v45  ;;  %14804 = vmatprep.mubr.msk.f32.mxu0 %vm31_vm1, %v3063_v39  ;;  %v3065_v60 = vld [vmem:[#allocation2 + $0x229] sm:$0xff] }
 0x17c   :  { %v14539_v4 = vpop.f32.mrf.mxu1  ;;  %14882 = vmatmul.mubr.msk.f32.gmra.mxu1 %vm31_vm1, %v16587_v17  ;;  %v1952_v40 = vpop.f32.mrf.mxu0  ;;  %v3763_v45 = vld [vmem:[#allocation2 + $0x16a] sm:$0xff] }
 0x17d   :  { %v16977_v32 = vadd.f32 %v14539_v4, %v14441_v58  ;;  %14884 = vmatprep.mubr.msk.f32.mxu1 %vm31_vm1, %v16591_v33  ;;  %v16982_v48 = vadd.f32 %v1952_v40, %v16690_v51  ;;  %v3066_v33 = vld [vmem:[#allocation2 + $0x231] sm:$0xff]  ;;  %v3068_v4 = vld [vmem:[#allocation2 + $0x249] sm:$0xff]  ;;  %v3069_v40 = vld [vmem:[#allocation2 + $0x259] sm:$0xff] }
 0x17e   :  { %v1566_v59 = vpop.f32.mrf.mxu1  ;;  %v14562_v63 = vpop.f32.mrf.mxu0  ;;  %14805 = vmatmul.mubr.msk.f32.gmra.mxu0 %vm31_vm1, %v3064_v14 }
 0x17f   :  { %v16984_v7 = vadd.f32 %v1566_v59, %v986_v23  ;;  %v16988_v17 = vadd.f32 %v14562_v63, %v16696_v0  ;;  %14807 = vmatprep.mubr.msk.f32.mxu0 %vm31_vm1, %v3065_v60  ;;  %v3067_v23 = vld [vmem:[#allocation2 + $0x241] sm:$0xff] }
 0x180   :  { %v16990_v58 = vpop.f32.mrf.mxu1  ;;  %14885 = vmatmul.mubr.msk.f32.gmra.mxu1 %vm31_vm1, %v16599_v35  ;;  %v1962_v51 = vpop.f32.mrf.mxu0  ;;  %v3765_v0 = vld [vmem:[#allocation2 + $0x182] sm:$0xff] }
 0x181   :  { %14887 = vmatprep.mubr.msk.f32.mxu1 %vm31_vm1, %v3763_v45  ;;  %v16997_v62 = vadd.f32 %v1962_v51, %v16700_v9  ;;  %v3766_v9 = vld [vmem:[#allocation2 + $0x18a] sm:$0xff]  ;;  %v3070_v51 = vld [vmem:[#allocation2 + $0x261] sm:$0xff] }
 0x182   :  { %v16999_v39 = vpop.f32.mrf.mxu1  ;;  %v14565_v2 = vpop.f32.mrf.mxu0  ;;  %14808 = vmatmul.mubr.msk.f32.gmra.mxu0 %vm31_vm1, %v3066_v33  ;;  %v3767_v45 = vld [vmem:[#allocation2 + $0x1ca] sm:$0xff] }
 0x183   :  { %v17003_v26 = vadd.f32 %v14565_v2, %v16706_v20  ;;  %14810 = vmatprep.mubr.msk.f32.mxu0 %vm31_vm1, %v3067_v23  ;;  %v3071_v23 = vld [vmem:[#allocation2 + $0x271] sm:$0xff] }
 0x184   :  { %v17005_v35 = vpop.f32.mrf.mxu1  ;;  %14888 = vmatmul.mubr.msk.f32.gmra.mxu1 %vm31_vm1, %v3764_v8  ;;  %v1972_v14 = vpop.f32.mrf.mxu0 }
 0x185   :  { %14890 = vmatprep.mubr.msk.f32.mxu1 %vm31_vm1, %v3765_v0  ;;  %v17011_v60 = vadd.f32 %v1972_v14, %v16710_v24  ;;  %v3768_v24 = vld [vmem:[#allocation2 + $0x1d2] sm:$0xff] }
 0x186   :  { %v17013_v59 = vpop.f32.mrf.mxu1  ;;  %v14568_v20 = vpop.f32.mrf.mxu0  ;;  %14811 = vmatmul.mubr.msk.f32.gmra.mxu0 %vm31_vm1, %v3068_v4  ;;  %v3769_v4 = vld [vmem:[#allocation2 + $0x1e2] sm:$0xff] }
 0x187   :  { %v17017_v63 = vadd.f32 %v14568_v20, %v16716_v18  ;;  %14813 = vmatprep.mubr.msk.f32.mxu0 %vm31_vm1, %v3069_v40  ;;  %v3072_v40 = vld [vmem:[#allocation2 + $0x279] sm:$0xff]  ;;  %v3770_v20 = vld [vmem:[#allocation2 + $0x1ea] sm:$0xff] }
 0x188   :  { %v17019_v33 = vpop.f32.mrf.mxu1  ;;  %14891 = vmatmul.mubr.msk.f32.gmra.mxu1 %vm31_vm1, %v3766_v9  ;;  %v1982_v8 = vpop.f32.mrf.mxu0 }
 0x189   :  { %14893 = vmatprep.mubr.msk.f32.mxu1 %vm31_vm1, %v3767_v45  ;;  %v17025_v0 = vadd.f32 %v1982_v8, %v16720_v61  ;;  %v3073_v8 = vld [vmem:[#allocation2 + $0x289] sm:$0xff] }
 0x18a   :  { %v17027_v2 = vpop.f32.mrf.mxu1  ;;  %v14571_v18 = vpop.f32.mrf.mxu0  ;;  %14814 = vmatmul.mubr.msk.f32.gmra.mxu0 %vm31_vm1, %v3070_v51 }
 0x18b   :  { %21107 = vst [vmem:[#allocation17_spill] sm:$0xff] %v17027_v2  ;;  %v17031_v14 = vadd.f32 %v14571_v18, %v16726_v5  ;;  %14816 = vmatprep.mubr.msk.f32.mxu0 %vm31_vm1, %v3071_v23  ;;  %v3771_v5 = vld [vmem:[#allocation2 + $0x1fa] sm:$0xff] }
 0x18c   :  { %v14651_v9 = vpop.f32.mrf.mxu1  ;;  %14894 = vmatmul.mubr.msk.f32.gmra.mxu1 %vm31_vm1, %v3768_v24  ;;  %v1992_v61 = vpop.f32.mrf.mxu0 }
 0x18d   :  { %v17036_v45 = vadd.f32 %v14651_v9, %v16940_v43  ;;  %14896 = vmatprep.mubr.msk.f32.mxu1 %vm31_vm1, %v3769_v4  ;;  %v17040_v2 = vadd.f32 %v1992_v61, %v16730_v36  ;;  %v3074_v4 = vld [vmem:[#allocation2 + $0x291] sm:$0xff]  ;;  %v3075_v61 = vld [vmem:[#allocation2 + $0x2a1] sm:$0xff] }
 0x18e   :  { %v2642_v51 = vpop.f32.mrf.mxu1  ;;  %v14574_v24 = vpop.f32.mrf.mxu0  ;;  %14817 = vmatmul.mubr.msk.f32.gmra.mxu0 %vm31_vm1, %v3072_v40 }
 0x18f   :  { %v17043_v18 = vadd.f32 %v2642_v51, %v16950_v29  ;;  %v17047_v23 = vadd.f32 %v14574_v24, %v16736_v15  ;;  %14819 = vmatprep.mubr.msk.f32.mxu0 %vm31_vm1, %v3073_v8  ;;  %v3772_v29 = vld [vmem:[#allocation2 + $0x202] sm:$0xff]  ;;  %v3773_v15 = vld [vmem:[#allocation2 + $0x212] sm:$0xff] }
 0x190   :  { %v14654_v43 = vpop.f32.mrf.mxu1  ;;  %14897 = vmatmul.mubr.msk.f32.gmra.mxu1 %vm31_vm1, %v3770_v20  ;;  %v2002_v9 = vpop.f32.mrf.mxu0 }
 0x191   :  { %v17052_v36 = vadd.f32 %v14654_v43, %v16956_v6  ;;  %14899 = vmatprep.mubr.msk.f32.mxu1 %vm31_vm1, %v3771_v5  ;;  %v17056_v51 = vadd.f32 %v2002_v9, %v16740_v44  ;;  %v3076_v5 = vld [vmem:[#allocation2 + $0x2a9] sm:$0xff]  ;;  %v3077_v9 = vld [vmem:[#allocation2 + $0x2b9] sm:$0xff] }
 0x192   :  { %v2652_v40 = vpop.f32.mrf.mxu1  ;;  %v14577_v20 = vpop.f32.mrf.mxu0  ;;  %14820 = vmatmul.mubr.msk.f32.gmra.mxu0 %vm31_vm1, %v3074_v4 }
 0x193   :  { %v17059_v24 = vadd.f32 %v2652_v40, %v16966_v13  ;;  %v17063_v8 = vadd.f32 %v14577_v20, %v16746_v28  ;;  %14822 = vmatprep.mubr.msk.f32.mxu0 %vm31_vm1, %v3075_v61  ;;  %v3774_v13 = vld [vmem:[#allocation2 + $0x21a] sm:$0xff]  ;;  %v3775_v28 = vld [vmem:[#allocation2 + $0x22a] sm:$0xff] }
 0x194   :  { %v14657_v6 = vpop.f32.mrf.mxu1  ;;  %14900 = vmatmul.mubr.msk.f32.gmra.mxu1 %vm31_vm1, %v3772_v29  ;;  %v2012_v43 = vpop.f32.mrf.mxu0 }
 0x195   :  { %v17068_v44 = vadd.f32 %v14657_v6, %v16972_v12  ;;  %14902 = vmatprep.mubr.msk.f32.mxu1 %vm31_vm1, %v3773_v15  ;;  %v17072_v40 = vadd.f32 %v2012_v43, %v16750_v50  ;;  %v3078_v15 = vld [vmem:[#allocation2 + $0x2c1] sm:$0xff]  ;;  %v3079_v43 = vld [vmem:[#allocation2 + $0x2d1] sm:$0xff] }
 0x196   :  { %v2662_v4 = vpop.f32.mrf.mxu1  ;;  %v14580_v29 = vpop.f32.mrf.mxu0  ;;  %14823 = vmatmul.mubr.msk.f32.gmra.mxu0 %vm31_vm1, %v3076_v5 }
 0x197   :  { %v17075_v20 = vadd.f32 %v2662_v4, %v16982_v48  ;;  %v17079_v61 = vadd.f32 %v14580_v29, %v16756_v22  ;;  %14825 = vmatprep.mubr.msk.f32.mxu0 %vm31_vm1, %v3077_v9  ;;  %v3776_v48 = vld [vmem:[#allocation2 + $0x232] sm:$0xff]  ;;  %v3777_v22 = vld [vmem:[#allocation2 + $0x242] sm:$0xff] }
 0x198   :  { %v14660_v12 = vpop.f32.mrf.mxu1  ;;  %14903 = vmatmul.mubr.msk.f32.gmra.mxu1 %vm31_vm1, %v3774_v13  ;;  %v2022_v6 = vpop.f32.mrf.mxu0 }
 0x199   :  { %v17084_v50 = vadd.f32 %v14660_v12, %v16988_v17  ;;  %14905 = vmatprep.mubr.msk.f32.mxu1 %vm31_vm1, %v3775_v28  ;;  %v17088_v4 = vadd.f32 %v2022_v6, %v16767_v57  ;;  %v3080_v28 = vld [vmem:[#allocation2 + $0x2d9] sm:$0xff]  ;;  %v3081_v6 = vld [vmem:[#allocation2 + $0x2e9] sm:$0xff] }
 0x19a   :  { %v2672_v5 = vpop.f32.mrf.mxu1  ;;  %v14583_v13 = vpop.f32.mrf.mxu0  ;;  %14826 = vmatmul.mubr.msk.f32.gmra.mxu0 %vm31_vm1, %v3078_v15 }
 0x19b   :  { %v17091_v29 = vadd.f32 %v2672_v5, %v16997_v62  ;;  %v17095_v9 = vadd.f32 %v14583_v13, %v16779_v10  ;;  %14828 = vmatprep.mubr.msk.f32.mxu0 %vm31_vm1, %v3079_v43  ;;  %v3778_v62 = vld [vmem:[#allocation2 + $0x24a] sm:$0xff]  ;;  %v3779_v10 = vld [vmem:[#allocation2 + $0x25a] sm:$0xff] }
 0x19c   :  { %v14663_v17 = vpop.f32.mrf.mxu1  ;;  %14906 = vmatmul.mubr.msk.f32.gmra.mxu1 %vm31_vm1, %v3776_v48  ;;  %v2032_v12 = vpop.f32.mrf.mxu0 }
 0x19d   :  { %v17100_v57 = vadd.f32 %v14663_v17, %v17003_v26  ;;  %14908 = vmatprep.mubr.msk.f32.mxu1 %vm31_vm1, %v3777_v22  ;;  %v17104_v5 = vadd.f32 %v2032_v12, %v16786_v56  ;;  %v3082_v22 = vld [vmem:[#allocation2 + $0x2f1] sm:$0xff]  ;;  %v3083_v12 = vld [vmem:[#allocation2 + $0x301] sm:$0xff] }
 0x19e   :  { %v2682_v15 = vpop.f32.mrf.mxu1  ;;  %v14586_v48 = vpop.f32.mrf.mxu0  ;;  %14829 = vmatmul.mubr.msk.f32.gmra.mxu0 %vm31_vm1, %v3080_v28 }
 0x19f   :  { %v17107_v13 = vadd.f32 %v2682_v15, %v17011_v60  ;;  %v17111_v43 = vadd.f32 %v14586_v48, %v16792_v21  ;;  %14831 = vmatprep.mubr.msk.f32.mxu0 %vm31_vm1, %v3081_v6  ;;  %v3780_v60 = vld [vmem:[#allocation2 + $0x262] sm:$0xff]  ;;  %v3781_v21 = vld [vmem:[#allocation2 + $0x272] sm:$0xff] }
 0x1a0   :  { %v14666_v26 = vpop.f32.mrf.mxu1  ;;  %14909 = vmatmul.mubr.msk.f32.gmra.mxu1 %vm31_vm1, %v3778_v62  ;;  %v2042_v17 = vpop.f32.mrf.mxu0 }
 0x1a1   :  { %v17116_v56 = vadd.f32 %v14666_v26, %v17017_v63  ;;  %14911 = vmatprep.mubr.msk.f32.mxu1 %vm31_vm1, %v3779_v10  ;;  %v17120_v15 = vadd.f32 %v2042_v17, %v16796_v16  ;;  %v3084_v10 = vld [vmem:[#allocation2 + $0x309] sm:$0xff]  ;;  %v3085_v17 = vld [vmem:[#allocation2 + $0x319] sm:$0xff] }
 0x1a2   :  { %v2692_v28 = vpop.f32.mrf.mxu1  ;;  %v14589_v62 = vpop.f32.mrf.mxu0  ;;  %14832 = vmatmul.mubr.msk.f32.gmra.mxu0 %vm31_vm1, %v3082_v22 }
 0x1a3   :  { %21108 = vst [vmem:[#allocation18_spill] sm:$0xff] %v17116_v56  ;;  %v17123_v48 = vadd.f32 %v2692_v28, %v17025_v0  ;;  %v17127_v6 = vadd.f32 %v14589_v62, %v16802_v53  ;;  %14834 = vmatprep.mubr.msk.f32.mxu0 %vm31_vm1, %v3083_v12  ;;  %v3782_v0 = vld [vmem:[#allocation2 + $0x27a] sm:$0xff]  ;;  %v21111_v28 = vld [vmem:[#allocation12_spill] sm:$0xff]  ;;  %v21113_v12 = vld [vmem:[#allocation15_spill] sm:$0xff] }
 0x1a4   :  { %v14669_v63 = vpop.f32.mrf.mxu1  ;;  %14912 = vmatmul.mubr.msk.f32.gmra.mxu1 %vm31_vm1, %v3780_v60  ;;  %v2052_v26 = vpop.f32.mrf.mxu0  ;;  %v3783_v53 = vld [vmem:[#allocation2 + $0x28a] sm:$0xff] }
 0x1a5   :  { %21109 = vst [vmem:[#allocation19_spill] sm:$0xff] %v17123_v48  ;;  %v17132_v16 = vadd.f32 %v14669_v63, %v17031_v14  ;;  %14914 = vmatprep.mubr.msk.f32.mxu1 %vm31_vm1, %v3781_v21  ;;  %v17136_v48 = vadd.f32 %v2052_v26, %v21111_v28  ;;  %v3086_v21 = vld [vmem:[#allocation2 + $0x321] sm:$0xff]  ;;  %v3087_v28 = vld [vmem:[#allocation2 + $0x331] sm:$0xff] }
 0x1a6   :  { %v2702_v22 = vpop.f32.mrf.mxu1  ;;  %v14592_v60 = vpop.f32.mrf.mxu0  ;;  %14835 = vmatmul.mubr.msk.f32.gmra.mxu0 %vm31_vm1, %v3084_v10 }
 0x1a7   :  { %21110 = vst [vmem:[#allocation29_spill] sm:$0xff] %v17132_v16  ;;  %v17139_v62 = vadd.f32 %v2702_v22, %v17040_v2  ;;  %v17143_v56 = vadd.f32 %v14592_v60, %v21113_v12  ;;  %14837 = vmatprep.mubr.msk.f32.mxu0 %vm31_vm1, %v3085_v17  ;;  %v3784_v2 = vld [vmem:[#allocation2 + $0x292] sm:$0xff]  ;;  %v21114_v22 = vld [vmem:[#allocation27_spill] sm:$0xff]  ;;  %v21115_v17 = vld [vmem:[#allocation28_spill] sm:$0xff] }
 0x1a8   :  { %v14672_v14 = vpop.f32.mrf.mxu1  ;;  %14915 = vmatmul.mubr.msk.f32.gmra.mxu1 %vm31_vm1, %v3782_v0  ;;  %v2062_v26 = vpop.f32.mrf.mxu0  ;;  %v3785_v60 = vld [vmem:[#allocation2 + $0x2a2] sm:$0xff] }
 0x1a9   :  { %21112 = vst [vmem:[#allocation12_spill] sm:$0xff] %v17139_v62  ;;  %v17148_v63 = vadd.f32 %v14672_v14, %v17047_v23  ;;  %14917 = vmatprep.mubr.msk.f32.mxu1 %vm31_vm1, %v3783_v53  ;;  %v17152_v62 = vadd.f32 %v2062_v26, %v21114_v22  ;;  %v3088_v53 = vld [vmem:[#allocation2 + $0x339] sm:$0xff]  ;;  %v4446_v22 = vld [vmem:[#allocation2 + $0x30] sm:$0xff] }
 0x1aa   :  { %v2712_v10 = vpop.f32.mrf.mxu1  ;;  %v14595_v0 = vpop.f32.mrf.mxu0  ;;  %14838 = vmatmul.mubr.msk.f32.gmra.mxu0 %vm31_vm1, %v3086_v21 }
 0x1ab   :  { %v17155_v12 = vadd.f32 %v2712_v10, %v17056_v51  ;;  %v17159_v16 = vadd.f32 %v14595_v0, %v21115_v17  ;;  %14840 = vmatprep.mubr.msk.f32.mxu0 %vm31_vm1, %v3087_v28  ;;  %v3786_v51 = vld [vmem:[#allocation2 + $0x2aa] sm:$0xff]  ;;  %v3787_v0 = vld [vmem:[#allocation2 + $0x2ba] sm:$0xff] }
 0x1ac   :  { %v14675_v23 = vpop.f32.mrf.mxu1  ;;  %14918 = vmatmul.mubr.msk.f32.gmra.mxu1 %vm31_vm1, %v3784_v2  ;;  %v2072_v26 = vpop.f32.mrf.mxu0 }
 0x1ad   :  { %v17164_v14 = vadd.f32 %v14675_v23, %v17063_v8  ;;  %14920 = vmatprep.mubr.msk.f32.mxu1 %vm31_vm1, %v3785_v60  ;;  %v17168_v10 = vadd.f32 %v2072_v26, %v16825_v3  ;;  %v4447_v60 = vld [vmem:[#allocation2 + $0x38] sm:$0xff]  ;;  %v21119_v26 = vld [vmem:[#allocation7_spill] sm:$0xff] }
 0x1ae   :  { %v2722_v21 = vpop.f32.mrf.mxu1  ;;  %v14598_v2 = vpop.f32.mrf.mxu0  ;;  %14841 = vmatmul.mubr.msk.f32.gmra.mxu0 %vm31_vm1, %v3088_v53 }
 0x1af   :  { %21116 = vst [vmem:[#allocation15_spill] sm:$0xff] %v17164_v14  ;;  %v17171_v17 = vadd.f32 %v2722_v21, %v17072_v40  ;;  %v17175_v28 = vadd.f32 %v14598_v2, %v16830_v37  ;;  %14943 = vmatprep.mubr.msk.f32.mxu0 %vm31_vm1, %v4446_v22  ;;  %v3788_v40 = vld [vmem:[#allocation2 + $0x2c2] sm:$0xff]  ;;  %v3789_v37 = vld [vmem:[#allocation2 + $0x2d2] sm:$0xff]  ;;  %v21121_v22 = vld [vmem:[#allocation8_spill] sm:$0xff] }
 0x1b0   :  { %v14678_v8 = vpop.f32.mrf.mxu1  ;;  %14921 = vmatmul.mubr.msk.f32.gmra.mxu1 %vm31_vm1, %v3786_v51  ;;  %v2082_v23 = vpop.f32.mrf.mxu0 }
 0x1b1   :  { %21117 = vst [vmem:[#allocation27_spill] sm:$0xff] %v17171_v17  ;;  %v17180_v3 = vadd.f32 %v14678_v8, %v17079_v61  ;;  %14923 = vmatprep.mubr.msk.f32.mxu1 %vm31_vm1, %v3787_v0  ;;  %v17184_v21 = vadd.f32 %v2082_v23, %v21119_v26  ;;  %v4448_v17 = vld [vmem:[#allocation2 + $0x48] sm:$0xff]  ;;  %v21122_v61 = vld [vmem:[#allocation26_spill] sm:$0xff]  ;;  %v4449_v8 = vld [vmem:[#allocation2 + $0x50] sm:$0xff] }
 0x1b2   :  { %v2732_v53 = vpop.f32.mrf.mxu1  ;;  %v14601_v51 = vpop.f32.mrf.mxu0  ;;  %14944 = vmatmul.mubr.msk.f32.vlgmr.msra.gmra.mxu0 %vm31_vm1, %v4447_v60  ;;  %v4450_v60 = vld [vmem:[#allocation2 + $0x60] sm:$0xff] }
 0x1b3   :  { %21118 = vst [vmem:[#allocation28_spill] sm:$0xff] %v17180_v3  ;;  %v17187_v2 = vadd.f32 %v2732_v53, %v17088_v4  ;;  %v17191_v14 = vadd.f32 %v14601_v51, %v21121_v22  ;;  %15138 = vmatpush3.msk.msra.mxu0 %vm636_vm0, %v21122_v61  ;;  %14946 = vmatprep.mubr.msk.f32.mxu0 %vm31_vm1, %v4448_v17  ;;  %v3790_v4 = vld [vmem:[#allocation2 + $0x2da] sm:$0xff]  ;;  %v21124_v53 = vld [vmem:[#allocation9_spill] sm:$0xff]  ;;  %v4451_v17 = vld [vmem:[#allocation2 + $0x68] sm:$0xff] }
 0x1b4   :  { %v14681_v0 = vpop.f32.mrf.mxu1  ;;  %14924 = vmatmul.mubr.msk.f32.gmra.mxu1 %vm31_vm1, %v3788_v40  ;;  %v2092_v26 = vpop.f32.mrf.mxu0 }
 0x1b5   :  { %21120 = vst [vmem:[#allocation7_spill] sm:$0xff] %v17187_v2  ;;  %v17197_v23 = vadd.f32 %v14681_v0, %v17095_v9  ;;  %14926 = vmatprep.mubr.msk.f32.mxu1 %vm31_vm1, %v3789_v37  ;;  %v17202_v51 = vadd.f32 %v2092_v26, %v21124_v53  ;;  %v3791_v2 = vld [vmem:[#allocation2 + $0x2ea] sm:$0xff]  ;;  %v21126_v9 = vld [vmem:[#allocation10_spill] sm:$0xff] }
 0x1b6   :  { %v2742_v22 = vpop.f32.mrf.mxu1  ;;  %v14604_v40 = vpop.f32.mrf.mxu0  ;;  %14947 = vmatmul.mubr.msk.f32.gmra.mxu0 %vm31_vm1, %v4449_v8  ;;  %v4452_v53 = vld [vmem:[#allocation2 + $0x78] sm:$0xff] }
 0x1b7   :  { %21123 = vst [vmem:[#allocation8_spill] sm:$0xff] %v17197_v23  ;;  %v17205_v61 = vadd.f32 %v2742_v22, %v17104_v5  ;;  %v17209_v0 = vadd.f32 %v14604_v40, %v21126_v9  ;;  %14949 = vmatprep.mubr.msk.f32.mxu0 %vm31_vm1, %v4450_v60  ;;  %v3792_v5 = vld [vmem:[#allocation2 + $0x2f2] sm:$0xff]  ;;  %v21128_v22 = vld [vmem:[#allocation11_spill] sm:$0xff] }
 0x1b8   :  { %v14684_v23 = vpop.f32.mrf.mxu1  ;;  %14927 = vmatmul.mubr.msk.f32.gmra.mxu1 %vm31_vm1, %v3790_v4  ;;  %v2102_v26 = vpop.f32.mrf.mxu0  ;;  %v3793_v40 = vld [vmem:[#allocation2 + $0x302] sm:$0xff]  ;;  %v21130_v60 = vld [vmem:[#allocation13_spill] sm:$0xff] }
 0x1b9   :  { %21125 = vst [vmem:[#allocation26_spill] sm:$0xff] %v17205_v61  ;;  %v17214_v37 = vadd.f32 %v14684_v23, %v17111_v43  ;;  %14929 = vmatprep.mubr.msk.f32.mxu1 %vm31_vm1, %v3791_v2  ;;  %v17218_v61 = vadd.f32 %v2102_v26, %v21128_v22  ;;  %v4453_v2 = vld [vmem:[#allocation2 + $0x80] sm:$0xff]  ;;  %v4454_v22 = vld [vmem:[#allocation2 + $0x90] sm:$0xff] }
 0x1ba   :  { %v2752_v8 = vpop.f32.mrf.mxu1  ;;  %v14607_v4 = vpop.f32.mrf.mxu0  ;;  %14950 = vmatmul.mubr.msk.f32.gmra.mxu0 %vm31_vm1, %v4451_v17 }
 0x1bb   :  { %21127 = vst [vmem:[#allocation9_spill] sm:$0xff] %v17214_v37  ;;  %v17221_v9 = vadd.f32 %v2752_v8, %v17120_v15  ;;  %v17225_v3 = vadd.f32 %v14607_v4, %v21130_v60  ;;  %14952 = vmatprep.mubr.msk.f32.mxu0 %vm31_vm1, %v4452_v53  ;;  %v3794_v15 = vld [vmem:[#allocation2 + $0x30a] sm:$0xff]  ;;  %v21131_v8 = vld [vmem:[#allocation14_spill] sm:$0xff] }
 0x1bc   :  { %v14687_v43 = vpop.f32.mrf.mxu1  ;;  %14930 = vmatmul.mubr.msk.f32.gmra.mxu1 %vm31_vm1, %v3792_v5  ;;  %v2112_v26 = vpop.f32.mrf.mxu0  ;;  %v3795_v4 = vld [vmem:[#allocation2 + $0x31a] sm:$0xff]  ;;  %v21132_v53 = vld [vmem:[#allocation16_spill] sm:$0xff] }
 0x1bd   :  { %21129 = vst [vmem:[#allocation10_spill] sm:$0xff] %v17221_v9  ;;  %v17230_v23 = vadd.f32 %v14687_v43, %v17127_v6  ;;  %14932 = vmatprep.mubr.msk.f32.mxu1 %vm31_vm1, %v3793_v40  ;;  %v17234_v9 = vadd.f32 %v2112_v26, %v21131_v8  ;;  %v4455_v40 = vld [vmem:[#allocation2 + $0x98] sm:$0xff]  ;;  %v4456_v8 = vld [vmem:[#allocation2 + $0xa8] sm:$0xff] }
 0x1be   :  { %v2762_v17 = vpop.f32.mrf.mxu1  ;;  %v14610_v5 = vpop.f32.mrf.mxu0  ;;  %14953 = vmatmul.mubr.msk.f32.gmra.mxu0 %vm31_vm1, %v4453_v2 }
 0x1bf   :  { %v17237_v60 = vadd.f32 %v2762_v17, %v17136_v48  ;;  %v17241_v37 = vadd.f32 %v14610_v5, %v21132_v53  ;;  %14955 = vmatprep.mubr.msk.f32.mxu0 %vm31_vm1, %v4454_v22  ;;  %v3796_v48 = vld [vmem:[#allocation2 + $0x322] sm:$0xff]  ;;  %v3797_v5 = vld [vmem:[#allocation2 + $0x332] sm:$0xff] }
 0x1c0   :  { %v14690_v6 = vpop.f32.mrf.mxu1  ;;  %14933 = vmatmul.mubr.msk.f32.gmra.mxu1 %vm31_vm1, %v3794_v15  ;;  %v2122_v26 = vpop.f32.mrf.mxu0 }
 0x1c1   :  { %v17246_v43 = vadd.f32 %v14690_v6, %v17143_v56  ;;  %14935 = vmatprep.mubr.msk.f32.mxu1 %vm31_vm1, %v3795_v4  ;;  %v17250_v17 = vadd.f32 %v2122_v26, %v16876_v19  ;;  %v4457_v4 = vld [vmem:[#allocation2 + $0xb0] sm:$0xff]  ;;  %v4458_v26 = vld [vmem:[#allocation2 + $0xc0] sm:$0xff] }
 0x1c2   :  { %v2772_v2 = vpop.f32.mrf.mxu1  ;;  %v14613_v15 = vpop.f32.mrf.mxu0  ;;  %14956 = vmatmul.mubr.msk.f32.gmra.mxu0 %vm31_vm1, %v4455_v40 }
 0x1c3   :  { %v17253_v53 = vadd.f32 %v2772_v2, %v17152_v62  ;;  %v17257_v22 = vadd.f32 %v14613_v15, %v16882_v31  ;;  %14958 = vmatprep.mubr.msk.f32.mxu0 %vm31_vm1, %v4456_v8  ;;  %v3798_v62 = vld [vmem:[#allocation2 + $0x33a] sm:$0xff]  ;;  %v5156_v31 = vld [vmem:[#allocation2 + $0x31] sm:$0xff] }
 0x1c4   :  { %v14693_v56 = vpop.f32.mrf.mxu1  ;;  %14936 = vmatmul.mubr.msk.f32.gmra.mxu1 %vm31_vm1, %v3796_v48  ;;  %v2132_v6 = vpop.f32.mrf.mxu0 }
 0x1c5   :  { %v17262_v19 = vadd.f32 %v14693_v56, %v17159_v16  ;;  %14938 = vmatprep.mubr.msk.f32.mxu1 %vm31_vm1, %v3797_v5  ;;  %v17266_v2 = vadd.f32 %v2132_v6, %v16886_v47  ;;  %v4459_v5 = vld [vmem:[#allocation2 + $0xc8] sm:$0xff]  ;;  %v4460_v6 = vld [vmem:[#allocation2 + $0xd8] sm:$0xff] }
 0x1c6   :  { %v2782_v40 = vpop.f32.mrf.mxu1  ;;  %v14616_v48 = vpop.f32.mrf.mxu0  ;;  %14959 = vmatmul.mubr.msk.f32.gmra.mxu0 %vm31_vm1, %v4457_v4 }
 0x1c7   :  { %v17269_v15 = vadd.f32 %v2782_v40, %v17168_v10  ;;  %v17273_v8 = vadd.f32 %v14616_v48, %v16892_v41  ;;  %14961 = vmatprep.mubr.msk.f32.mxu0 %vm31_vm1, %v4458_v26  ;;  %v5157_v10 = vld [vmem:[#allocation2 + $0x39] sm:$0xff]  ;;  %v5158_v41 = vld [vmem:[#allocation2 + $0x49] sm:$0xff] }
 0x1c8   :  { %v14696_v16 = vpop.f32.mrf.mxu1  ;;  %14939 = vmatmul.mubr.msk.f32.gmra.mxu1 %vm31_vm1, %v3798_v62  ;;  %v2142_v56 = vpop.f32.mrf.mxu0 }
 0x1c9   :  { %v17278_v47 = vadd.f32 %v14696_v16, %v17175_v28  ;;  %15041 = vmatprep.mubr.msk.f32.mxu1 %vm31_vm1, %v5156_v31  ;;  %v17282_v40 = vadd.f32 %v2142_v56, %v16896_v42  ;;  %v4461_v31 = vld [vmem:[#allocation2 + $0xe0] sm:$0xff]  ;;  %v4462_v56 = vld [vmem:[#allocation2 + $0xf0] sm:$0xff] }
 0x1ca   :  { %v2792_v4 = vpop.f32.mrf.mxu1  ;;  %v14619_v62 = vpop.f32.mrf.mxu0  ;;  %14962 = vmatmul.mubr.msk.f32.gmra.mxu0 %vm31_vm1, %v4459_v5 }
 0x1cb   :  { %v17285_v48 = vadd.f32 %v2792_v4, %v17184_v21  ;;  %v17289_v26 = vadd.f32 %v14619_v62, %v16902_v27  ;;  %14964 = vmatprep.mubr.msk.f32.mxu0 %vm31_vm1, %v4460_v6  ;;  %v5159_v21 = vld [vmem:[#allocation2 + $0x51] sm:$0xff]  ;;  %v5160_v27 = vld [vmem:[#allocation2 + $0x61] sm:$0xff] }
 0x1cc   :  { %v14699_v28 = vpop.f32.mrf.mxu1  ;;  %15042 = vmatmul.mubr.msk.f32.vlgmr.msra.gmra.mxu1 %vm31_vm1, %v5157_v10  ;;  %v2152_v16 = vpop.f32.mrf.mxu0 }
 0x1cd   :  { %v17294_v42 = vadd.f32 %v14699_v28, %v17191_v14  ;;  %15044 = vmatprep.mubr.msk.f32.mxu1 %vm31_vm1, %v5158_v41  ;;  %v17298_v4 = vadd.f32 %v2152_v16, %v16906_v34  ;;  %v4463_v41 = vld [vmem:[#allocation2 + $0xf8] sm:$0xff]  ;;  %v4464_v16 = vld [vmem:[#allocation2 + $0x108] sm:$0xff] }
 0x1ce   :  { %v2802_v5 = vpop.f32.mrf.mxu1  ;;  %v14622_v10 = vpop.f32.mrf.mxu0  ;;  %14965 = vmatmul.mubr.msk.f32.gmra.mxu0 %vm31_vm1, %v4461_v31 }
 0x1cf   :  { %v17301_v62 = vadd.f32 %v2802_v5, %v17202_v51  ;;  %v17305_v6 = vadd.f32 %v14622_v10, %v16912_v46  ;;  %14967 = vmatprep.mubr.msk.f32.mxu0 %vm31_vm1, %v4462_v56  ;;  %v5161_v51 = vld [vmem:[#allocation2 + $0x69] sm:$0xff]  ;;  %v5162_v46 = vld [vmem:[#allocation2 + $0x79] sm:$0xff] }
 0x1d0   :  { %v14702_v14 = vpop.f32.mrf.mxu1  ;;  %15045 = vmatmul.mubr.msk.f32.gmra.mxu1 %vm31_vm1, %v5159_v21  ;;  %v2162_v28 = vpop.f32.mrf.mxu0 }
 0x1d1   :  { %v17310_v34 = vadd.f32 %v14702_v14, %v17209_v0  ;;  %15047 = vmatprep.mubr.msk.f32.mxu1 %vm31_vm1, %v5160_v27  ;;  %v17314_v5 = vadd.f32 %v2162_v28, %v16916_v52  ;;  %v4465_v27 = vld [vmem:[#allocation2 + $0x110] sm:$0xff]  ;;  %v4466_v28 = vld [vmem:[#allocation2 + $0x120] sm:$0xff] }
 0x1d2   :  { %v2812_v31 = vpop.f32.mrf.mxu1  ;;  %v14625_v21 = vpop.f32.mrf.mxu0  ;;  %14968 = vmatmul.mubr.msk.f32.gmra.mxu0 %vm31_vm1, %v4463_v41 }
 0x1d3   :  { %v17317_v10 = vadd.f32 %v2812_v31, %v17218_v61  ;;  %v17321_v56 = vadd.f32 %v14625_v21, %v16922_v30  ;;  %14970 = vmatprep.mubr.msk.f32.mxu0 %vm31_vm1, %v4464_v16  ;;  %v5163_v61 = vld [vmem:[#allocation2 + $0x81] sm:$0xff]  ;;  %v5164_v30 = vld [vmem:[#allocation2 + $0x91] sm:$0xff] }
 0x1d4   :  { %v14705_v0 = vpop.f32.mrf.mxu1  ;;  %15048 = vmatmul.mubr.msk.f32.gmra.mxu1 %vm31_vm1, %v5161_v51  ;;  %v2172_v14 = vpop.f32.mrf.mxu0 }
 0x1d5   :  { %v17326_v52 = vadd.f32 %v14705_v0, %v17225_v3  ;;  %15050 = vmatprep.mubr.msk.f32.mxu1 %vm31_vm1, %v5162_v46  ;;  %v17330_v31 = vadd.f32 %v2172_v14, %v16926_v1  ;;  %v4467_v46 = vld [vmem:[#allocation2 + $0x128] sm:$0xff]  ;;  %v4468_v14 = vld [vmem:[#allocation2 + $0x138] sm:$0xff] }
 0x1d6   :  { %v2822_v41 = vpop.f32.mrf.mxu1  ;;  %v14628_v51 = vpop.f32.mrf.mxu0  ;;  %14971 = vmatmul.mubr.msk.f32.gmra.mxu0 %vm31_vm1, %v4465_v27 }
 0x1d7   :  { %v17333_v21 = vadd.f32 %v2822_v41, %v17234_v9  ;;  %v17337_v16 = vadd.f32 %v14628_v51, %v16932_v38  ;;  %14973 = vmatprep.mubr.msk.f32.mxu0 %vm31_vm1, %v4466_v28  ;;  %v5165_v9 = vld [vmem:[#allocation2 + $0x99] sm:$0xff]  ;;  %v5166_v38 = vld [vmem:[#allocation2 + $0xa9] sm:$0xff] }
 0x1d8   :  { %v14708_v3 = vpop.f32.mrf.mxu1  ;;  %15051 = vmatmul.mubr.msk.f32.gmra.mxu1 %vm31_vm1, %v5163_v61  ;;  %v2182_v0 = vpop.f32.mrf.mxu0 }
 0x1d9   :  { %v17342_v1 = vadd.f32 %v14708_v3, %v17241_v37  ;;  %15053 = vmatprep.mubr.msk.f32.mxu1 %vm31_vm1, %v5164_v30  ;;  %v17346_v41 = vadd.f32 %v2182_v0, %v16936_v55  ;;  %v4469_v30 = vld [vmem:[#allocation2 + $0x140] sm:$0xff]  ;;  %v4470_v0 = vld [vmem:[#allocation2 + $0x150] sm:$0xff] }
 0x1da   :  { %v2832_v27 = vpop.f32.mrf.mxu1  ;;  %v14631_v61 = vpop.f32.mrf.mxu0  ;;  %14974 = vmatmul.mubr.msk.f32.gmra.mxu0 %vm31_vm1, %v4467_v46 }
 0x1db   :  { %v17349_v51 = vadd.f32 %v2832_v27, %v17250_v17  ;;  %v17353_v28 = vadd.f32 %v14631_v61, %v16945_v49  ;;  %14976 = vmatprep.mubr.msk.f32.mxu0 %vm31_vm1, %v4468_v14  ;;  %v5167_v17 = vld [vmem:[#allocation2 + $0xb1] sm:$0xff]  ;;  %v5168_v49 = vld [vmem:[#allocation2 + $0xc1] sm:$0xff] }
 0x1dc   :  { %v14711_v37 = vpop.f32.mrf.mxu1  ;;  %15054 = vmatmul.mubr.msk.f32.gmra.mxu1 %vm31_vm1, %v5165_v9  ;;  %v2192_v3 = vpop.f32.mrf.mxu0 }
 0x1dd   :  { %v17358_v55 = vadd.f32 %v14711_v37, %v17257_v22  ;;  %15056 = vmatprep.mubr.msk.f32.mxu1 %vm31_vm1, %v5166_v38  ;;  %v17362_v27 = vadd.f32 %v2192_v3, %v16952_v54  ;;  %v4471_v38 = vld [vmem:[#allocation2 + $0x158] sm:$0xff]  ;;  %v4472_v3 = vld [vmem:[#allocation2 + $0x168] sm:$0xff] }
 0x1de   :  { %v2842_v46 = vpop.f32.mrf.mxu1  ;;  %v14634_v9 = vpop.f32.mrf.mxu0  ;;  %14977 = vmatmul.mubr.msk.f32.gmra.mxu0 %vm31_vm1, %v4469_v30 }
 0x1df   :  { %v17365_v61 = vadd.f32 %v2842_v46, %v17266_v2  ;;  %v17369_v14 = vadd.f32 %v14634_v9, %v16961_v25  ;;  %14979 = vmatprep.mubr.msk.f32.mxu0 %vm31_vm1, %v4470_v0  ;;  %v5169_v2 = vld [vmem:[#allocation2 + $0xc9] sm:$0xff]  ;;  %v5170_v25 = vld [vmem:[#allocation2 + $0xd9] sm:$0xff] }
 0x1e0   :  { %v14714_v22 = vpop.f32.mrf.mxu1  ;;  %15057 = vmatmul.mubr.msk.f32.gmra.mxu1 %vm31_vm1, %v5167_v17  ;;  %v2202_v37 = vpop.f32.mrf.mxu0 }
 0x1e1   :  { %v17374_v54 = vadd.f32 %v14714_v22, %v17273_v8  ;;  %15059 = vmatprep.mubr.msk.f32.mxu1 %vm31_vm1, %v5168_v49  ;;  %v17378_v46 = vadd.f32 %v2202_v37, %v16968_v11  ;;  %v4473_v49 = vld [vmem:[#allocation2 + $0x170] sm:$0xff]  ;;  %v4474_v37 = vld [vmem:[#allocation2 + $0x180] sm:$0xff] }
 0x1e2   :  { %v2852_v30 = vpop.f32.mrf.mxu1  ;;  %v14637_v17 = vpop.f32.mrf.mxu0  ;;  %14980 = vmatmul.mubr.msk.f32.gmra.mxu0 %vm31_vm1, %v4471_v38 }
 0x1e3   :  { %v17381_v9 = vadd.f32 %v2852_v30, %v17282_v40  ;;  %v17385_v0 = vadd.f32 %v14637_v17, %v16977_v32  ;;  %14982 = vmatprep.mubr.msk.f32.mxu0 %vm31_vm1, %v4472_v3  ;;  %v5171_v40 = vld [vmem:[#allocation2 + $0xe1] sm:$0xff]  ;;  %v21135_v30 = vld [vmem:[#allocation20_spill] sm:$0xff] }
 0x1e4   :  { %v14717_v8 = vpop.f32.mrf.mxu1  ;;  %15060 = vmatmul.mubr.msk.f32.gmra.mxu1 %vm31_vm1, %v5169_v2  ;;  %v2212_v22 = vpop.f32.mrf.mxu0  ;;  %v1582_v38 = vadd.f32 %v16990_v58, %v21135_v30  ;;  %v4476_v30 = vld [vmem:[#allocation2 + $0x198] sm:$0xff] }
 0x1e5   :  { %21133 = vst [vmem:[#allocation11_spill] sm:$0xff] %v17381_v9  ;;  %v17390_v11 = vadd.f32 %v14717_v8, %v17289_v26  ;;  %15062 = vmatprep.mubr.msk.f32.mxu1 %vm31_vm1, %v5170_v25  ;;  %v17396_v32 = vadd.f32 %v2212_v22, %v16984_v7  ;;  %v5172_v9 = vld [vmem:[#allocation2 + $0xf1] sm:$0xff]  ;;  %v4475_v7 = vld [vmem:[#allocation2 + $0x188] sm:$0xff] }
 0x1e6   :  { %v2862_v17 = vpop.f32.mrf.mxu1  ;;  %v14640_v3 = vpop.f32.mrf.mxu0  ;;  %14983 = vmatmul.mubr.msk.f32.gmra.mxu0 %vm31_vm1, %v4473_v49  ;;  %v21136_v26 = vld [vmem:[#allocation21_spill] sm:$0xff]  ;;  %v21137_v49 = vld [vmem:[#allocation22_spill] sm:$0xff] }
 0x1e7   :  { %21134 = vst [vmem:[#allocation13_spill] sm:$0xff] %v17390_v11  ;;  %v17399_v2 = vadd.f32 %v2862_v17, %v17298_v4  ;;  %v1577_v8 = vadd.f32 %v16999_v39, %v21136_v26  ;;  %v17404_v25 = vadd.f32 %v14640_v3, %v1582_v38  ;;  %14985 = vmatprep.mubr.msk.f32.mxu0 %vm31_vm1, %v4474_v37  ;;  %v5173_v4 = vld [vmem:[#allocation2 + $0xf9] sm:$0xff]  ;;  %v5174_v3 = vld [vmem:[#allocation2 + $0x109] sm:$0xff] }
 0x1e8   :  { %v14720_v11 = vpop.f32.mrf.mxu1  ;;  %15063 = vmatmul.mubr.msk.f32.gmra.mxu1 %vm31_vm1, %v5171_v40  ;;  %v2222_v22 = vpop.f32.mrf.mxu0  ;;  %v1592_v17 = vadd.f32 %v17005_v35, %v21137_v49  ;;  %v4477_v35 = vld [vmem:[#allocation2 + $0x1a0] sm:$0xff] }
 0x1e9   :  { %v17409_v58 = vadd.f32 %v14720_v11, %v17305_v6  ;;  %15065 = vmatprep.mubr.msk.f32.mxu1 %vm31_vm1, %v5172_v9  ;;  %v17414_v39 = vadd.f32 %v2222_v22, %v1577_v8  ;;  %v21138_v6 = vld [vmem:[#allocation23_spill] sm:$0xff] }
 0x1ea   :  { %v2872_v38 = vpop.f32.mrf.mxu1  ;;  %v14643_v37 = vpop.f32.mrf.mxu0  ;;  %14986 = vmatmul.mubr.msk.f32.gmra.mxu0 %vm31_vm1, %v4475_v7  ;;  %v1587_v11 = vadd.f32 %v17013_v59, %v21138_v6  ;;  %v4478_v49 = vld [vmem:[#allocation2 + $0x1e0] sm:$0xff]  ;;  %v21140_v7 = vld [vmem:[#allocation24_spill] sm:$0xff]  ;;  %v21142_v6 = vld [vmem:[#allocation17_spill] sm:$0xff] }
 0x1eb   :  { %v17417_v40 = vadd.f32 %v2872_v38, %v17314_v5  ;;  %v17422_v26 = vadd.f32 %v14643_v37, %v1592_v17  ;;  %14988 = vmatprep.mubr.msk.f32.mxu0 %vm31_vm1, %v4476_v30  ;;  %v5175_v5 = vld [vmem:[#allocation2 + $0x111] sm:$0xff]  ;;  %v1602_v38 = vadd.f32 %v17019_v33, %v21140_v7  ;;  %v5176_v37 = vld [vmem:[#allocation2 + $0x121] sm:$0xff] }
 0x1ec   :  { %v14723_v9 = vpop.f32.mrf.mxu1  ;;  %15066 = vmatmul.mubr.msk.f32.gmra.mxu1 %vm31_vm1, %v5173_v4  ;;  %v2232_v22 = vpop.f32.mrf.mxu0  ;;  %v4479_v33 = vld [vmem:[#allocation2 + $0x1e8] sm:$0xff]  ;;  %v4480_v7 = vld [vmem:[#allocation2 + $0x1f8] sm:$0xff] }
 0x1ed   :  { %v17427_v8 = vadd.f32 %v14723_v9, %v17321_v56  ;;  %15068 = vmatprep.mubr.msk.f32.mxu1 %vm31_vm1, %v5174_v3  ;;  %v17432_v59 = vadd.f32 %v2232_v22, %v1587_v11  ;;  %v21141_v56 = vld [vmem:[#allocation25_spill] sm:$0xff] }
 0x1ee   :  { %v2882_v17 = vpop.f32.mrf.mxu1  ;;  %v14646_v30 = vpop.f32.mrf.mxu0  ;;  %14989 = vmatmul.mubr.msk.f32.gmra.mxu0 %vm31_vm1, %v4477_v35  ;;  %v1597_v9 = vadd.f32 %v21142_v6, %v21141_v56  ;;  %v5178_v56 = vld [vmem:[#allocation2 + $0x139] sm:$0xff] }
 0x1ef   :  { %21139 = vst [vmem:[#allocation14_spill] sm:$0xff] %v17427_v8  ;;  %v17435_v4 = vadd.f32 %v2882_v17, %v17330_v31  ;;  %v17440_v8 = vadd.f32 %v14646_v30, %v1602_v38  ;;  %14991 = vmatprep.mubr.msk.f32.mxu0 %vm31_vm1, %v4478_v49  ;;  %v5177_v31 = vld [vmem:[#allocation2 + $0x129] sm:$0xff]  ;;  %v4481_v49 = vld [vmem:[#allocation2 + $0x200] sm:$0xff] }
 0x1f0   :  { %v14726_v3 = vpop.f32.mrf.mxu1  ;;  %15069 = vmatmul.mubr.msk.f32.gmra.mxu1 %vm31_vm1, %v5175_v5  ;;  %v2242_v22 = vpop.f32.mrf.mxu0 }
 0x1f1   :  { %v17445_v11 = vadd.f32 %v14726_v3, %v17337_v16  ;;  %15071 = vmatprep.mubr.msk.f32.mxu1 %vm31_vm1, %v5176_v37  ;;  %v17448_v35 = vadd.f32 %v2242_v22, %v1597_v9  ;;  %v4482_v9 = vld [vmem:[#allocation2 + $0x210] sm:$0xff] }
 0x1f2   :  { %v2892_v17 = vpop.f32.mrf.mxu1  ;;  %v14749_v30 = vpop.f32.mrf.mxu0  ;;  %14992 = vmatmul.mubr.msk.f32.gmra.mxu0 %vm31_vm1, %v4479_v33 }
 0x1f3   :  { %v17451_v38 = vadd.f32 %v2892_v17, %v17346_v41  ;;  %v17455_v5 = vadd.f32 %v14749_v30, %v17036_v45  ;;  %14994 = vmatprep.mubr.msk.f32.mxu0 %vm31_vm1, %v4480_v7  ;;  %v5179_v41 = vld [vmem:[#allocation2 + $0x141] sm:$0xff]  ;;  %v5180_v45 = vld [vmem:[#allocation2 + $0x151] sm:$0xff] }
 0x1f4   :  { %v14729_v16 = vpop.f32.mrf.mxu1  ;;  %15072 = vmatmul.mubr.msk.f32.gmra.mxu1 %vm31_vm1, %v5177_v31  ;;  %v3352_v6 = vpop.f32.mrf.mxu0  ;;  %v4483_v17 = vld [vmem:[#allocation2 + $0x218] sm:$0xff]  ;;  %v4484_v30 = vld [vmem:[#allocation2 + $0x228] sm:$0xff] }
 0x1f5   :  { %v17460_v37 = vadd.f32 %v14729_v16, %v17353_v28  ;;  %15074 = vmatprep.mubr.msk.f32.mxu1 %vm31_vm1, %v5178_v56  ;;  %v17464_v3 = vadd.f32 %v3352_v6, %v17043_v18 }
 0x1f6   :  { %v2902_v33 = vpop.f32.mrf.mxu1  ;;  %v14752_v31 = vpop.f32.mrf.mxu0  ;;  %14995 = vmatmul.mubr.msk.f32.gmra.mxu0 %vm31_vm1, %v4481_v49 }
 0x1f7   :  { %v17467_v22 = vadd.f32 %v2902_v33, %v17362_v27  ;;  %v17471_v7 = vadd.f32 %v14752_v31, %v17052_v36  ;;  %14997 = vmatprep.mubr.msk.f32.mxu0 %vm31_vm1, %v4482_v9  ;;  %v5181_v27 = vld [vmem:[#allocation2 + $0x159] sm:$0xff]  ;;  %v5182_v36 = vld [vmem:[#allocation2 + $0x169] sm:$0xff] }
 0x1f8   :  { %v14732_v28 = vpop.f32.mrf.mxu1  ;;  %15075 = vmatmul.mubr.msk.f32.gmra.mxu1 %vm31_vm1, %v5179_v41  ;;  %v3362_v56 = vpop.f32.mrf.mxu0  ;;  %v4485_v33 = vld [vmem:[#allocation2 + $0x230] sm:$0xff]  ;;  %v4486_v31 = vld [vmem:[#allocation2 + $0x240] sm:$0xff] }
 0x1f9   :  { %v17476_v18 = vadd.f32 %v14732_v28, %v17369_v14  ;;  %15077 = vmatprep.mubr.msk.f32.mxu1 %vm31_vm1, %v5180_v45  ;;  %v17480_v16 = vadd.f32 %v3362_v56, %v17059_v24 }
 0x1fa   :  { %v2912_v49 = vpop.f32.mrf.mxu1  ;;  %v14755_v41 = vpop.f32.mrf.mxu0  ;;  %14998 = vmatmul.mubr.msk.f32.gmra.mxu0 %vm31_vm1, %v4483_v17 }
 0x1fb   :  { %v17483_v6 = vadd.f32 %v2912_v49, %v17378_v46  ;;  %v17487_v9 = vadd.f32 %v14755_v41, %v17068_v44  ;;  %15000 = vmatprep.mubr.msk.f32.mxu0 %vm31_vm1, %v4484_v30  ;;  %v5183_v46 = vld [vmem:[#allocation2 + $0x171] sm:$0xff]  ;;  %v5184_v44 = vld [vmem:[#allocation2 + $0x181] sm:$0xff] }
 0x1fc   :  { %v14735_v14 = vpop.f32.mrf.mxu1  ;;  %15078 = vmatmul.mubr.msk.f32.gmra.mxu1 %vm31_vm1, %v5181_v27  ;;  %v3372_v45 = vpop.f32.mrf.mxu0  ;;  %v4487_v49 = vld [vmem:[#allocation2 + $0x248] sm:$0xff]  ;;  %v4488_v41 = vld [vmem:[#allocation2 + $0x258] sm:$0xff] }
 0x1fd   :  { %v17492_v24 = vadd.f32 %v14735_v14, %v17385_v0  ;;  %15080 = vmatprep.mubr.msk.f32.mxu1 %vm31_vm1, %v5182_v36  ;;  %v17496_v28 = vadd.f32 %v3372_v45, %v17075_v20 }
 0x1fe   :  { %v2922_v17 = vpop.f32.mrf.mxu1  ;;  %v14758_v27 = vpop.f32.mrf.mxu0  ;;  %15001 = vmatmul.mubr.msk.f32.gmra.mxu0 %vm31_vm1, %v4485_v33 }
 0x1ff   :  { %v17499_v56 = vadd.f32 %v2922_v17, %v17396_v32  ;;  %v17503_v30 = vadd.f32 %v14758_v27, %v17084_v50  ;;  %15003 = vmatprep.mubr.msk.f32.mxu0 %vm31_vm1, %v4486_v31  ;;  %v5185_v32 = vld [vmem:[#allocation2 + $0x189] sm:$0xff]  ;;  %v5186_v50 = vld [vmem:[#allocation2 + $0x199] sm:$0xff] }
 0x200   :  { %v14738_v0 = vpop.f32.mrf.mxu1  ;;  %15081 = vmatmul.mubr.msk.f32.gmra.mxu1 %vm31_vm1, %v5183_v46  ;;  %v3382_v36 = vpop.f32.mrf.mxu0  ;;  %v4489_v17 = vld [vmem:[#allocation2 + $0x260] sm:$0xff]  ;;  %v4490_v27 = vld [vmem:[#allocation2 + $0x270] sm:$0xff] }
 0x201   :  { %v17508_v20 = vadd.f32 %v14738_v0, %v17404_v25  ;;  %15083 = vmatprep.mubr.msk.f32.mxu1 %vm31_vm1, %v5184_v44  ;;  %v17512_v14 = vadd.f32 %v3382_v36, %v17091_v29 }
 0x202   :  { %v2932_v33 = vpop.f32.mrf.mxu1  ;;  %v14761_v46 = vpop.f32.mrf.mxu0  ;;  %15004 = vmatmul.mubr.msk.f32.gmra.mxu0 %vm31_vm1, %v4487_v49 }
 0x203   :  { %v17515_v45 = vadd.f32 %v2932_v33, %v17414_v39  ;;  %v17519_v31 = vadd.f32 %v14761_v46, %v17100_v57  ;;  %15006 = vmatprep.mubr.msk.f32.mxu0 %vm31_vm1, %v4488_v41  ;;  %v5187_v39 = vld [vmem:[#allocation2 + $0x1a1] sm:$0xff] }
 0x204   :  { %v14741_v25 = vpop.f32.mrf.mxu1  ;;  %15084 = vmatmul.mubr.msk.f32.gmra.mxu1 %vm31_vm1, %v5185_v32  ;;  %v3392_v44 = vpop.f32.mrf.mxu0  ;;  %v5188_v57 = vld [vmem:[#allocation2 + $0x1e1] sm:$0xff] }
 0x205   :  { %v17524_v29 = vadd.f32 %v14741_v25, %v17422_v26  ;;  %15086 = vmatprep.mubr.msk.f32.mxu1 %vm31_vm1, %v5186_v50  ;;  %v17528_v0 = vadd.f32 %v3392_v44, %v17107_v13  ;;  %v21144_v41 = vld [vmem:[#allocation18_spill] sm:$0xff]  ;;  %v4492_v25 = vld [vmem:[#allocation2 + $0x288] sm:$0xff] }
 0x206   :  { %v2942_v49 = vpop.f32.mrf.mxu1  ;;  %v14764_v32 = vpop.f32.mrf.mxu0  ;;  %15007 = vmatmul.mubr.msk.f32.gmra.mxu0 %vm31_vm1, %v4489_v17  ;;  %v4491_v50 = vld [vmem:[#allocation2 + $0x278] sm:$0xff]  ;;  %v21145_v44 = vld [vmem:[#allocation19_spill] sm:$0xff] }
 0x207   :  { %v17531_v36 = vadd.f32 %v2942_v49, %v17432_v59  ;;  %v17535_v33 = vadd.f32 %v14764_v32, %v21144_v41  ;;  %15009 = vmatprep.mubr.msk.f32.mxu0 %vm31_vm1, %v4490_v27  ;;  %v5189_v59 = vld [vmem:[#allocation2 + $0x1e9] sm:$0xff]  ;;  %v5190_v32 = vld [vmem:[#allocation2 + $0x1f9] sm:$0xff] }
 0x208   :  { %v14744_v26 = vpop.f32.mrf.mxu1  ;;  %15087 = vmatmul.mubr.msk.f32.gmra.mxu1 %vm31_vm1, %v5187_v39  ;;  %v3402_v46 = vpop.f32.mrf.mxu0  ;;  %v21147_v27 = vld [vmem:[#allocation29_spill] sm:$0xff] }
 0x209   :  { %21143 = vst [vmem:[#allocation16_spill] sm:$0xff] %v17531_v36  ;;  %v17540_v13 = vadd.f32 %v14744_v26, %v17440_v8  ;;  %15089 = vmatprep.mubr.msk.f32.mxu1 %vm31_vm1, %v5188_v57  ;;  %v17544_v49 = vadd.f32 %v3402_v46, %v21145_v44  ;;  %v4493_v57 = vld [vmem:[#allocation2 + $0x290] sm:$0xff]  ;;  %v4494_v44 = vld [vmem:[#allocation2 + $0x2a0] sm:$0xff] }
 0x20a   :  { %v2952_v17 = vpop.f32.mrf.mxu1  ;;  %v14767_v39 = vpop.f32.mrf.mxu0  ;;  %15010 = vmatmul.mubr.msk.f32.gmra.mxu0 %vm31_vm1, %v4491_v50 }
 0x20b   :  { %v17547_v41 = vadd.f32 %v2952_v17, %v17448_v35  ;;  %v17551_v36 = vadd.f32 %v14767_v39, %v21147_v27  ;;  %15012 = vmatprep.mubr.msk.f32.mxu0 %vm31_vm1, %v4492_v25  ;;  %v5191_v35 = vld [vmem:[#allocation2 + $0x201] sm:$0xff]  ;;  %v21148_v17 = vld [vmem:[#allocation12_spill] sm:$0xff] }
 0x20c   :  { %v14847_v8 = vpop.f32.mrf.mxu1  ;;  %15090 = vmatmul.mubr.msk.f32.gmra.mxu1 %vm31_vm1, %v5189_v59  ;;  %v3412_v46 = vpop.f32.mrf.mxu0  ;;  %v5192_v39 = vld [vmem:[#allocation2 + $0x211] sm:$0xff] }
 0x20d   :  { %21146 = vst [vmem:[#allocation20_spill] sm:$0xff] %v17547_v41  ;;  %v17556_v26 = vadd.f32 %v14847_v8, %v17455_v5  ;;  %15092 = vmatprep.mubr.msk.f32.mxu1 %vm31_vm1, %v5190_v32  ;;  %v17560_v41 = vadd.f32 %v3412_v46, %v21148_v17  ;;  %v4495_v32 = vld [vmem:[#allocation2 + $0x2a8] sm:$0xff]  ;;  %v4496_v17 = vld [vmem:[#allocation2 + $0x2b8] sm:$0xff] }
 0x20e   :  { %v4062_v50 = vpop.f32.mrf.mxu1  ;;  %v14770_v59 = vpop.f32.mrf.mxu0  ;;  %15013 = vmatmul.mubr.msk.f32.gmra.mxu0 %vm31_vm1, %v4493_v57 }
 0x20f   :  { %v17563_v27 = vadd.f32 %v4062_v50, %v17464_v3  ;;  %v17567_v25 = vadd.f32 %v14770_v59, %v17148_v63  ;;  %15015 = vmatprep.mubr.msk.f32.mxu0 %vm31_vm1, %v4494_v44  ;;  %v5193_v3 = vld [vmem:[#allocation2 + $0x219] sm:$0xff]  ;;  %v5194_v63 = vld [vmem:[#allocation2 + $0x229] sm:$0xff] }
 0x210   :  { %v14850_v5 = vpop.f32.mrf.mxu1  ;;  %15093 = vmatmul.mubr.msk.f32.gmra.mxu1 %vm31_vm1, %v5191_v35  ;;  %v3422_v46 = vpop.f32.mrf.mxu0  ;;  %v21152_v44 = vld [vmem:[#allocation15_spill] sm:$0xff] }
 0x211   :  { %21149 = vst [vmem:[#allocation21_spill] sm:$0xff] %v17563_v27  ;;  %v17572_v8 = vadd.f32 %v14850_v5, %v17471_v7  ;;  %15095 = vmatprep.mubr.msk.f32.mxu1 %vm31_vm1, %v5192_v39  ;;  %v17576_v50 = vadd.f32 %v3422_v46, %v17155_v12  ;;  %v4497_v39 = vld [vmem:[#allocation2 + $0x2c0] sm:$0xff]  ;;  %v4498_v46 = vld [vmem:[#allocation2 + $0x2d0] sm:$0xff] }
 0x212   :  { %v4072_v57 = vpop.f32.mrf.mxu1  ;;  %v14773_v35 = vpop.f32.mrf.mxu0  ;;  %15016 = vmatmul.mubr.msk.f32.gmra.mxu0 %vm31_vm1, %v4495_v32 }
 0x213   :  { %21150 = vst [vmem:[#allocation22_spill] sm:$0xff] %v17572_v8  ;;  %v17579_v59 = vadd.f32 %v4072_v57, %v17480_v16  ;;  %v17583_v27 = vadd.f32 %v14773_v35, %v21152_v44  ;;  %15018 = vmatprep.mubr.msk.f32.mxu0 %vm31_vm1, %v4496_v17  ;;  %v5195_v16 = vld [vmem:[#allocation2 + $0x231] sm:$0xff]  ;;  %v21153_v57 = vld [vmem:[#allocation27_spill] sm:$0xff] }
 0x214   :  { %v14853_v7 = vpop.f32.mrf.mxu1  ;;  %15096 = vmatmul.mubr.msk.f32.gmra.mxu1 %vm31_vm1, %v5193_v3  ;;  %v3432_v5 = vpop.f32.mrf.mxu0  ;;  %v5196_v35 = vld [vmem:[#allocation2 + $0x241] sm:$0xff]  ;;  %v21156_v17 = vld [vmem:[#allocation28_spill] sm:$0xff] }
 0x215   :  { %21151 = vst [vmem:[#allocation23_spill] sm:$0xff] %v17579_v59  ;;  %v17588_v12 = vadd.f32 %v14853_v7, %v17487_v9  ;;  %15098 = vmatprep.mubr.msk.f32.mxu1 %vm31_vm1, %v5194_v63  ;;  %v17592_v59 = vadd.f32 %v3432_v5, %v21153_v57  ;;  %v4499_v63 = vld [vmem:[#allocation2 + $0x2d8] sm:$0xff]  ;;  %v4500_v57 = vld [vmem:[#allocation2 + $0x2e8] sm:$0xff] }
 0x216   :  { %v4082_v32 = vpop.f32.mrf.mxu1  ;;  %v14776_v3 = vpop.f32.mrf.mxu0  ;;  %15019 = vmatmul.mubr.msk.f32.gmra.mxu0 %vm31_vm1, %v4497_v39 }
 0x217   :  { %21154 = vst [vmem:[#allocation24_spill] sm:$0xff] %v17592_v59  ;;  %v17595_v44 = vadd.f32 %v4082_v32, %v17496_v28  ;;  %v17599_v8 = vadd.f32 %v14776_v3, %v21156_v17  ;;  %15021 = vmatprep.mubr.msk.f32.mxu0 %vm31_vm1, %v4498_v46  ;;  %v5197_v28 = vld [vmem:[#allocation2 + $0x249] sm:$0xff]  ;;  %v5198_v3 = vld [vmem:[#allocation2 + $0x259] sm:$0xff] }
 0x218   :  { %v14856_v9 = vpop.f32.mrf.mxu1  ;;  %15099 = vmatmul.mubr.msk.f32.gmra.mxu1 %vm31_vm1, %v5195_v16  ;;  %v3442_v5 = vpop.f32.mrf.mxu0  ;;  %v21157_v32 = vld [vmem:[#allocation7_spill] sm:$0xff]  ;;  %v21160_v46 = vld [vmem:[#allocation8_spill] sm:$0xff] }
 0x219   :  { %21155 = vst [vmem:[#allocation25_spill] sm:$0xff] %v17595_v44  ;;  %v17604_v7 = vadd.f32 %v14856_v9, %v17503_v30  ;;  %15101 = vmatprep.mubr.msk.f32.mxu1 %vm31_vm1, %v5196_v35  ;;  %v17608_v59 = vadd.f32 %v3442_v5, %v21157_v32  ;;  %v4501_v35 = vld [vmem:[#allocation2 + $0x2f0] sm:$0xff]  ;;  %v4502_v32 = vld [vmem:[#allocation2 + $0x300] sm:$0xff] }
 0x21a   :  { %v4092_v39 = vpop.f32.mrf.mxu1  ;;  %v14779_v16 = vpop.f32.mrf.mxu0  ;;  %15022 = vmatmul.mubr.msk.f32.gmra.mxu0 %vm31_vm1, %v4499_v63 }
 0x21b   :  { %21158 = vst [vmem:[#allocation17_spill] sm:$0xff] %v17608_v59  ;;  %v17611_v17 = vadd.f32 %v4092_v39, %v17512_v14  ;;  %v17615_v44 = vadd.f32 %v14779_v16, %v21160_v46  ;;  %15024 = vmatprep.mubr.msk.f32.mxu0 %vm31_vm1, %v4500_v57  ;;  %v5199_v14 = vld [vmem:[#allocation2 + $0x261] sm:$0xff]  ;;  %v5200_v16 = vld [vmem:[#allocation2 + $0x271] sm:$0xff] }
 0x21c   :  { %v14859_v30 = vpop.f32.mrf.mxu1  ;;  %15102 = vmatmul.mubr.msk.f32.gmra.mxu1 %vm31_vm1, %v5197_v28  ;;  %v3452_v5 = vpop.f32.mrf.mxu0  ;;  %v21161_v39 = vld [vmem:[#allocation26_spill] sm:$0xff]  ;;  %v21163_v57 = vld [vmem:[#allocation9_spill] sm:$0xff] }
 0x21d   :  { %21159 = vst [vmem:[#allocation18_spill] sm:$0xff] %v17611_v17  ;;  %v17620_v9 = vadd.f32 %v14859_v30, %v17519_v31  ;;  %15104 = vmatprep.mubr.msk.f32.mxu1 %vm31_vm1, %v5198_v3  ;;  %v17624_v59 = vadd.f32 %v3452_v5, %v21161_v39  ;;  %v4503_v3 = vld [vmem:[#allocation2 + $0x308] sm:$0xff]  ;;  %v4504_v39 = vld [vmem:[#allocation2 + $0x318] sm:$0xff] }
 0x21e   :  { %v4102_v63 = vpop.f32.mrf.mxu1  ;;  %v14782_v28 = vpop.f32.mrf.mxu0  ;;  %15025 = vmatmul.mubr.msk.f32.gmra.mxu0 %vm31_vm1, %v4501_v35 }
 0x21f   :  { %21162 = vst [vmem:[#allocation19_spill] sm:$0xff] %v17624_v59  ;;  %v17627_v46 = vadd.f32 %v4102_v63, %v17528_v0  ;;  %v17631_v17 = vadd.f32 %v14782_v28, %v21163_v57  ;;  %15027 = vmatprep.mubr.msk.f32.mxu0 %vm31_vm1, %v4502_v32  ;;  %v5201_v0 = vld [vmem:[#allocation2 + $0x279] sm:$0xff]  ;;  %v5202_v28 = vld [vmem:[#allocation2 + $0x289] sm:$0xff] }
 0x220   :  { %v14862_v31 = vpop.f32.mrf.mxu1  ;;  %15105 = vmatmul.mubr.msk.f32.gmra.mxu1 %vm31_vm1, %v5199_v14  ;;  %v3462_v5 = vpop.f32.mrf.mxu0  ;;  %v21164_v63 = vld [vmem:[#allocation10_spill] sm:$0xff] }
 0x221   :  { %v17636_v30 = vadd.f32 %v14862_v31, %v17535_v33  ;;  %15107 = vmatprep.mubr.msk.f32.mxu1 %vm31_vm1, %v5200_v16  ;;  %v17640_v59 = vadd.f32 %v3462_v5, %v21164_v63  ;;  %v4505_v16 = vld [vmem:[#allocation2 + $0x320] sm:$0xff]  ;;  %v4506_v63 = vld [vmem:[#allocation2 + $0x330] sm:$0xff] }
 0x222   :  { %v4112_v35 = vpop.f32.mrf.mxu1  ;;  %v14785_v14 = vpop.f32.mrf.mxu0  ;;  %15028 = vmatmul.mubr.msk.f32.gmra.mxu0 %vm31_vm1, %v4503_v3 }
 0x223   :  { %v17643_v57 = vadd.f32 %v4112_v35, %v17544_v49  ;;  %v17647_v32 = vadd.f32 %v14785_v14, %v17230_v23  ;;  %15030 = vmatprep.mubr.msk.f32.mxu0 %vm31_vm1, %v4504_v39  ;;  %v5203_v49 = vld [vmem:[#allocation2 + $0x291] sm:$0xff]  ;;  %v5204_v23 = vld [vmem:[#allocation2 + $0x2a1] sm:$0xff] }
 0x224   :  { %v14865_v33 = vpop.f32.mrf.mxu1  ;;  %15108 = vmatmul.mubr.msk.f32.gmra.mxu1 %vm31_vm1, %v5201_v0  ;;  %v3472_v5 = vpop.f32.mrf.mxu0 }
 0x225   :  { %v17652_v31 = vadd.f32 %v14865_v33, %v17551_v36  ;;  %15110 = vmatprep.mubr.msk.f32.mxu1 %vm31_vm1, %v5202_v28  ;;  %v17656_v35 = vadd.f32 %v3472_v5, %v17237_v60  ;;  %v4507_v28 = vld [vmem:[#allocation2 + $0x338] sm:$0xff]  ;;  %v4508_v5 = vld [vmem:[#allocation2 + $0x348] sm:$0xff] }
 0x226   :  { %v4122_v3 = vpop.f32.mrf.mxu1  ;;  %v14788_v0 = vpop.f32.mrf.mxu0  ;;  %15031 = vmatmul.mubr.msk.f32.gmra.mxu0 %vm31_vm1, %v4505_v16 }
 0x227   :  { %v17659_v14 = vadd.f32 %v4122_v3, %v17560_v41  ;;  %v17663_v39 = vadd.f32 %v14788_v0, %v17246_v43  ;;  %15033 = vmatprep.mubr.msk.f32.mxu0 %vm31_vm1, %v4506_v63  ;;  %v5205_v41 = vld [vmem:[#allocation2 + $0x2a9] sm:$0xff]  ;;  %v5206_v43 = vld [vmem:[#allocation2 + $0x2b9] sm:$0xff] }
 0x228   :  { %v14868_v36 = vpop.f32.mrf.mxu1  ;;  %15111 = vmatmul.mubr.msk.f32.gmra.mxu1 %vm31_vm1, %v5203_v49  ;;  %v3482_v33 = vpop.f32.mrf.mxu0 }
 0x229   :  { %v17668_v60 = vadd.f32 %v14868_v36, %v17567_v25  ;;  %15113 = vmatprep.mubr.msk.f32.mxu1 %vm31_vm1, %v5204_v23  ;;  %v17672_v3 = vadd.f32 %v3482_v33, %v17253_v53  ;;  %v4509_v23 = vld [vmem:[#allocation2 + $0x350] sm:$0xff] }
 0x22a   :  { %v4132_v16 = vpop.f32.mrf.mxu1  ;;  %v14791_v49 = vpop.f32.mrf.mxu0  ;;  %15034 = vmatmul.mubr.msk.f32.gmra.mxu0 %vm31_vm1, %v4507_v28  ;;  %v5866_v33 = vld [vmem:[#allocation2 + $0x32] sm:$0xff] }
 0x22b   :  { %v17675_v0 = vadd.f32 %v4132_v16, %v17576_v50  ;;  %v17679_v63 = vadd.f32 %v14791_v49, %v17262_v19  ;;  %15036 = vmatprep.mubr.msk.f32.mxu0 %vm31_vm1, %v4508_v5  ;;  %v5207_v50 = vld [vmem:[#allocation2 + $0x2c1] sm:$0xff]  ;;  %v5208_v19 = vld [vmem:[#allocation2 + $0x2d1] sm:$0xff] }
 0x22c   :  { %v14871_v25 = vpop.f32.mrf.mxu1  ;;  %15114 = vmatmul.mubr.msk.f32.gmra.mxu1 %vm31_vm1, %v5205_v41  ;;  %v3492_v36 = vpop.f32.mrf.mxu0 }
 0x22d   :  { %v17684_v53 = vadd.f32 %v14871_v25, %v17583_v27  ;;  %15116 = vmatprep.mubr.msk.f32.mxu1 %vm31_vm1, %v5206_v43  ;;  %v17688_v16 = vadd.f32 %v3492_v36, %v17269_v15  ;;  %v5867_v27 = vld [vmem:[#allocation2 + $0x3a] sm:$0xff]  ;;  %v5868_v36 = vld [vmem:[#allocation2 + $0x4a] sm:$0xff] }
 0x22e   :  { %v17690_v28 = vpop.f32.mrf.mxu1  ;;  %v14794_v49 = vpop.f32.mrf.mxu0  ;;  %15037 = vmatmul.mubr.msk.f32.gmra.mxu0 %vm31_vm1, %v4509_v23  ;;  %v5209_v25 = vld [vmem:[#allocation2 + $0x2d9] sm:$0xff] }
 0x22f   :  { %21165 = vst [vmem:[#allocation29_spill] sm:$0xff] %v17688_v16  ;;  %v17694_v41 = vadd.f32 %v14794_v49, %v17278_v47  ;;  %15139 = vmatprep.mubr.msk.f32.mxu0 %vm31_vm1, %v5866_v33  ;;  %v5210_v47 = vld [vmem:[#allocation2 + $0x2e9] sm:$0xff] }
 0x230   :  { %v14874_v5 = vpop.f32.mrf.mxu1  ;;  %15117 = vmatmul.mubr.msk.f32.gmra.mxu1 %vm31_vm1, %v5207_v50  ;;  %v3502_v15 = vpop.f32.mrf.mxu0 }
 0x231   :  { %v17699_v43 = vadd.f32 %v14874_v5, %v17599_v8  ;;  %15119 = vmatprep.mubr.msk.f32.mxu1 %vm31_vm1, %v5208_v19  ;;  %v17703_v16 = vadd.f32 %v3502_v15, %v17285_v48  ;;  %v5869_v8 = vld [vmem:[#allocation2 + $0x52] sm:$0xff]  ;;  %v5870_v15 = vld [vmem:[#allocation2 + $0x62] sm:$0xff] }
 0x232   :  { %v17705_v23 = vpop.f32.mrf.mxu1  ;;  %v14797_v49 = vpop.f32.mrf.mxu0  ;;  %15140 = vmatmul.mubr.msk.f32.vlgmr.msra.gmra.mxu0 %vm31_vm1, %v5867_v27  ;;  %v5211_v5 = vld [vmem:[#allocation2 + $0x2f1] sm:$0xff] }
 0x233   :  { %21166 = vst [vmem:[#allocation12_spill] sm:$0xff] %v17703_v16  ;;  %v17709_v50 = vadd.f32 %v14797_v49, %v17294_v42  ;;  %15142 = vmatprep.mubr.msk.f32.mxu0 %vm31_vm1, %v5868_v36  ;;  %v5212_v42 = vld [vmem:[#allocation2 + $0x301] sm:$0xff] }
 0x234   :  { %v14877_v33 = vpop.f32.mrf.mxu1  ;;  %15120 = vmatmul.mubr.msk.f32.gmra.mxu1 %vm31_vm1, %v5209_v25  ;;  %v3512_v48 = vpop.f32.mrf.mxu0 }
 0x235   :  { %v17714_v19 = vadd.f32 %v14877_v33, %v17615_v44  ;;  %15122 = vmatprep.mubr.msk.f32.mxu1 %vm31_vm1, %v5210_v47  ;;  %v17718_v16 = vadd.f32 %v3512_v48, %v17301_v62  ;;  %v5871_v44 = vld [vmem:[#allocation2 + $0x6a] sm:$0xff]  ;;  %v5872_v48 = vld [vmem:[#allocation2 + $0x7a] sm:$0xff] }
 0x236   :  { %v17720_v27 = vpop.f32.mrf.mxu1  ;;  %v14800_v49 = vpop.f32.mrf.mxu0  ;;  %15143 = vmatmul.mubr.msk.f32.gmra.mxu0 %vm31_vm1, %v5869_v8  ;;  %v5213_v33 = vld [vmem:[#allocation2 + $0x309] sm:$0xff] }
 0x237   :  { %21167 = vst [vmem:[#allocation15_spill] sm:$0xff] %v17718_v16  ;;  %v17724_v25 = vadd.f32 %v14800_v49, %v17310_v34  ;;  %15145 = vmatprep.mubr.msk.f32.mxu0 %vm31_vm1, %v5870_v15  ;;  %v5214_v34 = vld [vmem:[#allocation2 + $0x319] sm:$0xff] }
 0x238   :  { %v14880_v36 = vpop.f32.mrf.mxu1  ;;  %15123 = vmatmul.mubr.msk.f32.gmra.mxu1 %vm31_vm1, %v5211_v5  ;;  %v3522_v62 = vpop.f32.mrf.mxu0 }
 0x239   :  { %v17729_v47 = vadd.f32 %v14880_v36, %v17631_v17  ;;  %15125 = vmatprep.mubr.msk.f32.mxu1 %vm31_vm1, %v5212_v42  ;;  %v17733_v16 = vadd.f32 %v3522_v62, %v17317_v10  ;;  %v5873_v17 = vld [vmem:[#allocation2 + $0x82] sm:$0xff]  ;;  %v5874_v62 = vld [vmem:[#allocation2 + $0x92] sm:$0xff] }
 0x23a   :  { %v17735_v8 = vpop.f32.mrf.mxu1  ;;  %v14803_v49 = vpop.f32.mrf.mxu0  ;;  %15146 = vmatmul.mubr.msk.f32.gmra.mxu0 %vm31_vm1, %v5871_v44  ;;  %v5215_v36 = vld [vmem:[#allocation2 + $0x321] sm:$0xff] }
 0x23b   :  { %21168 = vst [vmem:[#allocation27_spill] sm:$0xff] %v17733_v16  ;;  %v17739_v5 = vadd.f32 %v14803_v49, %v17326_v52  ;;  %15148 = vmatprep.mubr.msk.f32.mxu0 %vm31_vm1, %v5872_v48  ;;  %v5216_v52 = vld [vmem:[#allocation2 + $0x331] sm:$0xff] }
 0x23c   :  { %v14883_v15 = vpop.f32.mrf.mxu1  ;;  %15126 = vmatmul.mubr.msk.f32.gmra.mxu1 %vm31_vm1, %v5213_v33  ;;  %v3532_v10 = vpop.f32.mrf.mxu0 }
 0x23d   :  { %v17744_v42 = vadd.f32 %v14883_v15, %v17647_v32  ;;  %15128 = vmatprep.mubr.msk.f32.mxu1 %vm31_vm1, %v5214_v34  ;;  %v17748_v16 = vadd.f32 %v3532_v10, %v17333_v21  ;;  %v5875_v32 = vld [vmem:[#allocation2 + $0x9a] sm:$0xff]  ;;  %v5876_v10 = vld [vmem:[#allocation2 + $0xaa] sm:$0xff] }
 0x23e   :  { %v17750_v44 = vpop.f32.mrf.mxu1  ;;  %v14806_v49 = vpop.f32.mrf.mxu0  ;;  %15149 = vmatmul.mubr.msk.f32.gmra.mxu0 %vm31_vm1, %v5873_v17  ;;  %v5217_v15 = vld [vmem:[#allocation2 + $0x339] sm:$0xff] }
 0x23f   :  { %21169 = vst [vmem:[#allocation28_spill] sm:$0xff] %v17748_v16  ;;  %v17754_v33 = vadd.f32 %v14806_v49, %v17342_v1  ;;  %15151 = vmatprep.mubr.msk.f32.mxu0 %vm31_vm1, %v5874_v62  ;;  %v5218_v1 = vld [vmem:[#allocation2 + $0x349] sm:$0xff] }
 0x240   :  { %v14886_v48 = vpop.f32.mrf.mxu1  ;;  %15129 = vmatmul.mubr.msk.f32.gmra.mxu1 %vm31_vm1, %v5215_v36  ;;  %v3542_v21 = vpop.f32.mrf.mxu0 }
 0x241   :  { %v17759_v34 = vadd.f32 %v14886_v48, %v17663_v39  ;;  %15131 = vmatprep.mubr.msk.f32.mxu1 %vm31_vm1, %v5216_v52  ;;  %v17763_v16 = vadd.f32 %v3542_v21, %v17349_v51  ;;  %v5877_v39 = vld [vmem:[#allocation2 + $0xb2] sm:$0xff]  ;;  %v5878_v21 = vld [vmem:[#allocation2 + $0xc2] sm:$0xff] }
 0x242   :  { %v17765_v17 = vpop.f32.mrf.mxu1  ;;  %v14809_v49 = vpop.f32.mrf.mxu0  ;;  %15152 = vmatmul.mubr.msk.f32.gmra.mxu0 %vm31_vm1, %v5875_v32  ;;  %v5219_v48 = vld [vmem:[#allocation2 + $0x351] sm:$0xff] }
 0x243   :  { %21170 = vst [vmem:[#allocation7_spill] sm:$0xff] %v17763_v16  ;;  %v17769_v36 = vadd.f32 %v14809_v49, %v17358_v55  ;;  %15154 = vmatprep.mubr.msk.f32.mxu0 %vm31_vm1, %v5876_v10 }
 0x244   :  { %v14889_v62 = vpop.f32.mrf.mxu1  ;;  %15132 = vmatmul.mubr.msk.f32.gmra.mxu1 %vm31_vm1, %v5217_v15  ;;  %v3552_v51 = vpop.f32.mrf.mxu0 }
 0x245   :  { %v17774_v52 = vadd.f32 %v14889_v62, %v17679_v63  ;;  %15134 = vmatprep.mubr.msk.f32.mxu1 %vm31_vm1, %v5218_v1  ;;  %v17778_v16 = vadd.f32 %v3552_v51, %v17365_v61  ;;  %v5879_v63 = vld [vmem:[#allocation2 + $0xca] sm:$0xff]  ;;  %v5880_v61 = vld [vmem:[#allocation2 + $0xda] sm:$0xff]  ;;  %v21173_v62 = vld [vmem:[#allocation11_spill] sm:$0xff] }
 0x246   :  { %v17780_v32 = vpop.f32.mrf.mxu1  ;;  %v14812_v55 = vpop.f32.mrf.mxu0  ;;  %15155 = vmatmul.mubr.msk.f32.gmra.mxu0 %vm31_vm1, %v5877_v39 }
 0x247   :  { %21171 = vst [vmem:[#allocation8_spill] sm:$0xff] %v17778_v16  ;;  %21172 = vst [vmem:[#allocation26_spill] sm:$0xff] %v17780_v32  ;;  %v17784_v15 = vadd.f32 %v14812_v55, %v17374_v54  ;;  %15157 = vmatprep.mubr.msk.f32.mxu0 %vm31_vm1, %v5878_v21  ;;  %v21175_v54 = vld [vmem:[#allocation13_spill] sm:$0xff]  ;;  %v5881_v21 = vld [vmem:[#allocation2 + $0xe2] sm:$0xff] }
 0x248   :  { %v14892_v10 = vpop.f32.mrf.mxu1  ;;  %15135 = vmatmul.mubr.msk.f32.gmra.mxu1 %vm31_vm1, %v5219_v48  ;;  %v3562_v49 = vpop.f32.mrf.mxu0  ;;  %v5882_v32 = vld [vmem:[#allocation2 + $0xf2] sm:$0xff] }
 0x249   :  { %v17789_v1 = vadd.f32 %v14892_v10, %v17694_v41  ;;  %v17792_v51 = vadd.f32 %v3562_v49, %v21173_v62 }
 0x24a   :  { %v17794_v16 = vpop.f32.mrf.mxu1  ;;  %v14815_v39 = vpop.f32.mrf.mxu0  ;;  %15158 = vmatmul.mubr.msk.f32.gmra.mxu0 %vm31_vm1, %v5879_v63 }
 0x24b   :  { %21174 = vst [vmem:[#allocation9_spill] sm:$0xff] %v17792_v51  ;;  %v17798_v55 = vadd.f32 %v14815_v39, %v21175_v54  ;;  %15160 = vmatprep.mubr.msk.f32.mxu0 %vm31_vm1, %v5880_v61  ;;  %v5883_v61 = vld [vmem:[#allocation2 + $0xfa] sm:$0xff] }
 0x24c   :  { %v14895_v48 = vpop.f32.mrf.mxu1  ;;  %v3572_v10 = vpop.f32.mrf.mxu0 }
 0x24d   :  { %v17802_v41 = vadd.f32 %v14895_v48, %v17709_v50  ;;  %v17805_v49 = vadd.f32 %v3572_v10, %v17399_v2  ;;  %v5884_v48 = vld [vmem:[#allocation2 + $0x10a] sm:$0xff] }
 0x24e   :  { %v17807_v62 = vpop.f32.mrf.mxu1  ;;  %v14818_v51 = vpop.f32.mrf.mxu0  ;;  %15161 = vmatmul.mubr.msk.f32.gmra.mxu0 %vm31_vm1, %v5881_v21  ;;  %v21179_v21 = vld [vmem:[#allocation14_spill] sm:$0xff] }
 0x24f   :  { %21176 = vst [vmem:[#allocation10_spill] sm:$0xff] %v17805_v49  ;;  %21177 = vst [vmem:[#allocation11_spill] sm:$0xff] %v17807_v62  ;;  %v17811_v63 = vadd.f32 %v14818_v51, %v17409_v58  ;;  %15163 = vmatprep.mubr.msk.f32.mxu0 %vm31_vm1, %v5882_v32  ;;  %v5885_v32 = vld [vmem:[#allocation2 + $0x112] sm:$0xff]  ;;  %v5886_v62 = vld [vmem:[#allocation2 + $0x122] sm:$0xff] }
 0x250   :  { %v14898_v39 = vpop.f32.mrf.mxu1  ;;  %v3582_v54 = vpop.f32.mrf.mxu0 }
 0x251   :  { %v17815_v50 = vadd.f32 %v14898_v39, %v17724_v25  ;;  %v17818_v2 = vadd.f32 %v3582_v54, %v17417_v40 }
 0x252   :  { %v17820_v10 = vpop.f32.mrf.mxu1  ;;  %v14821_v49 = vpop.f32.mrf.mxu0  ;;  %15164 = vmatmul.mubr.msk.f32.gmra.mxu0 %vm31_vm1, %v5883_v61 }
 0x253   :  { %21178 = vst [vmem:[#allocation13_spill] sm:$0xff] %v17818_v2  ;;  %v17824_v58 = vadd.f32 %v14821_v49, %v21179_v21  ;;  %15166 = vmatprep.mubr.msk.f32.mxu0 %vm31_vm1, %v5884_v48  ;;  %v5887_v48 = vld [vmem:[#allocation2 + $0x12a] sm:$0xff] }
 0x254   :  { %v14901_v51 = vpop.f32.mrf.mxu1  ;;  %v3592_v39 = vpop.f32.mrf.mxu0 }
 0x255   :  { %v17828_v25 = vadd.f32 %v14901_v51, %v17739_v5  ;;  %v17831_v40 = vadd.f32 %v3592_v39, %v17435_v4  ;;  %v5888_v51 = vld [vmem:[#allocation2 + $0x13a] sm:$0xff] }
 0x256   :  { %v17833_v54 = vpop.f32.mrf.mxu1  ;;  %v14824_v2 = vpop.f32.mrf.mxu0  ;;  %15167 = vmatmul.mubr.msk.f32.gmra.mxu0 %vm31_vm1, %v5885_v32 }
 0x257   :  { %21180 = vst [vmem:[#allocation14_spill] sm:$0xff] %v17831_v40  ;;  %v17837_v49 = vadd.f32 %v14824_v2, %v17445_v11  ;;  %15169 = vmatprep.mubr.msk.f32.mxu0 %vm31_vm1, %v5886_v62  ;;  %v5889_v62 = vld [vmem:[#allocation2 + $0x142] sm:$0xff] }
 0x258   :  { %v14904_v61 = vpop.f32.mrf.mxu1  ;;  %v3602_v21 = vpop.f32.mrf.mxu0 }
 0x259   :  { %v17841_v5 = vadd.f32 %v14904_v61, %v17754_v33  ;;  %v17844_v4 = vadd.f32 %v3602_v21, %v17451_v38  ;;  %v5890_v61 = vld [vmem:[#allocation2 + $0x152] sm:$0xff] }
 0x25a   :  { %v17846_v39 = vpop.f32.mrf.mxu1  ;;  %v14827_v40 = vpop.f32.mrf.mxu0  ;;  %15170 = vmatmul.mubr.msk.f32.gmra.mxu0 %vm31_vm1, %v5887_v48  ;;  %v5891_v48 = vld [vmem:[#allocation2 + $0x15a] sm:$0xff] }
 0x25b   :  { %21181 = vst [vmem:[#allocation30_spill] sm:$0xff] %v17844_v4  ;;  %v17850_v11 = vadd.f32 %v14827_v40, %v17460_v37  ;;  %15172 = vmatprep.mubr.msk.f32.mxu0 %vm31_vm1, %v5888_v51 }
 0x25c   :  { %v14907_v2 = vpop.f32.mrf.mxu1  ;;  %v3612_v32 = vpop.f32.mrf.mxu0 }
 0x25d   :  { %v17854_v33 = vadd.f32 %v14907_v2, %v17769_v36  ;;  %v17857_v38 = vadd.f32 %v3612_v32, %v17467_v22  ;;  %v5892_v2 = vld [vmem:[#allocation2 + $0x16a] sm:$0xff] }
 0x25e   :  { %v17859_v21 = vpop.f32.mrf.mxu1  ;;  %v14830_v4 = vpop.f32.mrf.mxu0  ;;  %15173 = vmatmul.mubr.msk.f32.gmra.mxu0 %vm31_vm1, %v5889_v62  ;;  %v5893_v62 = vld [vmem:[#allocation2 + $0x172] sm:$0xff] }
 0x25f   :  { %21182 = vst [vmem:[#allocation31_spill] sm:$0xff] %v17857_v38  ;;  %v17863_v37 = vadd.f32 %v14830_v4, %v17476_v18  ;;  %15175 = vmatprep.mubr.msk.f32.mxu0 %vm31_vm1, %v5890_v61 }
 0x260   :  { %v14910_v40 = vpop.f32.mrf.mxu1  ;;  %v3622_v51 = vpop.f32.mrf.mxu0 }
 0x261   :  { %v17867_v36 = vadd.f32 %v14910_v40, %v17784_v15  ;;  %v17870_v22 = vadd.f32 %v3622_v51, %v17483_v6  ;;  %v5894_v40 = vld [vmem:[#allocation2 + $0x182] sm:$0xff] }
 0x262   :  { %v17872_v32 = vpop.f32.mrf.mxu1  ;;  %v14833_v38 = vpop.f32.mrf.mxu0  ;;  %15176 = vmatmul.mubr.msk.f32.gmra.mxu0 %vm31_vm1, %v5891_v48  ;;  %v5895_v48 = vld [vmem:[#allocation2 + $0x18a] sm:$0xff] }
 0x263   :  { %21183 = vst [vmem:[#allocation32_spill] sm:$0xff] %v17870_v22  ;;  %v17876_v18 = vadd.f32 %v14833_v38, %v17492_v24  ;;  %15178 = vmatprep.mubr.msk.f32.mxu0 %vm31_vm1, %v5892_v2 }
 0x264   :  { %v14913_v4 = vpop.f32.mrf.mxu1  ;;  %v3632_v61 = vpop.f32.mrf.mxu0 }
 0x265   :  { %v17880_v15 = vadd.f32 %v14913_v4, %v17798_v55  ;;  %v17883_v6 = vadd.f32 %v3632_v61, %v17499_v56  ;;  %v5896_v4 = vld [vmem:[#allocation2 + $0x19a] sm:$0xff] }
 0x266   :  { %v17885_v51 = vpop.f32.mrf.mxu1  ;;  %v14836_v22 = vpop.f32.mrf.mxu0  ;;  %15179 = vmatmul.mubr.msk.f32.gmra.mxu0 %vm31_vm1, %v5893_v62  ;;  %v5897_v62 = vld [vmem:[#allocation2 + $0x1a2] sm:$0xff] }
 0x267   :  { %21184 = vst [vmem:[#allocation33_spill] sm:$0xff] %v17883_v6  ;;  %21185 = vst [vmem:[#allocation34_spill] sm:$0xff] %v17885_v51  ;;  %v17889_v24 = vadd.f32 %v14836_v22, %v17508_v20  ;;  %15181 = vmatprep.mubr.msk.f32.mxu0 %vm31_vm1, %v5894_v40  ;;  %v21188_v51 = vld [vmem:[#allocation16_spill] sm:$0xff] }
 0x268   :  { %v14916_v38 = vpop.f32.mrf.mxu1  ;;  %v3642_v2 = vpop.f32.mrf.mxu0 }
 0x269   :  { %v17893_v55 = vadd.f32 %v14916_v38, %v17811_v63  ;;  %v17896_v56 = vadd.f32 %v3642_v2, %v17515_v45  ;;  %v5898_v38 = vld [vmem:[#allocation2 + $0x1e2] sm:$0xff] }
 0x26a   :  { %v17898_v61 = vpop.f32.mrf.mxu1  ;;  %v14839_v6 = vpop.f32.mrf.mxu0  ;;  %15182 = vmatmul.mubr.msk.f32.gmra.mxu0 %vm31_vm1, %v5895_v48  ;;  %v5899_v48 = vld [vmem:[#allocation2 + $0x1ea] sm:$0xff] }
 0x26b   :  { %21186 = vst [vmem:[#allocation35_spill] sm:$0xff] %v17896_v56  ;;  %21187 = vst [vmem:[#allocation36_spill] sm:$0xff] %v17898_v61  ;;  %v17902_v20 = vadd.f32 %v14839_v6, %v17524_v29  ;;  %15184 = vmatprep.mubr.msk.f32.mxu0 %vm31_vm1, %v5896_v4  ;;  %v21191_v61 = vld [vmem:[#allocation20_spill] sm:$0xff] }
 0x26c   :  { %v14919_v22 = vpop.f32.mrf.mxu1  ;;  %v3652_v40 = vpop.f32.mrf.mxu0 }
 0x26d   :  { %v17906_v63 = vadd.f32 %v14919_v22, %v17824_v58  ;;  %v17909_v45 = vadd.f32 %v3652_v40, %v21188_v51  ;;  %v5900_v22 = vld [vmem:[#allocation2 + $0x1fa] sm:$0xff] }
 0x26e   :  { %v17911_v2 = vpop.f32.mrf.mxu1  ;;  %v14842_v56 = vpop.f32.mrf.mxu0  ;;  %15185 = vmatmul.mubr.msk.f32.gmra.mxu0 %vm31_vm1, %v5897_v62  ;;  %v21195_v62 = vmov 0.0  }
 0x26f   :  { %21189 = vst [vmem:[#allocation16_spill] sm:$0xff] %v17909_v45  ;;  %21190 = vst [vmem:[#allocation37_spill] sm:$0xff] %v17911_v2  ;;  %v17915_v29 = vadd.f32 %v14842_v56, %v17540_v13  ;;  %15187 = vmatprep.mubr.msk.f32.mxu0 %vm31_vm1, %v5898_v38  ;;  %v5902_v38 = vld [vmem:[#allocation2 + $0x212] sm:$0xff]  ;;  %v21200_v2 = vld [vmem:[#allocation23_spill] sm:$0xff] }
 0x270   :  { %v14922_v6 = vpop.f32.mrf.mxu1  ;;  %v3662_v4 = vpop.f32.mrf.mxu0  ;;  %142 = vst.msk [vmem:[#allocation3] sm:$0xff] %vm141_vm3, %v21195_v62  ;;  %145 = vst.msk [vmem:[#allocation3 + $0x10] sm:$0xff] %vm141_vm3, %v21195_v62 }
 0x271   :  { %v17919_v58 = vadd.f32 %v14922_v6, %v17837_v49  ;;  %v17922_v51 = vadd.f32 %v3662_v4, %v21191_v61  ;;  %v5901_v49 = vld [vmem:[#allocation2 + $0x202] sm:$0xff]  ;;  %144 = vst.msk [vmem:[#allocation3 + $0x8] sm:$0x3] %vm143_vm4, %v21195_v62  ;;  %146 = vst.msk [vmem:[#allocation3 + $0x18] sm:$0x3] %vm143_vm4, %v21195_v62 }
 0x272   :  { %v17924_v40 = vpop.f32.mrf.mxu1  ;;  %v14945_v45 = vpop.f32.mrf.mxu0  ;;  %15188 = vmatmul.mubr.msk.f32.gmra.mxu0 %vm31_vm1, %v5899_v48  ;;  %147 = vst.msk [vmem:[#allocation3 + $0x20] sm:$0xff] %vm141_vm3, %v21195_v62  ;;  %149 = vst.msk [vmem:[#allocation3 + $0x30] sm:$0xff] %vm141_vm3, %v21195_v62 }
 0x273   :  { %21192 = vst [vmem:[#allocation20_spill] sm:$0xff] %v17922_v51  ;;  %21193 = vst [vmem:[#allocation38_spill] sm:$0xff] %v17924_v40  ;;  %v17928_v13 = vadd.f32 %v14945_v45, %v17556_v26  ;;  %15190 = vmatprep.mubr.msk.f32.mxu0 %vm31_vm1, %v5900_v22  ;;  %v21196_v45 = vld [vmem:[#allocation21_spill] sm:$0xff]  ;;  %v21198_v22 = vld [vmem:[#allocation22_spill] sm:$0xff] }
 0x274   :  { %v14925_v56 = vpop.f32.mrf.mxu1  ;;  %148 = vst.msk [vmem:[#allocation3 + $0x28] sm:$0x3] %vm143_vm4, %v21195_v62  ;;  %150 = vst.msk [vmem:[#allocation3 + $0x38] sm:$0x3] %vm143_vm4, %v21195_v62  ;;  %v4773_v61 = vpop.f32.mrf.mxu0  ;;  %v5904_v40 = vld [vmem:[#allocation2 + $0x22a] sm:$0xff] }
 0x275   :  { %21194 = vst [vmem:[#allocation39_spill] sm:$0xff] %v17928_v13  ;;  %151 = vst.msk [vmem:[#allocation3 + $0x40] sm:$0xff] %vm141_vm3, %v21195_v62  ;;  %v18012_v26 = vadd.f32 %v14925_v56, %v17850_v11  ;;  %v18015_v6 = vadd.f32 %v4773_v61, %v21196_v45 }
 0x276   :  { %152 = vst.msk [vmem:[#allocation3 + $0x48] sm:$0x3] %vm143_vm4, %v21195_v62  ;;  %154 = vst.msk [vmem:[#allocation3 + $0x58] sm:$0x3] %vm143_vm4, %v21195_v62  ;;  %v18017_v48 = vpop.f32.mrf.mxu1  ;;  %v14948_v4 = vpop.f32.mrf.mxu0  ;;  %15191 = vmatmul.mubr.msk.f32.gmra.mxu0 %vm31_vm1, %v5901_v49 }
 0x277   :  { %153 = vst.msk [vmem:[#allocation3 + $0x50] sm:$0xff] %vm141_vm3, %v21195_v62  ;;  %155 = vst.msk [vmem:[#allocation3 + $0x60] sm:$0xff] %vm141_vm3, %v21195_v62  ;;  %v18021_v13 = vadd.f32 %v14948_v4, %v21198_v22  ;;  %15193 = vmatprep.mubr.msk.f32.mxu0 %vm31_vm1, %v5902_v38  ;;  %v5905_v38 = vld [vmem:[#allocation2 + $0x232] sm:$0xff]  ;;  %v5906_v22 = vld [vmem:[#allocation2 + $0x242] sm:$0xff] }
 0x278   :  { %156 = vst.msk [vmem:[#allocation3 + $0x68] sm:$0x3] %vm143_vm4, %v21195_v62  ;;  %158 = vst.msk [vmem:[#allocation3 + $0x78] sm:$0x3] %vm143_vm4, %v21195_v62  ;;  %v14928_v51 = vpop.f32.mrf.mxu1  ;;  %v4783_v56 = vpop.f32.mrf.mxu0 }
 0x279   :  { %157 = vst.msk [vmem:[#allocation3 + $0x70] sm:$0xff] %vm141_vm3, %v21195_v62  ;;  %159 = vst.msk [vmem:[#allocation3 + $0x80] sm:$0xff] %vm141_vm3, %v21195_v62  ;;  %v18025_v11 = vadd.f32 %v14928_v51, %v17863_v37  ;;  %v18028_v61 = vadd.f32 %v4783_v56, %v21200_v2 }
 0x27a   :  { %160 = vst.msk [vmem:[#allocation3 + $0x88] sm:$0x3] %vm143_vm4, %v21195_v62  ;;  %162 = vst.msk [vmem:[#allocation3 + $0x98] sm:$0x3] %vm143_vm4, %v21195_v62  ;;  %v18030_v45 = vpop.f32.mrf.mxu1 }
 0x27b   :  { %161 = vst.msk [vmem:[#allocation3 + $0x90] sm:$0xff] %vm141_vm3, %v21195_v62  ;;  %163 = vst.msk [vmem:[#allocation3 + $0xa0] sm:$0xff] %vm141_vm3, %v21195_v62 }
 0x27c   :  { %164 = vst.msk [vmem:[#allocation3 + $0xa8] sm:$0x3] %vm143_vm4, %v21195_v62  ;;  %166 = vst.msk [vmem:[#allocation3 + $0xb8] sm:$0x3] %vm143_vm4, %v21195_v62  ;;  %v14931_v4 = vpop.f32.mrf.mxu1 }
 0x27d   :  { %165 = vst.msk [vmem:[#allocation3 + $0xb0] sm:$0xff] %vm141_vm3, %v21195_v62  ;;  %167 = vst.msk [vmem:[#allocation3 + $0xc0] sm:$0xff] %vm141_vm3, %v21195_v62  ;;  %v18038_v37 = vadd.f32 %v14931_v4, %v17876_v18  ;;  %v5908_v4 = vld [vmem:[#allocation2 + $0x25a] sm:$0xff] }
 0x27e   :  { %168 = vst.msk [vmem:[#allocation3 + $0xc8] sm:$0x3] %vm143_vm4, %v21195_v62  ;;  %170 = vst.msk [vmem:[#allocation3 + $0xd8] sm:$0x3] %vm143_vm4, %v21195_v62  ;;  %v18043_v56 = vpop.f32.mrf.mxu1 }
 0x27f   :  { %169 = vst.msk [vmem:[#allocation3 + $0xd0] sm:$0xff] %vm141_vm3, %v21195_v62  ;;  %171 = vst.msk [vmem:[#allocation3 + $0xe0] sm:$0xff] %vm141_vm3, %v21195_v62 }
 0x280   :  { %172 = vst.msk [vmem:[#allocation3 + $0xe8] sm:$0x3] %vm143_vm4, %v21195_v62  ;;  %174 = vst.msk [vmem:[#allocation3 + $0xf8] sm:$0x3] %vm143_vm4, %v21195_v62 }
 0x281   :  { %173 = vst.msk [vmem:[#allocation3 + $0xf0] sm:$0xff] %vm141_vm3, %v21195_v62  ;;  %175 = vst.msk [vmem:[#allocation3 + $0x100] sm:$0xff] %vm141_vm3, %v21195_v62 }
 0x282   :  { %176 = vst.msk [vmem:[#allocation3 + $0x108] sm:$0x3] %vm143_vm4, %v21195_v62  ;;  %178 = vst.msk [vmem:[#allocation3 + $0x118] sm:$0x3] %vm143_vm4, %v21195_v62 }
 0x283   :  { %177 = vst.msk [vmem:[#allocation3 + $0x110] sm:$0xff] %vm141_vm3, %v21195_v62  ;;  %179 = vst.msk [vmem:[#allocation3 + $0x120] sm:$0xff] %vm141_vm3, %v21195_v62 }
 0x284   :  { %180 = vst.msk [vmem:[#allocation3 + $0x128] sm:$0x3] %vm143_vm4, %v21195_v62  ;;  %182 = vst.msk [vmem:[#allocation3 + $0x138] sm:$0x3] %vm143_vm4, %v21195_v62 }
 0x285   :  { %181 = vst.msk [vmem:[#allocation3 + $0x130] sm:$0xff] %vm141_vm3, %v21195_v62  ;;  %21197 = vst [vmem:[#allocation21_spill] sm:$0xff] %v18015_v6  ;;  %v5903_v62 = vld [vmem:[#allocation2 + $0x21a] sm:$0xff]  ;;  %v14951_v6 = vpop.f32.mrf.mxu0 }
 0x286   :  { %21199 = vst [vmem:[#allocation22_spill] sm:$0xff] %v18021_v13  ;;  %21201 = vst [vmem:[#allocation23_spill] sm:$0xff] %v18028_v61  ;;  %15194 = vmatmul.mubr.msk.f32.gmra.mxu0 %vm31_vm1, %v5903_v62  ;;  %v18034_v49 = vadd.f32 %v14951_v6, %v17588_v12  ;;  %v21203_v13 = vld [vmem:[#allocation25_spill] sm:$0xff]  ;;  %v14934_v62 = vpop.f32.mrf.mxu1 }
 0x287   :  { %15196 = vmatprep.mubr.msk.f32.mxu0 %vm31_vm1, %v5904_v40  ;;  %v4793_v51 = vpop.f32.mrf.mxu0  ;;  %v5907_v40 = vld [vmem:[#allocation2 + $0x24a] sm:$0xff]  ;;  %v18051_v18 = vadd.f32 %v14934_v62, %v17889_v24  ;;  %v5910_v62 = vld [vmem:[#allocation2 + $0x272] sm:$0xff] }
 0x288   :  { %21202 = vst [vmem:[#allocation40_spill] sm:$0xff] %v18034_v49  ;;  %v18041_v2 = vadd.f32 %v4793_v51, %v21203_v13  ;;  %v21206_v49 = vld [vmem:[#allocation18_spill] sm:$0xff]  ;;  %v18056_v51 = vpop.f32.mrf.mxu1 }
 0x289   :  { %v14954_v61 = vpop.f32.mrf.mxu0  ;;  %21205 = vst [vmem:[#allocation41_spill] sm:$0xff] %v18051_v18 }
 0x28a   :  { %21204 = vst [vmem:[#allocation25_spill] sm:$0xff] %v18041_v2  ;;  %15197 = vmatmul.mubr.msk.f32.gmra.mxu0 %vm31_vm1, %v5905_v38  ;;  %v18047_v12 = vadd.f32 %v14954_v61, %v17604_v7  ;;  %v14937_v61 = vpop.f32.mrf.mxu1  ;;  %v5909_v38 = vld [vmem:[#allocation2 + $0x262] sm:$0xff] }
 0x28b   :  { %15199 = vmatprep.mubr.msk.f32.mxu0 %vm31_vm1, %v5906_v22  ;;  %v4803_v6 = vpop.f32.mrf.mxu0  ;;  %v18064_v24 = vadd.f32 %v14937_v61, %v17902_v20  ;;  %v5912_v61 = vld [vmem:[#allocation2 + $0x28a] sm:$0xff] }
 0x28c   :  { %v18054_v13 = vadd.f32 %v4803_v6, %v21206_v49  ;;  %v18069_v6 = vpop.f32.mrf.mxu1 }
 0x28d   :  { %v14957_v2 = vpop.f32.mrf.mxu0  ;;  %21207 = vst [vmem:[#allocation18_spill] sm:$0xff] %v18064_v24 }
 0x28e   :  { %15200 = vmatmul.mubr.msk.f32.gmra.mxu0 %vm31_vm1, %v5907_v40  ;;  %v18060_v7 = vadd.f32 %v14957_v2, %v17620_v9  ;;  %v14940_v2 = vpop.f32.mrf.mxu1  ;;  %v5911_v40 = vld [vmem:[#allocation2 + $0x27a] sm:$0xff] }
 0x28f   :  { %15202 = vmatprep.mubr.msk.f32.mxu0 %vm31_vm1, %v5908_v4  ;;  %v4813_v22 = vpop.f32.mrf.mxu0  ;;  %v18077_v20 = vadd.f32 %v14940_v2, %v17915_v29 }
 0x290   :  { %v18067_v49 = vadd.f32 %v4813_v22, %v17627_v46  ;;  %v18082_v22 = vpop.f32.mrf.mxu1 }
 0x291   :  { %v14960_v18 = vpop.f32.mrf.mxu0  ;;  %21210 = vst [vmem:[#allocation44_spill] sm:$0xff] %v18077_v20 }
 0x292   :  { %21208 = vst [vmem:[#allocation42_spill] sm:$0xff] %v18067_v49  ;;  %15203 = vmatmul.mubr.msk.f32.gmra.mxu0 %vm31_vm1, %v5909_v38  ;;  %v18073_v9 = vadd.f32 %v14960_v18, %v17636_v30  ;;  %v18088_v18 = vpop.f32.mrf.mxu1  ;;  %v5913_v38 = vld [vmem:[#allocation2 + $0x292] sm:$0xff] }
 0x293   :  { %15205 = vmatprep.mubr.msk.f32.mxu0 %vm31_vm1, %v5910_v62  ;;  %v4823_v4 = vpop.f32.mrf.mxu0  ;;  %v5914_v62 = vld [vmem:[#allocation2 + $0x2a2] sm:$0xff] }
 0x294   :  { %21209 = vst [vmem:[#allocation43_spill] sm:$0xff] %v18073_v9  ;;  %v18080_v46 = vadd.f32 %v4823_v4, %v17643_v57  ;;  %v18094_v57 = vpop.f32.mrf.mxu1 }
 0x295   :  { %v14963_v24 = vpop.f32.mrf.mxu0 }
 0x296   :  { %21211 = vst [vmem:[#allocation45_spill] sm:$0xff] %v18080_v46  ;;  %15206 = vmatmul.mubr.msk.f32.gmra.mxu0 %vm31_vm1, %v5911_v40  ;;  %v18086_v30 = vadd.f32 %v14963_v24, %v17652_v31  ;;  %v18100_v31 = vpop.f32.mrf.mxu1  ;;  %v5915_v24 = vld [vmem:[#allocation2 + $0x2aa] sm:$0xff] }
 0x297   :  { %15208 = vmatprep.mubr.msk.f32.mxu0 %vm31_vm1, %v5912_v61  ;;  %v4833_v29 = vpop.f32.mrf.mxu0  ;;  %v13403_v61 = vld [vmem:[%s21040_s3 + $0x38] sm:$0xff] }
 0x298   :  { %21212 = vst [vmem:[#allocation46_spill] sm:$0xff] %v18086_v30  ;;  %v18092_v2 = vadd.f32 %v4833_v29, %v17659_v14  ;;  %v5916_v14 = vld [vmem:[#allocation2 + $0x2ba] sm:$0xff]  ;;  %15235 = vmatprep.subr.mxu1 %v13403_v61  ;;  %v5918_v30 = vld [vmem:[#allocation2 + $0x2d2] sm:$0xff] }
 0x299   :  { %v14966_v4 = vpop.f32.mrf.mxu0  ;;  %15236 = vmatpush3.msra.mxu1 %v13403_v61 }
 0x29a   :  { %21213 = vst [vmem:[#allocation47_spill] sm:$0xff] %v18092_v2  ;;  %15209 = vmatmul.mubr.msk.f32.gmra.mxu0 %vm31_vm1, %v5913_v38  ;;  %v18098_v40 = vadd.f32 %v14966_v4, %v17668_v60  ;;  %v18109_v2 = vpop.f32.mrf.mxu1  ;;  %v5917_v4 = vld [vmem:[#allocation2 + $0x2c2] sm:$0xff] }
 0x29b   :  { %15211 = vmatprep.mubr.msk.f32.mxu0 %vm31_vm1, %v5914_v62  ;;  %v4843_v20 = vpop.f32.mrf.mxu0 }
 0x29c   :  { %21214 = vst [vmem:[#allocation48_spill] sm:$0xff] %v18098_v40  ;;  %v18107_v29 = vadd.f32 %v4843_v20, %v17675_v0  ;;  %v18115_v62 = vpop.f32.mrf.mxu1 }
 0x29d   :  { %v14969_v60 = vpop.f32.mrf.mxu0 }
 0x29e   :  { %21215 = vst [vmem:[#allocation49_spill] sm:$0xff] %v18107_v29  ;;  %15212 = vmatmul.mubr.msk.f32.gmra.mxu0 %vm31_vm1, %v5915_v24  ;;  %v18113_v38 = vadd.f32 %v14969_v60, %v17684_v53  ;;  %v18120_v46 = vpop.f32.mrf.mxu1  ;;  %v5919_v53 = vld [vmem:[#allocation2 + $0x2da] sm:$0xff] }
 0x29f   :  { %15214 = vmatprep.mubr.msk.f32.mxu0 %vm31_vm1, %v5916_v14  ;;  %v18118_v40 = vpop.f32.mrf.mxu0  ;;  %v5920_v14 = vld [vmem:[#allocation2 + $0x2ea] sm:$0xff] }
 0x2a0   :  { %21216 = vst [vmem:[#allocation50_spill] sm:$0xff] %v18113_v38  ;;  %v18126_v24 = vpop.f32.mrf.mxu1 }
 0x2a1   :  { %v14972_v0 = vpop.f32.mrf.mxu0 }
 0x2a2   :  { %15215 = vmatmul.mubr.msk.f32.gmra.mxu0 %vm31_vm1, %v5917_v4  ;;  %v18124_v20 = vadd.f32 %v14972_v0, %v17699_v43  ;;  %v18131_v60 = vpop.f32.mrf.mxu1  ;;  %v5921_v43 = vld [vmem:[#allocation2 + $0x2f2] sm:$0xff] }
 0x2a3   :  { %15217 = vmatprep.mubr.msk.f32.mxu0 %vm31_vm1, %v5918_v30  ;;  %v18129_v61 = vpop.f32.mrf.mxu0  ;;  %v5922_v30 = vld [vmem:[#allocation2 + $0x302] sm:$0xff] }
 0x2a4   :  { %21217 = vst [vmem:[#allocation51_spill] sm:$0xff] %v18124_v20  ;;  %v18137_v4 = vpop.f32.mrf.mxu1 }
 0x2a5   :  { %v14975_v38 = vpop.f32.mrf.mxu0 }
 0x2a6   :  { %15218 = vmatmul.mubr.msk.f32.gmra.mxu0 %vm31_vm1, %v5919_v53  ;;  %v18135_v29 = vadd.f32 %v14975_v38, %v17714_v19  ;;  %v18142_v20 = vpop.f32.mrf.mxu1  ;;  %v5923_v19 = vld [vmem:[#allocation2 + $0x30a] sm:$0xff] }
 0x2a7   :  { %15220 = vmatprep.mubr.msk.f32.mxu0 %vm31_vm1, %v5920_v14  ;;  %v18140_v0 = vpop.f32.mrf.mxu0  ;;  %21220 = vst [vmem:[#allocation54_spill] sm:$0xff] %v18142_v20  ;;  %v5924_v14 = vld [vmem:[#allocation2 + $0x31a] sm:$0xff] }
 0x2a8   :  { %21218 = vst [vmem:[#allocation52_spill] sm:$0xff] %v18135_v29  ;;  %21219 = vst [vmem:[#allocation53_spill] sm:$0xff] %v18140_v0  ;;  %v18148_v53 = vpop.f32.mrf.mxu1 }
 0x2a9   :  { %v14978_v9 = vpop.f32.mrf.mxu0 }
 0x2aa   :  { %15221 = vmatmul.mubr.msk.f32.gmra.mxu0 %vm31_vm1, %v5921_v43  ;;  %v18146_v49 = vadd.f32 %v14978_v9, %v17729_v47  ;;  %v18153_v29 = vpop.f32.mrf.mxu1  ;;  %v5925_v47 = vld [vmem:[#allocation2 + $0x322] sm:$0xff] }
 0x2ab   :  { %15223 = vmatprep.mubr.msk.f32.mxu0 %vm31_vm1, %v5922_v30  ;;  %v18151_v38 = vpop.f32.mrf.mxu0  ;;  %21223 = vst [vmem:[#allocation57_spill] sm:$0xff] %v18153_v29  ;;  %v5926_v30 = vld [vmem:[#allocation2 + $0x332] sm:$0xff] }
 0x2ac   :  { %21221 = vst [vmem:[#allocation55_spill] sm:$0xff] %v18146_v49  ;;  %21222 = vst [vmem:[#allocation56_spill] sm:$0xff] %v18151_v38  ;;  %v18159_v43 = vpop.f32.mrf.mxu1 }
 0x2ad   :  { %v14981_v0 = vpop.f32.mrf.mxu0 }
 0x2ae   :  { %15224 = vmatmul.mubr.msk.f32.gmra.mxu0 %vm31_vm1, %v5923_v19  ;;  %v18157_v20 = vadd.f32 %v14981_v0, %v17744_v42  ;;  %v18164_v49 = vpop.f32.mrf.mxu1  ;;  %v5927_v42 = vld [vmem:[#allocation2 + $0x33a] sm:$0xff] }
 0x2af   :  { %15226 = vmatprep.mubr.msk.f32.mxu0 %vm31_vm1, %v5924_v14  ;;  %v18162_v9 = vpop.f32.mrf.mxu0  ;;  %21226 = vst [vmem:[#allocation60_spill] sm:$0xff] %v18164_v49  ;;  %v5928_v14 = vld [vmem:[#allocation2 + $0x34a] sm:$0xff] }
 0x2b0   :  { %21224 = vst [vmem:[#allocation58_spill] sm:$0xff] %v18157_v20  ;;  %21225 = vst [vmem:[#allocation59_spill] sm:$0xff] %v18162_v9  ;;  %v18170_v19 = vpop.f32.mrf.mxu1 }
 0x2b1   :  { %v14984_v38 = vpop.f32.mrf.mxu0 }
 0x2b2   :  { %15227 = vmatmul.mubr.msk.f32.gmra.mxu0 %vm31_vm1, %v5925_v47  ;;  %v18168_v29 = vadd.f32 %v14984_v38, %v17759_v34  ;;  %v18175_v20 = vpop.f32.mrf.mxu1  ;;  %v5929_v34 = vld [vmem:[#allocation2 + $0x352] sm:$0xff] }
 0x2b3   :  { %15229 = vmatprep.mubr.msk.f32.mxu0 %vm31_vm1, %v5926_v30  ;;  %v18173_v0 = vpop.f32.mrf.mxu0  ;;  %21229 = vst [vmem:[#allocation63_spill] sm:$0xff] %v18175_v20 }
 0x2b4   :  { %21227 = vst [vmem:[#allocation61_spill] sm:$0xff] %v18168_v29  ;;  %21228 = vst [vmem:[#allocation62_spill] sm:$0xff] %v18173_v0  ;;  %v18181_v47 = vpop.f32.mrf.mxu1 }
 0x2b5   :  { %v14987_v9 = vpop.f32.mrf.mxu0 }
 0x2b6   :  { %15230 = vmatmul.mubr.msk.f32.gmra.mxu0 %vm31_vm1, %v5927_v42  ;;  %v18179_v49 = vadd.f32 %v14987_v9, %v17774_v52  ;;  %v18186_v30 = vpop.f32.mrf.mxu1 }
 0x2b7   :  { %15232 = vmatprep.mubr.msk.f32.mxu0 %vm31_vm1, %v5928_v14  ;;  %v18184_v38 = vpop.f32.mrf.mxu0  ;;  %21232 = vst [vmem:[#allocation66_spill] sm:$0xff] %v18186_v30 }
 0x2b8   :  { %21230 = vst [vmem:[#allocation64_spill] sm:$0xff] %v18179_v49  ;;  %21231 = vst [vmem:[#allocation65_spill] sm:$0xff] %v18184_v38  ;;  %v18192_v0 = vpop.f32.mrf.mxu1 }
 0x2b9   :  { %v14990_v29 = vpop.f32.mrf.mxu0 }
 0x2ba   :  { %15233 = vmatmul.mubr.msk.f32.gmra.mxu0 %vm31_vm1, %v5929_v34  ;;  %v18190_v20 = vadd.f32 %v14990_v29, %v17789_v1  ;;  %v18196_v52 = vpop.f32.mrf.mxu1 }
 0x2bb   :  { %v18194_v42 = vpop.f32.mrf.mxu0  ;;  %21235 = vst [vmem:[#allocation69_spill] sm:$0xff] %v18196_v52 }
 0x2bc   :  { %21233 = vst [vmem:[#allocation67_spill] sm:$0xff] %v18190_v20  ;;  %21234 = vst [vmem:[#allocation68_spill] sm:$0xff] %v18194_v42  ;;  %v18201_v49 = vpop.f32.mrf.mxu1 }
 0x2bd   :  { %v14993_v9 = vpop.f32.mrf.mxu0 }
 0x2be   :  { %v18199_v14 = vadd.f32 %v14993_v9, %v17802_v41  ;;  %v18205_v30 = vpop.f32.mrf.mxu1 }
 0x2bf   :  { %v18203_v38 = vpop.f32.mrf.mxu0  ;;  %21238 = vst [vmem:[#allocation72_spill] sm:$0xff] %v18205_v30 }
 0x2c0   :  { %21236 = vst [vmem:[#allocation70_spill] sm:$0xff] %v18199_v14  ;;  %21237 = vst [vmem:[#allocation71_spill] sm:$0xff] %v18203_v38  ;;  %v18210_v29 = vpop.f32.mrf.mxu1 }
 0x2c1   :  { %v14996_v34 = vpop.f32.mrf.mxu0 }
 0x2c2   :  { %v18208_v1 = vadd.f32 %v14996_v34, %v17815_v50  ;;  %v18214_v42 = vpop.f32.mrf.mxu1 }
 0x2c3   :  { %v18212_v20 = vpop.f32.mrf.mxu0  ;;  %21241 = vst [vmem:[#allocation75_spill] sm:$0xff] %v18214_v42 }
 0x2c4   :  { %21239 = vst [vmem:[#allocation73_spill] sm:$0xff] %v18208_v1  ;;  %21240 = vst [vmem:[#allocation74_spill] sm:$0xff] %v18212_v20  ;;  %v18219_v9 = vpop.f32.mrf.mxu1 }
 0x2c5   :  { %v14999_v52 = vpop.f32.mrf.mxu0 }
 0x2c6   :  { %v18217_v41 = vadd.f32 %v14999_v52, %v17828_v25  ;;  %v18223_v38 = vpop.f32.mrf.mxu1 }
 0x2c7   :  { %v18221_v14 = vpop.f32.mrf.mxu0  ;;  %21244 = vst [vmem:[#allocation78_spill] sm:$0xff] %v18223_v38 }
 0x2c8   :  { %21242 = vst [vmem:[#allocation76_spill] sm:$0xff] %v18217_v41  ;;  %21243 = vst [vmem:[#allocation77_spill] sm:$0xff] %v18221_v14  ;;  %v18228_v34 = vpop.f32.mrf.mxu1 }
 0x2c9   :  { %v15002_v30 = vpop.f32.mrf.mxu0 }
 0x2ca   :  { %v18226_v50 = vadd.f32 %v15002_v30, %v17841_v5  ;;  %v18232_v20 = vpop.f32.mrf.mxu1 }
 0x2cb   :  { %v18230_v1 = vpop.f32.mrf.mxu0  ;;  %21247 = vst [vmem:[#allocation81_spill] sm:$0xff] %v18232_v20 }
 0x2cc   :  { %21245 = vst [vmem:[#allocation79_spill] sm:$0xff] %v18226_v50  ;;  %21246 = vst [vmem:[#allocation80_spill] sm:$0xff] %v18230_v1  ;;  %v18237_v52 = vpop.f32.mrf.mxu1 }
 0x2cd   :  { %v15005_v42 = vpop.f32.mrf.mxu0 }
 0x2ce   :  { %v18235_v25 = vadd.f32 %v15005_v42, %v17854_v33  ;;  %v18241_v14 = vpop.f32.mrf.mxu1 }
 0x2cf   :  { %v18239_v41 = vpop.f32.mrf.mxu0  ;;  %21250 = vst [vmem:[#allocation84_spill] sm:$0xff] %v18241_v14 }
 0x2d0   :  { %21248 = vst [vmem:[#allocation82_spill] sm:$0xff] %v18235_v25  ;;  %21249 = vst [vmem:[#allocation83_spill] sm:$0xff] %v18239_v41  ;;  %v18246_v30 = vpop.f32.mrf.mxu1 }
 0x2d1   :  { %v15008_v38 = vpop.f32.mrf.mxu0 }
 0x2d2   :  { %v18244_v5 = vadd.f32 %v15008_v38, %v17867_v36  ;;  %v18250_v1 = vpop.f32.mrf.mxu1 }
 0x2d3   :  { %v18248_v50 = vpop.f32.mrf.mxu0  ;;  %21253 = vst [vmem:[#allocation87_spill] sm:$0xff] %v18250_v1 }
 0x2d4   :  { %21251 = vst [vmem:[#allocation85_spill] sm:$0xff] %v18244_v5  ;;  %21252 = vst [vmem:[#allocation86_spill] sm:$0xff] %v18248_v50  ;;  %v18255_v42 = vpop.f32.mrf.mxu1 }
 0x2d5   :  { %v15011_v20 = vpop.f32.mrf.mxu0  ;;  %21255 = vst [vmem:[#allocation89_spill] sm:$0xff] %v18255_v42  ;;  %v21281_v42 = vld [vmem:[#allocation11_spill] sm:$0xff] }
 0x2d6   :  { %v18253_v33 = vadd.f32 %v15011_v20, %v17880_v15  ;;  %v18259_v41 = vpop.f32.mrf.mxu1 }
 0x2d7   :  { %v18257_v25 = vpop.f32.mrf.mxu0  ;;  %21257 = vst [vmem:[#allocation91_spill] sm:$0xff] %v18259_v41 }
 0x2d8   :  { %21254 = vst [vmem:[#allocation88_spill] sm:$0xff] %v18253_v33  ;;  %21256 = vst [vmem:[#allocation90_spill] sm:$0xff] %v18257_v25  ;;  %v18264_v38 = vpop.f32.mrf.mxu1 }
 0x2d9   :  { %v15014_v14 = vpop.f32.mrf.mxu0  ;;  %21259 = vst [vmem:[#allocation93_spill] sm:$0xff] %v18264_v38  ;;  %v15581_v38 = vmov 1983009808  }
 0x2da   :  { %v18262_v36 = vadd.f32 %v15014_v14, %v17893_v55  ;;  %v18268_v50 = vpop.f32.mrf.mxu1 }
 0x2db   :  { %v18266_v5 = vpop.f32.mrf.mxu0  ;;  %21261 = vst [vmem:[#allocation95_spill] sm:$0xff] %v18268_v50 }
 0x2dc   :  { %21258 = vst [vmem:[#allocation92_spill] sm:$0xff] %v18262_v36  ;;  %21260 = vst [vmem:[#allocation94_spill] sm:$0xff] %v18266_v5  ;;  %v18273_v20 = vpop.f32.mrf.mxu1 }
 0x2dd   :  { %v15017_v1 = vpop.f32.mrf.mxu0  ;;  %21263 = vst [vmem:[#allocation97_spill] sm:$0xff] %v18273_v20 }
 0x2de   :  { %v18271_v15 = vadd.f32 %v15017_v1, %v17906_v63  ;;  %v18277_v25 = vpop.f32.mrf.mxu1  ;;  %v6777_v63 = vunpack.c.l.s4 %v15581_v38  ;;  %v6779_v1 = vlaneseq  ;;  %v4403_v38 = vadd.f32 %v17735_v8, %v17640_v59  ;;  %v21282_v8 = vld [vmem:[#allocation27_spill] sm:$0xff] }
 0x2df   :  { %v18275_v33 = vpop.f32.mrf.mxu0  ;;  %21265 = vst [vmem:[#allocation99_spill] sm:$0xff] %v18277_v25  ;;  %v21272_v25 = vld [vmem:[#allocation24_spill] sm:$0xff] }
 0x2e0   :  { %21262 = vst [vmem:[#allocation96_spill] sm:$0xff] %v18271_v15  ;;  %21264 = vst [vmem:[#allocation98_spill] sm:$0xff] %v18275_v33  ;;  %v18282_v14 = vpop.f32.mrf.mxu1  ;;  %v4397_v20 = vadd.f32 %v17690_v28, %v21272_v25  ;;  %v21277_v28 = vld [vmem:[#allocation29_spill] sm:$0xff]  ;;  %v21278_v25 = vld [vmem:[#allocation26_spill] sm:$0xff] }
 0x2e1   :  { %v15020_v41 = vpop.f32.mrf.mxu0  ;;  %21267 = vst [vmem:[#allocation101_spill] sm:$0xff] %v18282_v14  ;;  %v6778_v14 = vunpack.c.0.s8 %v6777_v63  ;;  %v21286_v63 = vld [vmem:[#allocation7_spill] sm:$0xff] }
 0x2e2   :  { %v18280_v55 = vadd.f32 %v15020_v41, %v17919_v58  ;;  %v18286_v5 = vpop.f32.mrf.mxu1  ;;  %v21274_v41 = vld [vmem:[#allocation17_spill] sm:$0xff] }
 0x2e3   :  { %v18284_v36 = vpop.f32.mrf.mxu0  ;;  %21269 = vst [vmem:[#allocation103_spill] sm:$0xff] %v18286_v5 }
 0x2e4   :  { %21266 = vst [vmem:[#allocation100_spill] sm:$0xff] %v18280_v55  ;;  %21268 = vst [vmem:[#allocation102_spill] sm:$0xff] %v18284_v36  ;;  %v18291_v33 = vpop.f32.mrf.mxu1  ;;  %v4399_v55 = vadd.f32 %v17705_v23, %v21274_v41  ;;  %v21275_v36 = vld [vmem:[#allocation19_spill] sm:$0xff]  ;;  %v6780_v23 = vshrl.u32 %v6779_v1, 7  ;;  %v21279_v41 = vld [vmem:[#allocation12_spill] sm:$0xff]  ;;  %v18330_v1 = vadd.f32 %v17846_v39, %v21286_v63 }
 0x2e5   :  { %v15023_v50 = vpop.f32.mrf.mxu0  ;;  %21271 = vst [vmem:[#allocation105_spill] sm:$0xff] %v18291_v33  ;;  %v4401_v5 = vadd.f32 %v17720_v27, %v21275_v36  ;;  %v4411_v27 = vadd.f32 %v17794_v16, %v21279_v41  ;;  %v21280_v36 = vld [vmem:[#allocation15_spill] sm:$0xff]  ;;  %v21287_v16 = vld [vmem:[#allocation8_spill] sm:$0xff]  ;;  %v21291_v41 = vld [vmem:[#allocation34_spill] sm:$0xff] }
 0x2e6   :  { %v18289_v15 = vadd.f32 %v15023_v50, %v18012_v26  ;;  %v4405_v26 = vadd.f32 %v17750_v44, %v17656_v35  ;;  %v18305_v50 = vpop.f32.mrf.mxu1  ;;  %v4413_v59 = vadd.f32 %v21281_v42, %v21280_v36  ;;  %v18317_v35 = vadd.f32 %v17820_v10, %v21282_v8  ;;  %v21293_v8 = vld [vmem:[#allocation36_spill] sm:$0xff]  ;;  %v21294_v39 = vld [vmem:[#allocation14_spill] sm:$0xff]  ;;  %v21295_v63 = vld [vmem:[#allocation37_spill] sm:$0xff] }
 0x2e7   :  { %v18295_v58 = vpop.f32.mrf.mxu0  ;;  %21276 = vst [vmem:[#allocation17_spill] sm:$0xff] %v18305_v50  ;;  %v18334_v42 = vadd.f32 %v17859_v21, %v21287_v16  ;;  %v21296_v21 = vld [vmem:[#allocation30_spill] sm:$0xff]  ;;  %v21302_v50 = vld [vmem:[#allocation35_spill] sm:$0xff] }
 0x2e8   :  { %21270 = vst [vmem:[#allocation104_spill] sm:$0xff] %v18289_v15  ;;  %21273 = vst [vmem:[#allocation24_spill] sm:$0xff] %v18295_v58  ;;  %v4407_v15 = vadd.f32 %v17765_v17, %v17672_v3  ;;  %v4409_v58 = vadd.f32 %v21278_v25, %v21277_v28  ;;  %v18322_v3 = vpop.f32.mrf.mxu1  ;;  %v21285_v17 = vld [vmem:[#allocation28_spill] sm:$0xff]  ;;  %v21288_v25 = vld [vmem:[#allocation9_spill] sm:$0xff] }
 0x2e9   :  { %v15026_v33 = vpop.f32.mrf.mxu0  ;;  %21284 = vst [vmem:[#allocation29_spill] sm:$0xff] %v18322_v3  ;;  %v18326_v28 = vadd.f32 %v17833_v54, %v21285_v17  ;;  %v18338_v10 = vadd.f32 %v17872_v32, %v21288_v25  ;;  %v21292_v54 = vld [vmem:[#allocation13_spill] sm:$0xff]  ;;  %v21297_v16 = vld [vmem:[#allocation38_spill] sm:$0xff]  ;;  %v21299_v25 = vld [vmem:[#allocation31_spill] sm:$0xff] }
 0x2ea   :  { %v18320_v44 = vadd.f32 %v15026_v33, %v18025_v11  ;;  %v21290_v33 = vld [vmem:[#allocation10_spill] sm:$0xff]  ;;  %v18348_v17 = vadd.f32 %v21293_v8, %v21292_v54  ;;  %v18356_v3 = vadd.f32 %v21297_v16, %v21296_v21  ;;  %v18358_v32 = vpop.f32.mrf.mxu1  ;;  %v21301_v54 = vld [vmem:[#allocation33_spill] sm:$0xff]  ;;  %v18376_v21 = vadd.f32 %v18056_v51, %v21302_v50  ;;  %v21303_v16 = vld [vmem:[#allocation16_spill] sm:$0xff] }
 0x2eb   :  { %v18340_v11 = vpop.f32.mrf.mxu0  ;;  %v18344_v36 = vadd.f32 %v21291_v41, %v21290_v33  ;;  %21298 = vst [vmem:[#allocation12_spill] sm:$0xff] %v18358_v32  ;;  %v21300_v33 = vld [vmem:[#allocation32_spill] sm:$0xff]  ;;  %v18370_v8 = vadd.f32 %v18043_v56, %v21301_v54  ;;  %v18380_v32 = vadd.f32 %v18069_v6, %v21303_v16  ;;  %v21307_v50 = vld [vmem:[#allocation22_spill] sm:$0xff]  ;;  %v21308_v54 = vld [vmem:[#allocation23_spill] sm:$0xff] }
 0x2ec   :  { %21283 = vst [vmem:[#allocation19_spill] sm:$0xff] %v18320_v44  ;;  %21289 = vst [vmem:[#allocation26_spill] sm:$0xff] %v18340_v11  ;;  %v18352_v44 = vadd.f32 %v21295_v63, %v21294_v39  ;;  %v18362_v11 = vadd.f32 %v18017_v48, %v21299_v25  ;;  %v18366_v41 = vadd.f32 %v18030_v45, %v21300_v33  ;;  %v21304_v48 = vld [vmem:[#allocation20_spill] sm:$0xff]  ;;  %v18389_v56 = vpop.f32.mrf.mxu1  ;;  %v21305_v33 = vld [vmem:[#allocation39_spill] sm:$0xff] }
 0x2ed   :  { %v15029_v39 = vpop.f32.mrf.mxu0  ;;  %v18372_v63 = vsub.s32 %v6778_v14, %v6780_v23  ;;  %v18384_v25 = vadd.f32 %v18082_v22, %v21304_v48  ;;  %v18393_v14 = vadd.f32 %v18088_v18, %v21305_v33  ;;  %v21306_v23 = vld [vmem:[#allocation21_spill] sm:$0xff]  ;;  %v18401_v6 = vadd.f32 %v18100_v31, %v21307_v50  ;;  %v21313_v50 = vld [vmem:[#allocation42_spill] sm:$0xff] }
 0x2ee   :  { %v18387_v45 = vadd.f32 %v15029_v39, %v18038_v37  ;;  %v18397_v51 = vadd.f32 %v18094_v57, %v21306_v23  ;;  %v18405_v22 = vadd.f32 %v18109_v2, %v21308_v54  ;;  %v21309_v39 = vld [vmem:[#allocation40_spill] sm:$0xff]  ;;  %v5108_v18 = vadd.f32 %v18118_v40, %v4397_v20  ;;  %v21310_v48 = vld [vmem:[#allocation25_spill] sm:$0xff]  ;;  %v18422_v33 = vpop.f32.mrf.mxu1  ;;  %v21314_v54 = vld [vmem:[#allocation54_spill] sm:$0xff] }
 0x2ef   :  { %v18407_v37 = vpop.f32.mrf.mxu0  ;;  %v18411_v16 = vadd.f32 %v18115_v62, %v21309_v39  ;;  %v18416_v57 = vadd.f32 %v18120_v46, %v21310_v48  ;;  %v18420_v31 = vadd.f32 %v18126_v24, %v18047_v12  ;;  %v5110_v2 = vadd.f32 %v18129_v61, %v4399_v55  ;;  %v21312_v40 = vld [vmem:[#allocation53_spill] sm:$0xff]  ;;  %v21316_v12 = vld [vmem:[#allocation43_spill] sm:$0xff]  ;;  %v21318_v61 = vld [vmem:[#allocation56_spill] sm:$0xff] }
 0x2f0   :  { %v18427_v23 = vadd.f32 %v18131_v60, %v18054_v13  ;;  %v18431_v62 = vadd.f32 %v18137_v4, %v18060_v7  ;;  %v5112_v20 = vadd.f32 %v21312_v40, %v4401_v5  ;;  %v18436_v39 = vadd.f32 %v21314_v54, %v21313_v50  ;;  %v21319_v48 = vld [vmem:[#allocation41_spill] sm:$0xff]  ;;  %v18446_v60 = vpop.f32.mrf.mxu1  ;;  %v21323_v5 = vld [vmem:[#allocation46_spill] sm:$0xff]  ;;  %v21325_v50 = vld [vmem:[#allocation59_spill] sm:$0xff] }
 0x2f1   :  { %v15032_v46 = vpop.f32.mrf.mxu0  ;;  %v18440_v24 = vadd.f32 %v18148_v53, %v21316_v12  ;;  %v5114_v55 = vadd.f32 %v21318_v61, %v4403_v38  ;;  %v21320_v7 = vld [vmem:[#allocation45_spill] sm:$0xff]  ;;  %v18454_v40 = vadd.f32 %v18159_v43, %v21323_v5  ;;  %v5116_v54 = vadd.f32 %v21325_v50, %v4405_v26  ;;  %v21327_v53 = vld [vmem:[#allocation60_spill] sm:$0xff]  ;;  %v21334_v43 = vld [vmem:[#allocation50_spill] sm:$0xff] }
 0x2f2   :  { %21311 = vst [vmem:[#allocation15_spill] sm:$0xff] %v18431_v62  ;;  %21315 = vst [vmem:[#allocation11_spill] sm:$0xff] %v18436_v39  ;;  %v18444_v13 = vadd.f32 %v15032_v46, %v21319_v48  ;;  %v21321_v4 = vld [vmem:[#allocation57_spill] sm:$0xff]  ;;  %v21326_v39 = vld [vmem:[#allocation47_spill] sm:$0xff]  ;;  %v18474_v5 = vadd.f32 %v18181_v47, %v21334_v43  ;;  %v18476_v26 = vpop.f32.mrf.mxu1 }
 0x2f3   :  { %21317 = vst [vmem:[#allocation27_spill] sm:$0xff] %v18440_v24  ;;  %v18450_v62 = vadd.f32 %v21321_v4, %v21320_v7  ;;  %21324 = vst [vmem:[#allocation7_spill] sm:$0xff] %v18454_v40  ;;  %v18459_v12 = vadd.f32 %v21327_v53, %v21326_v39  ;;  %v18461_v38 = vpop.f32.mrf.mxu0  ;;  %v21329_v46 = vld [vmem:[#allocation48_spill] sm:$0xff]  ;;  %v21330_v48 = vld [vmem:[#allocation62_spill] sm:$0xff] }
 0x2f4   :  { %v18465_v61 = vadd.f32 %v18170_v19, %v21329_v46  ;;  %v5118_v24 = vadd.f32 %v21330_v48, %v4407_v15  ;;  %v21331_v7 = vld [vmem:[#allocation49_spill] sm:$0xff]  ;;  %v21332_v4 = vld [vmem:[#allocation63_spill] sm:$0xff]  ;;  %21335 = vst [vmem:[#allocation10_spill] sm:$0xff] %v18474_v5  ;;  %v21337_v53 = vld [vmem:[#allocation66_spill] sm:$0xff] }
 0x2f5   :  { %21322 = vst [vmem:[#allocation28_spill] sm:$0xff] %v18450_v62  ;;  %21328 = vst [vmem:[#allocation8_spill] sm:$0xff] %v18459_v12  ;;  %v18470_v62 = vadd.f32 %v21332_v4, %v21331_v7  ;;  %v21336_v39 = vld [vmem:[#allocation65_spill] sm:$0xff]  ;;  %v18480_v12 = vadd.f32 %v21337_v53, %v5108_v18  ;;  %v21339_v40 = vld [vmem:[#allocation51_spill] sm:$0xff]  ;;  %v15035_v48 = vpop.f32.mrf.mxu0  ;;  %v15115_v18 = vpop.f32.mrf.mxu1 }
 0x2f6   :  { %v5120_v50 = vadd.f32 %v21336_v39, %v4409_v58  ;;  %v18484_v19 = vadd.f32 %v18192_v0, %v21339_v40  ;;  %v21340_v15 = vld [vmem:[#allocation68_spill] sm:$0xff]  ;;  %v21341_v7 = vld [vmem:[#allocation69_spill] sm:$0xff]  ;;  %v21343_v43 = vld [vmem:[#allocation71_spill] sm:$0xff] }
 0x2f7   :  { %21333 = vst [vmem:[#allocation9_spill] sm:$0xff] %v18470_v62  ;;  %21338 = vst [vmem:[#allocation34_spill] sm:$0xff] %v18480_v12  ;;  %v5122_v46 = vadd.f32 %v21340_v15, %v4411_v27  ;;  %v18488_v4 = vadd.f32 %v21341_v7, %v5110_v2  ;;  %v21342_v62 = vld [vmem:[#allocation52_spill] sm:$0xff]  ;;  %v5124_v5 = vadd.f32 %v21343_v43, %v4413_v59  ;;  %v21344_v58 = vld [vmem:[#allocation18_spill] sm:$0xff] }
 0x2f8   :  { %v18492_v47 = vadd.f32 %v18201_v49, %v21342_v62  ;;  %v18496_v39 = vadd.f32 %v15035_v48, %v21344_v58  ;;  %v21345_v53 = vld [vmem:[#allocation72_spill] sm:$0xff]  ;;  %v21346_v0 = vld [vmem:[#allocation55_spill] sm:$0xff]  ;;  %v21347_v2 = vld [vmem:[#allocation74_spill] sm:$0xff]  ;;  %v5073_v49 = vpop.f32.mrf.mxu0 }
 0x2f9   :  { %v18499_v12 = vadd.f32 %v21345_v53, %v5112_v20  ;;  %v18503_v27 = vadd.f32 %v18210_v29, %v21346_v0  ;;  %v5126_v40 = vadd.f32 %v21347_v2, %v18317_v35  ;;  %v21348_v15 = vld [vmem:[#allocation75_spill] sm:$0xff]  ;;  %v21350_v62 = vld [vmem:[#allocation58_spill] sm:$0xff]  ;;  %v21351_v48 = vld [vmem:[#allocation77_spill] sm:$0xff]  ;;  %v5723_v0 = vpop.f32.mrf.mxu1 }
 0x2fa   :  { %v18508_v7 = vadd.f32 %v21348_v15, %v5114_v55  ;;  %v18512_v59 = vadd.f32 %v18219_v9, %v21350_v62  ;;  %v5128_v43 = vadd.f32 %v21351_v48, %v18326_v28  ;;  %v21352_v20 = vld [vmem:[#allocation78_spill] sm:$0xff]  ;;  %v21353_v53 = vld [vmem:[#allocation61_spill] sm:$0xff]  ;;  %v21354_v35 = vld [vmem:[#allocation80_spill] sm:$0xff] }
 0x2fb   :  { %v18517_v58 = vadd.f32 %v21352_v20, %v5116_v54  ;;  %v18521_v29 = vadd.f32 %v18228_v34, %v21353_v53  ;;  %v5130_v55 = vadd.f32 %v21354_v35, %v18330_v1  ;;  %v21355_v2 = vld [vmem:[#allocation81_spill] sm:$0xff]  ;;  %v21359_v28 = vld [vmem:[#allocation83_spill] sm:$0xff]  ;;  %v15038_v54 = vpop.f32.mrf.mxu0  ;;  %v21360_v48 = vld [vmem:[#allocation84_spill] sm:$0xff] }
 0x2fc   :  { %21349 = vst [vmem:[#allocation13_spill] sm:$0xff] %v18508_v7  ;;  %v18526_v15 = vadd.f32 %v21355_v2, %v5118_v24  ;;  %v21357_v7 = vld [vmem:[#allocation64_spill] sm:$0xff]  ;;  %v5132_v62 = vadd.f32 %v21359_v28, %v18334_v42  ;;  %v18535_v20 = vadd.f32 %v21360_v48, %v5120_v50  ;;  %v21362_v34 = vld [vmem:[#allocation67_spill] sm:$0xff]  ;;  %v21364_v1 = vld [vmem:[#allocation86_spill] sm:$0xff] }
 0x2fd   :  { %v18530_v9 = vadd.f32 %v18237_v52, %v21357_v7  ;;  %v18539_v53 = vadd.f32 %v18246_v30, %v21362_v34  ;;  %v5134_v35 = vadd.f32 %v21364_v1, %v18338_v10  ;;  %v21365_v24 = vld [vmem:[#allocation44_spill] sm:$0xff]  ;;  %v21367_v52 = vld [vmem:[#allocation87_spill] sm:$0xff]  ;;  %v21369_v42 = vld [vmem:[#allocation89_spill] sm:$0xff]  ;;  %v5083_v34 = vpop.f32.mrf.mxu0 }
 0x2fe   :  { %21356 = vst [vmem:[#allocation36_spill] sm:$0xff] %v18526_v15  ;;  %21361 = vst [vmem:[#allocation37_spill] sm:$0xff] %v18535_v20  ;;  %v18544_v2 = vadd.f32 %v15038_v54, %v21365_v24  ;;  %v15118_v15 = vpop.f32.mrf.mxu1  ;;  %v18547_v7 = vadd.f32 %v21367_v52, %v5122_v46  ;;  %v21371_v50 = vld [vmem:[#allocation90_spill] sm:$0xff]  ;;  %v21372_v20 = vld [vmem:[#allocation91_spill] sm:$0xff] }
 0x2ff   :  { %21358 = vst [vmem:[#allocation14_spill] sm:$0xff] %v18530_v9  ;;  %21363 = vst [vmem:[#allocation30_spill] sm:$0xff] %v18539_v53  ;;  %v21368_v9 = vld [vmem:[#allocation70_spill] sm:$0xff]  ;;  %v5136_v48 = vadd.f32 %v21371_v50, %v18344_v36  ;;  %v18556_v30 = vadd.f32 %v21372_v20, %v5124_v5  ;;  %v21374_v53 = vld [vmem:[#allocation73_spill] sm:$0xff] }
 0x300   :  { %21366 = vst [vmem:[#allocation38_spill] sm:$0xff] %v18544_v2  ;;  %v18551_v28 = vadd.f32 %v21369_v42, %v21368_v9  ;;  %v21375_v10 = vld [vmem:[#allocation93_spill] sm:$0xff]  ;;  %v21376_v54 = vld [vmem:[#allocation94_spill] sm:$0xff]  ;;  %v21377_v46 = vld [vmem:[#allocation95_spill] sm:$0xff] }
 0x301   :  { %21373 = vst [vmem:[#allocation32_spill] sm:$0xff] %v18556_v30  ;;  %v18560_v1 = vadd.f32 %v21375_v10, %v21374_v53  ;;  %v5138_v24 = vadd.f32 %v21376_v54, %v18348_v17  ;;  %v18565_v52 = vadd.f32 %v21377_v46, %v5126_v40  ;;  %v21379_v2 = vld [vmem:[#allocation76_spill] sm:$0xff]  ;;  %v21380_v9 = vld [vmem:[#allocation97_spill] sm:$0xff]  ;;  %v21382_v36 = vld [vmem:[#allocation98_spill] sm:$0xff]  ;;  %v15141_v40 = vpop.f32.mrf.mxu0 }
 0x302   :  { %21370 = vst [vmem:[#allocation31_spill] sm:$0xff] %v18551_v28  ;;  %v18569_v42 = vadd.f32 %v21380_v9, %v21379_v2  ;;  %v5733_v28 = vpop.f32.mrf.mxu1  ;;  %v5140_v5 = vadd.f32 %v21382_v36, %v18352_v44  ;;  %v21383_v20 = vld [vmem:[#allocation99_spill] sm:$0xff]  ;;  %v21386_v53 = vld [vmem:[#allocation101_spill] sm:$0xff]  ;;  %v21388_v17 = vld [vmem:[#allocation102_spill] sm:$0xff] }
 0x303   :  { %21378 = vst [vmem:[#allocation33_spill] sm:$0xff] %v18565_v52  ;;  %v18574_v50 = vadd.f32 %v21383_v20, %v5128_v43  ;;  %v21385_v30 = vld [vmem:[#allocation79_spill] sm:$0xff]  ;;  %v5142_v54 = vadd.f32 %v21388_v17, %v18356_v3  ;;  %v18585_v2 = vld [vmem:[%s21039_s2] ss:$0 sm:$0xff]  ;;  %v21392_v36 = vld [vmem:[#allocation105_spill] sm:$0xff] }
 0x304   :  { %21381 = vst [vmem:[#allocation35_spill] sm:$0xff] %v18569_v42  ;;  %v18578_v10 = vadd.f32 %v21386_v53, %v21385_v30  ;;  %v21389_v46 = vld [vmem:[#allocation103_spill] sm:$0xff]  ;;  %v21391_v44 = vld [vmem:[#allocation82_spill] sm:$0xff]  ;;  %v21394_v20 = vld [vmem:[#allocation24_spill] sm:$0xff]  ;;  %v6513_v53 = vadd.f32 %v15141_v40, %v18393_v14  ;;  %v18617_v14 = vadd.f32 %v18407_v37, %v18370_v8 }
 0x305   :  { %21384 = vst [vmem:[#allocation16_spill] sm:$0xff] %v18574_v50  ;;  %v18588_v9 = vadd.f32 %v21389_v46, %v5130_v55  ;;  %v18592_v43 = vadd.f32 %v21392_v36, %v21391_v44  ;;  %v5144_v30 = vadd.f32 %v21394_v20, %v18362_v11  ;;  %v21395_v3 = vld [vmem:[#allocation17_spill] sm:$0xff]  ;;  %v21398_v55 = vld [vmem:[#allocation26_spill] sm:$0xff]  ;;  %v6193_v36 = vpop.f32.mrf.mxu0  ;;  %v21404_v40 = vld [vmem:[#allocation92_spill] sm:$0xff] }
 0x306   :  { %21387 = vst [vmem:[#allocation20_spill] sm:$0xff] %v18578_v10  ;;  %v15121_v10 = vpop.f32.mrf.mxu1  ;;  %v18598_v17 = vadd.f32 %v21395_v3, %v5132_v62  ;;  %v21396_v50 = vld [vmem:[#allocation85_spill] sm:$0xff]  ;;  %v18606_v46 = vadd.f32 %v21398_v55, %v18366_v41  ;;  %v6584_v62 = vadd.f32 %v18585_v2, %v6513_v53  ;;  %v18622_v41 = vadd.f32 %v18422_v33, %v5136_v48  ;;  %v21407_v37 = vld [vmem:[#allocation96_spill] sm:$0xff] }
 0x307   :  { %21390 = vst [vmem:[#allocation39_spill] sm:$0xff] %v18588_v9  ;;  %21393 = vst [vmem:[#allocation21_spill] sm:$0xff] %v18592_v43  ;;  %v21397_v42 = vld [vmem:[#allocation29_spill] sm:$0xff]  ;;  %v21399_v9 = vld [vmem:[#allocation12_spill] sm:$0xff]  ;;  %v15144_v8 = vpop.f32.mrf.mxu0  ;;  %v18643_v53 = vadd.f32 %v5723_v0, %v5140_v5 }
 0x308   :  { %v18602_v52 = vadd.f32 %v21397_v42, %v21396_v50  ;;  %v18609_v44 = vadd.f32 %v21399_v9, %v5134_v35  ;;  %v21401_v43 = vld [vmem:[#allocation88_spill] sm:$0xff]  ;;  %v6512_v42 = vadd.f32 %v6193_v36, %v18397_v51  ;;  %v5743_v50 = vpop.f32.mrf.mxu1  ;;  %21403 = vst [vmem:[#allocation40_spill] sm:$0xff] %v18622_v41  ;;  %v18626_v35 = vadd.f32 %v18446_v60, %v21404_v40  ;;  %v21417_v0 = vld [vmem:[#allocation19_spill] sm:$0xff] }
 0x309   :  { %v18613_v11 = vadd.f32 %v18389_v56, %v21401_v43  ;;  %v18630_v56 = vadd.f32 %v18461_v38, %v18376_v21  ;;  %v18633_v9 = vadd.f32 %v18476_v26, %v5138_v24  ;;  %v18636_v43 = vadd.f32 %v15115_v18, %v21407_v37  ;;  %21409 = vst [vmem:[#allocation54_spill] sm:$0xff] %v18643_v53  ;;  %v21410_v21 = vld [vmem:[#allocation100_spill] sm:$0xff]  ;;  %v6203_v36 = vpop.f32.mrf.mxu0 }
 0x30a   :  { %21400 = vst [vmem:[#allocation22_spill] sm:$0xff] %v18609_v44  ;;  %21405 = vst [vmem:[#allocation25_spill] sm:$0xff] %v18626_v35  ;;  %v6648_v51 = vmax.f32 %v6584_v62, 0.0  ;;  %v6583_v20 = vadd.f32 %v18585_v2, %v6512_v42  ;;  %v6515_v33 = vadd.f32 %v15144_v8, %v18401_v6  ;;  %v15124_v48 = vpop.f32.mrf.mxu1  ;;  %v18641_v60 = vadd.f32 %v5073_v49, %v18380_v32  ;;  %v21414_v62 = vld [vmem:[#allocation104_spill] sm:$0xff] }
 0x30b   :  { %21402 = vst [vmem:[#allocation23_spill] sm:$0xff] %v18613_v11  ;;  %21406 = vst [vmem:[#allocation53_spill] sm:$0xff] %v18633_v9  ;;  %v18646_v38 = vadd.f32 %v15118_v15, %v21410_v21  ;;  %v18649_v26 = vadd.f32 %v5083_v34, %v18384_v25  ;;  %v18653_v6 = vadd.f32 %v5733_v28, %v5142_v54 }
 0x30c   :  { %21408 = vst [vmem:[#allocation42_spill] sm:$0xff] %v18636_v43  ;;  %v6792_v24 = vcombine.high %v6648_v51, %v6648_v51  ;;  %v6799_v18 = vrot.slane %v6648_v51, %v18372_v63  ;;  %v6647_v3 = vmax.f32 %v6583_v20, 0.0  ;;  %v6586_v55 = vadd.f32 %v18585_v2, %v6515_v33 }
 0x30d   :  { %21411 = vst [vmem:[#allocation43_spill] sm:$0xff] %v18646_v38  ;;  %21412 = vst [vmem:[#allocation56_spill] sm:$0xff] %v18649_v26  ;;  %v18656_v32 = vadd.f32 %v15121_v10, %v21414_v62  ;;  %v18658_v49 = vadd.f32 %v5743_v50, %v5144_v30  ;;  %v18661_v15 = vadd.f32 %v15124_v48, %v21417_v0 }
 0x30e   :  { %21413 = vst [vmem:[#allocation41_spill] sm:$0xff] %v18653_v6  ;;  %v6806_v25 = vrot.slane %v6792_v24, %v18372_v63  ;;  %v6807_v34 = vcombine.high %v6799_v18, %v6799_v18  ;;  %v8148_v5 = vsel %vm143_vm4, %v6799_v18, -inf  ;;  %v6775_v42 = vcombine.high %v6647_v3, %v6647_v3 }
 0x30f   :  { %21415 = vst [vmem:[#allocation45_spill] sm:$0xff] %v18656_v32  ;;  %21416 = vst [vmem:[#allocation57_spill] sm:$0xff] %v18658_v49  ;;  %v8149_v40 = vrot.slane %v8148_v5, 4  ;;  %v6782_v8 = vrot.slane %v6647_v3, %v18372_v63  ;;  %v18666_v37 = vmax.f32 %v6586_v55, 0.0  ;;  %v6514_v28 = vadd.f32 %v6203_v36, %v18405_v22 }
 0x310   :  { %21418 = vst [vmem:[#allocation46_spill] sm:$0xff] %v18661_v15  ;;  %v6808_v10 = vcombine.high %v6806_v25, %v6806_v25  ;;  %v8155_v54 = vsel %vm143_vm4, %v6807_v34, -inf  ;;  %v8162_v30 = vsel %vm143_vm4, %v6806_v25, -inf  ;;  %v6789_v50 = vrot.slane %v6775_v42, %v18372_v63 }
 0x311   :  { %v8150_v51 = vmax.f32 %v8148_v5, %v8149_v40  ;;  %v8156_v20 = vrot.slane %v8155_v54, 4  ;;  %v8163_v33 = vrot.slane %v8162_v30, 4  ;;  %v6790_v48 = vcombine.high %v6782_v8, %v6782_v8 }
 0x312   :  { %v8169_v21 = vsel %vm143_vm4, %v6808_v10, -inf  ;;  %v6791_v24 = vcombine.high %v6789_v50, %v6789_v50  ;;  %v8120_v18 = vsel %vm143_vm4, %v6782_v8, -inf  ;;  %v8134_v3 = vsel %vm143_vm4, %v6789_v50, -inf }
 0x313   :  { %v8151_v55 = vrot.slane %v8150_v51, 2  ;;  %v8157_v22 = vmax.f32 %v8155_v54, %v8156_v20  ;;  %v8164_v36 = vmax.f32 %v8162_v30, %v8163_v33  ;;  %v8170_v62 = vrot.slane %v8169_v21, 4 }
 0x314   :  { %v8121_v0 = vrot.slane %v8120_v18, 4  ;;  %v8127_v25 = vsel %vm143_vm4, %v6790_v48, -inf  ;;  %v8135_v34 = vrot.slane %v8134_v3, 4  ;;  %v8141_v5 = vsel %vm143_vm4, %v6791_v24, -inf }
 0x315   :  { %v8152_v42 = vmax.f32 %v8150_v51, %v8151_v55  ;;  %v8158_v40 = vrot.slane %v8157_v22, 2  ;;  %v8165_v26 = vrot.slane %v8164_v36, 2  ;;  %v8171_v15 = vmax.f32 %v8169_v21, %v8170_v62 }
 0x316   :  { %v8122_v10 = vmax.f32 %v8120_v18, %v8121_v0  ;;  %v8128_v49 = vrot.slane %v8127_v25, 4  ;;  %v8136_v32 = vmax.f32 %v8134_v3, %v8135_v34  ;;  %v8142_v8 = vrot.slane %v8141_v5, 4  ;;  %v5753_v18 = vpop.f32.mrf.mxu1 }
 0x317   :  { %v8153_v6 = vrot.slane %v8152_v42, 1  ;;  %v8159_v50 = vmax.f32 %v8157_v22, %v8158_v40  ;;  %v8166_v38 = vmax.f32 %v8164_v36, %v8165_v26  ;;  %v8172_v54 = vrot.slane %v8171_v15, 2 }
 0x318   :  { %v8123_v30 = vrot.slane %v8122_v10, 2  ;;  %v8129_v20 = vmax.f32 %v8127_v25, %v8128_v49  ;;  %v8137_v33 = vrot.slane %v8136_v32, 2  ;;  %v8143_v53 = vmax.f32 %v8141_v5, %v8142_v8 }
 0x319   :  { %v8154_v48 = vmax.f32 %v8152_v42, %v8153_v6  ;;  %v8160_v43 = vrot.slane %v8159_v50, 1  ;;  %v8167_v9 = vrot.slane %v8166_v38, 1  ;;  %v8173_v24 = vmax.f32 %v8171_v15, %v8172_v54 }
 0x31a   :  { %v8124_v51 = vmax.f32 %v8122_v10, %v8123_v30  ;;  %v8130_v55 = vrot.slane %v8129_v20, 2  ;;  %v8138_v35 = vmax.f32 %v8136_v32, %v8137_v33  ;;  %v8144_v21 = vrot.slane %v8143_v53, 2 }
 0x31b   :  { %v8161_v62 = vmax.f32 %v8159_v50, %v8160_v43  ;;  %v8168_v3 = vmax.f32 %v8166_v38, %v8167_v9  ;;  %v8174_v0 = vrot.slane %v8173_v24, 1  ;;  %v6585_v22 = vadd.f32 %v18585_v2, %v6514_v28 }
 0x31c   :  { %v8125_v26 = vrot.slane %v8124_v51, 1  ;;  %v8131_v36 = vmax.f32 %v8129_v20, %v8130_v55  ;;  %v8139_v34 = vrot.slane %v8138_v35, 1  ;;  %v8145_v49 = vmax.f32 %v8143_v53, %v8144_v21 }
 0x31d   :  { %v8175_v25 = vmax.f32 %v8173_v24, %v8174_v0  ;;  %v18679_v6 = vsel %vm141_vm3, %v8154_v48, -inf  ;;  %v6826_v15 = vcombine.high %v18666_v37, %v18666_v37  ;;  %v18684_v32 = vadd.f32 %v5753_v18, %v18606_v46 }
 0x31e   :  { %v8126_v5 = vmax.f32 %v8124_v51, %v8125_v26  ;;  %v8132_v43 = vrot.slane %v8131_v36, 1  ;;  %v8140_v9 = vmax.f32 %v8138_v35, %v8139_v34  ;;  %v8146_v38 = vrot.slane %v8145_v49, 1  ;;  %v15147_v51 = vpop.f32.mrf.mxu0 }
 0x31f   :  { %21419 = vst [vmem:[#allocation59_spill] sm:$0xff] %v18684_v32  ;;  %v18687_v28 = vsel %vm141_vm3, %v8161_v62, -inf  ;;  %v6833_v53 = vrot.slane %v18666_v37, %v18372_v63  ;;  %v6840_v42 = vrot.slane %v6826_v15, %v18372_v63  ;;  %v6649_v40 = vmax.f32 %v6585_v22, 0.0 }
 0x320   :  { %v18693_v10 = vsel %vm141_vm3, %v8168_v3, -inf  ;;  %v18696_v8 = vsel %vm141_vm3, %v8175_v25, -inf  ;;  %v18698_v46 = vmax.f32 %v8131_v36, %v8132_v43  ;;  %v18700_v50 = vmax.f32 %v8145_v49, %v8146_v38 }
 0x321   :  { %v6841_v35 = vcombine.high %v6833_v53, %v6833_v53  ;;  %v6842_v54 = vcombine.high %v6840_v42, %v6840_v42  ;;  %v8204_v30 = vsel %vm143_vm4, %v6833_v53, -inf  ;;  %v8218_v20 = vsel %vm143_vm4, %v6840_v42, -inf }
 0x322   :  { %v18705_v37 = vsel %vm141_vm3, %v8126_v5, -inf  ;;  %v18708_v33 = vsel %vm141_vm3, %v8140_v9, -inf  ;;  %v8205_v48 = vrot.slane %v8204_v30, 4  ;;  %v8219_v24 = vrot.slane %v8218_v20, 4 }
 0x323   :  { %v8211_v55 = vsel %vm143_vm4, %v6841_v35, -inf  ;;  %v8225_v21 = vsel %vm143_vm4, %v6842_v54, -inf  ;;  %v6809_v18 = vcombine.high %v6649_v40, %v6649_v40  ;;  %v6816_v62 = vrot.slane %v6649_v40, %v18372_v63 }
 0x324   :  { %v8206_v3 = vmax.f32 %v8204_v30, %v8205_v48  ;;  %v8212_v0 = vrot.slane %v8211_v55, 4  ;;  %v8220_v22 = vmax.f32 %v8218_v20, %v8219_v24  ;;  %v8226_v26 = vrot.slane %v8225_v21, 4 }
 0x325   :  { %v6823_v36 = vrot.slane %v6809_v18, %v18372_v63  ;;  %v6824_v34 = vcombine.high %v6816_v62, %v6816_v62  ;;  %v8176_v49 = vsel %vm143_vm4, %v6816_v62, -inf  ;;  %v6517_v25 = vadd.f32 %v15147_v51, %v18411_v16 }
 0x326   :  { %v8207_v15 = vrot.slane %v8206_v3, 2  ;;  %v8213_v5 = vmax.f32 %v8211_v55, %v8212_v0  ;;  %v8221_v43 = vrot.slane %v8220_v22, 2  ;;  %v8227_v9 = vmax.f32 %v8225_v21, %v8226_v26 }
 0x327   :  { %v6825_v38 = vcombine.high %v6823_v36, %v6823_v36  ;;  %v8177_v53 = vrot.slane %v8176_v49, 4  ;;  %v8183_v42 = vsel %vm143_vm4, %v6824_v34, -inf  ;;  %v8190_v40 = vsel %vm143_vm4, %v6823_v36, -inf }
 0x328   :  { %v8208_v35 = vmax.f32 %v8206_v3, %v8207_v15  ;;  %v8214_v54 = vrot.slane %v8213_v5, 2  ;;  %v8222_v30 = vmax.f32 %v8220_v22, %v8221_v43  ;;  %v8228_v20 = vrot.slane %v8227_v9, 2 }
 0x329   :  { %v8178_v48 = vmax.f32 %v8176_v49, %v8177_v53  ;;  %v8184_v24 = vrot.slane %v8183_v42, 4  ;;  %v8191_v18 = vrot.slane %v8190_v40, 4  ;;  %v8197_v62 = vsel %vm143_vm4, %v6825_v38, -inf  ;;  %v6213_v53 = vpop.f32.mrf.mxu0 }
 0x32a   :  { %v8209_v16 = vrot.slane %v8208_v35, 1  ;;  %v8215_v51 = vmax.f32 %v8213_v5, %v8214_v54  ;;  %v8223_v55 = vrot.slane %v8222_v30, 1  ;;  %v8229_v0 = vmax.f32 %v8227_v9, %v8228_v20 }
 0x32b   :  { %v8179_v21 = vrot.slane %v8178_v48, 2  ;;  %v8185_v26 = vmax.f32 %v8183_v42, %v8184_v24  ;;  %v8192_v32 = vmax.f32 %v8190_v40, %v8191_v18  ;;  %v8198_v41 = vrot.slane %v8197_v62, 4 }
 0x32c   :  { %v8210_v34 = vmax.f32 %v8208_v35, %v8209_v16  ;;  %v8216_v11 = vrot.slane %v8215_v51, 1  ;;  %v8224_v36 = vmax.f32 %v8222_v30, %v8223_v55  ;;  %v8230_v3 = vrot.slane %v8229_v0, 1 }
 0x32d   :  { %v8180_v15 = vmax.f32 %v8178_v48, %v8179_v21  ;;  %v8186_v22 = vrot.slane %v8185_v26, 2  ;;  %v8193_v43 = vrot.slane %v8192_v32, 2  ;;  %v8199_v49 = vmax.f32 %v8197_v62, %v8198_v41  ;;  %v15150_v62 = vpop.f32.mrf.mxu0 }
 0x32e   :  { %v8217_v44 = vmax.f32 %v8215_v51, %v8216_v11  ;;  %v8231_v38 = vmax.f32 %v8229_v0, %v8230_v3  ;;  %v18720_v5 = vsel %vm141_vm3, %v8210_v34, -inf  ;;  %v18723_v9 = vsel %vm141_vm3, %v8224_v36, -inf }
 0x32f   :  { %v9927_v42 = vmax.f32 %v18679_v6, %v18720_v5  ;;  %v9933_v40 = vmax.f32 %v18693_v10, %v18723_v9  ;;  %v8181_v35 = vrot.slane %v8180_v15, 1  ;;  %v8187_v54 = vmax.f32 %v8185_v26, %v8186_v22 }
 0x330   :  { %v9929_v41 = vsel %vm141_vm3, %v8217_v44, -inf  ;;  %v18731_v11 = vsel %vm141_vm3, %v8231_v38, -inf  ;;  %v8194_v30 = vmax.f32 %v8192_v32, %v8193_v43  ;;  %v8200_v20 = vrot.slane %v8199_v49, 2  ;;  %v15127_v32 = vpop.f32.mrf.mxu1  ;;  %v6223_v43 = vpop.f32.mrf.mxu0 }
 0x331   :  { %v9930_v48 = vmax.f32 %v18687_v28, %v9929_v41  ;;  %v9936_v24 = vmax.f32 %v18696_v8, %v18731_v11  ;;  %v8182_v18 = vmax.f32 %v8180_v15, %v8181_v35  ;;  %v8188_v6 = vrot.slane %v8187_v54, 1 }
 0x332   :  { %v9916_v16 = vsel %vm141_vm3, %v18698_v46, -inf  ;;  %v8195_v51 = vrot.slane %v8194_v30, 1  ;;  %v8201_v44 = vmax.f32 %v8199_v49, %v8200_v20  ;;  %v6588_v55 = vadd.f32 %v18585_v2, %v6517_v25 }
 0x333   :  { %v9922_v0 = vsel %vm141_vm3, %v18700_v50, -inf  ;;  %v8189_v28 = vmax.f32 %v8187_v54, %v8188_v6  ;;  %v9914_v21 = vsel %vm141_vm3, %v8182_v18, -inf  ;;  %v6516_v26 = vadd.f32 %v6213_v53, %v18416_v57 }
 0x334   :  { %v8196_v34 = vmax.f32 %v8194_v30, %v8195_v51  ;;  %v8202_v36 = vrot.slane %v8201_v44, 1  ;;  %v9915_v3 = vmax.f32 %v18705_v37, %v9914_v21  ;;  %v6652_v46 = vmax.f32 %v6588_v55, 0.0 }
 0x335   :  { %v9917_v15 = vsel %vm141_vm3, %v8189_v28, -inf  ;;  %v18746_v25 = vadd.f32 %v15127_v32, %v18387_v45  ;;  %v6587_v22 = vadd.f32 %v18585_v2, %v6516_v26  ;;  %v6519_v50 = vadd.f32 %v15150_v62, %v18420_v31 }
 0x336   :  { %v8203_v49 = vmax.f32 %v8201_v44, %v8202_v36  ;;  %v9918_v38 = vmax.f32 %v9916_v16, %v9917_v15  ;;  %v9920_v57 = vsel %vm141_vm3, %v8196_v34, -inf  ;;  %v6860_v53 = vcombine.high %v6652_v46, %v6652_v46 }
 0x337   :  { %v9921_v5 = vmax.f32 %v18708_v33, %v9920_v57  ;;  %v6867_v37 = vrot.slane %v6652_v46, %v18372_v63  ;;  %v6651_v35 = vmax.f32 %v6587_v22, 0.0  ;;  %v18754_v54 = vadd.f32 %v18585_v2, %v6519_v50 }
 0x338   :  { %v9923_v45 = vsel %vm141_vm3, %v8203_v49, -inf  ;;  %v10426_v41 = vsel %vm10425_vm5, %v9918_v38, %v9915_v3  ;;  %v6874_v31 = vrot.slane %v6860_v53, %v18372_v63  ;;  %v18760_v30 = vadd.f32 %v6223_v43, %v18427_v23  ;;  %v5763_v53 = vpop.f32.mrf.mxu1 }
 0x339   :  { %v9924_v20 = vmax.f32 %v9922_v0, %v9923_v45  ;;  %v10428_v18 = vsel %vm10427_vm6, %v9921_v5, %v10426_v41  ;;  %v6875_v6 = vcombine.high %v6867_v37, %v6867_v37  ;;  %v8260_v33 = vsel %vm143_vm4, %v6867_v37, -inf }
 0x33a   :  { %v6876_v62 = vcombine.high %v6874_v31, %v6874_v31  ;;  %v8261_v16 = vrot.slane %v8260_v33, 4  ;;  %v8274_v51 = vsel %vm143_vm4, %v6874_v31, -inf  ;;  %v6843_v44 = vcombine.high %v6651_v35, %v6651_v35 }
 0x33b   :  { %v10430_v55 = vsel %vm10429_vm7, %v9924_v20, %v10428_v18  ;;  %v8267_v32 = vsel %vm143_vm4, %v6875_v6, -inf  ;;  %v8275_v28 = vrot.slane %v8274_v51, 4  ;;  %v6850_v21 = vrot.slane %v6651_v35, %v18372_v63 }
 0x33c   :  { %v10432_v23 = vsel %vm10431_vm8, %v9927_v42, %v10430_v55  ;;  %v8262_v0 = vmax.f32 %v8260_v33, %v8261_v16  ;;  %v8268_v26 = vrot.slane %v8267_v32, 4  ;;  %v8281_v34 = vsel %vm143_vm4, %v6876_v62, -inf  ;;  %v15130_v62 = vpop.f32.mrf.mxu1 }
 0x33d   :  { %v10434_v36 = vsel %vm10433_vm9, %v9930_v48, %v10432_v23  ;;  %v8276_v3 = vmax.f32 %v8274_v51, %v8275_v28  ;;  %v8282_v46 = vrot.slane %v8281_v34, 4  ;;  %v6857_v15 = vrot.slane %v6843_v44, %v18372_v63 }
 0x33e   :  { %v10436_v22 = vsel %vm10435_vm10, %v9933_v40, %v10434_v36  ;;  %v8263_v50 = vrot.slane %v8262_v0, 2  ;;  %v8269_v43 = vmax.f32 %v8267_v32, %v8268_v26  ;;  %v6858_v49 = vcombine.high %v6850_v21, %v6850_v21 }
 0x33f   :  { %v10438_v42 = vsel %vm10437_vm11, %v9936_v24, %v10436_v22  ;;  %v8277_v38 = vrot.slane %v8276_v3, 2  ;;  %v8283_v57 = vmax.f32 %v8281_v34, %v8282_v46  ;;  %v6859_v48 = vcombine.high %v6857_v15, %v6857_v15 }
 0x340   :  { %10561 = vst.msk [vmem:[#allocation3 + $0x11] sm:$0xff] %vm141_vm3, %v10438_v42  ;;  %v8264_v5 = vmax.f32 %v8262_v0, %v8263_v50  ;;  %v8270_v37 = vrot.slane %v8269_v43, 2  ;;  %v8232_v10 = vsel %vm143_vm4, %v6850_v21, -inf  ;;  %v8239_v9 = vsel %vm143_vm4, %v6858_v49, -inf }
 0x341   :  { %v8278_v40 = vmax.f32 %v8276_v3, %v8277_v38  ;;  %v8284_v35 = vrot.slane %v8283_v57, 2  ;;  %v8233_v45 = vrot.slane %v8232_v10, 4  ;;  %v8240_v41 = vrot.slane %v8239_v9, 4  ;;  %v13402_v3 = vld [vmem:[%s21040_s3 + $0x30] sm:$0xff] }
 0x342   :  { %v8265_v31 = vrot.slane %v8264_v5, 1  ;;  %v8271_v8 = vmax.f32 %v8269_v43, %v8270_v37  ;;  %v8246_v11 = vsel %vm143_vm4, %v6857_v15, -inf  ;;  %v8253_v24 = vsel %vm143_vm4, %v6859_v48, -inf  ;;  %15237 = vmatprep.subr.mxu1 %v13402_v3 }
 0x343   :  { %v8279_v20 = vrot.slane %v8278_v40, 1  ;;  %v8285_v18 = vmax.f32 %v8283_v57, %v8284_v35  ;;  %v8234_v6 = vmax.f32 %v8232_v10, %v8233_v45  ;;  %v8241_v33 = vmax.f32 %v8239_v9, %v8240_v41  ;;  %15238 = vmatpush3.msra.mxu1 %v13402_v3  ;;  %v5773_v9 = vpop.f32.mrf.mxu1 }
 0x344   :  { %v8266_v16 = vmax.f32 %v8264_v5, %v8265_v31  ;;  %v8272_v51 = vrot.slane %v8271_v8, 1  ;;  %v8247_v44 = vrot.slane %v8246_v11, 4  ;;  %v8254_v55 = vrot.slane %v8253_v24, 4 }
 0x345   :  { %v8280_v32 = vmax.f32 %v8278_v40, %v8279_v20  ;;  %v8286_v28 = vrot.slane %v8285_v18, 1  ;;  %v8235_v21 = vrot.slane %v8234_v6, 2  ;;  %v8242_v23 = vrot.slane %v8241_v33, 2 }
 0x346   :  { %v8248_v0 = vmax.f32 %v8246_v11, %v8247_v44  ;;  %v8255_v26 = vmax.f32 %v8253_v24, %v8254_v55  ;;  %v18786_v34 = vadd.f32 %v5763_v53, %v18617_v14  ;;  %v18789_v36 = vadd.f32 %v15130_v62, %v18444_v13 }
 0x347   :  { %v8273_v46 = vmax.f32 %v8271_v8, %v8272_v51  ;;  %v18795_v15 = vsel %vm141_vm3, %v8266_v16, -inf  ;;  %v8236_v22 = vmax.f32 %v8234_v6, %v8235_v21  ;;  %v8243_v50 = vmax.f32 %v8241_v33, %v8242_v23 }
 0x348   :  { %v8287_v43 = vmax.f32 %v8285_v18, %v8286_v28  ;;  %v8249_v49 = vrot.slane %v8248_v0, 2  ;;  %v8256_v42 = vrot.slane %v8255_v26, 2  ;;  %v6654_v14 = vmax.f32 %v18754_v54, 0.0 }
 0x349   :  { %v18799_v13 = vsel %vm141_vm3, %v8280_v32, -inf  ;;  %v8237_v38 = vrot.slane %v8236_v22, 1  ;;  %v8244_v57 = vrot.slane %v8243_v50, 1  ;;  %v6589_v48 = vadd.f32 %v18585_v2, %v18760_v30 }
 0x34a   :  { %v8250_v53 = vmax.f32 %v8248_v0, %v8249_v49  ;;  %v8257_v5 = vmax.f32 %v8255_v26, %v8256_v42  ;;  %v6894_v37 = vcombine.high %v6654_v14, %v6654_v14  ;;  %v6901_v10 = vrot.slane %v6654_v14, %v18372_v63 }
 0x34b   :  { %v18805_v40 = vsel %vm141_vm3, %v8273_v46, -inf  ;;  %v8238_v35 = vmax.f32 %v8236_v22, %v8237_v38  ;;  %v8245_v54 = vmax.f32 %v8243_v50, %v8244_v57  ;;  %v6653_v45 = vmax.f32 %v6589_v48, 0.0  ;;  %v15153_v48 = vpop.f32.mrf.mxu0 }
 0x34c   :  { %v8251_v41 = vrot.slane %v8250_v53, 1  ;;  %v8258_v31 = vrot.slane %v8257_v5, 1  ;;  %v6908_v8 = vrot.slane %v6894_v37, %v18372_v63  ;;  %v6909_v11 = vcombine.high %v6901_v10, %v6901_v10 }
 0x34d   :  { %v18809_v24 = vsel %vm141_vm3, %v8287_v43, -inf  ;;  %v8316_v30 = vsel %vm143_vm4, %v6901_v10, -inf  ;;  %v6877_v20 = vcombine.high %v6653_v45, %v6653_v45  ;;  %v18813_v18 = vadd.f32 %v5773_v9, %v18630_v56 }
 0x34e   :  { %v18816_v6 = vsel %vm141_vm3, %v8238_v35, -inf  ;;  %v18819_v33 = vsel %vm141_vm3, %v8245_v54, -inf  ;;  %v6910_v62 = vcombine.high %v6908_v8, %v6908_v8  ;;  %v8317_v16 = vrot.slane %v8316_v30, 4 }
 0x34f   :  { %v8323_v51 = vsel %vm143_vm4, %v6909_v11, -inf  ;;  %v8330_v44 = vsel %vm143_vm4, %v6908_v8, -inf  ;;  %v6884_v55 = vrot.slane %v6653_v45, %v18372_v63  ;;  %v6891_v32 = vrot.slane %v6877_v20, %v18372_v63 }
 0x350   :  { %v18825_v28 = vmax.f32 %v8250_v53, %v8251_v41  ;;  %v18827_v56 = vmax.f32 %v8257_v5, %v8258_v31  ;;  %v8318_v21 = vmax.f32 %v8316_v30, %v8317_v16  ;;  %v8324_v23 = vrot.slane %v8323_v51, 4 }
 0x351   :  { %v8331_v0 = vrot.slane %v8330_v44, 4  ;;  %v8337_v26 = vsel %vm143_vm4, %v6910_v62, -inf  ;;  %v6892_v3 = vcombine.high %v6884_v55, %v6884_v55  ;;  %v6893_v46 = vcombine.high %v6891_v32, %v6891_v32 }
 0x352   :  { %v8319_v22 = vrot.slane %v8318_v21, 2  ;;  %v8325_v50 = vmax.f32 %v8323_v51, %v8324_v23  ;;  %v8338_v43 = vrot.slane %v8337_v26, 4  ;;  %v8288_v49 = vsel %vm143_vm4, %v6884_v55, -inf  ;;  %v6233_v51 = vpop.f32.mrf.mxu0 }
 0x353   :  { %v8332_v42 = vmax.f32 %v8330_v44, %v8331_v0  ;;  %v8289_v14 = vrot.slane %v8288_v49, 4  ;;  %v8295_v38 = vsel %vm143_vm4, %v6892_v3, -inf  ;;  %v8302_v57 = vsel %vm143_vm4, %v6891_v32, -inf }
 0x354   :  { %v8320_v53 = vmax.f32 %v8318_v21, %v8319_v22  ;;  %v8326_v5 = vrot.slane %v8325_v50, 2  ;;  %v8339_v37 = vmax.f32 %v8337_v26, %v8338_v43  ;;  %v8296_v10 = vrot.slane %v8295_v38, 4 }
 0x355   :  { %v8333_v9 = vrot.slane %v8332_v42, 2  ;;  %v8290_v35 = vmax.f32 %v8288_v49, %v8289_v14  ;;  %v8303_v54 = vrot.slane %v8302_v57, 4  ;;  %v8309_v45 = vsel %vm143_vm4, %v6893_v46, -inf }
 0x356   :  { %v8321_v41 = vrot.slane %v8320_v53, 1  ;;  %v8327_v31 = vmax.f32 %v8325_v50, %v8326_v5  ;;  %v8340_v8 = vrot.slane %v8339_v37, 2  ;;  %v8297_v11 = vmax.f32 %v8295_v38, %v8296_v10 }
 0x357   :  { %v8334_v30 = vmax.f32 %v8332_v42, %v8333_v9  ;;  %v8291_v20 = vrot.slane %v8290_v35, 2  ;;  %v8304_v62 = vmax.f32 %v8302_v57, %v8303_v54  ;;  %v8310_v16 = vrot.slane %v8309_v45, 4  ;;  %v15156_v57 = vpop.f32.mrf.mxu0 }
 0x358   :  { %v8322_v44 = vmax.f32 %v8320_v53, %v8321_v41  ;;  %v8328_v55 = vrot.slane %v8327_v31, 1  ;;  %v8341_v32 = vmax.f32 %v8339_v37, %v8340_v8  ;;  %v8298_v21 = vrot.slane %v8297_v11, 2 }
 0x359   :  { %v8335_v23 = vrot.slane %v8334_v30, 1  ;;  %v8292_v0 = vmax.f32 %v8290_v35, %v8291_v20  ;;  %v8305_v26 = vrot.slane %v8304_v62, 2  ;;  %v8311_v3 = vmax.f32 %v8309_v45, %v8310_v16 }
 0x35a   :  { %v8329_v22 = vmax.f32 %v8327_v31, %v8328_v55  ;;  %v8342_v43 = vrot.slane %v8341_v32, 1  ;;  %v9950_v46 = vsel %vm141_vm3, %v8322_v44, -inf  ;;  %v8299_v50 = vmax.f32 %v8297_v11, %v8298_v21  ;;  %v15133_v44 = vpop.f32.mrf.mxu1  ;;  %v6243_v55 = vpop.f32.mrf.mxu0 }
 0x35b   :  { %v8336_v49 = vmax.f32 %v8334_v30, %v8335_v23  ;;  %v9951_v42 = vmax.f32 %v18795_v15, %v9950_v46  ;;  %v8293_v14 = vrot.slane %v8292_v0, 1  ;;  %v8306_v38 = vmax.f32 %v8304_v62, %v8305_v26  ;;  %v21420_v62 = vld [vmem:[#allocation15_spill] sm:$0xff] }
 0x35c   :  { %v8343_v5 = vmax.f32 %v8341_v32, %v8342_v43  ;;  %v9953_v53 = vsel %vm141_vm3, %v8329_v22, -inf  ;;  %v8300_v37 = vrot.slane %v8299_v50, 1  ;;  %v8312_v10 = vrot.slane %v8311_v3, 2  ;;  %v21421_v26 = vld [vmem:[#allocation11_spill] sm:$0xff] }
 0x35d   :  { %v9954_v9 = vmax.f32 %v18805_v40, %v9953_v53  ;;  %v9956_v35 = vsel %vm141_vm3, %v8336_v49, -inf  ;;  %v8294_v54 = vmax.f32 %v8292_v0, %v8293_v14  ;;  %v8307_v45 = vrot.slane %v8306_v38, 1  ;;  %v21422_v46 = vld [vmem:[#allocation27_spill] sm:$0xff]  ;;  %v5783_v14 = vpop.f32.mrf.mxu1  ;;  %v21423_v53 = vld [vmem:[#allocation28_spill] sm:$0xff] }
 0x35e   :  { %v9957_v41 = vmax.f32 %v18799_v13, %v9956_v35  ;;  %v9959_v31 = vsel %vm141_vm3, %v8343_v5, -inf  ;;  %v8301_v8 = vmax.f32 %v8299_v50, %v8300_v37  ;;  %v8313_v15 = vmax.f32 %v8311_v3, %v8312_v10 }
 0x35f   :  { %v9960_v11 = vmax.f32 %v18809_v24, %v9959_v31  ;;  %v8308_v30 = vmax.f32 %v8306_v38, %v8307_v45  ;;  %v9938_v20 = vsel %vm141_vm3, %v8294_v54, -inf  ;;  %v6521_v16 = vadd.f32 %v15153_v48, %v21420_v62  ;;  %v15159_v38 = vpop.f32.mrf.mxu0 }
 0x360   :  { %v9943_v40 = vsel %vm141_vm3, %v18825_v28, -inf  ;;  %v8314_v32 = vrot.slane %v8313_v15, 1  ;;  %v9939_v21 = vmax.f32 %v18816_v6, %v9938_v20  ;;  %v9941_v13 = vsel %vm141_vm3, %v8301_v8, -inf  ;;  %v21424_v8 = vld [vmem:[#allocation7_spill] sm:$0xff] }
 0x361   :  { %v9942_v23 = vmax.f32 %v18819_v33, %v9941_v13  ;;  %v9944_v0 = vsel %vm141_vm3, %v8308_v30, -inf  ;;  %v6592_v24 = vadd.f32 %v18585_v2, %v6521_v16  ;;  %v6520_v3 = vadd.f32 %v6233_v51, %v21421_v26 }
 0x362   :  { %v9946_v48 = vsel %vm141_vm3, %v18827_v56, -inf  ;;  %v8315_v22 = vmax.f32 %v8313_v15, %v8314_v32  ;;  %v9945_v43 = vmax.f32 %v9943_v40, %v9944_v0  ;;  %v6523_v28 = vadd.f32 %v15156_v57, %v21422_v46 }
 0x363   :  { %v10439_v50 = vsel %vm10425_vm5, %v9942_v23, %v9939_v21  ;;  %v6656_v6 = vmax.f32 %v6592_v24, 0.0  ;;  %v18857_v49 = vadd.f32 %v15133_v44, %v18496_v39  ;;  %v6591_v33 = vadd.f32 %v18585_v2, %v6520_v3 }
 0x364   :  { %v9947_v5 = vsel %vm141_vm3, %v8315_v22, -inf  ;;  %v10440_v51 = vsel %vm10427_vm6, %v9945_v43, %v10439_v50  ;;  %v6594_v56 = vadd.f32 %v18585_v2, %v6523_v28  ;;  %v6522_v37 = vadd.f32 %v6243_v55, %v21423_v53 }
 0x365   :  { %v9948_v10 = vmax.f32 %v9946_v48, %v9947_v5  ;;  %v6928_v57 = vcombine.high %v6656_v6, %v6656_v6  ;;  %v6935_v35 = vrot.slane %v6656_v6, %v18372_v63  ;;  %v6655_v54 = vmax.f32 %v6591_v33, 0.0 }
 0x366   :  { %v18866_v39 = vadd.f32 %v5783_v14, %v18641_v60  ;;  %v18868_v45 = vmax.f32 %v6594_v56, 0.0  ;;  %v18871_v31 = vadd.f32 %v18585_v2, %v6522_v37  ;;  %v18874_v15 = vadd.f32 %v15159_v38, %v21424_v8 }
 0x367   :  { %v10441_v30 = vsel %vm10429_vm7, %v9948_v10, %v10440_v51  ;;  %v6942_v20 = vrot.slane %v6928_v57, %v18372_v63  ;;  %v6943_v62 = vcombine.high %v6935_v35, %v6935_v35  ;;  %v8372_v16 = vsel %vm143_vm4, %v6935_v35, -inf }
 0x368   :  { %v10442_v44 = vsel %vm10431_vm8, %v9951_v42, %v10441_v30  ;;  %v8373_v55 = vrot.slane %v8372_v16, 4  ;;  %v6911_v60 = vcombine.high %v6655_v54, %v6655_v54  ;;  %v6918_v40 = vrot.slane %v6655_v54, %v18372_v63 }
 0x369   :  { %v10443_v32 = vsel %vm10433_vm9, %v9954_v9, %v10442_v44  ;;  %v6944_v2 = vcombine.high %v6942_v20, %v6942_v20  ;;  %v8379_v21 = vsel %vm143_vm4, %v6943_v62, -inf  ;;  %v8386_v13 = vsel %vm143_vm4, %v6942_v20, -inf }
 0x36a   :  { %v10444_v23 = vsel %vm10435_vm10, %v9957_v41, %v10443_v32  ;;  %v8374_v0 = vmax.f32 %v8372_v16, %v8373_v55  ;;  %v8380_v24 = vrot.slane %v8379_v21, 4  ;;  %v8387_v26 = vrot.slane %v8386_v13, 4 }
 0x36b   :  { %v10445_v3 = vsel %vm10437_vm11, %v9960_v11, %v10444_v23  ;;  %v8393_v42 = vsel %vm143_vm4, %v6944_v2, -inf  ;;  %v6925_v48 = vrot.slane %v6911_v60, %v18372_v63  ;;  %v6926_v22 = vcombine.high %v6918_v40, %v6918_v40 }
 0x36c   :  { %10562 = vst.msk [vmem:[#allocation3 + $0x21] sm:$0xff] %vm141_vm3, %v10445_v3  ;;  %v8375_v9 = vrot.slane %v8374_v0, 2  ;;  %v8381_v43 = vmax.f32 %v8379_v21, %v8380_v24  ;;  %v8388_v46 = vmax.f32 %v8386_v13, %v8387_v26  ;;  %v8394_v28 = vrot.slane %v8393_v42, 4 }
 0x36d   :  { %v6927_v50 = vcombine.high %v6925_v48, %v6925_v48  ;;  %v8344_v6 = vsel %vm143_vm4, %v6918_v40, -inf  ;;  %v8351_v41 = vsel %vm143_vm4, %v6926_v22, -inf  ;;  %v8358_v33 = vsel %vm143_vm4, %v6925_v48, -inf  ;;  %v13401_v40 = vld [vmem:[%s21040_s3 + $0x28] sm:$0xff] }
 0x36e   :  { %v8376_v14 = vmax.f32 %v8374_v0, %v8375_v9  ;;  %v8382_v11 = vrot.slane %v8381_v43, 2  ;;  %v8389_v38 = vrot.slane %v8388_v46, 2  ;;  %v8395_v5 = vmax.f32 %v8393_v42, %v8394_v28  ;;  %15239 = vmatprep.subr.mxu1 %v13401_v40 }
 0x36f   :  { %v8345_v51 = vrot.slane %v8344_v6, 4  ;;  %v8352_v56 = vrot.slane %v8351_v41, 4  ;;  %v8359_v53 = vrot.slane %v8358_v33, 4  ;;  %v8365_v37 = vsel %vm143_vm4, %v6927_v50, -inf  ;;  %15240 = vmatpush3.msra.mxu1 %v13401_v40 }
 0x370   :  { %v8377_v10 = vrot.slane %v8376_v14, 1  ;;  %v8383_v57 = vmax.f32 %v8381_v43, %v8382_v11  ;;  %v8390_v35 = vmax.f32 %v8388_v46, %v8389_v38  ;;  %v8396_v54 = vrot.slane %v8395_v5, 2 }
 0x371   :  { %v8346_v8 = vmax.f32 %v8344_v6, %v8345_v51  ;;  %v8353_v30 = vmax.f32 %v8351_v41, %v8352_v56  ;;  %v8360_v20 = vmax.f32 %v8358_v33, %v8359_v53  ;;  %v8366_v62 = vrot.slane %v8365_v37, 4 }
 0x372   :  { %v8378_v16 = vmax.f32 %v8376_v14, %v8377_v10  ;;  %v8384_v44 = vrot.slane %v8383_v57, 1  ;;  %v8391_v55 = vrot.slane %v8390_v35, 1  ;;  %v8397_v60 = vmax.f32 %v8395_v5, %v8396_v54 }
 0x373   :  { %v8347_v32 = vrot.slane %v8346_v8, 2  ;;  %v8354_v2 = vrot.slane %v8353_v30, 2  ;;  %v8361_v21 = vrot.slane %v8360_v20, 2  ;;  %v8367_v13 = vmax.f32 %v8365_v37, %v8366_v62 }
 0x374   :  { %v8385_v23 = vmax.f32 %v8383_v57, %v8384_v44  ;;  %v8392_v0 = vmax.f32 %v8390_v35, %v8391_v55  ;;  %v8398_v24 = vrot.slane %v8397_v60, 1  ;;  %v18897_v26 = vsel %vm141_vm3, %v8378_v16, -inf  ;;  %v6253_v55 = vpop.f32.mrf.mxu0 }
 0x375   :  { %v8348_v3 = vmax.f32 %v8346_v8, %v8347_v32  ;;  %v8355_v42 = vmax.f32 %v8353_v30, %v8354_v2  ;;  %v8362_v48 = vmax.f32 %v8360_v20, %v8361_v21  ;;  %v8368_v22 = vrot.slane %v8367_v13, 2 }
 0x376   :  { %v8399_v9 = vmax.f32 %v8397_v60, %v8398_v24  ;;  %v18900_v43 = vsel %vm141_vm3, %v8385_v23, -inf  ;;  %v18903_v46 = vsel %vm141_vm3, %v8392_v0, -inf  ;;  %v6962_v28 = vcombine.high %v18868_v45, %v18868_v45  ;;  %v13400_v60 = vld [vmem:[%s21040_s3 + $0x20] sm:$0xff] }
 0x377   :  { %v8349_v50 = vrot.slane %v8348_v3, 1  ;;  %v8356_v6 = vrot.slane %v8355_v42, 1  ;;  %v8363_v41 = vrot.slane %v8362_v48, 1  ;;  %v8369_v33 = vmax.f32 %v8367_v13, %v8368_v22  ;;  %15241 = vmatprep.subr.mxu1 %v13400_v60  ;;  %v10597_v13 = vld [vmem:[#allocation3 + $0x1] sm:$0xff] }
 0x378   :  { %v18908_v14 = vsel %vm141_vm3, %v8399_v9, -inf  ;;  %v6969_v11 = vrot.slane %v18868_v45, %v18372_v63  ;;  %v6976_v38 = vrot.slane %v6962_v28, %v18372_v63  ;;  %v6657_v5 = vmax.f32 %v18871_v31, 0.0  ;;  %15242 = vmatpush3.msra.mxu1 %v13400_v60  ;;  %v21425_v28 = vld [vmem:[#allocation8_spill] sm:$0xff]  ;;  %15243 = vmatprep.mubr.msk.f32.mxu1 %vm141_vm3, %v10597_v13 }
 0x379   :  { %v8350_v51 = vmax.f32 %v8348_v3, %v8349_v50  ;;  %v8357_v56 = vmax.f32 %v8355_v42, %v8356_v6  ;;  %v8364_v53 = vmax.f32 %v8362_v48, %v8363_v41  ;;  %v8370_v37 = vrot.slane %v8369_v33, 1  ;;  %v18937_v3 = vld [vmem:[%s21039_s2] ss:$0 sm:$0xff] }
 0x37a   :  { %v6977_v10 = vcombine.high %v6969_v11, %v6969_v11  ;;  %v6978_v57 = vcombine.high %v6976_v38, %v6976_v38  ;;  %v8428_v35 = vsel %vm143_vm4, %v6969_v11, -inf  ;;  %v8442_v54 = vsel %vm143_vm4, %v6976_v38, -inf }
 0x37b   :  { %v8371_v8 = vmax.f32 %v8369_v33, %v8370_v37  ;;  %v18917_v30 = vsel %vm141_vm3, %v8350_v51, -inf  ;;  %v18920_v45 = vsel %vm141_vm3, %v8357_v56, -inf  ;;  %v18923_v20 = vsel %vm141_vm3, %v8364_v53, -inf }
 0x37c   :  { %v8429_v31 = vrot.slane %v8428_v35, 4  ;;  %v8435_v62 = vsel %vm143_vm4, %v6977_v10, -inf  ;;  %v8443_v16 = vrot.slane %v8442_v54, 4  ;;  %v8449_v44 = vsel %vm143_vm4, %v6978_v57, -inf }
 0x37d   :  { %v18931_v40 = vsel %vm141_vm3, %v8371_v8, -inf  ;;  %v8436_v32 = vrot.slane %v8435_v62, 4  ;;  %v8450_v2 = vrot.slane %v8449_v44, 4  ;;  %v6945_v21 = vcombine.high %v6657_v5, %v6657_v5 }
 0x37e   :  { %v8430_v23 = vmax.f32 %v8428_v35, %v8429_v31  ;;  %v8444_v0 = vmax.f32 %v8442_v54, %v8443_v16  ;;  %v6952_v24 = vrot.slane %v6657_v5, %v18372_v63  ;;  %v6596_v42 = vadd.f32 %v18937_v3, %v18874_v15 }
 0x37f   :  { %v8437_v48 = vmax.f32 %v8435_v62, %v8436_v32  ;;  %v8451_v22 = vmax.f32 %v8449_v44, %v8450_v2  ;;  %v6959_v9 = vrot.slane %v6945_v21, %v18372_v63  ;;  %v6524_v50 = vadd.f32 %v6253_v55, %v21425_v28  ;;  %v15162_v21 = vpop.f32.mrf.mxu0 }
 0x380   :  { %v8431_v6 = vrot.slane %v8430_v23, 2  ;;  %v8445_v41 = vrot.slane %v8444_v0, 2  ;;  %v6960_v33 = vcombine.high %v6952_v24, %v6952_v24  ;;  %v8400_v11 = vsel %vm143_vm4, %v6952_v24, -inf }
 0x381   :  { %v8438_v38 = vrot.slane %v8437_v48, 2  ;;  %v8452_v5 = vrot.slane %v8451_v22, 2  ;;  %v6961_v51 = vcombine.high %v6959_v9, %v6959_v9  ;;  %v8401_v56 = vrot.slane %v8400_v11, 4 }
 0x382   :  { %v8432_v53 = vmax.f32 %v8430_v23, %v8431_v6  ;;  %v8446_v15 = vmax.f32 %v8444_v0, %v8445_v41  ;;  %v8407_v37 = vsel %vm143_vm4, %v6960_v33, -inf  ;;  %v8414_v10 = vsel %vm143_vm4, %v6959_v9, -inf }
 0x383   :  { %v8439_v57 = vmax.f32 %v8437_v48, %v8438_v38  ;;  %v8453_v35 = vmax.f32 %v8451_v22, %v8452_v5  ;;  %v8402_v54 = vmax.f32 %v8400_v11, %v8401_v56  ;;  %v8408_v8 = vrot.slane %v8407_v37, 4 }
 0x384   :  { %v8433_v31 = vrot.slane %v8432_v53, 1  ;;  %v8447_v62 = vrot.slane %v8446_v15, 1  ;;  %v8415_v16 = vrot.slane %v8414_v10, 4  ;;  %v8421_v44 = vsel %vm143_vm4, %v6961_v51, -inf }
 0x385   :  { %v8440_v55 = vrot.slane %v8439_v57, 1  ;;  %v8454_v60 = vrot.slane %v8453_v35, 1  ;;  %v8403_v32 = vrot.slane %v8402_v54, 2  ;;  %v8409_v2 = vmax.f32 %v8407_v37, %v8408_v8  ;;  %v13479_v37 = vld [vmem:[%s21040_s3 + $0x98] sm:$0xff] }
 0x386   :  { %v8434_v13 = vmax.f32 %v8432_v53, %v8433_v31  ;;  %v8448_v23 = vmax.f32 %v8446_v15, %v8447_v62  ;;  %v8416_v0 = vmax.f32 %v8414_v10, %v8415_v16  ;;  %v8422_v24 = vrot.slane %v8421_v44, 4  ;;  %v6263_v53 = vpop.f32.mrf.mxu0  ;;  %v10598_v15 = vld [vmem:[#allocation3 + $0x11] sm:$0xff]  ;;  %15363 = vmatprep.subr.mxu0 %v13479_v37 }
 0x387   :  { %v8441_v28 = vmax.f32 %v8439_v57, %v8440_v55  ;;  %v8455_v9 = vmax.f32 %v8453_v35, %v8454_v60  ;;  %v8404_v48 = vmax.f32 %v8402_v54, %v8403_v32  ;;  %v8410_v22 = vrot.slane %v8409_v2, 2  ;;  %15244 = vmatmul.mubr.msk.f32.vlgmr.msra.gmra.mxu1 %vm141_vm3, %v10598_v15  ;;  %15371 = vmatprep.mubr.msk.f32.mxu0 %vm141_vm3, %v10598_v15  ;;  %v21426_v32 = vld [vmem:[#allocation9_spill] sm:$0xff] }
 0x388   :  { %v18949_v6 = vsel %vm141_vm3, %v8434_v13, -inf  ;;  %v18952_v41 = vsel %vm141_vm3, %v8448_v23, -inf  ;;  %v8417_v33 = vrot.slane %v8416_v0, 2  ;;  %v8423_v11 = vmax.f32 %v8421_v44, %v8422_v24  ;;  %15364 = vmatpush3.msra.mxu0 %v13479_v37 }
 0x389   :  { %v9975_v38 = vmax.f32 %v18897_v26, %v18949_v6  ;;  %v18957_v5 = vsel %vm141_vm3, %v8441_v28, -inf  ;;  %v9981_v51 = vmax.f32 %v18903_v46, %v18952_v41  ;;  %v18962_v56 = vsel %vm141_vm3, %v8455_v9, -inf }
 0x38a   :  { %v9978_v10 = vmax.f32 %v18900_v43, %v18957_v5  ;;  %v9984_v57 = vmax.f32 %v18908_v14, %v18962_v56  ;;  %v8405_v35 = vrot.slane %v8404_v48, 1  ;;  %v8411_v54 = vmax.f32 %v8409_v2, %v8410_v22  ;;  %v13477_v14 = vld [vmem:[%s21040_s3 + $0x88] sm:$0xff] }
 0x38b   :  { %v8418_v8 = vmax.f32 %v8416_v0, %v8417_v33  ;;  %v8424_v31 = vrot.slane %v8423_v11, 2  ;;  %v6660_v62 = vmax.f32 %v6596_v42, 0.0  ;;  %v6595_v16 = vadd.f32 %v18937_v3, %v6524_v50 }
 0x38c   :  { %v8406_v44 = vmax.f32 %v8404_v48, %v8405_v35  ;;  %v8412_v55 = vrot.slane %v8411_v54, 1  ;;  %v6527_v60 = vadd.f32 %v15162_v21, %v18465_v61  ;;  %v18976_v13 = vadd.f32 %v6263_v53, %v21426_v32 }
 0x38d   :  { %v8419_v23 = vrot.slane %v8418_v8, 1  ;;  %v8425_v2 = vmax.f32 %v8423_v11, %v8424_v31  ;;  %v6996_v24 = vcombine.high %v6660_v62, %v6660_v62  ;;  %v7003_v28 = vrot.slane %v6660_v62, %v18372_v63 }
 0x38e   :  { %v8413_v0 = vmax.f32 %v8411_v54, %v8412_v55  ;;  %v9962_v42 = vsel %vm141_vm3, %v8406_v44, -inf  ;;  %v6659_v9 = vmax.f32 %v6595_v16, 0.0  ;;  %v6598_v50 = vadd.f32 %v18937_v3, %v6527_v60 }
 0x38f   :  { %v8420_v22 = vmax.f32 %v8418_v8, %v8419_v23  ;;  %v8426_v33 = vrot.slane %v8425_v2, 1  ;;  %v9963_v48 = vmax.f32 %v18917_v30, %v9962_v42  ;;  %v7010_v61 = vrot.slane %v6996_v24, %v18372_v63 }
 0x390   :  { %v9965_v21 = vsel %vm141_vm3, %v8413_v0, -inf  ;;  %v7011_v53 = vcombine.high %v7003_v28, %v7003_v28  ;;  %v8484_v11 = vsel %vm143_vm4, %v7003_v28, -inf  ;;  %v6979_v15 = vcombine.high %v6659_v9, %v6659_v9 }
 0x391   :  { %v8427_v37 = vmax.f32 %v8425_v2, %v8426_v33  ;;  %v9966_v35 = vmax.f32 %v18920_v45, %v9965_v21  ;;  %v9968_v54 = vsel %vm141_vm3, %v8420_v22, -inf  ;;  %v7012_v31 = vcombine.high %v7010_v61, %v7010_v61 }
 0x392   :  { %v9969_v62 = vmax.f32 %v18923_v20, %v9968_v54  ;;  %v8485_v8 = vrot.slane %v8484_v11, 4  ;;  %v8491_v16 = vsel %vm143_vm4, %v7011_v53, -inf  ;;  %v8498_v30 = vsel %vm143_vm4, %v7010_v61, -inf  ;;  %v13478_v20 = vld [vmem:[%s21040_s3 + $0x90] sm:$0xff] }
 0x393   :  { %v9971_v44 = vsel %vm141_vm3, %v8427_v37, -inf  ;;  %v10446_v55 = vsel %vm10425_vm5, %v9966_v35, %v9963_v48  ;;  %v8492_v60 = vrot.slane %v8491_v16, 4  ;;  %v8499_v32 = vrot.slane %v8498_v30, 4  ;;  %15365 = vmatprep.subr.mxu0 %v13478_v20 }
 0x394   :  { %v9972_v23 = vmax.f32 %v18931_v40, %v9971_v44  ;;  %v10447_v45 = vsel %vm10427_vm6, %v9969_v62, %v10446_v55  ;;  %v8486_v2 = vmax.f32 %v8484_v11, %v8485_v8  ;;  %v8505_v24 = vsel %vm143_vm4, %v7012_v31, -inf  ;;  %15366 = vmatpush3.msra.mxu0 %v13478_v20 }
 0x395   :  { %v8493_v28 = vmax.f32 %v8491_v16, %v8492_v60  ;;  %v8500_v0 = vmax.f32 %v8498_v30, %v8499_v32  ;;  %v8506_v42 = vrot.slane %v8505_v24, 4  ;;  %v6986_v22 = vrot.slane %v6659_v9, %v18372_v63  ;;  %15367 = vmatprep.subr.mxu0 %v13477_v14 }
 0x396   :  { %v10448_v33 = vsel %vm10429_vm7, %v9972_v23, %v10447_v45  ;;  %v8487_v48 = vrot.slane %v8486_v2, 2  ;;  %v6993_v40 = vrot.slane %v6979_v15, %v18372_v63  ;;  %v6662_v61 = vmax.f32 %v6598_v50, 0.0  ;;  %15368 = vmatpush3.msra.mxu0 %v13477_v14 }
 0x397   :  { %v10449_v21 = vsel %vm10431_vm8, %v9975_v38, %v10448_v33  ;;  %v8494_v53 = vrot.slane %v8493_v28, 2  ;;  %v8501_v11 = vrot.slane %v8500_v0, 2  ;;  %v8507_v37 = vmax.f32 %v8505_v24, %v8506_v42 }
 0x398   :  { %v10450_v9 = vsel %vm10433_vm9, %v9978_v10, %v10449_v21  ;;  %v8488_v35 = vmax.f32 %v8486_v2, %v8487_v48  ;;  %v6994_v54 = vcombine.high %v6986_v22, %v6986_v22  ;;  %v6995_v31 = vcombine.high %v6993_v40, %v6993_v40 }
 0x399   :  { %v10451_v50 = vsel %vm10435_vm10, %v9981_v51, %v10450_v9  ;;  %v8495_v15 = vmax.f32 %v8493_v28, %v8494_v53  ;;  %v8502_v26 = vmax.f32 %v8500_v0, %v8501_v11  ;;  %v8508_v6 = vrot.slane %v8507_v37, 2 }
 0x39a   :  { %v10452_v38 = vsel %vm10437_vm11, %v9984_v57, %v10451_v50  ;;  %v8489_v62 = vrot.slane %v8488_v35, 1  ;;  %v8456_v43 = vsel %vm143_vm4, %v6986_v22, -inf  ;;  %v8463_v5 = vsel %vm143_vm4, %v6994_v54, -inf }
 0x39b   :  { %10563 = vst.msk [vmem:[#allocation3 + $0x31] sm:$0xff] %vm141_vm3, %v10452_v38  ;;  %v8496_v10 = vrot.slane %v8495_v15, 1  ;;  %v8503_v8 = vrot.slane %v8502_v26, 1  ;;  %v8509_v46 = vmax.f32 %v8507_v37, %v8508_v6  ;;  %v8457_v41 = vrot.slane %v8456_v43, 4 }
 0x39c   :  { %v8490_v51 = vmax.f32 %v8488_v35, %v8489_v62  ;;  %v8464_v16 = vrot.slane %v8463_v5, 4  ;;  %v8470_v30 = vsel %vm143_vm4, %v6993_v40, -inf  ;;  %v8477_v44 = vsel %vm143_vm4, %v6995_v31, -inf }
 0x39d   :  { %v8497_v56 = vmax.f32 %v8495_v15, %v8496_v10  ;;  %v8504_v57 = vmax.f32 %v8502_v26, %v8503_v8  ;;  %v8510_v55 = vrot.slane %v8509_v46, 1  ;;  %v8458_v60 = vmax.f32 %v8456_v43, %v8457_v41 }
 0x39e   :  { %v19026_v32 = vsel %vm141_vm3, %v8490_v51, -inf  ;;  %v8465_v23 = vmax.f32 %v8463_v5, %v8464_v16  ;;  %v8471_v45 = vrot.slane %v8470_v30, 4  ;;  %v8478_v2 = vrot.slane %v8477_v44, 4 }
 0x39f   :  { %v8511_v24 = vmax.f32 %v8509_v46, %v8510_v55  ;;  %v19029_v20 = vsel %vm141_vm3, %v8497_v56, -inf  ;;  %v19032_v28 = vsel %vm141_vm3, %v8504_v57, -inf  ;;  %v8459_v0 = vrot.slane %v8458_v60, 2 }
 0x3a0   :  { %v8466_v42 = vrot.slane %v8465_v23, 2  ;;  %v8472_v22 = vmax.f32 %v8470_v30, %v8471_v45  ;;  %v8479_v33 = vmax.f32 %v8477_v44, %v8478_v2  ;;  %v7030_v48 = vcombine.high %v6662_v61, %v6662_v61 }
 0x3a1   :  { %v19035_v40 = vsel %vm141_vm3, %v8511_v24, -inf  ;;  %v8460_v21 = vmax.f32 %v8458_v60, %v8459_v0  ;;  %v7037_v53 = vrot.slane %v6662_v61, %v18372_v63  ;;  %v6597_v11 = vadd.f32 %v18937_v3, %v18976_v13  ;;  %v15165_v0 = vpop.f32.mrf.mxu0 }
 0x3a2   :  { %v8467_v37 = vmax.f32 %v8465_v23, %v8466_v42  ;;  %v8473_v9 = vrot.slane %v8472_v22, 2  ;;  %v8480_v35 = vrot.slane %v8479_v33, 2  ;;  %v7044_v54 = vrot.slane %v7030_v48, %v18372_v63 }
 0x3a3   :  { %v8461_v31 = vrot.slane %v8460_v21, 1  ;;  %v7045_v50 = vcombine.high %v7037_v53, %v7037_v53  ;;  %v8540_v15 = vsel %vm143_vm4, %v7037_v53, -inf  ;;  %v6661_v26 = vmax.f32 %v6597_v11, 0.0 }
 0x3a4   :  { %v8468_v6 = vrot.slane %v8467_v37, 1  ;;  %v8474_v38 = vmax.f32 %v8472_v22, %v8473_v9  ;;  %v8481_v62 = vmax.f32 %v8479_v33, %v8480_v35  ;;  %v7046_v43 = vcombine.high %v7044_v54, %v7044_v54  ;;  %v13476_v9 = vld [vmem:[%s21040_s3 + $0x80] sm:$0xff] }
 0x3a5   :  { %v8462_v5 = vmax.f32 %v8460_v21, %v8461_v31  ;;  %v8541_v10 = vrot.slane %v8540_v15, 4  ;;  %v8547_v61 = vsel %vm143_vm4, %v7045_v50, -inf  ;;  %v8554_v13 = vsel %vm143_vm4, %v7044_v54, -inf  ;;  %v21427_v50 = vld [vmem:[#allocation10_spill] sm:$0xff]  ;;  %15369 = vmatprep.subr.mxu0 %v13476_v9 }
 0x3a6   :  { %v8469_v8 = vmax.f32 %v8467_v37, %v8468_v6  ;;  %v8475_v46 = vrot.slane %v8474_v38, 1  ;;  %v8482_v41 = vrot.slane %v8481_v62, 1  ;;  %v8548_v51 = vrot.slane %v8547_v61, 4  ;;  %15370 = vmatpush3.msra.mxu0 %v13476_v9 }
 0x3a7   :  { %v19045_v16 = vsel %vm141_vm3, %v8462_v5, -inf  ;;  %v8542_v30 = vmax.f32 %v8540_v15, %v8541_v10  ;;  %v8555_v44 = vrot.slane %v8554_v13, 4  ;;  %v8561_v14 = vsel %vm143_vm4, %v7046_v43, -inf  ;;  %v6273_v43 = vpop.f32.mrf.mxu0 }
 0x3a8   :  { %v8476_v56 = vmax.f32 %v8474_v38, %v8475_v46  ;;  %v8483_v57 = vmax.f32 %v8481_v62, %v8482_v41  ;;  %v19049_v55 = vsel %vm141_vm3, %v8469_v8, -inf  ;;  %v8549_v60 = vmax.f32 %v8547_v61, %v8548_v51 }
 0x3a9   :  { %v8543_v23 = vrot.slane %v8542_v30, 2  ;;  %v8556_v45 = vmax.f32 %v8554_v13, %v8555_v44  ;;  %v8562_v2 = vrot.slane %v8561_v14, 4  ;;  %v7013_v24 = vcombine.high %v6661_v26, %v6661_v26 }
 0x3aa   :  { %v19052_v42 = vsel %vm141_vm3, %v8476_v56, -inf  ;;  %v19055_v22 = vsel %vm141_vm3, %v8483_v57, -inf  ;;  %v8550_v33 = vrot.slane %v8549_v60, 2  ;;  %v7020_v48 = vrot.slane %v6661_v26, %v18372_v63 }
 0x3ab   :  { %v8544_v21 = vmax.f32 %v8542_v30, %v8543_v23  ;;  %v8557_v53 = vrot.slane %v8556_v45, 2  ;;  %v8563_v11 = vmax.f32 %v8561_v14, %v8562_v2  ;;  %v7027_v37 = vrot.slane %v7013_v24, %v18372_v63  ;;  %v15168_v2 = vpop.f32.mrf.mxu0 }
 0x3ac   :  { %v8551_v35 = vmax.f32 %v8549_v60, %v8550_v33  ;;  %v7028_v54 = vcombine.high %v7020_v48, %v7020_v48  ;;  %v8512_v31 = vsel %vm143_vm4, %v7020_v48, -inf  ;;  %v6529_v15 = vadd.f32 %v15165_v0, %v21427_v50 }
 0x3ad   :  { %v8545_v6 = vrot.slane %v8544_v21, 1  ;;  %v8558_v38 = vmax.f32 %v8556_v45, %v8557_v53  ;;  %v8564_v62 = vrot.slane %v8563_v11, 2  ;;  %v7029_v26 = vcombine.high %v7027_v37, %v7027_v37 }
 0x3ae   :  { %v8552_v5 = vrot.slane %v8551_v35, 1  ;;  %v8513_v10 = vrot.slane %v8512_v31, 4  ;;  %v8519_v61 = vsel %vm143_vm4, %v7028_v54, -inf  ;;  %v8526_v13 = vsel %vm143_vm4, %v7027_v37, -inf }
 0x3af   :  { %v8546_v8 = vmax.f32 %v8544_v21, %v8545_v6  ;;  %v8559_v46 = vrot.slane %v8558_v38, 1  ;;  %v8565_v41 = vmax.f32 %v8563_v11, %v8564_v62  ;;  %v8520_v51 = vrot.slane %v8519_v61, 4  ;;  %v10599_v21 = vld [vmem:[#allocation3 + $0x21] sm:$0xff] }
 0x3b0   :  { %v8553_v30 = vmax.f32 %v8551_v35, %v8552_v5  ;;  %v8514_v44 = vmax.f32 %v8512_v31, %v8513_v10  ;;  %v8527_v14 = vrot.slane %v8526_v13, 4  ;;  %v8533_v56 = vsel %vm143_vm4, %v7029_v26, -inf  ;;  %15246 = vmatprep.mubr.msk.f32.mxu1 %vm141_vm3, %v10599_v21  ;;  %15372 = vmatmul.mubr.msk.f32.vlgmr.msra.gmra.mxu0 %vm141_vm3, %v10599_v21  ;;  %v21428_v26 = vld [vmem:[#allocation34_spill] sm:$0xff]  ;;  %v6283_v10 = vpop.f32.mrf.mxu0 }
 0x3b1   :  { %v8560_v57 = vmax.f32 %v8558_v38, %v8559_v46  ;;  %v8566_v60 = vrot.slane %v8565_v41, 1  ;;  %v19068_v23 = vsel %vm141_vm3, %v8546_v8, -inf  ;;  %v8521_v45 = vmax.f32 %v8519_v61, %v8520_v51 }
 0x3b2   :  { %v9999_v24 = vmax.f32 %v19026_v32, %v19068_v23  ;;  %v19073_v0 = vsel %vm141_vm3, %v8553_v30, -inf  ;;  %v8515_v33 = vrot.slane %v8514_v44, 2  ;;  %v8528_v48 = vmax.f32 %v8526_v13, %v8527_v14 }
 0x3b3   :  { %v8567_v53 = vmax.f32 %v8565_v41, %v8566_v60  ;;  %v10002_v11 = vmax.f32 %v19029_v20, %v19073_v0  ;;  %v19078_v37 = vsel %vm141_vm3, %v8560_v57, -inf  ;;  %v8522_v9 = vrot.slane %v8521_v45, 2 }
 0x3b4   :  { %v10005_v35 = vmax.f32 %v19032_v28, %v19078_v37  ;;  %v8516_v54 = vmax.f32 %v8514_v44, %v8515_v33  ;;  %v8529_v31 = vrot.slane %v8528_v48, 2  ;;  %v8534_v50 = vrot.slane %v8533_v56, 4 }
 0x3b5   :  { %v19085_v6 = vsel %vm141_vm3, %v8567_v53, -inf  ;;  %v8523_v38 = vmax.f32 %v8521_v45, %v8522_v9  ;;  %v6600_v62 = vadd.f32 %v18937_v3, %v6529_v15  ;;  %v6528_v5 = vadd.f32 %v6273_v43, %v21428_v26 }
 0x3b6   :  { %v10008_v61 = vmax.f32 %v19035_v40, %v19085_v6  ;;  %v8517_v13 = vrot.slane %v8516_v54, 1  ;;  %v8530_v8 = vmax.f32 %v8528_v48, %v8529_v31  ;;  %v8535_v46 = vmax.f32 %v8533_v56, %v8534_v50 }
 0x3b7   :  { %v8524_v41 = vrot.slane %v8523_v38, 1  ;;  %v6664_v51 = vmax.f32 %v6600_v62, 0.0  ;;  %v6599_v30 = vadd.f32 %v18937_v3, %v6528_v5  ;;  %v6531_v44 = vadd.f32 %v15168_v2, %v18484_v19 }
 0x3b8   :  { %v8518_v14 = vmax.f32 %v8516_v54, %v8517_v13  ;;  %v8531_v57 = vrot.slane %v8530_v8, 1  ;;  %v8536_v60 = vrot.slane %v8535_v46, 2  ;;  %v19094_v15 = vadd.f32 %v6283_v10, %v18488_v4 }
 0x3b9   :  { %v8525_v43 = vmax.f32 %v8523_v38, %v8524_v41  ;;  %v7064_v45 = vcombine.high %v6664_v51, %v6664_v51  ;;  %v7071_v33 = vrot.slane %v6664_v51, %v18372_v63  ;;  %v6663_v21 = vmax.f32 %v6599_v30, 0.0 }
 0x3ba   :  { %v8532_v53 = vmax.f32 %v8530_v8, %v8531_v57  ;;  %v8537_v48 = vmax.f32 %v8535_v46, %v8536_v60  ;;  %v9986_v56 = vsel %vm141_vm3, %v8518_v14, -inf  ;;  %v6602_v9 = vadd.f32 %v18937_v3, %v6531_v44 }
 0x3bb   :  { %v9987_v31 = vmax.f32 %v19045_v16, %v9986_v56  ;;  %v9989_v19 = vsel %vm141_vm3, %v8525_v43, -inf  ;;  %v7078_v2 = vrot.slane %v7064_v45, %v18372_v63  ;;  %v7079_v54 = vcombine.high %v7071_v33, %v7071_v33 }
 0x3bc   :  { %v8538_v4 = vrot.slane %v8537_v48, 1  ;;  %v9990_v50 = vmax.f32 %v19049_v55, %v9989_v19  ;;  %v9992_v38 = vsel %vm141_vm3, %v8532_v53, -inf  ;;  %v8596_v62 = vsel %vm143_vm4, %v7071_v33, -inf }
 0x3bd   :  { %v9993_v26 = vmax.f32 %v19052_v42, %v9992_v38  ;;  %v7080_v5 = vcombine.high %v7078_v2, %v7078_v2  ;;  %v8597_v10 = vrot.slane %v8596_v62, 4  ;;  %v8603_v13 = vsel %vm143_vm4, %v7079_v54, -inf }
 0x3be   :  { %v8539_v8 = vmax.f32 %v8537_v48, %v8538_v4  ;;  %v10453_v16 = vsel %vm10425_vm5, %v9990_v50, %v9987_v31  ;;  %v8604_v46 = vrot.slane %v8603_v13, 4  ;;  %v8610_v41 = vsel %vm143_vm4, %v7078_v2, -inf }
 0x3bf   :  { %v10454_v51 = vsel %vm10427_vm6, %v9993_v26, %v10453_v16  ;;  %v8598_v30 = vmax.f32 %v8596_v62, %v8597_v10  ;;  %v8611_v55 = vrot.slane %v8610_v41, 4  ;;  %v8617_v44 = vsel %vm143_vm4, %v7080_v5, -inf }
 0x3c0   :  { %v9995_v14 = vsel %vm141_vm3, %v8539_v8, -inf  ;;  %v8605_v57 = vmax.f32 %v8603_v13, %v8604_v46  ;;  %v8618_v42 = vrot.slane %v8617_v44, 4  ;;  %v7047_v60 = vcombine.high %v6663_v21, %v6663_v21 }
 0x3c1   :  { %v9996_v43 = vmax.f32 %v19055_v22, %v9995_v14  ;;  %v8599_v45 = vrot.slane %v8598_v30, 2  ;;  %v8612_v33 = vmax.f32 %v8610_v41, %v8611_v55  ;;  %v7054_v53 = vrot.slane %v6663_v21, %v18372_v63 }
 0x3c2   :  { %v8606_v48 = vrot.slane %v8605_v57, 2  ;;  %v8619_v56 = vmax.f32 %v8617_v44, %v8618_v42  ;;  %v7061_v31 = vrot.slane %v7047_v60, %v18372_v63  ;;  %v6666_v19 = vmax.f32 %v6602_v9, 0.0 }
 0x3c3   :  { %v10455_v2 = vsel %vm10429_vm7, %v9996_v43, %v10454_v51  ;;  %v8600_v54 = vmax.f32 %v8598_v30, %v8599_v45  ;;  %v8613_v4 = vrot.slane %v8612_v33, 2  ;;  %v7062_v50 = vcombine.high %v7054_v53, %v7054_v53 }
 0x3c4   :  { %v10456_v38 = vsel %vm10431_vm8, %v9999_v24, %v10455_v2  ;;  %v8607_v22 = vmax.f32 %v8605_v57, %v8606_v48  ;;  %v8620_v62 = vrot.slane %v8619_v56, 2  ;;  %v7063_v26 = vcombine.high %v7061_v31, %v7061_v31 }
 0x3c5   :  { %v10457_v21 = vsel %vm10433_vm9, %v10002_v11, %v10456_v38  ;;  %v8601_v5 = vrot.slane %v8600_v54, 1  ;;  %v8614_v9 = vmax.f32 %v8612_v33, %v8613_v4  ;;  %v8568_v10 = vsel %vm143_vm4, %v7054_v53, -inf }
 0x3c6   :  { %v10458_v13 = vsel %vm10435_vm10, %v10005_v35, %v10457_v21  ;;  %v8608_v32 = vrot.slane %v8607_v22, 1  ;;  %v8621_v23 = vmax.f32 %v8619_v56, %v8620_v62  ;;  %v8569_v24 = vrot.slane %v8568_v10, 4 }
 0x3c7   :  { %v10459_v8 = vsel %vm10437_vm11, %v10008_v61, %v10458_v13  ;;  %v8602_v20 = vmax.f32 %v8600_v54, %v8601_v5  ;;  %v8615_v0 = vrot.slane %v8614_v9, 1  ;;  %v8575_v11 = vsel %vm143_vm4, %v7062_v50, -inf }
 0x3c8   :  { %10564 = vst.msk [vmem:[#allocation3 + $0x41] sm:$0xff] %vm141_vm3, %v10459_v8  ;;  %v8609_v16 = vmax.f32 %v8607_v22, %v8608_v32  ;;  %v8622_v46 = vrot.slane %v8621_v23, 1  ;;  %v8570_v41 = vmax.f32 %v8568_v10, %v8569_v24  ;;  %v8576_v28 = vrot.slane %v8575_v11, 4 }
 0x3c9   :  { %v8616_v37 = vmax.f32 %v8614_v9, %v8615_v0  ;;  %v19136_v35 = vsel %vm141_vm3, %v8602_v20, -inf  ;;  %v8582_v51 = vsel %vm143_vm4, %v7061_v31, -inf  ;;  %v8589_v40 = vsel %vm143_vm4, %v7063_v26, -inf }
 0x3ca   :  { %v8623_v6 = vmax.f32 %v8621_v23, %v8622_v46  ;;  %v19141_v61 = vsel %vm141_vm3, %v8609_v16, -inf  ;;  %v8571_v30 = vrot.slane %v8570_v41, 2  ;;  %v8577_v55 = vmax.f32 %v8575_v11, %v8576_v28 }
 0x3cb   :  { %v19144_v44 = vsel %vm141_vm3, %v8616_v37, -inf  ;;  %v8583_v14 = vrot.slane %v8582_v51, 4  ;;  %v8590_v57 = vrot.slane %v8589_v40, 4  ;;  %v7098_v42 = vcombine.high %v6666_v19, %v6666_v19 }
 0x3cc   :  { %v19147_v60 = vsel %vm141_vm3, %v8623_v6, -inf  ;;  %v8572_v43 = vmax.f32 %v8570_v41, %v8571_v30  ;;  %v8578_v45 = vrot.slane %v8577_v55, 2  ;;  %v7105_v33 = vrot.slane %v6666_v19, %v18372_v63 }
 0x3cd   :  { %v8584_v53 = vmax.f32 %v8582_v51, %v8583_v14  ;;  %v8591_v48 = vmax.f32 %v8589_v40, %v8590_v57  ;;  %v7112_v56 = vrot.slane %v7098_v42, %v18372_v63  ;;  %v6601_v31 = vadd.f32 %v18937_v3, %v19094_v15  ;;  %v15171_v40 = vpop.f32.mrf.mxu0 }
 0x3ce   :  { %v8573_v2 = vrot.slane %v8572_v43, 1  ;;  %v8579_v54 = vmax.f32 %v8577_v55, %v8578_v45  ;;  %v7113_v4 = vcombine.high %v7105_v33, %v7105_v33  ;;  %v8652_v50 = vsel %vm143_vm4, %v7105_v33, -inf }
 0x3cf   :  { %v8585_v38 = vrot.slane %v8584_v53, 2  ;;  %v8592_v22 = vrot.slane %v8591_v48, 2  ;;  %v7114_v62 = vcombine.high %v7112_v56, %v7112_v56  ;;  %v8653_v26 = vrot.slane %v8652_v50, 4 }
 0x3d0   :  { %v8574_v21 = vmax.f32 %v8572_v43, %v8573_v2  ;;  %v8580_v5 = vrot.slane %v8579_v54, 1  ;;  %v8659_v19 = vsel %vm143_vm4, %v7113_v4, -inf  ;;  %v8666_v9 = vsel %vm143_vm4, %v7112_v56, -inf }
 0x3d1   :  { %v8586_v10 = vmax.f32 %v8584_v53, %v8585_v38  ;;  %v8593_v13 = vmax.f32 %v8591_v48, %v8592_v22  ;;  %v8654_v32 = vmax.f32 %v8652_v50, %v8653_v26  ;;  %v8660_v23 = vrot.slane %v8659_v19, 4  ;;  %v6293_v50 = vpop.f32.mrf.mxu0 }
 0x3d2   :  { %v8581_v15 = vmax.f32 %v8579_v54, %v8580_v5  ;;  %v19157_v24 = vsel %vm141_vm3, %v8574_v21, -inf  ;;  %v8667_v8 = vrot.slane %v8666_v9, 4  ;;  %v8673_v20 = vsel %vm143_vm4, %v7114_v62, -inf }
 0x3d3   :  { %v8587_v0 = vrot.slane %v8586_v10, 1  ;;  %v8594_v11 = vrot.slane %v8593_v13, 1  ;;  %v8655_v16 = vrot.slane %v8654_v32, 2  ;;  %v8661_v46 = vmax.f32 %v8659_v19, %v8660_v23 }
 0x3d4   :  { %v19161_v41 = vsel %vm141_vm3, %v8581_v15, -inf  ;;  %v8668_v28 = vmax.f32 %v8666_v9, %v8667_v8  ;;  %v8674_v37 = vrot.slane %v8673_v20, 4  ;;  %v6665_v51 = vmax.f32 %v6601_v31, 0.0 }
 0x3d5   :  { %v8588_v6 = vmax.f32 %v8586_v10, %v8587_v0  ;;  %v8595_v30 = vmax.f32 %v8593_v13, %v8594_v11  ;;  %v8656_v55 = vmax.f32 %v8654_v32, %v8655_v16  ;;  %v8662_v14 = vrot.slane %v8661_v46, 2  ;;  %v15174_v11 = vpop.f32.mrf.mxu0 }
 0x3d6   :  { %v8669_v57 = vrot.slane %v8668_v28, 2  ;;  %v8675_v42 = vmax.f32 %v8673_v20, %v8674_v37  ;;  %v7081_v43 = vcombine.high %v6665_v51, %v6665_v51  ;;  %v7088_v45 = vrot.slane %v6665_v51, %v18372_v63 }
 0x3d7   :  { %v19165_v33 = vsel %vm141_vm3, %v8588_v6, -inf  ;;  %v19168_v53 = vsel %vm141_vm3, %v8595_v30, -inf  ;;  %v8657_v48 = vrot.slane %v8656_v55, 1  ;;  %v8663_v56 = vmax.f32 %v8661_v46, %v8662_v14 }
 0x3d8   :  { %v8670_v2 = vmax.f32 %v8668_v28, %v8669_v57  ;;  %v8676_v31 = vrot.slane %v8675_v42, 2  ;;  %v7095_v54 = vrot.slane %v7081_v43, %v18372_v63  ;;  %v7096_v4 = vcombine.high %v7088_v45, %v7088_v45 }
 0x3d9   :  { %v8658_v38 = vmax.f32 %v8656_v55, %v8657_v48  ;;  %v8664_v22 = vrot.slane %v8663_v56, 1  ;;  %v8624_v62 = vsel %vm143_vm4, %v7088_v45, -inf  ;;  %v6533_v26 = vadd.f32 %v15171_v40, %v18492_v47 }
 0x3da   :  { %v8671_v21 = vrot.slane %v8670_v2, 1  ;;  %v8677_v5 = vmax.f32 %v8675_v42, %v8676_v31  ;;  %v7097_v19 = vcombine.high %v7095_v54, %v7095_v54  ;;  %v8625_v9 = vrot.slane %v8624_v62, 4  ;;  %v10600_v42 = vld [vmem:[#allocation3 + $0x31] sm:$0xff] }
 0x3db   :  { %v8665_v10 = vmax.f32 %v8663_v56, %v8664_v22  ;;  %v19174_v13 = vsel %vm141_vm3, %v8658_v38, -inf  ;;  %v8631_v32 = vsel %vm143_vm4, %v7096_v4, -inf  ;;  %v8638_v23 = vsel %vm143_vm4, %v7095_v54, -inf  ;;  %15247 = vmatmul.mubr.msk.f32.gmra.mxu1 %vm141_vm3, %v10600_v42  ;;  %15374 = vmatprep.mubr.msk.f32.mxu0 %vm141_vm3, %v10600_v42 }
 0x3dc   :  { %v8672_v15 = vmax.f32 %v8670_v2, %v8671_v21  ;;  %v8678_v8 = vrot.slane %v8677_v5, 1  ;;  %v10023_v20 = vmax.f32 %v19136_v35, %v19174_v13  ;;  %v8626_v0 = vmax.f32 %v8624_v62, %v8625_v9  ;;  %v6303_v2 = vpop.f32.mrf.mxu0 }
 0x3dd   :  { %v19181_v47 = vsel %vm141_vm3, %v8665_v10, -inf  ;;  %v8632_v16 = vrot.slane %v8631_v32, 4  ;;  %v8639_v46 = vrot.slane %v8638_v23, 4  ;;  %v8645_v28 = vsel %vm143_vm4, %v7097_v19, -inf }
 0x3de   :  { %v8679_v37 = vmax.f32 %v8677_v5, %v8678_v8  ;;  %v10026_v51 = vmax.f32 %v19141_v61, %v19181_v47  ;;  %v19187_v40 = vsel %vm141_vm3, %v8672_v15, -inf  ;;  %v8627_v6 = vrot.slane %v8626_v0, 2 }
 0x3df   :  { %v10029_v30 = vmax.f32 %v19144_v44, %v19187_v40  ;;  %v8633_v55 = vmax.f32 %v8631_v32, %v8632_v16  ;;  %v8640_v14 = vmax.f32 %v8638_v23, %v8639_v46  ;;  %v8646_v57 = vrot.slane %v8645_v28, 4 }
 0x3e0   :  { %v19192_v43 = vsel %vm141_vm3, %v8679_v37, -inf  ;;  %v8628_v45 = vmax.f32 %v8626_v0, %v8627_v6  ;;  %v6604_v48 = vadd.f32 %v18937_v3, %v6533_v26  ;;  %v6532_v56 = vadd.f32 %v6293_v50, %v18499_v12  ;;  %v21429_v50 = vld [vmem:[#allocation13_spill] sm:$0xff] }
 0x3e1   :  { %v10032_v31 = vmax.f32 %v19147_v60, %v19192_v43  ;;  %v8634_v54 = vrot.slane %v8633_v55, 2  ;;  %v8641_v4 = vrot.slane %v8640_v14, 2  ;;  %v8647_v38 = vmax.f32 %v8645_v28, %v8646_v57 }
 0x3e2   :  { %v8629_v22 = vrot.slane %v8628_v45, 1  ;;  %v6668_v62 = vmax.f32 %v6604_v48, 0.0  ;;  %v6603_v21 = vadd.f32 %v18937_v3, %v6532_v56  ;;  %v6535_v5 = vadd.f32 %v15174_v11, %v18503_v27 }
 0x3e3   :  { %v8635_v26 = vmax.f32 %v8633_v55, %v8634_v54  ;;  %v8642_v19 = vmax.f32 %v8640_v14, %v8641_v4  ;;  %v8648_v12 = vrot.slane %v8647_v38, 2  ;;  %v19203_v9 = vadd.f32 %v6303_v2, %v21429_v50 }
 0x3e4   :  { %v8630_v10 = vmax.f32 %v8628_v45, %v8629_v22  ;;  %v7132_v32 = vcombine.high %v6668_v62, %v6668_v62  ;;  %v7139_v23 = vrot.slane %v6668_v62, %v18372_v63  ;;  %v6667_v15 = vmax.f32 %v6603_v21, 0.0 }
 0x3e5   :  { %v8636_v8 = vrot.slane %v8635_v26, 1  ;;  %v8643_v0 = vrot.slane %v8642_v19, 1  ;;  %v8649_v16 = vmax.f32 %v8647_v38, %v8648_v12  ;;  %v19207_v46 = vadd.f32 %v18937_v3, %v6535_v5 }
 0x3e6   :  { %v10010_v28 = vsel %vm141_vm3, %v8630_v10, -inf  ;;  %v7146_v27 = vrot.slane %v7132_v32, %v18372_v63  ;;  %v7147_v11 = vcombine.high %v7139_v23, %v7139_v23  ;;  %v8708_v37 = vsel %vm143_vm4, %v7139_v23, -inf }
 0x3e7   :  { %v8637_v6 = vmax.f32 %v8635_v26, %v8636_v8  ;;  %v8644_v55 = vmax.f32 %v8642_v19, %v8643_v0  ;;  %v8650_v14 = vrot.slane %v8649_v16, 1  ;;  %v10011_v57 = vmax.f32 %v19157_v24, %v10010_v28 }
 0x3e8   :  { %v7148_v42 = vcombine.high %v7146_v27, %v7146_v27  ;;  %v8709_v45 = vrot.slane %v8708_v37, 4  ;;  %v8715_v48 = vsel %vm143_vm4, %v7147_v11, -inf  ;;  %v8722_v56 = vsel %vm143_vm4, %v7146_v27, -inf }
 0x3e9   :  { %v8651_v3 = vmax.f32 %v8649_v16, %v8650_v14  ;;  %v10013_v2 = vsel %vm141_vm3, %v8637_v6, -inf  ;;  %v10016_v54 = vsel %vm141_vm3, %v8644_v55, -inf  ;;  %v8716_v4 = vrot.slane %v8715_v48, 4 }
 0x3ea   :  { %v10014_v38 = vmax.f32 %v19161_v41, %v10013_v2  ;;  %v10017_v22 = vmax.f32 %v19165_v33, %v10016_v54  ;;  %v8710_v62 = vmax.f32 %v8708_v37, %v8709_v45  ;;  %v8723_v21 = vrot.slane %v8722_v56, 4 }
 0x3eb   :  { %v10019_v24 = vsel %vm141_vm3, %v8651_v3, -inf  ;;  %v8717_v5 = vmax.f32 %v8715_v48, %v8716_v4  ;;  %v8729_v26 = vsel %vm143_vm4, %v7148_v42, -inf  ;;  %v7115_v19 = vcombine.high %v6667_v15, %v6667_v15 }
 0x3ec   :  { %v10020_v12 = vmax.f32 %v19168_v53, %v10019_v24  ;;  %v10460_v50 = vsel %vm10425_vm5, %v10014_v38, %v10011_v57  ;;  %v8711_v10 = vrot.slane %v8710_v62, 2  ;;  %v8724_v32 = vmax.f32 %v8722_v56, %v8723_v21  ;;  %v15177_v38 = vpop.f32.mrf.mxu0 }
 0x3ed   :  { %v10461_v23 = vsel %vm10427_vm6, %v10017_v22, %v10460_v50  ;;  %v8718_v8 = vrot.slane %v8717_v5, 2  ;;  %v8730_v41 = vrot.slane %v8729_v26, 4  ;;  %v7122_v33 = vrot.slane %v6667_v15, %v18372_v63 }
 0x3ee   :  { %v10462_v0 = vsel %vm10429_vm7, %v10020_v12, %v10461_v23  ;;  %v8712_v16 = vmax.f32 %v8710_v62, %v8711_v10  ;;  %v8725_v28 = vrot.slane %v8724_v32, 2  ;;  %v7129_v27 = vrot.slane %v7115_v19, %v18372_v63  ;;  %v19261_v12 = vld [vmem:[%s21039_s2] ss:$0 sm:$0xff] }
 0x3ef   :  { %v10463_v53 = vsel %vm10431_vm8, %v10023_v20, %v10462_v0  ;;  %v8719_v11 = vmax.f32 %v8717_v5, %v8718_v8  ;;  %v8731_v37 = vmax.f32 %v8729_v26, %v8730_v41  ;;  %v7130_v6 = vcombine.high %v7122_v33, %v7122_v33 }
 0x3f0   :  { %v10464_v55 = vsel %vm10433_vm9, %v10026_v51, %v10463_v53  ;;  %v8713_v15 = vrot.slane %v8712_v16, 1  ;;  %v8726_v14 = vmax.f32 %v8724_v32, %v8725_v28  ;;  %v7131_v57 = vcombine.high %v7129_v27, %v7129_v27 }
 0x3f1   :  { %v10465_v42 = vsel %vm10435_vm10, %v10029_v30, %v10464_v55  ;;  %v8720_v45 = vrot.slane %v8719_v11, 1  ;;  %v8732_v35 = vrot.slane %v8731_v37, 2  ;;  %v8680_v13 = vsel %vm143_vm4, %v7122_v33, -inf }
 0x3f2   :  { %v10466_v20 = vsel %vm10437_vm11, %v10032_v31, %v10465_v42  ;;  %v8714_v61 = vmax.f32 %v8712_v16, %v8713_v15  ;;  %v8727_v47 = vrot.slane %v8726_v14, 1  ;;  %v8681_v51 = vrot.slane %v8680_v13, 4 }
 0x3f3   :  { %10565 = vst.msk [vmem:[#allocation3 + $0x51] sm:$0xff] %vm141_vm3, %v10466_v20  ;;  %v8721_v48 = vmax.f32 %v8719_v11, %v8720_v45  ;;  %v8733_v56 = vmax.f32 %v8731_v37, %v8732_v35  ;;  %v8687_v44 = vsel %vm143_vm4, %v7130_v6, -inf  ;;  %v8694_v40 = vsel %vm143_vm4, %v7129_v27, -inf }
 0x3f4   :  { %v8728_v30 = vmax.f32 %v8726_v14, %v8727_v47  ;;  %v19248_v3 = vsel %vm141_vm3, %v8714_v61, -inf  ;;  %v8682_v2 = vmax.f32 %v8680_v13, %v8681_v51  ;;  %v8688_v54 = vrot.slane %v8687_v44, 4 }
 0x3f5   :  { %v8734_v60 = vrot.slane %v8733_v56, 1  ;;  %v19251_v43 = vsel %vm141_vm3, %v8721_v48, -inf  ;;  %v8695_v31 = vrot.slane %v8694_v40, 4  ;;  %v8701_v4 = vsel %vm143_vm4, %v7131_v57, -inf }
 0x3f6   :  { %v19255_v22 = vsel %vm141_vm3, %v8728_v30, -inf  ;;  %v8683_v62 = vrot.slane %v8682_v2, 2  ;;  %v8689_v21 = vmax.f32 %v8687_v44, %v8688_v54  ;;  %v8702_v24 = vrot.slane %v8701_v4, 4 }
 0x3f7   :  { %v8735_v5 = vmax.f32 %v8733_v56, %v8734_v60  ;;  %v8696_v26 = vmax.f32 %v8694_v40, %v8695_v31  ;;  %v6670_v19 = vmax.f32 %v19207_v46, 0.0  ;;  %v6605_v50 = vadd.f32 %v19261_v12, %v19203_v9 }
 0x3f8   :  { %v8684_v10 = vmax.f32 %v8682_v2, %v8683_v62  ;;  %v8690_v32 = vrot.slane %v8689_v21, 2  ;;  %v8703_v23 = vmax.f32 %v8701_v4, %v8702_v24  ;;  %v6537_v8 = vadd.f32 %v15177_v38, %v18512_v59 }
 0x3f9   :  { %v19267_v41 = vsel %vm141_vm3, %v8735_v5, -inf  ;;  %v8697_v33 = vrot.slane %v8696_v26, 2  ;;  %v7166_v0 = vcombine.high %v6670_v19, %v6670_v19  ;;  %v7173_v46 = vrot.slane %v6670_v19, %v18372_v63 }
 0x3fa   :  { %v8685_v16 = vrot.slane %v8684_v10, 1  ;;  %v8691_v28 = vmax.f32 %v8689_v21, %v8690_v32  ;;  %v8704_v27 = vrot.slane %v8703_v23, 2  ;;  %v6669_v53 = vmax.f32 %v6605_v50, 0.0 }
 0x3fb   :  { %v8698_v11 = vmax.f32 %v8696_v26, %v8697_v33  ;;  %v7180_v37 = vrot.slane %v7166_v0, %v18372_v63  ;;  %v7181_v9 = vcombine.high %v7173_v46, %v7173_v46  ;;  %v8764_v6 = vsel %vm143_vm4, %v7173_v46, -inf }
 0x3fc   :  { %v8686_v55 = vmax.f32 %v8684_v10, %v8685_v16  ;;  %v8692_v15 = vrot.slane %v8691_v28, 1  ;;  %v8705_v59 = vmax.f32 %v8703_v23, %v8704_v27  ;;  %v8765_v14 = vrot.slane %v8764_v6, 4 }
 0x3fd   :  { %v8699_v57 = vrot.slane %v8698_v11, 1  ;;  %v7182_v42 = vcombine.high %v7180_v37, %v7180_v37  ;;  %v8771_v45 = vsel %vm143_vm4, %v7181_v9, -inf  ;;  %v8778_v35 = vsel %vm143_vm4, %v7180_v37, -inf }
 0x3fe   :  { %v8693_v13 = vmax.f32 %v8691_v28, %v8692_v15  ;;  %v8706_v20 = vrot.slane %v8705_v59, 1  ;;  %v19275_v61 = vsel %vm141_vm3, %v8686_v55, -inf  ;;  %v8766_v47 = vmax.f32 %v8764_v6, %v8765_v14 }
 0x3ff   :  { %v8700_v51 = vmax.f32 %v8698_v11, %v8699_v57  ;;  %v8772_v48 = vrot.slane %v8771_v45, 4  ;;  %v8779_v56 = vrot.slane %v8778_v35, 4  ;;  %v8785_v44 = vsel %vm143_vm4, %v7182_v42, -inf }
 0x400   :  { %v8707_v40 = vmax.f32 %v8705_v59, %v8706_v20  ;;  %v19279_v30 = vsel %vm141_vm3, %v8693_v13, -inf  ;;  %v8767_v2 = vrot.slane %v8766_v47, 2  ;;  %v8786_v54 = vrot.slane %v8785_v44, 4 }
 0x401   :  { %v19282_v60 = vsel %vm141_vm3, %v8700_v51, -inf  ;;  %v8773_v31 = vmax.f32 %v8771_v45, %v8772_v48  ;;  %v8780_v4 = vmax.f32 %v8778_v35, %v8779_v56  ;;  %v7149_v38 = vcombine.high %v6669_v53, %v6669_v53  ;;  %v6313_v45 = vpop.f32.mrf.mxu0 }
 0x402   :  { %v19285_v62 = vsel %vm141_vm3, %v8707_v40, -inf  ;;  %v8768_v21 = vmax.f32 %v8766_v47, %v8767_v2  ;;  %v8787_v24 = vmax.f32 %v8785_v44, %v8786_v54  ;;  %v7156_v5 = vrot.slane %v6669_v53, %v18372_v63 }
 0x403   :  { %v8774_v26 = vrot.slane %v8773_v31, 2  ;;  %v8781_v19 = vrot.slane %v8780_v4, 2  ;;  %v7163_v50 = vrot.slane %v7149_v38, %v18372_v63  ;;  %v6608_v10 = vadd.f32 %v19261_v12, %v6537_v8 }
 0x404   :  { %v8769_v32 = vrot.slane %v8768_v21, 1  ;;  %v8788_v23 = vrot.slane %v8787_v24, 2  ;;  %v7164_v33 = vcombine.high %v7156_v5, %v7156_v5  ;;  %v8736_v0 = vsel %vm143_vm4, %v7156_v5, -inf }
 0x405   :  { %v8775_v46 = vmax.f32 %v8773_v31, %v8774_v26  ;;  %v8782_v16 = vmax.f32 %v8780_v4, %v8781_v19  ;;  %v7165_v28 = vcombine.high %v7163_v50, %v7163_v50  ;;  %v8737_v27 = vrot.slane %v8736_v0, 4  ;;  %v10601_v4 = vld [vmem:[#allocation3 + $0x41] sm:$0xff]  ;;  %v15180_v26 = vpop.f32.mrf.mxu0 }
 0x406   :  { %v8770_v11 = vmax.f32 %v8768_v21, %v8769_v32  ;;  %v8789_v37 = vmax.f32 %v8787_v24, %v8788_v23  ;;  %v8743_v9 = vsel %vm143_vm4, %v7164_v33, -inf  ;;  %v8750_v53 = vsel %vm143_vm4, %v7163_v50, -inf  ;;  %15249 = vmatprep.mubr.msk.f32.mxu1 %vm141_vm3, %v10601_v4  ;;  %15375 = vmatmul.mubr.msk.f32.gmra.mxu0 %vm141_vm3, %v10601_v4 }
 0x407   :  { %v8776_v6 = vrot.slane %v8775_v46, 1  ;;  %v8783_v55 = vrot.slane %v8782_v16, 1  ;;  %v8738_v15 = vmax.f32 %v8736_v0, %v8737_v27  ;;  %v8744_v59 = vrot.slane %v8743_v9, 4 }
 0x408   :  { %v8790_v8 = vrot.slane %v8789_v37, 1  ;;  %v19294_v14 = vsel %vm141_vm3, %v8770_v11, -inf  ;;  %v8751_v57 = vrot.slane %v8750_v53, 4  ;;  %v8757_v42 = vsel %vm143_vm4, %v7165_v28, -inf }
 0x409   :  { %v8777_v35 = vmax.f32 %v8775_v46, %v8776_v6  ;;  %v8784_v13 = vmax.f32 %v8782_v16, %v8783_v55  ;;  %v10047_v20 = vmax.f32 %v19248_v3, %v19294_v14  ;;  %v8739_v47 = vrot.slane %v8738_v15, 2 }
 0x40a   :  { %v8791_v51 = vmax.f32 %v8789_v37, %v8790_v8  ;;  %v8745_v48 = vmax.f32 %v8743_v9, %v8744_v59  ;;  %v8752_v56 = vmax.f32 %v8750_v53, %v8751_v57  ;;  %v8758_v44 = vrot.slane %v8757_v42, 4 }
 0x40b   :  { %v19300_v40 = vsel %vm141_vm3, %v8777_v35, -inf  ;;  %v19303_v2 = vsel %vm141_vm3, %v8784_v13, -inf  ;;  %v8740_v54 = vmax.f32 %v8738_v15, %v8739_v47  ;;  %v6672_v31 = vmax.f32 %v6608_v10, 0.0 }
 0x40c   :  { %v10050_v38 = vmax.f32 %v19251_v43, %v19300_v40  ;;  %v10053_v21 = vmax.f32 %v19255_v22, %v19303_v2  ;;  %v19310_v24 = vsel %vm141_vm3, %v8791_v51, -inf  ;;  %v8746_v5 = vrot.slane %v8745_v48, 2 }
 0x40d   :  { %v10056_v19 = vmax.f32 %v19267_v41, %v19310_v24  ;;  %v8741_v50 = vrot.slane %v8740_v54, 1  ;;  %v8753_v10 = vrot.slane %v8752_v56, 2  ;;  %v8759_v32 = vmax.f32 %v8757_v42, %v8758_v44 }
 0x40e   :  { %v8747_v23 = vmax.f32 %v8745_v48, %v8746_v5  ;;  %v7200_v33 = vcombine.high %v6672_v31, %v6672_v31  ;;  %v7207_v0 = vrot.slane %v6672_v31, %v18372_v63  ;;  %v6536_v46 = vadd.f32 %v6313_v45, %v18517_v58 }
 0x40f   :  { %v8742_v16 = vmax.f32 %v8740_v54, %v8741_v50  ;;  %v8754_v28 = vmax.f32 %v8752_v56, %v8753_v10  ;;  %v8760_v27 = vrot.slane %v8759_v32, 2  ;;  %v6539_v11 = vadd.f32 %v15180_v26, %v18521_v29 }
 0x410   :  { %v8748_v37 = vrot.slane %v8747_v23, 1  ;;  %v7214_v9 = vrot.slane %v7200_v33, %v18372_v63  ;;  %v7215_v53 = vcombine.high %v7207_v0, %v7207_v0  ;;  %v8820_v6 = vsel %vm143_vm4, %v7207_v0, -inf }
 0x411   :  { %v8755_v55 = vrot.slane %v8754_v28, 1  ;;  %v8761_v15 = vmax.f32 %v8759_v32, %v8760_v27  ;;  %v10034_v59 = vsel %vm141_vm3, %v8742_v16, -inf  ;;  %v8821_v8 = vrot.slane %v8820_v6, 4 }
 0x412   :  { %v8749_v57 = vmax.f32 %v8747_v23, %v8748_v37  ;;  %v10035_v42 = vmax.f32 %v19275_v61, %v10034_v59  ;;  %v7216_v58 = vcombine.high %v7214_v9, %v7214_v9  ;;  %v8827_v45 = vsel %vm143_vm4, %v7215_v53, -inf }
 0x413   :  { %v8756_v35 = vmax.f32 %v8754_v28, %v8755_v55  ;;  %v8762_v13 = vrot.slane %v8761_v15, 1  ;;  %v8822_v29 = vmax.f32 %v8820_v6, %v8821_v8  ;;  %v8828_v47 = vrot.slane %v8827_v45, 4 }
 0x414   :  { %v10037_v51 = vsel %vm141_vm3, %v8749_v57, -inf  ;;  %v8834_v48 = vsel %vm143_vm4, %v7214_v9, -inf  ;;  %v8841_v56 = vsel %vm143_vm4, %v7216_v58, -inf  ;;  %v6607_v44 = vadd.f32 %v19261_v12, %v6536_v46 }
 0x415   :  { %v8763_v54 = vmax.f32 %v8761_v15, %v8762_v13  ;;  %v10038_v31 = vmax.f32 %v19279_v30, %v10037_v51  ;;  %v10040_v61 = vsel %vm141_vm3, %v8756_v35, -inf  ;;  %v8823_v4 = vrot.slane %v8822_v29, 2 }
 0x416   :  { %v10041_v5 = vmax.f32 %v19282_v60, %v10040_v61  ;;  %v8829_v26 = vmax.f32 %v8827_v45, %v8828_v47  ;;  %v8835_v50 = vrot.slane %v8834_v48, 4  ;;  %v8842_v10 = vrot.slane %v8841_v56, 4 }
 0x417   :  { %v10043_v32 = vsel %vm141_vm3, %v8763_v54, -inf  ;;  %v10467_v23 = vsel %vm10425_vm5, %v10038_v31, %v10035_v42  ;;  %v8824_v33 = vmax.f32 %v8822_v29, %v8823_v4  ;;  %v6671_v0 = vmax.f32 %v6607_v44, 0.0  ;;  %v6323_v54 = vpop.f32.mrf.mxu0 }
 0x418   :  { %v10044_v16 = vmax.f32 %v19285_v62, %v10043_v32  ;;  %v10468_v46 = vsel %vm10427_vm6, %v10041_v5, %v10467_v23  ;;  %v8830_v28 = vrot.slane %v8829_v26, 2  ;;  %v8836_v30 = vmax.f32 %v8834_v48, %v8835_v50 }
 0x419   :  { %v8825_v27 = vrot.slane %v8824_v33, 1  ;;  %v8843_v37 = vmax.f32 %v8841_v56, %v8842_v10  ;;  %v7183_v9 = vcombine.high %v6671_v0, %v6671_v0  ;;  %v7190_v60 = vrot.slane %v6671_v0, %v18372_v63 }
 0x41a   :  { %v10469_v53 = vsel %vm10429_vm7, %v10044_v16, %v10468_v46  ;;  %v8831_v6 = vmax.f32 %v8829_v26, %v8830_v28  ;;  %v8837_v55 = vrot.slane %v8836_v30, 2  ;;  %v6610_v15 = vadd.f32 %v19261_v12, %v6539_v11  ;;  %v21430_v16 = vld [vmem:[#allocation36_spill] sm:$0xff] }
 0x41b   :  { %v10470_v62 = vsel %vm10431_vm8, %v10047_v20, %v10469_v53  ;;  %v8826_v59 = vmax.f32 %v8824_v33, %v8825_v27  ;;  %v8844_v8 = vrot.slane %v8843_v37, 2  ;;  %v7197_v57 = vrot.slane %v7183_v9, %v18372_v63  ;;  %v15183_v9 = vpop.f32.mrf.mxu0 }
 0x41c   :  { %v10471_v42 = vsel %vm10433_vm9, %v10050_v38, %v10470_v62  ;;  %v8832_v58 = vrot.slane %v8831_v6, 1  ;;  %v8838_v45 = vmax.f32 %v8836_v30, %v8837_v55  ;;  %v7198_v35 = vcombine.high %v7190_v60, %v7190_v60 }
 0x41d   :  { %v10472_v11 = vsel %vm10435_vm10, %v10053_v21, %v10471_v42  ;;  %v8845_v3 = vmax.f32 %v8843_v37, %v8844_v8  ;;  %v19352_v14 = vsel %vm141_vm3, %v8826_v59, -inf  ;;  %v7199_v20 = vcombine.high %v7197_v57, %v7197_v57 }
 0x41e   :  { %v10473_v43 = vsel %vm10437_vm11, %v10056_v19, %v10472_v11  ;;  %v8833_v40 = vmax.f32 %v8831_v6, %v8832_v58  ;;  %v8839_v38 = vrot.slane %v8838_v45, 1  ;;  %v8792_v13 = vsel %vm143_vm4, %v7190_v60, -inf }
 0x41f   :  { %10566 = vst.msk [vmem:[#allocation3 + $0x61] sm:$0xff] %vm141_vm3, %v10473_v43  ;;  %v8846_v29 = vrot.slane %v8845_v3, 1  ;;  %v8793_v22 = vrot.slane %v8792_v13, 4  ;;  %v8799_v2 = vsel %vm143_vm4, %v7198_v35, -inf  ;;  %v8806_v21 = vsel %vm143_vm4, %v7197_v57, -inf  ;;  %v6333_v43 = vpop.f32.mrf.mxu0 }
 0x420   :  { %v8840_v47 = vmax.f32 %v8838_v45, %v8839_v38  ;;  %v19363_v51 = vsel %vm141_vm3, %v8833_v40, -inf  ;;  %v8800_v48 = vrot.slane %v8799_v2, 4  ;;  %v8807_v41 = vrot.slane %v8806_v21, 4 }
 0x421   :  { %v8847_v24 = vmax.f32 %v8845_v3, %v8846_v29  ;;  %v8794_v19 = vmax.f32 %v8792_v13, %v8793_v22  ;;  %v8813_v56 = vsel %vm143_vm4, %v7199_v20, -inf  ;;  %v6674_v44 = vmax.f32 %v6610_v15, 0.0 }
 0x422   :  { %v19367_v31 = vsel %vm141_vm3, %v8840_v47, -inf  ;;  %v8801_v61 = vmax.f32 %v8799_v2, %v8800_v48  ;;  %v8808_v4 = vmax.f32 %v8806_v21, %v8807_v41  ;;  %v8814_v5 = vrot.slane %v8813_v56, 4 }
 0x423   :  { %v19370_v26 = vsel %vm141_vm3, %v8847_v24, -inf  ;;  %v8795_v50 = vrot.slane %v8794_v19, 2  ;;  %v7234_v10 = vcombine.high %v6674_v44, %v6674_v44  ;;  %v7241_v32 = vrot.slane %v6674_v44, %v18372_v63 }
 0x424   :  { %v8802_v23 = vrot.slane %v8801_v61, 2  ;;  %v8809_v33 = vrot.slane %v8808_v4, 2  ;;  %v8815_v0 = vmax.f32 %v8813_v56, %v8814_v5  ;;  %v6538_v46 = vadd.f32 %v6323_v54, %v21430_v16 }
 0x425   :  { %v8796_v28 = vmax.f32 %v8794_v19, %v8795_v50  ;;  %v7248_v30 = vrot.slane %v7234_v10, %v18372_v63  ;;  %v7249_v27 = vcombine.high %v7241_v32, %v7241_v32  ;;  %v8876_v37 = vsel %vm143_vm4, %v7241_v32, -inf  ;;  %v21431_v10 = vld [vmem:[#allocation14_spill] sm:$0xff] }
 0x426   :  { %v8803_v60 = vmax.f32 %v8801_v61, %v8802_v23  ;;  %v8810_v53 = vmax.f32 %v8808_v4, %v8809_v33  ;;  %v8816_v6 = vrot.slane %v8815_v0, 2  ;;  %v8877_v55 = vrot.slane %v8876_v37, 4  ;;  %v15186_v4 = vpop.f32.mrf.mxu0  ;;  %v21432_v23 = vld [vmem:[#allocation37_spill] sm:$0xff] }
 0x427   :  { %v8797_v15 = vrot.slane %v8796_v28, 1  ;;  %v7250_v62 = vcombine.high %v7248_v30, %v7248_v30  ;;  %v8883_v59 = vsel %vm143_vm4, %v7249_v27, -inf  ;;  %v8890_v8 = vsel %vm143_vm4, %v7248_v30, -inf }
 0x428   :  { %v8804_v57 = vrot.slane %v8803_v60, 1  ;;  %v8811_v42 = vrot.slane %v8810_v53, 1  ;;  %v8817_v58 = vmax.f32 %v8815_v0, %v8816_v6  ;;  %v8878_v45 = vmax.f32 %v8876_v37, %v8877_v55 }
 0x429   :  { %v8798_v35 = vmax.f32 %v8796_v28, %v8797_v15  ;;  %v8884_v11 = vrot.slane %v8883_v59, 4  ;;  %v8891_v3 = vrot.slane %v8890_v8, 4  ;;  %v8897_v20 = vsel %vm143_vm4, %v7250_v62, -inf }
 0x42a   :  { %v8805_v40 = vmax.f32 %v8803_v60, %v8804_v57  ;;  %v8812_v38 = vmax.f32 %v8810_v53, %v8811_v42  ;;  %v8818_v13 = vrot.slane %v8817_v58, 1  ;;  %v8879_v29 = vrot.slane %v8878_v45, 2  ;;  %v21433_v53 = vld [vmem:[#allocation30_spill] sm:$0xff] }
 0x42b   :  { %v19380_v22 = vsel %vm141_vm3, %v8798_v35, -inf  ;;  %v8885_v2 = vmax.f32 %v8883_v59, %v8884_v11  ;;  %v8892_v21 = vmax.f32 %v8890_v8, %v8891_v3  ;;  %v8898_v47 = vrot.slane %v8897_v20, 4 }
 0x42c   :  { %v8819_v48 = vmax.f32 %v8817_v58, %v8818_v13  ;;  %v19383_v41 = vsel %vm141_vm3, %v8805_v40, -inf  ;;  %v19386_v24 = vsel %vm141_vm3, %v8812_v38, -inf  ;;  %v8880_v19 = vmax.f32 %v8878_v45, %v8879_v29 }
 0x42d   :  { %v8886_v56 = vrot.slane %v8885_v2, 2  ;;  %v8893_v44 = vrot.slane %v8892_v21, 2  ;;  %v8899_v54 = vmax.f32 %v8897_v20, %v8898_v47  ;;  %v6609_v61 = vadd.f32 %v19261_v12, %v6538_v46 }
 0x42e   :  { %v19390_v5 = vsel %vm141_vm3, %v8819_v48, -inf  ;;  %v8881_v50 = vrot.slane %v8880_v19, 1  ;;  %v6541_v32 = vadd.f32 %v15183_v9, %v21431_v10  ;;  %v6540_v33 = vadd.f32 %v6333_v43, %v21432_v23 }
 0x42f   :  { %v8887_v0 = vmax.f32 %v8885_v2, %v8886_v56  ;;  %v8894_v16 = vmax.f32 %v8892_v21, %v8893_v44  ;;  %v8900_v28 = vrot.slane %v8899_v54, 2  ;;  %v6673_v30 = vmax.f32 %v6609_v61, 0.0 }
 0x430   :  { %v8882_v27 = vmax.f32 %v8880_v19, %v8881_v50  ;;  %v6612_v37 = vadd.f32 %v19261_v12, %v6541_v32  ;;  %v6611_v60 = vadd.f32 %v19261_v12, %v6540_v33  ;;  %v19397_v46 = vadd.f32 %v15186_v4, %v21433_v53 }
 0x431   :  { %v8888_v6 = vrot.slane %v8887_v0, 1  ;;  %v8895_v55 = vrot.slane %v8894_v16, 1  ;;  %v8901_v15 = vmax.f32 %v8899_v54, %v8900_v28  ;;  %v7217_v62 = vcombine.high %v6673_v30, %v6673_v30 }
 0x432   :  { %v19400_v9 = vsel %vm141_vm3, %v8882_v27, -inf  ;;  %v7224_v59 = vrot.slane %v6673_v30, %v18372_v63  ;;  %v6676_v8 = vmax.f32 %v6612_v37, 0.0  ;;  %v19403_v57 = vmax.f32 %v6611_v60, 0.0  ;;  %v10602_v37 = vld [vmem:[#allocation3 + $0x51] sm:$0xff] }
 0x433   :  { %v8889_v42 = vmax.f32 %v8887_v0, %v8888_v6  ;;  %v8896_v58 = vmax.f32 %v8894_v16, %v8895_v55  ;;  %v8902_v45 = vrot.slane %v8901_v15, 1  ;;  %v10071_v35 = vmax.f32 %v19352_v14, %v19400_v9  ;;  %15250 = vmatmul.mubr.msk.f32.gmra.mxu1 %vm141_vm3, %v10602_v37  ;;  %15377 = vmatprep.mubr.msk.f32.mxu0 %vm141_vm3, %v10602_v37 }
 0x434   :  { %v7231_v11 = vrot.slane %v7217_v62, %v18372_v63  ;;  %v7232_v3 = vcombine.high %v7224_v59, %v7224_v59  ;;  %v8848_v20 = vsel %vm143_vm4, %v7224_v59, -inf  ;;  %v7268_v43 = vcombine.high %v6676_v8, %v6676_v8 }
 0x435   :  { %v8903_v40 = vmax.f32 %v8901_v15, %v8902_v45  ;;  %v19410_v38 = vsel %vm141_vm3, %v8889_v42, -inf  ;;  %v19413_v13 = vsel %vm141_vm3, %v8896_v58, -inf  ;;  %v8849_v29 = vrot.slane %v8848_v20, 4 }
 0x436   :  { %v10074_v2 = vmax.f32 %v19363_v51, %v19410_v38  ;;  %v10077_v21 = vmax.f32 %v19367_v31, %v19413_v13  ;;  %v7233_v47 = vcombine.high %v7231_v11, %v7231_v11  ;;  %v8855_v48 = vsel %vm143_vm4, %v7232_v3, -inf }
 0x437   :  { %v19421_v19 = vsel %vm141_vm3, %v8903_v40, -inf  ;;  %v8850_v56 = vmax.f32 %v8848_v20, %v8849_v29  ;;  %v8856_v44 = vrot.slane %v8855_v48, 4  ;;  %v8862_v54 = vsel %vm143_vm4, %v7231_v11, -inf }
 0x438   :  { %v10080_v61 = vmax.f32 %v19370_v26, %v19421_v19  ;;  %v8863_v4 = vrot.slane %v8862_v54, 4  ;;  %v8869_v50 = vsel %vm143_vm4, %v7233_v47, -inf  ;;  %v7275_v10 = vrot.slane %v6676_v8, %v18372_v63 }
 0x439   :  { %v8851_v32 = vrot.slane %v8850_v56, 2  ;;  %v8857_v23 = vmax.f32 %v8855_v48, %v8856_v44  ;;  %v8870_v33 = vrot.slane %v8869_v50, 4  ;;  %v7282_v0 = vrot.slane %v7268_v43, %v18372_v63 }
 0x43a   :  { %v8864_v16 = vmax.f32 %v8862_v54, %v8863_v4  ;;  %v7283_v28 = vcombine.high %v7275_v10, %v7275_v10  ;;  %v8932_v30 = vsel %vm143_vm4, %v7275_v10, -inf  ;;  %v7251_v27 = vcombine.high %v19403_v57, %v19403_v57 }
 0x43b   :  { %v8852_v60 = vmax.f32 %v8850_v56, %v8851_v32  ;;  %v8858_v53 = vrot.slane %v8857_v23, 2  ;;  %v8871_v6 = vmax.f32 %v8869_v50, %v8870_v33  ;;  %v7284_v55 = vcombine.high %v7282_v0, %v7282_v0 }
 0x43c   :  { %v8865_v15 = vrot.slane %v8864_v16, 2  ;;  %v8933_v62 = vrot.slane %v8932_v30, 4  ;;  %v8939_v59 = vsel %vm143_vm4, %v7283_v28, -inf  ;;  %v8946_v8 = vsel %vm143_vm4, %v7282_v0, -inf }
 0x43d   :  { %v8853_v42 = vrot.slane %v8852_v60, 1  ;;  %v8859_v58 = vmax.f32 %v8857_v23, %v8858_v53  ;;  %v8872_v45 = vrot.slane %v8871_v6, 2  ;;  %v8940_v11 = vrot.slane %v8939_v59, 4 }
 0x43e   :  { %v8866_v3 = vmax.f32 %v8864_v16, %v8865_v15  ;;  %v8934_v20 = vmax.f32 %v8932_v30, %v8933_v62  ;;  %v8947_v43 = vrot.slane %v8946_v8, 4  ;;  %v8953_v40 = vsel %vm143_vm4, %v7284_v55, -inf }
 0x43f   :  { %v8854_v29 = vmax.f32 %v8852_v60, %v8853_v42  ;;  %v8860_v47 = vrot.slane %v8859_v58, 1  ;;  %v8873_v48 = vmax.f32 %v8871_v6, %v8872_v45  ;;  %v8941_v56 = vmax.f32 %v8939_v59, %v8940_v11 }
 0x440   :  { %v8867_v44 = vrot.slane %v8866_v3, 1  ;;  %v8935_v54 = vrot.slane %v8934_v20, 2  ;;  %v8948_v4 = vmax.f32 %v8946_v8, %v8947_v43  ;;  %v8954_v50 = vrot.slane %v8953_v40, 4  ;;  %v6343_v8 = vpop.f32.mrf.mxu0 }
 0x441   :  { %v8861_v10 = vmax.f32 %v8859_v58, %v8860_v47  ;;  %v8874_v32 = vrot.slane %v8873_v48, 1  ;;  %v10058_v33 = vsel %vm141_vm3, %v8854_v29, -inf  ;;  %v8942_v23 = vrot.slane %v8941_v56, 2 }
 0x442   :  { %v8868_v0 = vmax.f32 %v8866_v3, %v8867_v44  ;;  %v10059_v16 = vmax.f32 %v19380_v22, %v10058_v33  ;;  %v8936_v28 = vmax.f32 %v8934_v20, %v8935_v54  ;;  %v8949_v30 = vrot.slane %v8948_v4, 2 }
 0x443   :  { %v8875_v37 = vmax.f32 %v8873_v48, %v8874_v32  ;;  %v10061_v60 = vsel %vm141_vm3, %v8861_v10, -inf  ;;  %v8943_v53 = vmax.f32 %v8941_v56, %v8942_v23  ;;  %v8955_v6 = vmax.f32 %v8953_v40, %v8954_v50 }
 0x444   :  { %v10062_v55 = vmax.f32 %v19383_v41, %v10061_v60  ;;  %v10064_v15 = vsel %vm141_vm3, %v8868_v0, -inf  ;;  %v8937_v62 = vrot.slane %v8936_v28, 1  ;;  %v8950_v59 = vmax.f32 %v8948_v4, %v8949_v30 }
 0x445   :  { %v10065_v42 = vmax.f32 %v19386_v24, %v10064_v15  ;;  %v10067_v58 = vsel %vm141_vm3, %v8875_v37, -inf  ;;  %v8944_v45 = vrot.slane %v8943_v53, 1  ;;  %v8956_v22 = vrot.slane %v8955_v6, 2 }
 0x446   :  { %v10068_v11 = vmax.f32 %v19390_v5, %v10067_v58  ;;  %v10474_v3 = vsel %vm10425_vm5, %v10062_v55, %v10059_v16  ;;  %v8938_v20 = vmax.f32 %v8936_v28, %v8937_v62  ;;  %v8951_v43 = vrot.slane %v8950_v59, 1  ;;  %v15189_v5 = vpop.f32.mrf.mxu0  ;;  %v21435_v55 = vld [vmem:[#allocation32_spill] sm:$0xff] }
 0x447   :  { %v10475_v40 = vsel %vm10427_vm6, %v10065_v42, %v10474_v3  ;;  %v8945_v41 = vmax.f32 %v8943_v53, %v8944_v45  ;;  %v8957_v29 = vmax.f32 %v8955_v6, %v8956_v22  ;;  %v7258_v47 = vrot.slane %v19403_v57, %v18372_v63 }
 0x448   :  { %v10476_v48 = vsel %vm10429_vm7, %v10068_v11, %v10475_v40  ;;  %v8952_v24 = vmax.f32 %v8950_v59, %v8951_v43  ;;  %v19451_v56 = vsel %vm141_vm3, %v8938_v20, -inf  ;;  %v7265_v44 = vrot.slane %v7251_v27, %v18372_v63  ;;  %v6353_v16 = vpop.f32.mrf.mxu0 }
 0x449   :  { %v10477_v54 = vsel %vm10431_vm8, %v10071_v35, %v10476_v48  ;;  %v8958_v4 = vrot.slane %v8957_v29, 1  ;;  %v19459_v50 = vsel %vm141_vm3, %v8945_v41, -inf  ;;  %v7266_v10 = vcombine.high %v7258_v47, %v7258_v47 }
 0x44a   :  { %v10478_v57 = vsel %vm10433_vm9, %v10074_v2, %v10477_v54  ;;  %v19466_v32 = vsel %vm141_vm3, %v8952_v24, -inf  ;;  %v7267_v27 = vcombine.high %v7265_v44, %v7265_v44  ;;  %v8904_v33 = vsel %vm143_vm4, %v7258_v47, -inf }
 0x44b   :  { %v10479_v14 = vsel %vm10435_vm10, %v10077_v21, %v10478_v57  ;;  %v8959_v9 = vmax.f32 %v8957_v29, %v8958_v4  ;;  %v8905_v35 = vrot.slane %v8904_v33, 4  ;;  %v8911_v23 = vsel %vm143_vm4, %v7266_v10, -inf }
 0x44c   :  { %v10480_v51 = vsel %vm10437_vm11, %v10080_v61, %v10479_v14  ;;  %v8912_v38 = vrot.slane %v8911_v23, 4  ;;  %v8918_v2 = vsel %vm143_vm4, %v7265_v44, -inf  ;;  %v8925_v0 = vsel %vm143_vm4, %v7267_v27, -inf  ;;  %v21434_v61 = vld [vmem:[#allocation31_spill] sm:$0xff] }
 0x44d   :  { %10567 = vst.msk [vmem:[#allocation3 + $0x71] sm:$0xff] %vm141_vm3, %v10480_v51  ;;  %v19482_v31 = vsel %vm141_vm3, %v8959_v9, -inf  ;;  %v8906_v13 = vmax.f32 %v8904_v33, %v8905_v35  ;;  %v8919_v21 = vrot.slane %v8918_v2, 4  ;;  %v8926_v28 = vrot.slane %v8925_v0, 4 }
 0x44e   :  { %v8913_v30 = vmax.f32 %v8911_v23, %v8912_v38  ;;  %v6614_v26 = vadd.f32 %v19261_v12, %v19397_v46  ;;  %v6542_v19 = vadd.f32 %v6343_v8, %v18547_v7  ;;  %v6545_v37 = vadd.f32 %v15189_v5, %v21434_v61 }
 0x44f   :  { %v8907_v60 = vrot.slane %v8906_v13, 2  ;;  %v8920_v53 = vmax.f32 %v8918_v2, %v8919_v21  ;;  %v8927_v6 = vmax.f32 %v8925_v0, %v8926_v28  ;;  %v6544_v15 = vadd.f32 %v6353_v16, %v21435_v55 }
 0x450   :  { %v8914_v62 = vrot.slane %v8913_v30, 2  ;;  %v6678_v59 = vmax.f32 %v6614_v26, 0.0  ;;  %v6613_v42 = vadd.f32 %v19261_v12, %v6542_v19  ;;  %v6616_v58 = vadd.f32 %v19261_v12, %v6545_v37 }
 0x451   :  { %v8908_v45 = vmax.f32 %v8906_v13, %v8907_v60  ;;  %v8921_v22 = vrot.slane %v8920_v53, 2  ;;  %v8928_v11 = vrot.slane %v8927_v6, 2  ;;  %v19492_v46 = vadd.f32 %v19261_v12, %v6544_v15 }
 0x452   :  { %v8915_v7 = vmax.f32 %v8913_v30, %v8914_v62  ;;  %v7302_v8 = vcombine.high %v6678_v59, %v6678_v59  ;;  %v7309_v3 = vrot.slane %v6678_v59, %v18372_v63  ;;  %v6677_v20 = vmax.f32 %v6613_v42, 0.0 }
 0x453   :  { %v8909_v43 = vrot.slane %v8908_v45, 1  ;;  %v8922_v40 = vmax.f32 %v8920_v53, %v8921_v22  ;;  %v8929_v41 = vmax.f32 %v8927_v6, %v8928_v11  ;;  %v6680_v29 = vmax.f32 %v6616_v58, 0.0 }
 0x454   :  { %v8916_v47 = vrot.slane %v8915_v7, 1  ;;  %v7316_v48 = vrot.slane %v7302_v8, %v18372_v63  ;;  %v7317_v24 = vcombine.high %v7309_v3, %v7309_v3  ;;  %v8988_v44 = vsel %vm143_vm4, %v7309_v3, -inf }
 0x455   :  { %v8910_v5 = vmax.f32 %v8908_v45, %v8909_v43  ;;  %v8923_v54 = vrot.slane %v8922_v40, 1  ;;  %v8930_v4 = vrot.slane %v8929_v41, 1  ;;  %v8989_v12 = vrot.slane %v8988_v44, 4 }
 0x456   :  { %v8917_v10 = vmax.f32 %v8915_v7, %v8916_v47  ;;  %v7318_v57 = vcombine.high %v7316_v48, %v7316_v48  ;;  %v8995_v27 = vsel %vm143_vm4, %v7317_v24, -inf  ;;  %v9002_v33 = vsel %vm143_vm4, %v7316_v48, -inf }
 0x457   :  { %v8924_v14 = vmax.f32 %v8922_v40, %v8923_v54  ;;  %v8931_v9 = vmax.f32 %v8929_v41, %v8930_v4  ;;  %v19500_v35 = vsel %vm141_vm3, %v8910_v5, -inf  ;;  %v8990_v23 = vmax.f32 %v8988_v44, %v8989_v12 }
 0x458   :  { %v19503_v51 = vsel %vm141_vm3, %v8917_v10, -inf  ;;  %v8996_v38 = vrot.slane %v8995_v27, 4  ;;  %v9003_v2 = vrot.slane %v9002_v33, 4  ;;  %v9009_v0 = vsel %vm143_vm4, %v7318_v57, -inf }
 0x459   :  { %v19507_v16 = vsel %vm141_vm3, %v8924_v14, -inf  ;;  %v19510_v13 = vsel %vm141_vm3, %v8931_v9, -inf  ;;  %v8991_v21 = vrot.slane %v8990_v23, 2  ;;  %v9010_v28 = vrot.slane %v9009_v0, 4 }
 0x45a   :  { %v8997_v30 = vmax.f32 %v8995_v27, %v8996_v38  ;;  %v9004_v26 = vmax.f32 %v9002_v33, %v9003_v2  ;;  %v7285_v19 = vcombine.high %v6677_v20, %v6677_v20  ;;  %v7292_v61 = vrot.slane %v6677_v20, %v18372_v63  ;;  %v10603_v38 = vld [vmem:[#allocation3 + $0x61] sm:$0xff] }
 0x45b   :  { %v8992_v37 = vmax.f32 %v8990_v23, %v8991_v21  ;;  %v9011_v60 = vmax.f32 %v9009_v0, %v9010_v28  ;;  %v7336_v53 = vcombine.high %v6680_v29, %v6680_v29  ;;  %v7343_v6 = vrot.slane %v6680_v29, %v18372_v63  ;;  %15252 = vmatprep.mubr.msk.f32.mxu1 %vm141_vm3, %v10603_v38 }
 0x45c   :  { %v8998_v55 = vrot.slane %v8997_v30, 2  ;;  %v9005_v15 = vrot.slane %v9004_v26, 2  ;;  %v7299_v62 = vrot.slane %v7285_v19, %v18372_v63  ;;  %v7300_v59 = vcombine.high %v7292_v61, %v7292_v61  ;;  %15378 = vmatmul.mubr.msk.f32.gmra.mxu0 %vm141_vm3, %v10603_v38 }
 0x45d   :  { %v8993_v42 = vrot.slane %v8992_v37, 1  ;;  %v9012_v58 = vrot.slane %v9011_v60, 2  ;;  %v8960_v45 = vsel %vm143_vm4, %v7292_v61, -inf  ;;  %v7350_v22 = vrot.slane %v7336_v53, %v18372_v63 }
 0x45e   :  { %v8999_v11 = vmax.f32 %v8997_v30, %v8998_v55  ;;  %v9006_v7 = vmax.f32 %v9004_v26, %v9005_v15  ;;  %v7301_v8 = vcombine.high %v7299_v62, %v7299_v62  ;;  %v8961_v3 = vrot.slane %v8960_v45, 4 }
 0x45f   :  { %v8994_v20 = vmax.f32 %v8992_v37, %v8993_v42  ;;  %v9013_v43 = vmax.f32 %v9011_v60, %v9012_v58  ;;  %v8967_v40 = vsel %vm143_vm4, %v7300_v59, -inf  ;;  %v8974_v41 = vsel %vm143_vm4, %v7299_v62, -inf }
 0x460   :  { %v9000_v29 = vrot.slane %v8999_v11, 1  ;;  %v9007_v47 = vrot.slane %v9006_v7, 1  ;;  %v8962_v48 = vmax.f32 %v8960_v45, %v8961_v3  ;;  %v8968_v24 = vrot.slane %v8967_v40, 4 }
 0x461   :  { %v9014_v44 = vrot.slane %v9013_v43, 1  ;;  %v19520_v5 = vsel %vm141_vm3, %v8994_v20, -inf  ;;  %v8975_v54 = vrot.slane %v8974_v41, 4  ;;  %v8981_v4 = vsel %vm143_vm4, %v7301_v8, -inf }
 0x462   :  { %v9001_v12 = vmax.f32 %v8999_v11, %v9000_v29  ;;  %v9008_v10 = vmax.f32 %v9006_v7, %v9007_v47  ;;  %v10095_v57 = vmax.f32 %v19451_v56, %v19520_v5  ;;  %v8963_v27 = vrot.slane %v8962_v48, 2 }
 0x463   :  { %v9015_v33 = vmax.f32 %v9013_v43, %v9014_v44  ;;  %v8969_v14 = vmax.f32 %v8967_v40, %v8968_v24  ;;  %v8976_v9 = vmax.f32 %v8974_v41, %v8975_v54  ;;  %v8982_v23 = vrot.slane %v8981_v4, 4 }
 0x464   :  { %v19526_v2 = vsel %vm141_vm3, %v9001_v12, -inf  ;;  %v19529_v0 = vsel %vm141_vm3, %v9008_v10, -inf  ;;  %v8964_v21 = vmax.f32 %v8962_v48, %v8963_v27  ;;  %v7351_v28 = vcombine.high %v7343_v6, %v7343_v6 }
 0x465   :  { %v10098_v30 = vmax.f32 %v19459_v50, %v19526_v2  ;;  %v10101_v26 = vmax.f32 %v19466_v32, %v19529_v0  ;;  %v19538_v19 = vsel %vm141_vm3, %v9015_v33, -inf  ;;  %v8970_v61 = vrot.slane %v8969_v14, 2 }
 0x466   :  { %v10104_v37 = vmax.f32 %v19482_v31, %v19538_v19  ;;  %v8965_v60 = vrot.slane %v8964_v21, 1  ;;  %v8977_v53 = vrot.slane %v8976_v9, 2  ;;  %v8983_v55 = vmax.f32 %v8981_v4, %v8982_v23 }
 0x467   :  { %v8971_v15 = vmax.f32 %v8969_v14, %v8970_v61  ;;  %v7352_v62 = vcombine.high %v7350_v22, %v7350_v22  ;;  %v9044_v59 = vsel %vm143_vm4, %v7343_v6, -inf  ;;  %v9051_v42 = vsel %vm143_vm4, %v7351_v28, -inf }
 0x468   :  { %v8966_v58 = vmax.f32 %v8964_v21, %v8965_v60  ;;  %v8978_v45 = vmax.f32 %v8976_v9, %v8977_v53  ;;  %v8984_v11 = vrot.slane %v8983_v55, 2  ;;  %v9045_v7 = vrot.slane %v9044_v59, 4  ;;  %v15192_v53 = vpop.f32.mrf.mxu0 }
 0x469   :  { %v8972_v8 = vrot.slane %v8971_v15, 1  ;;  %v9052_v3 = vrot.slane %v9051_v42, 4  ;;  %v9058_v20 = vsel %vm143_vm4, %v7350_v22, -inf  ;;  %v9065_v43 = vsel %vm143_vm4, %v7352_v62, -inf }
 0x46a   :  { %v8979_v40 = vrot.slane %v8978_v45, 1  ;;  %v8985_v41 = vmax.f32 %v8983_v55, %v8984_v11  ;;  %v10082_v29 = vsel %vm141_vm3, %v8966_v58, -inf  ;;  %v9046_v47 = vmax.f32 %v9044_v59, %v9045_v7 }
 0x46b   :  { %v8973_v48 = vmax.f32 %v8971_v15, %v8972_v8  ;;  %v10083_v6 = vmax.f32 %v19500_v35, %v10082_v29  ;;  %v9053_v24 = vmax.f32 %v9051_v42, %v9052_v3  ;;  %v9059_v44 = vrot.slane %v9058_v20, 4 }
 0x46c   :  { %v8980_v54 = vmax.f32 %v8978_v45, %v8979_v40  ;;  %v8986_v4 = vrot.slane %v8985_v41, 1  ;;  %v9047_v12 = vrot.slane %v9046_v47, 2  ;;  %v9066_v10 = vrot.slane %v9065_v43, 4  ;;  %v6363_v40 = vpop.f32.mrf.mxu0 }
 0x46d   :  { %v10085_v27 = vsel %vm141_vm3, %v8973_v48, -inf  ;;  %v9054_v33 = vrot.slane %v9053_v24, 2  ;;  %v9060_v22 = vmax.f32 %v9058_v20, %v9059_v44  ;;  %v6679_v14 = vmax.f32 %v19492_v46, 0.0 }
 0x46e   :  { %v8987_v9 = vmax.f32 %v8985_v41, %v8986_v4  ;;  %v10086_v23 = vmax.f32 %v19503_v51, %v10085_v27  ;;  %v10088_v38 = vsel %vm141_vm3, %v8980_v54, -inf  ;;  %v9048_v21 = vmax.f32 %v9046_v47, %v9047_v12  ;;  %v15195_v4 = vpop.f32.mrf.mxu0  ;;  %v19594_v12 = vld [vmem:[%s21039_s2] ss:$0 sm:$0xff] }
 0x46f   :  { %v10089_v35 = vmax.f32 %v19507_v16, %v10088_v38  ;;  %v9055_v28 = vmax.f32 %v9053_v24, %v9054_v33  ;;  %v9061_v61 = vrot.slane %v9060_v22, 2  ;;  %v9067_v60 = vmax.f32 %v9065_v43, %v9066_v10 }
 0x470   :  { %v10091_v55 = vsel %vm141_vm3, %v8987_v9, -inf  ;;  %v10481_v15 = vsel %vm10425_vm5, %v10086_v23, %v10083_v6  ;;  %v9049_v62 = vrot.slane %v9048_v21, 1  ;;  %v7319_v59 = vcombine.high %v6679_v14, %v6679_v14  ;;  %v21437_v23 = vld [vmem:[#allocation35_spill] sm:$0xff] }
 0x471   :  { %v10092_v46 = vmax.f32 %v19510_v13, %v10091_v55  ;;  %v10482_v42 = vsel %vm10427_vm6, %v10089_v35, %v10481_v15  ;;  %v9056_v51 = vrot.slane %v9055_v28, 1  ;;  %v9062_v58 = vmax.f32 %v9060_v22, %v9061_v61 }
 0x472   :  { %v9050_v45 = vmax.f32 %v9048_v21, %v9049_v62  ;;  %v9068_v11 = vrot.slane %v9067_v60, 2  ;;  %v7326_v16 = vrot.slane %v6679_v14, %v18372_v63  ;;  %v7333_v7 = vrot.slane %v7319_v59, %v18372_v63  ;;  %v21436_v14 = vld [vmem:[#allocation33_spill] sm:$0xff] }
 0x473   :  { %v10483_v8 = vsel %vm10429_vm7, %v10092_v46, %v10482_v42  ;;  %v9057_v3 = vmax.f32 %v9055_v28, %v9056_v51  ;;  %v9063_v20 = vrot.slane %v9062_v58, 1  ;;  %v6547_v43 = vadd.f32 %v15192_v53, %v18560_v1 }
 0x474   :  { %v10484_v13 = vsel %vm10431_vm8, %v10095_v57, %v10483_v8  ;;  %v9069_v41 = vmax.f32 %v9067_v60, %v9068_v11  ;;  %v19566_v29 = vsel %vm141_vm3, %v9050_v45, -inf  ;;  %v7334_v47 = vcombine.high %v7326_v16, %v7326_v16 }
 0x475   :  { %v10485_v48 = vsel %vm10433_vm9, %v10098_v30, %v10484_v13  ;;  %v9064_v6 = vmax.f32 %v9062_v58, %v9063_v20  ;;  %v19573_v24 = vsel %vm141_vm3, %v9057_v3, -inf  ;;  %v7335_v1 = vcombine.high %v7333_v7, %v7333_v7 }
 0x476   :  { %v10486_v56 = vsel %vm10435_vm10, %v10101_v26, %v10485_v48  ;;  %v9070_v5 = vrot.slane %v9069_v41, 1  ;;  %v9016_v57 = vsel %vm143_vm4, %v7326_v16, -inf  ;;  %v9023_v44 = vsel %vm143_vm4, %v7334_v47, -inf }
 0x477   :  { %v10487_v50 = vsel %vm10437_vm11, %v10104_v37, %v10486_v56  ;;  %v19586_v2 = vsel %vm141_vm3, %v9064_v6, -inf  ;;  %v9017_v30 = vrot.slane %v9016_v57, 4  ;;  %v9024_v54 = vrot.slane %v9023_v44, 4 }
 0x478   :  { %10568 = vst.msk [vmem:[#allocation3 + $0x81] sm:$0xff] %vm141_vm3, %v10487_v50  ;;  %v9071_v32 = vmax.f32 %v9069_v41, %v9070_v5  ;;  %v9030_v0 = vsel %vm143_vm4, %v7333_v7, -inf  ;;  %v9037_v26 = vsel %vm143_vm4, %v7335_v1, -inf  ;;  %v6618_v31 = vadd.f32 %v19594_v12, %v6547_v43 }
 0x479   :  { %v9018_v19 = vmax.f32 %v9016_v57, %v9017_v30  ;;  %v9025_v37 = vmax.f32 %v9023_v44, %v9024_v54  ;;  %v9031_v10 = vrot.slane %v9030_v0, 4  ;;  %v9038_v27 = vrot.slane %v9037_v26, 4 }
 0x47a   :  { %v19598_v33 = vsel %vm141_vm3, %v9071_v32, -inf  ;;  %v6682_v22 = vmax.f32 %v6618_v31, 0.0  ;;  %v6546_v9 = vadd.f32 %v6363_v40, %v21436_v14  ;;  %v6549_v38 = vadd.f32 %v15195_v4, %v21437_v23 }
 0x47b   :  { %v9019_v21 = vrot.slane %v9018_v19, 2  ;;  %v9026_v35 = vrot.slane %v9025_v37, 2  ;;  %v9032_v28 = vmax.f32 %v9030_v0, %v9031_v10  ;;  %v9039_v61 = vmax.f32 %v9037_v26, %v9038_v27 }
 0x47c   :  { %v7370_v60 = vcombine.high %v6682_v22, %v6682_v22  ;;  %v7377_v53 = vrot.slane %v6682_v22, %v18372_v63  ;;  %v6617_v55 = vadd.f32 %v19594_v12, %v6546_v9  ;;  %v6620_v15 = vadd.f32 %v19594_v12, %v6549_v38 }
 0x47d   :  { %v9020_v62 = vmax.f32 %v9018_v19, %v9019_v21  ;;  %v9027_v59 = vmax.f32 %v9025_v37, %v9026_v35  ;;  %v9033_v46 = vrot.slane %v9032_v28, 2  ;;  %v9040_v42 = vrot.slane %v9039_v61, 2 }
 0x47e   :  { %v7384_v51 = vrot.slane %v7370_v60, %v18372_v63  ;;  %v7385_v58 = vcombine.high %v7377_v53, %v7377_v53  ;;  %v9100_v45 = vsel %vm143_vm4, %v7377_v53, -inf  ;;  %v6681_v11 = vmax.f32 %v6617_v55, 0.0 }
 0x47f   :  { %v9021_v16 = vrot.slane %v9020_v62, 1  ;;  %v9028_v7 = vrot.slane %v9027_v59, 1  ;;  %v9034_v8 = vmax.f32 %v9032_v28, %v9033_v46  ;;  %v9041_v3 = vmax.f32 %v9039_v61, %v9040_v42 }
 0x480   :  { %v7386_v20 = vcombine.high %v7384_v51, %v7384_v51  ;;  %v9101_v43 = vrot.slane %v9100_v45, 4  ;;  %v9107_v40 = vsel %vm143_vm4, %v7385_v58, -inf  ;;  %v9114_v13 = vsel %vm143_vm4, %v7384_v51, -inf }
 0x481   :  { %v9022_v41 = vmax.f32 %v9020_v62, %v9021_v16  ;;  %v9029_v47 = vmax.f32 %v9027_v59, %v9028_v7  ;;  %v9035_v48 = vrot.slane %v9034_v8, 1  ;;  %v9042_v6 = vrot.slane %v9041_v3, 1 }
 0x482   :  { %v9102_v1 = vmax.f32 %v9100_v45, %v9101_v43  ;;  %v9108_v56 = vrot.slane %v9107_v40, 4  ;;  %v9115_v5 = vrot.slane %v9114_v13, 4  ;;  %v9121_v57 = vsel %vm143_vm4, %v7386_v20, -inf }
 0x483   :  { %v9036_v44 = vmax.f32 %v9034_v8, %v9035_v48  ;;  %v9043_v50 = vmax.f32 %v9041_v3, %v9042_v6  ;;  %v19611_v30 = vsel %vm141_vm3, %v9022_v41, -inf  ;;  %v19614_v54 = vsel %vm141_vm3, %v9029_v47, -inf  ;;  %v10604_v48 = vld [vmem:[#allocation3 + $0x71] sm:$0xff] }
 0x484   :  { %v9103_v4 = vrot.slane %v9102_v1, 2  ;;  %v9109_v32 = vmax.f32 %v9107_v40, %v9108_v56  ;;  %v9116_v0 = vmax.f32 %v9114_v13, %v9115_v5  ;;  %v9122_v26 = vrot.slane %v9121_v57, 4  ;;  %15253 = vmatmul.mubr.msk.f32.gmra.mxu1 %vm141_vm3, %v10604_v48  ;;  %15380 = vmatprep.mubr.msk.f32.mxu0 %vm141_vm3, %v10604_v48 }
 0x485   :  { %v19617_v31 = vsel %vm141_vm3, %v9036_v44, -inf  ;;  %v19620_v19 = vsel %vm141_vm3, %v9043_v50, -inf  ;;  %v7353_v37 = vcombine.high %v6681_v11, %v6681_v11  ;;  %v7360_v10 = vrot.slane %v6681_v11, %v18372_v63 }
 0x486   :  { %v9104_v27 = vmax.f32 %v9102_v1, %v9103_v4  ;;  %v9110_v22 = vrot.slane %v9109_v32, 2  ;;  %v9117_v14 = vrot.slane %v9116_v0, 2  ;;  %v9123_v9 = vmax.f32 %v9121_v57, %v9122_v26 }
 0x487   :  { %v7367_v23 = vrot.slane %v7353_v37, %v18372_v63  ;;  %v7368_v38 = vcombine.high %v7360_v10, %v7360_v10  ;;  %v9072_v21 = vsel %vm143_vm4, %v7360_v10, -inf  ;;  %v6684_v35 = vmax.f32 %v6620_v15, 0.0 }
 0x488   :  { %v9105_v28 = vrot.slane %v9104_v27, 1  ;;  %v9111_v61 = vmax.f32 %v9109_v32, %v9110_v22  ;;  %v9118_v60 = vmax.f32 %v9116_v0, %v9117_v14  ;;  %v9124_v53 = vrot.slane %v9123_v9, 2  ;;  %v6373_v32 = vpop.f32.mrf.mxu0 }
 0x489   :  { %v7369_v55 = vcombine.high %v7367_v23, %v7367_v23  ;;  %v9073_v62 = vrot.slane %v9072_v21, 4  ;;  %v9079_v59 = vsel %vm143_vm4, %v7368_v38, -inf  ;;  %v9086_v46 = vsel %vm143_vm4, %v7367_v23, -inf }
 0x48a   :  { %v9106_v42 = vmax.f32 %v9104_v27, %v9105_v28  ;;  %v9112_v51 = vrot.slane %v9111_v61, 1  ;;  %v9119_v58 = vrot.slane %v9118_v60, 1  ;;  %v9125_v45 = vmax.f32 %v9123_v9, %v9124_v53  ;;  %v21438_v28 = vld [vmem:[#allocation16_spill] sm:$0xff] }
 0x48b   :  { %v9074_v11 = vmax.f32 %v9072_v21, %v9073_v62  ;;  %v9080_v16 = vrot.slane %v9079_v59, 4  ;;  %v9087_v7 = vrot.slane %v9086_v46, 4  ;;  %v9093_v8 = vsel %vm143_vm4, %v7369_v55, -inf }
 0x48c   :  { %v9113_v15 = vmax.f32 %v9111_v61, %v9112_v51  ;;  %v9120_v3 = vmax.f32 %v9118_v60, %v9119_v58  ;;  %v9126_v20 = vrot.slane %v9125_v45, 1  ;;  %v19629_v43 = vsel %vm141_vm3, %v9106_v42, -inf }
 0x48d   :  { %v10119_v40 = vmax.f32 %v19566_v29, %v19629_v43  ;;  %v9075_v13 = vrot.slane %v9074_v11, 2  ;;  %v9081_v41 = vmax.f32 %v9079_v59, %v9080_v16  ;;  %v9088_v47 = vmax.f32 %v9086_v46, %v9087_v7 }
 0x48e   :  { %v9127_v6 = vmax.f32 %v9125_v45, %v9126_v20  ;;  %v19634_v1 = vsel %vm141_vm3, %v9113_v15, -inf  ;;  %v19637_v56 = vsel %vm141_vm3, %v9120_v3, -inf  ;;  %v9094_v5 = vrot.slane %v9093_v8, 4  ;;  %v15198_v3 = vpop.f32.mrf.mxu0 }
 0x48f   :  { %v10122_v57 = vmax.f32 %v19573_v24, %v19634_v1  ;;  %v10125_v44 = vmax.f32 %v19586_v2, %v19637_v56  ;;  %v9076_v50 = vmax.f32 %v9074_v11, %v9075_v13  ;;  %v9082_v4 = vrot.slane %v9081_v41, 2 }
 0x490   :  { %v19646_v0 = vsel %vm141_vm3, %v9127_v6, -inf  ;;  %v9089_v26 = vrot.slane %v9088_v47, 2  ;;  %v9095_v37 = vmax.f32 %v9093_v8, %v9094_v5  ;;  %v7404_v10 = vcombine.high %v6684_v35, %v6684_v35 }
 0x491   :  { %v10128_v27 = vmax.f32 %v19598_v33, %v19646_v0  ;;  %v9077_v22 = vrot.slane %v9076_v50, 1  ;;  %v9083_v14 = vmax.f32 %v9081_v41, %v9082_v4  ;;  %v7411_v9 = vrot.slane %v6684_v35, %v18372_v63 }
 0x492   :  { %v9090_v23 = vmax.f32 %v9088_v47, %v9089_v26  ;;  %v9096_v38 = vrot.slane %v9095_v37, 2  ;;  %v7418_v21 = vrot.slane %v7404_v10, %v18372_v63  ;;  %v6548_v61 = vadd.f32 %v6373_v32, %v21438_v28 }
 0x493   :  { %v9078_v60 = vmax.f32 %v9076_v50, %v9077_v22  ;;  %v9084_v53 = vrot.slane %v9083_v14, 1  ;;  %v7419_v55 = vcombine.high %v7411_v9, %v7411_v9  ;;  %v9156_v62 = vsel %vm143_vm4, %v7411_v9, -inf  ;;  %v6383_v9 = vpop.f32.mrf.mxu0 }
 0x494   :  { %v9091_v59 = vrot.slane %v9090_v23, 1  ;;  %v9097_v46 = vmax.f32 %v9095_v37, %v9096_v38  ;;  %v7420_v42 = vcombine.high %v7418_v21, %v7418_v21  ;;  %v9157_v51 = vrot.slane %v9156_v62, 4 }
 0x495   :  { %v9085_v58 = vmax.f32 %v9083_v14, %v9084_v53  ;;  %v10106_v45 = vsel %vm141_vm3, %v9078_v60, -inf  ;;  %v9163_v35 = vsel %vm143_vm4, %v7419_v55, -inf  ;;  %v9170_v11 = vsel %vm143_vm4, %v7418_v21, -inf  ;;  %v21439_v53 = vld [vmem:[#allocation20_spill] sm:$0xff] }
 0x496   :  { %v9092_v16 = vmax.f32 %v9090_v23, %v9091_v59  ;;  %v9098_v7 = vrot.slane %v9097_v46, 1  ;;  %v10107_v8 = vmax.f32 %v19611_v30, %v10106_v45  ;;  %v9158_v15 = vmax.f32 %v9156_v62, %v9157_v51 }
 0x497   :  { %v10109_v20 = vsel %vm141_vm3, %v9085_v58, -inf  ;;  %v9164_v13 = vrot.slane %v9163_v35, 4  ;;  %v9171_v41 = vrot.slane %v9170_v11, 4  ;;  %v9177_v47 = vsel %vm143_vm4, %v7420_v42, -inf  ;;  %v21440_v42 = vld [vmem:[#allocation39_spill] sm:$0xff] }
 0x498   :  { %v9099_v48 = vmax.f32 %v9097_v46, %v9098_v7  ;;  %v10110_v6 = vmax.f32 %v19614_v54, %v10109_v20  ;;  %v10112_v5 = vsel %vm141_vm3, %v9092_v16, -inf  ;;  %v9159_v50 = vrot.slane %v9158_v15, 2 }
 0x499   :  { %v10113_v4 = vmax.f32 %v19617_v31, %v10112_v5  ;;  %v9165_v32 = vmax.f32 %v9163_v35, %v9164_v13  ;;  %v9172_v26 = vmax.f32 %v9170_v11, %v9171_v41  ;;  %v9178_v37 = vrot.slane %v9177_v47, 4 }
 0x49a   :  { %v10115_v30 = vsel %vm141_vm3, %v9099_v48, -inf  ;;  %v10488_v10 = vsel %vm10425_vm5, %v10110_v6, %v10107_v8  ;;  %v9160_v22 = vmax.f32 %v9158_v15, %v9159_v50  ;;  %v6619_v14 = vadd.f32 %v19594_v12, %v6548_v61 }
 0x49b   :  { %v10116_v23 = vmax.f32 %v19620_v19, %v10115_v30  ;;  %v10489_v54 = vsel %vm10427_vm6, %v10113_v4, %v10488_v10  ;;  %v9166_v38 = vrot.slane %v9165_v32, 2  ;;  %v9173_v21 = vrot.slane %v9172_v26, 2 }
 0x49c   :  { %v9161_v28 = vrot.slane %v9160_v22, 1  ;;  %v9179_v60 = vmax.f32 %v9177_v47, %v9178_v37  ;;  %v6683_v31 = vmax.f32 %v6619_v14, 0.0  ;;  %v6551_v55 = vadd.f32 %v15198_v3, %v21439_v53  ;;  %v15201_v3 = vpop.f32.mrf.mxu0 }
 0x49d   :  { %v10490_v62 = vsel %vm10429_vm7, %v10116_v23, %v10489_v54  ;;  %v9167_v59 = vmax.f32 %v9165_v32, %v9166_v38  ;;  %v9174_v46 = vmax.f32 %v9172_v26, %v9173_v21  ;;  %v6550_v51 = vadd.f32 %v6383_v9, %v21440_v42 }
 0x49e   :  { %v10491_v19 = vsel %vm10431_vm8, %v10119_v40, %v10490_v62  ;;  %v9162_v61 = vmax.f32 %v9160_v22, %v9161_v28  ;;  %v9180_v58 = vrot.slane %v9179_v60, 2  ;;  %v7387_v45 = vcombine.high %v6683_v31, %v6683_v31  ;;  %v6393_v26 = vpop.f32.mrf.mxu0  ;;  %v21441_v22 = vld [vmem:[#allocation21_spill] sm:$0xff] }
 0x49f   :  { %v10492_v35 = vsel %vm10433_vm9, %v10122_v57, %v10491_v19  ;;  %v9168_v11 = vrot.slane %v9167_v59, 1  ;;  %v9175_v16 = vrot.slane %v9174_v46, 1  ;;  %v7394_v7 = vrot.slane %v6683_v31, %v18372_v63 }
 0x4a0   :  { %v10493_v8 = vsel %vm10435_vm10, %v10125_v44, %v10492_v35  ;;  %v9181_v29 = vmax.f32 %v9179_v60, %v9180_v58  ;;  %v19685_v43 = vsel %vm141_vm3, %v9162_v61, -inf  ;;  %v7401_v40 = vrot.slane %v7387_v45, %v18372_v63 }
 0x4a1   :  { %v10494_v24 = vsel %vm10437_vm11, %v10128_v27, %v10493_v8  ;;  %v9169_v1 = vmax.f32 %v9167_v59, %v9168_v11  ;;  %v9176_v57 = vmax.f32 %v9174_v46, %v9175_v16  ;;  %v7402_v15 = vcombine.high %v7394_v7, %v7394_v7 }
 0x4a2   :  { %10569 = vst.msk [vmem:[#allocation3 + $0xb1] sm:$0xff] %vm141_vm3, %v10494_v24  ;;  %v9182_v2 = vrot.slane %v9181_v29, 1  ;;  %v7403_v56 = vcombine.high %v7401_v40, %v7401_v40  ;;  %v9128_v44 = vsel %vm143_vm4, %v7394_v7, -inf  ;;  %v9142_v20 = vsel %vm143_vm4, %v7401_v40, -inf }
 0x4a3   :  { %v19696_v13 = vsel %vm141_vm3, %v9169_v1, -inf  ;;  %v19699_v41 = vsel %vm141_vm3, %v9176_v57, -inf  ;;  %v9129_v33 = vrot.slane %v9128_v44, 4  ;;  %v9135_v0 = vsel %vm143_vm4, %v7402_v15, -inf }
 0x4a4   :  { %v9183_v27 = vmax.f32 %v9181_v29, %v9182_v2  ;;  %v9136_v47 = vrot.slane %v9135_v0, 4  ;;  %v9143_v48 = vrot.slane %v9142_v20, 4  ;;  %v9149_v6 = vsel %vm143_vm4, %v7403_v56, -inf }
 0x4a5   :  { %v9130_v5 = vmax.f32 %v9128_v44, %v9129_v33  ;;  %v9150_v50 = vrot.slane %v9149_v6, 4  ;;  %v6622_v4 = vadd.f32 %v19594_v12, %v6551_v55  ;;  %v6621_v32 = vadd.f32 %v19594_v12, %v6550_v51 }
 0x4a6   :  { %v19706_v37 = vsel %vm141_vm3, %v9183_v27, -inf  ;;  %v9137_v30 = vmax.f32 %v9135_v0, %v9136_v47  ;;  %v9144_v10 = vmax.f32 %v9142_v20, %v9143_v48  ;;  %v6553_v14 = vadd.f32 %v15201_v3, %v21441_v22 }
 0x4a7   :  { %v9131_v9 = vrot.slane %v9130_v5, 2  ;;  %v9151_v23 = vmax.f32 %v9149_v6, %v9150_v50  ;;  %v6686_v54 = vmax.f32 %v6622_v4, 0.0  ;;  %v6685_v38 = vmax.f32 %v6621_v32, 0.0 }
 0x4a8   :  { %v9138_v21 = vrot.slane %v9137_v30, 2  ;;  %v9145_v28 = vrot.slane %v9144_v10, 2  ;;  %v19710_v60 = vadd.f32 %v19594_v12, %v6553_v14  ;;  %v19713_v31 = vadd.f32 %v6393_v26, %v18598_v17 }
 0x4a9   :  { %v9132_v53 = vmax.f32 %v9130_v5, %v9131_v9  ;;  %v9152_v55 = vrot.slane %v9151_v23, 2  ;;  %v7438_v62 = vcombine.high %v6686_v54, %v6686_v54  ;;  %v7445_v59 = vrot.slane %v6686_v54, %v18372_v63 }
 0x4aa   :  { %v9139_v46 = vmax.f32 %v9137_v30, %v9138_v21  ;;  %v9146_v42 = vmax.f32 %v9144_v10, %v9145_v28  ;;  %v7421_v51 = vcombine.high %v6685_v38, %v6685_v38  ;;  %v7428_v19 = vrot.slane %v6685_v38, %v18372_v63 }
 0x4ab   :  { %v9133_v61 = vrot.slane %v9132_v53, 1  ;;  %v9153_v58 = vmax.f32 %v9151_v23, %v9152_v55  ;;  %v7452_v45 = vrot.slane %v7438_v62, %v18372_v63  ;;  %v7453_v35 = vcombine.high %v7445_v59, %v7445_v59 }
 0x4ac   :  { %v9140_v11 = vrot.slane %v9139_v46, 1  ;;  %v9147_v16 = vrot.slane %v9146_v42, 1  ;;  %v9212_v17 = vsel %vm143_vm4, %v7445_v59, -inf  ;;  %v7435_v7 = vrot.slane %v7421_v51, %v18372_v63 }
 0x4ad   :  { %v9134_v8 = vmax.f32 %v9132_v53, %v9133_v61  ;;  %v9154_v29 = vrot.slane %v9153_v58, 1  ;;  %v7454_v40 = vcombine.high %v7452_v45, %v7452_v45  ;;  %v9213_v24 = vrot.slane %v9212_v17, 4 }
 0x4ae   :  { %v9141_v1 = vmax.f32 %v9139_v46, %v9140_v11  ;;  %v9148_v57 = vmax.f32 %v9146_v42, %v9147_v16  ;;  %v9219_v15 = vsel %vm143_vm4, %v7453_v35, -inf  ;;  %v9226_v3 = vsel %vm143_vm4, %v7452_v45, -inf }
 0x4af   :  { %v9155_v2 = vmax.f32 %v9153_v58, %v9154_v29  ;;  %v19723_v56 = vsel %vm141_vm3, %v9134_v8, -inf  ;;  %v9214_v44 = vmax.f32 %v9212_v17, %v9213_v24  ;;  %v9220_v20 = vrot.slane %v9219_v15, 4 }
 0x4b0   :  { %v19726_v33 = vsel %vm141_vm3, %v9141_v1, -inf  ;;  %v19729_v0 = vsel %vm141_vm3, %v9148_v57, -inf  ;;  %v9227_v27 = vrot.slane %v9226_v3, 4  ;;  %v9233_v47 = vsel %vm143_vm4, %v7454_v40, -inf }
 0x4b1   :  { %v19733_v48 = vsel %vm141_vm3, %v9155_v2, -inf  ;;  %v9215_v6 = vrot.slane %v9214_v44, 2  ;;  %v9221_v5 = vmax.f32 %v9219_v15, %v9220_v20  ;;  %v9234_v50 = vrot.slane %v9233_v47, 4 }
 0x4b2   :  { %v9228_v4 = vmax.f32 %v9226_v3, %v9227_v27  ;;  %v7436_v32 = vcombine.high %v7428_v19, %v7428_v19  ;;  %v7437_v26 = vcombine.high %v7435_v7, %v7435_v7  ;;  %v9184_v30 = vsel %vm143_vm4, %v7428_v19, -inf  ;;  %v15204_v27 = vpop.f32.mrf.mxu0 }
 0x4b3   :  { %v9216_v10 = vmax.f32 %v9214_v44, %v9215_v6  ;;  %v9222_v22 = vrot.slane %v9221_v5, 2  ;;  %v9235_v14 = vmax.f32 %v9233_v47, %v9234_v50  ;;  %v9185_v9 = vrot.slane %v9184_v30, 4  ;;  %v11471_v47 = vld [vmem:[#allocation3 + $0x81] sm:$0xff] }
 0x4b4   :  { %v9229_v23 = vrot.slane %v9228_v4, 2  ;;  %v9191_v54 = vsel %vm143_vm4, %v7436_v32, -inf  ;;  %v9198_v38 = vsel %vm143_vm4, %v7435_v7, -inf  ;;  %v9205_v21 = vsel %vm143_vm4, %v7437_v26, -inf  ;;  %15381 = vmatmul.mubr.msk.f32.gmra.mxu0 %vm141_vm3, %v11471_v47 }
 0x4b5   :  { %v9217_v28 = vrot.slane %v9216_v10, 1  ;;  %v9223_v53 = vmax.f32 %v9221_v5, %v9222_v22  ;;  %v9236_v55 = vrot.slane %v9235_v14, 2  ;;  %v9186_v62 = vmax.f32 %v9184_v30, %v9185_v9 }
 0x4b6   :  { %v9230_v59 = vmax.f32 %v9228_v4, %v9229_v23  ;;  %v9192_v46 = vrot.slane %v9191_v54, 4  ;;  %v9199_v42 = vrot.slane %v9198_v38, 4  ;;  %v9206_v51 = vrot.slane %v9205_v21, 4 }
 0x4b7   :  { %v9218_v19 = vmax.f32 %v9216_v10, %v9217_v28  ;;  %v9224_v61 = vrot.slane %v9223_v53, 1  ;;  %v9237_v58 = vmax.f32 %v9235_v14, %v9236_v55  ;;  %v9187_v45 = vrot.slane %v9186_v62, 2 }
 0x4b8   :  { %v9231_v35 = vrot.slane %v9230_v59, 1  ;;  %v9193_v11 = vmax.f32 %v9191_v54, %v9192_v46  ;;  %v9200_v16 = vmax.f32 %v9198_v38, %v9199_v42  ;;  %v9207_v17 = vmax.f32 %v9205_v21, %v9206_v51  ;;  %v6403_v21 = vpop.f32.mrf.mxu0 }
 0x4b9   :  { %v9225_v8 = vmax.f32 %v9223_v53, %v9224_v61  ;;  %v9238_v7 = vrot.slane %v9237_v58, 1  ;;  %v19740_v29 = vsel %vm141_vm3, %v9218_v19, -inf  ;;  %v9188_v40 = vmax.f32 %v9186_v62, %v9187_v45 }
 0x4ba   :  { %v9232_v24 = vmax.f32 %v9230_v59, %v9231_v35  ;;  %v10143_v1 = vmax.f32 %v19685_v43, %v19740_v29  ;;  %v9194_v57 = vrot.slane %v9193_v11, 2  ;;  %v9201_v15 = vrot.slane %v9200_v16, 2 }
 0x4bb   :  { %v9239_v3 = vmax.f32 %v9237_v58, %v9238_v7  ;;  %v10145_v2 = vsel %vm141_vm3, %v9225_v8, -inf  ;;  %v9189_v44 = vrot.slane %v9188_v40, 1  ;;  %v9208_v20 = vrot.slane %v9207_v17, 2 }
 0x4bc   :  { %v10146_v6 = vmax.f32 %v19696_v13, %v10145_v2  ;;  %v10148_v5 = vsel %vm141_vm3, %v9232_v24, -inf  ;;  %v9195_v50 = vmax.f32 %v9193_v11, %v9194_v57  ;;  %v9202_v4 = vmax.f32 %v9200_v16, %v9201_v15 }
 0x4bd   :  { %v10149_v32 = vmax.f32 %v19699_v41, %v10148_v5  ;;  %v10151_v43 = vsel %vm141_vm3, %v9239_v3, -inf  ;;  %v9190_v26 = vmax.f32 %v9188_v40, %v9189_v44  ;;  %v9209_v30 = vmax.f32 %v9207_v17, %v9208_v20 }
 0x4be   :  { %v10152_v10 = vmax.f32 %v19706_v37, %v10151_v43  ;;  %v9196_v22 = vrot.slane %v9195_v50, 1  ;;  %v9203_v14 = vrot.slane %v9202_v4, 1  ;;  %v6688_v9 = vmax.f32 %v19710_v60, 0.0 }
 0x4bf   :  { %v9210_v23 = vrot.slane %v9209_v30, 1  ;;  %v10130_v13 = vsel %vm141_vm3, %v9190_v26, -inf  ;;  %v6623_v54 = vadd.f32 %v19594_v12, %v19713_v31  ;;  %v6555_v38 = vadd.f32 %v15204_v27, %v18602_v52  ;;  %v21442_v52 = vld [vmem:[#allocation22_spill] sm:$0xff] }
 0x4c0   :  { %v9197_v41 = vmax.f32 %v9195_v50, %v9196_v22  ;;  %v9204_v28 = vmax.f32 %v9202_v4, %v9203_v14  ;;  %v10131_v53 = vmax.f32 %v19723_v56, %v10130_v13  ;;  %v7472_v55 = vcombine.high %v6688_v9, %v6688_v9 }
 0x4c1   :  { %v9211_v62 = vmax.f32 %v9209_v30, %v9210_v23  ;;  %v7479_v37 = vrot.slane %v6688_v9, %v18372_v63  ;;  %v6687_v59 = vmax.f32 %v6623_v54, 0.0  ;;  %v19759_v60 = vadd.f32 %v19594_v12, %v6555_v38 }
 0x4c2   :  { %v10133_v46 = vsel %vm141_vm3, %v9197_v41, -inf  ;;  %v10136_v42 = vsel %vm141_vm3, %v9204_v28, -inf  ;;  %v7486_v31 = vrot.slane %v7472_v55, %v18372_v63  ;;  %v19765_v51 = vadd.f32 %v6403_v21, %v21442_v52 }
 0x4c3   :  { %v10134_v19 = vmax.f32 %v19726_v33, %v10133_v46  ;;  %v10137_v56 = vmax.f32 %v19729_v0, %v10136_v42  ;;  %v10139_v61 = vsel %vm141_vm3, %v9211_v62, -inf  ;;  %v7487_v58 = vcombine.high %v7479_v37, %v7479_v37 }
 0x4c4   :  { %v10140_v45 = vmax.f32 %v19733_v48, %v10139_v61  ;;  %v7488_v35 = vcombine.high %v7486_v31, %v7486_v31  ;;  %v9268_v11 = vsel %vm143_vm4, %v7479_v37, -inf  ;;  %v9282_v16 = vsel %vm143_vm4, %v7486_v31, -inf }
 0x4c5   :  { %v10495_v17 = vsel %vm10425_vm5, %v10134_v19, %v10131_v53  ;;  %v9269_v8 = vrot.slane %v9268_v11, 4  ;;  %v9275_v7 = vsel %vm143_vm4, %v7487_v58, -inf  ;;  %v9283_v29 = vrot.slane %v9282_v16, 4 }
 0x4c6   :  { %v10496_v33 = vsel %vm10427_vm6, %v10137_v56, %v10495_v17  ;;  %v9276_v40 = vrot.slane %v9275_v7, 4  ;;  %v9289_v0 = vsel %vm143_vm4, %v7488_v35, -inf  ;;  %v7455_v24 = vcombine.high %v6687_v59, %v6687_v59 }
 0x4c7   :  { %v10497_v57 = vsel %vm10429_vm7, %v10140_v45, %v10496_v33  ;;  %v9270_v48 = vmax.f32 %v9268_v11, %v9269_v8  ;;  %v9284_v15 = vmax.f32 %v9282_v16, %v9283_v29  ;;  %v9290_v3 = vrot.slane %v9289_v0, 4  ;;  %v15207_v11 = vpop.f32.mrf.mxu0 }
 0x4c8   :  { %v10498_v2 = vsel %vm10431_vm8, %v10143_v1, %v10497_v57  ;;  %v9277_v44 = vmax.f32 %v9275_v7, %v9276_v40  ;;  %v7462_v20 = vrot.slane %v6687_v59, %v18372_v63  ;;  %v7469_v27 = vrot.slane %v7455_v24, %v18372_v63 }
 0x4c9   :  { %v10499_v47 = vsel %vm10433_vm9, %v10146_v6, %v10498_v2  ;;  %v9271_v5 = vrot.slane %v9270_v48, 2  ;;  %v9285_v50 = vrot.slane %v9284_v15, 2  ;;  %v9291_v4 = vmax.f32 %v9289_v0, %v9290_v3 }
 0x4ca   :  { %v10500_v43 = vsel %vm10435_vm10, %v10149_v32, %v10499_v47  ;;  %v9278_v26 = vrot.slane %v9277_v44, 2  ;;  %v7470_v30 = vcombine.high %v7462_v20, %v7462_v20  ;;  %v7471_v22 = vcombine.high %v7469_v27, %v7469_v27 }
 0x4cb   :  { %v10501_v14 = vsel %vm10437_vm11, %v10152_v10, %v10500_v43  ;;  %v9272_v9 = vmax.f32 %v9270_v48, %v9271_v5  ;;  %v9286_v23 = vmax.f32 %v9284_v15, %v9285_v50  ;;  %v9292_v1 = vrot.slane %v9291_v4, 2  ;;  %v21443_v15 = vld [vmem:[#allocation23_spill] sm:$0xff] }
 0x4cc   :  { %10570 = vst.msk [vmem:[#allocation3 + $0xc1] sm:$0xff] %vm141_vm3, %v10501_v14  ;;  %v9279_v13 = vmax.f32 %v9277_v44, %v9278_v26  ;;  %v9240_v54 = vsel %vm143_vm4, %v7462_v20, -inf  ;;  %v9247_v6 = vsel %vm143_vm4, %v7470_v30, -inf  ;;  %v9254_v38 = vsel %vm143_vm4, %v7469_v27, -inf }
 0x4cd   :  { %v9273_v21 = vrot.slane %v9272_v9, 1  ;;  %v9287_v41 = vrot.slane %v9286_v23, 1  ;;  %v9293_v32 = vmax.f32 %v9291_v4, %v9292_v1  ;;  %v9241_v28 = vrot.slane %v9240_v54, 4 }
 0x4ce   :  { %v9280_v53 = vrot.slane %v9279_v13, 1  ;;  %v9248_v55 = vrot.slane %v9247_v6, 4  ;;  %v9255_v62 = vrot.slane %v9254_v38, 4  ;;  %v9261_v10 = vsel %vm143_vm4, %v7471_v22, -inf }
 0x4cf   :  { %v9274_v37 = vmax.f32 %v9272_v9, %v9273_v21  ;;  %v9288_v59 = vmax.f32 %v9286_v23, %v9287_v41  ;;  %v9294_v46 = vrot.slane %v9293_v32, 1  ;;  %v9242_v42 = vmax.f32 %v9240_v54, %v9241_v28  ;;  %v10605_v23 = vld [vmem:[#allocation3 + $0xa1] sm:$0xff] }
 0x4d0   :  { %v9281_v31 = vmax.f32 %v9279_v13, %v9280_v53  ;;  %v9249_v52 = vmax.f32 %v9247_v6, %v9248_v55  ;;  %v9256_v19 = vmax.f32 %v9254_v38, %v9255_v62  ;;  %v9262_v56 = vrot.slane %v9261_v10, 4  ;;  %15255 = vmatprep.mubr.msk.f32.mxu1 %vm141_vm3, %v10605_v23 }
 0x4d1   :  { %v9295_v61 = vmax.f32 %v9293_v32, %v9294_v46  ;;  %v19790_v58 = vsel %vm141_vm3, %v9274_v37, -inf  ;;  %v19793_v45 = vsel %vm141_vm3, %v9288_v59, -inf  ;;  %v9243_v35 = vrot.slane %v9242_v42, 2 }
 0x4d2   :  { %v19796_v16 = vsel %vm141_vm3, %v9281_v31, -inf  ;;  %v9250_v17 = vrot.slane %v9249_v52, 2  ;;  %v9257_v8 = vrot.slane %v9256_v19, 2  ;;  %v9263_v7 = vmax.f32 %v9261_v10, %v9262_v56 }
 0x4d3   :  { %v19799_v29 = vsel %vm141_vm3, %v9295_v61, -inf  ;;  %v9244_v33 = vmax.f32 %v9242_v42, %v9243_v35  ;;  %v6690_v40 = vmax.f32 %v19759_v60, 0.0  ;;  %v6625_v0 = vadd.f32 %v19594_v12, %v19765_v51 }
 0x4d4   :  { %v9251_v24 = vmax.f32 %v9249_v52, %v9250_v17  ;;  %v9258_v57 = vmax.f32 %v9256_v19, %v9257_v8  ;;  %v9264_v48 = vrot.slane %v9263_v7, 2  ;;  %v6557_v3 = vadd.f32 %v15207_v11, %v21443_v15 }
 0x4d5   :  { %v9245_v2 = vrot.slane %v9244_v33, 1  ;;  %v7506_v44 = vcombine.high %v6690_v40, %v6690_v40  ;;  %v7513_v20 = vrot.slane %v6690_v40, %v18372_v63  ;;  %v6689_v27 = vmax.f32 %v6625_v0, 0.0 }
 0x4d6   :  { %v9252_v47 = vrot.slane %v9251_v24, 1  ;;  %v9259_v5 = vrot.slane %v9258_v57, 1  ;;  %v9265_v50 = vmax.f32 %v9263_v7, %v9264_v48  ;;  %v6628_v4 = vadd.f32 %v19594_v12, %v6557_v3 }
 0x4d7   :  { %v9246_v43 = vmax.f32 %v9244_v33, %v9245_v2  ;;  %v7520_v60 = vrot.slane %v7506_v44, %v18372_v63  ;;  %v7521_v26 = vcombine.high %v7513_v20, %v7513_v20  ;;  %v9324_v51 = vsel %vm143_vm4, %v7513_v20, -inf }
 0x4d8   :  { %v9253_v30 = vmax.f32 %v9251_v24, %v9252_v47  ;;  %v9260_v22 = vmax.f32 %v9258_v57, %v9259_v5  ;;  %v9266_v14 = vrot.slane %v9265_v50, 1  ;;  %v9325_v9 = vrot.slane %v9324_v51, 4 }
 0x4d9   :  { %v19810_v1 = vsel %vm141_vm3, %v9246_v43, -inf  ;;  %v7522_v13 = vcombine.high %v7520_v60, %v7520_v60  ;;  %v9331_v54 = vsel %vm143_vm4, %v7521_v26, -inf  ;;  %v9338_v6 = vsel %vm143_vm4, %v7520_v60, -inf }
 0x4da   :  { %v9267_v12 = vmax.f32 %v9265_v50, %v9266_v14  ;;  %v19816_v38 = vsel %vm141_vm3, %v9253_v30, -inf  ;;  %v19819_v21 = vsel %vm141_vm3, %v9260_v22, -inf  ;;  %v9326_v41 = vmax.f32 %v9324_v51, %v9325_v9  ;;  %v6413_v30 = vpop.f32.mrf.mxu0 }
 0x4db   :  { %v9332_v32 = vrot.slane %v9331_v54, 4  ;;  %v9339_v28 = vrot.slane %v9338_v6, 4  ;;  %v9345_v53 = vsel %vm143_vm4, %v7522_v13, -inf  ;;  %v7489_v55 = vcombine.high %v6689_v27, %v6689_v27 }
 0x4dc   :  { %v19823_v62 = vsel %vm141_vm3, %v9267_v12, -inf  ;;  %v9327_v10 = vrot.slane %v9326_v41, 2  ;;  %v9346_v37 = vrot.slane %v9345_v53, 4  ;;  %v7496_v59 = vrot.slane %v6689_v27, %v18372_v63 }
 0x4dd   :  { %v9333_v46 = vmax.f32 %v9331_v54, %v9332_v32  ;;  %v9340_v42 = vmax.f32 %v9338_v6, %v9339_v28  ;;  %v7503_v31 = vrot.slane %v7489_v55, %v18372_v63  ;;  %v6692_v52 = vmax.f32 %v6628_v4, 0.0 }
 0x4de   :  { %v9328_v19 = vmax.f32 %v9326_v41, %v9327_v10  ;;  %v9347_v56 = vmax.f32 %v9345_v53, %v9346_v37  ;;  %v7504_v61 = vcombine.high %v7496_v59, %v7496_v59  ;;  %v9296_v35 = vsel %vm143_vm4, %v7496_v59, -inf }
 0x4df   :  { %v9334_v11 = vrot.slane %v9333_v46, 2  ;;  %v9341_v17 = vrot.slane %v9340_v42, 2  ;;  %v7505_v8 = vcombine.high %v7503_v31, %v7503_v31  ;;  %v9297_v7 = vrot.slane %v9296_v35, 4 }
 0x4e0   :  { %v9329_v33 = vrot.slane %v9328_v19, 1  ;;  %v9348_v40 = vrot.slane %v9347_v56, 2  ;;  %v9303_v0 = vsel %vm143_vm4, %v7504_v61, -inf  ;;  %v9310_v24 = vsel %vm143_vm4, %v7503_v31, -inf  ;;  %v10606_v61 = vld [vmem:[#allocation3 + $0xb1] sm:$0xff] }
 0x4e1   :  { %v9335_v57 = vmax.f32 %v9333_v46, %v9334_v11  ;;  %v9342_v48 = vmax.f32 %v9340_v42, %v9341_v17  ;;  %v9298_v15 = vmax.f32 %v9296_v35, %v9297_v7  ;;  %v9304_v3 = vrot.slane %v9303_v0, 4  ;;  %v15210_v46 = vpop.f32.mrf.mxu0  ;;  %15256 = vmatmul.mubr.msk.f32.gmra.mxu1 %vm141_vm3, %v10606_v61  ;;  %15383 = vmatprep.mubr.msk.f32.mxu0 %vm141_vm3, %v10606_v61 }
 0x4e2   :  { %v9330_v2 = vmax.f32 %v9328_v19, %v9329_v33  ;;  %v9349_v44 = vmax.f32 %v9347_v56, %v9348_v40  ;;  %v9311_v20 = vrot.slane %v9310_v24, 4  ;;  %v9317_v27 = vsel %vm143_vm4, %v7505_v8, -inf  ;;  %v21444_v8 = vld [vmem:[#allocation40_spill] sm:$0xff] }
 0x4e3   :  { %v9336_v47 = vrot.slane %v9335_v57, 1  ;;  %v9343_v5 = vrot.slane %v9342_v48, 1  ;;  %v9299_v50 = vrot.slane %v9298_v15, 2  ;;  %v9305_v4 = vmax.f32 %v9303_v0, %v9304_v3 }
 0x4e4   :  { %v9350_v43 = vrot.slane %v9349_v44, 1  ;;  %v19832_v60 = vsel %vm141_vm3, %v9330_v2, -inf  ;;  %v9312_v26 = vmax.f32 %v9310_v24, %v9311_v20  ;;  %v9318_v51 = vrot.slane %v9317_v27, 4  ;;  %v21445_v24 = vld [vmem:[#allocation25_spill] sm:$0xff] }
 0x4e5   :  { %v9337_v22 = vmax.f32 %v9335_v57, %v9336_v47  ;;  %v9344_v14 = vmax.f32 %v9342_v48, %v9343_v5  ;;  %v10167_v9 = vmax.f32 %v19790_v58, %v19832_v60  ;;  %v9300_v23 = vmax.f32 %v9298_v15, %v9299_v50 }
 0x4e6   :  { %v9351_v13 = vmax.f32 %v9349_v44, %v9350_v43  ;;  %v9306_v54 = vrot.slane %v9305_v4, 2  ;;  %v9313_v6 = vrot.slane %v9312_v26, 2  ;;  %v9319_v12 = vmax.f32 %v9317_v27, %v9318_v51 }
 0x4e7   :  { %v19837_v41 = vsel %vm141_vm3, %v9337_v22, -inf  ;;  %v19840_v32 = vsel %vm141_vm3, %v9344_v14, -inf  ;;  %v9301_v28 = vrot.slane %v9300_v23, 1  ;;  %v7540_v53 = vcombine.high %v6692_v52, %v6692_v52 }
 0x4e8   :  { %v10170_v55 = vmax.f32 %v19796_v16, %v19837_v41  ;;  %v10173_v10 = vmax.f32 %v19793_v45, %v19840_v32  ;;  %v19847_v37 = vsel %vm141_vm3, %v9351_v13, -inf  ;;  %v9307_v59 = vmax.f32 %v9305_v4, %v9306_v54 }
 0x4e9   :  { %v10176_v42 = vmax.f32 %v19799_v29, %v19847_v37  ;;  %v9302_v31 = vmax.f32 %v9300_v23, %v9301_v28  ;;  %v9314_v19 = vmax.f32 %v9312_v26, %v9313_v6  ;;  %v9320_v56 = vrot.slane %v9319_v12, 2  ;;  %v6423_v28 = vpop.f32.mrf.mxu0 }
 0x4ea   :  { %v9308_v35 = vrot.slane %v9307_v59, 1  ;;  %v7547_v11 = vrot.slane %v6692_v52, %v18372_v63  ;;  %v7554_v17 = vrot.slane %v7540_v53, %v18372_v63  ;;  %v6556_v7 = vadd.f32 %v6413_v30, %v21444_v8 }
 0x4eb   :  { %v9315_v33 = vrot.slane %v9314_v19, 1  ;;  %v9321_v40 = vmax.f32 %v9319_v12, %v9320_v56  ;;  %v10154_v0 = vsel %vm141_vm3, %v9302_v31, -inf  ;;  %v6559_v57 = vadd.f32 %v15210_v46, %v21445_v24 }
 0x4ec   :  { %v9309_v48 = vmax.f32 %v9307_v59, %v9308_v35  ;;  %v10155_v15 = vmax.f32 %v19810_v1, %v10154_v0  ;;  %v7555_v3 = vcombine.high %v7547_v11, %v7547_v11  ;;  %v7556_v2 = vcombine.high %v7554_v17, %v7554_v17 }
 0x4ed   :  { %v9316_v52 = vmax.f32 %v9314_v19, %v9315_v33  ;;  %v9322_v44 = vrot.slane %v9321_v40, 1  ;;  %v9380_v20 = vsel %vm143_vm4, %v7547_v11, -inf  ;;  %v9394_v27 = vsel %vm143_vm4, %v7554_v17, -inf }
 0x4ee   :  { %v10157_v47 = vsel %vm141_vm3, %v9309_v48, -inf  ;;  %v9381_v5 = vrot.slane %v9380_v20, 4  ;;  %v9387_v50 = vsel %vm143_vm4, %v7555_v3, -inf  ;;  %v9395_v4 = vrot.slane %v9394_v27, 4 }
 0x4ef   :  { %v9323_v43 = vmax.f32 %v9321_v40, %v9322_v44  ;;  %v10158_v26 = vmax.f32 %v19816_v38, %v10157_v47  ;;  %v10160_v51 = vsel %vm141_vm3, %v9316_v52, -inf  ;;  %v9388_v1 = vrot.slane %v9387_v50, 4 }
 0x4f0   :  { %v10161_v30 = vmax.f32 %v19819_v21, %v10160_v51  ;;  %v9382_v22 = vmax.f32 %v9380_v20, %v9381_v5  ;;  %v9396_v14 = vmax.f32 %v9394_v27, %v9395_v4  ;;  %v9401_v23 = vsel %vm143_vm4, %v7556_v2, -inf  ;;  %v19874_v21 = vld [vmem:[%s21039_s2] ss:$0 sm:$0xff] }
 0x4f1   :  { %v10163_v13 = vsel %vm141_vm3, %v9323_v43, -inf  ;;  %v10502_v54 = vsel %vm10425_vm5, %v10158_v26, %v10155_v15  ;;  %v9389_v6 = vmax.f32 %v9387_v50, %v9388_v1  ;;  %v9402_v12 = vrot.slane %v9401_v23, 4 }
 0x4f2   :  { %v10164_v53 = vmax.f32 %v19823_v62, %v10163_v13  ;;  %v10503_v38 = vsel %vm10427_vm6, %v10161_v30, %v10502_v54  ;;  %v9383_v59 = vrot.slane %v9382_v22, 2  ;;  %v9397_v46 = vrot.slane %v9396_v14, 2  ;;  %v21446_v62 = vld [vmem:[#allocation53_spill] sm:$0xff] }
 0x4f3   :  { %v9390_v31 = vrot.slane %v9389_v6, 2  ;;  %v9403_v19 = vmax.f32 %v9401_v23, %v9402_v12  ;;  %v6627_v56 = vadd.f32 %v19874_v21, %v6556_v7  ;;  %v6630_v61 = vadd.f32 %v19874_v21, %v6559_v57 }
 0x4f4   :  { %v10504_v35 = vsel %vm10429_vm7, %v10164_v53, %v10503_v38  ;;  %v9384_v11 = vmax.f32 %v9382_v22, %v9383_v59  ;;  %v9398_v17 = vmax.f32 %v9396_v14, %v9397_v46  ;;  %v19880_v8 = vadd.f32 %v6423_v28, %v21446_v62 }
 0x4f5   :  { %v10505_v33 = vsel %vm10431_vm8, %v10167_v9, %v10504_v35  ;;  %v9391_v40 = vmax.f32 %v9389_v6, %v9390_v31  ;;  %v9404_v0 = vrot.slane %v9403_v19, 2  ;;  %v6691_v24 = vmax.f32 %v6627_v56, 0.0 }
 0x4f6   :  { %v10506_v7 = vsel %vm10433_vm9, %v10170_v55, %v10505_v33  ;;  %v9385_v57 = vrot.slane %v9384_v11, 1  ;;  %v9399_v48 = vrot.slane %v9398_v17, 1  ;;  %v6694_v15 = vmax.f32 %v6630_v61, 0.0 }
 0x4f7   :  { %v10507_v3 = vsel %vm10435_vm10, %v10173_v10, %v10506_v7  ;;  %v9392_v2 = vrot.slane %v9391_v40, 1  ;;  %v9405_v58 = vmax.f32 %v9403_v19, %v9404_v0  ;;  %v7523_v60 = vcombine.high %v6691_v24, %v6691_v24 }
 0x4f8   :  { %v10508_v9 = vsel %vm10437_vm11, %v10176_v42, %v10507_v3  ;;  %v9386_v52 = vmax.f32 %v9384_v11, %v9385_v57  ;;  %v9400_v16 = vmax.f32 %v9398_v17, %v9399_v48  ;;  %v7530_v41 = vrot.slane %v6691_v24, %v18372_v63 }
 0x4f9   :  { %10571 = vst.msk [vmem:[#allocation3 + $0xd1] sm:$0xff] %vm141_vm3, %v10508_v9  ;;  %v9393_v55 = vmax.f32 %v9391_v40, %v9392_v2  ;;  %v9406_v44 = vrot.slane %v9405_v58, 1  ;;  %v7537_v45 = vrot.slane %v7523_v60, %v18372_v63  ;;  %v7574_v32 = vcombine.high %v6694_v15, %v6694_v15  ;;  %v15213_v2 = vpop.f32.mrf.mxu0 }
 0x4fa   :  { %v19902_v10 = vsel %vm141_vm3, %v9386_v52, -inf  ;;  %v19905_v20 = vsel %vm141_vm3, %v9400_v16, -inf  ;;  %v7538_v29 = vcombine.high %v7530_v41, %v7530_v41  ;;  %v9352_v37 = vsel %vm143_vm4, %v7530_v41, -inf }
 0x4fb   :  { %v9407_v42 = vmax.f32 %v9405_v58, %v9406_v44  ;;  %v19909_v27 = vsel %vm141_vm3, %v9393_v55, -inf  ;;  %v7539_v47 = vcombine.high %v7537_v45, %v7537_v45  ;;  %v9353_v5 = vrot.slane %v9352_v37, 4 }
 0x4fc   :  { %v9359_v50 = vsel %vm143_vm4, %v7538_v29, -inf  ;;  %v9366_v4 = vsel %vm143_vm4, %v7537_v45, -inf  ;;  %v7581_v43 = vrot.slane %v6694_v15, %v18372_v63  ;;  %v7588_v26 = vrot.slane %v7574_v32, %v18372_v63 }
 0x4fd   :  { %v19916_v51 = vsel %vm141_vm3, %v9407_v42, -inf  ;;  %v9354_v1 = vmax.f32 %v9352_v37, %v9353_v5  ;;  %v9360_v30 = vrot.slane %v9359_v50, 4  ;;  %v9367_v22 = vrot.slane %v9366_v4, 4 }
 0x4fe   :  { %v9373_v14 = vsel %vm143_vm4, %v7539_v47, -inf  ;;  %v7589_v23 = vcombine.high %v7581_v43, %v7581_v43  ;;  %v7590_v13 = vcombine.high %v7588_v26, %v7588_v26  ;;  %v9436_v54 = vsel %vm143_vm4, %v7581_v43, -inf }
 0x4ff   :  { %v9355_v6 = vrot.slane %v9354_v1, 2  ;;  %v9361_v12 = vmax.f32 %v9359_v50, %v9360_v30  ;;  %v9368_v28 = vmax.f32 %v9366_v4, %v9367_v22  ;;  %v9374_v53 = vrot.slane %v9373_v14, 4  ;;  %v6433_v4 = vpop.f32.mrf.mxu0 }
 0x500   :  { %v9437_v38 = vrot.slane %v9436_v54, 4  ;;  %v9443_v59 = vsel %vm143_vm4, %v7589_v23, -inf  ;;  %v9450_v46 = vsel %vm143_vm4, %v7588_v26, -inf  ;;  %v9457_v31 = vsel %vm143_vm4, %v7590_v13, -inf }
 0x501   :  { %v9356_v19 = vmax.f32 %v9354_v1, %v9355_v6  ;;  %v9362_v56 = vrot.slane %v9361_v12, 2  ;;  %v9369_v61 = vrot.slane %v9368_v28, 2  ;;  %v9375_v35 = vmax.f32 %v9373_v14, %v9374_v53  ;;  %v21448_v53 = vld [vmem:[#allocation54_spill] sm:$0xff] }
 0x502   :  { %v9438_v11 = vmax.f32 %v9436_v54, %v9437_v38  ;;  %v9444_v17 = vrot.slane %v9443_v59, 4  ;;  %v9451_v62 = vrot.slane %v9450_v46, 4  ;;  %v9458_v33 = vrot.slane %v9457_v31, 4 }
 0x503   :  { %v9357_v40 = vrot.slane %v9356_v19, 1  ;;  %v9363_v0 = vmax.f32 %v9361_v12, %v9362_v56  ;;  %v9370_v24 = vmax.f32 %v9368_v28, %v9369_v61  ;;  %v9376_v7 = vrot.slane %v9375_v35, 2  ;;  %v21447_v12 = vld [vmem:[#allocation42_spill] sm:$0xff] }
 0x504   :  { %v9439_v57 = vrot.slane %v9438_v11, 2  ;;  %v9445_v48 = vmax.f32 %v9443_v59, %v9444_v17  ;;  %v9452_v15 = vmax.f32 %v9450_v46, %v9451_v62  ;;  %v9459_v3 = vmax.f32 %v9457_v31, %v9458_v33 }
 0x505   :  { %v9358_v58 = vmax.f32 %v9356_v19, %v9357_v40  ;;  %v9364_v60 = vrot.slane %v9363_v0, 1  ;;  %v9371_v9 = vrot.slane %v9370_v24, 1  ;;  %v9377_v52 = vmax.f32 %v9375_v35, %v9376_v7  ;;  %v15216_v40 = vpop.f32.mrf.mxu0 }
 0x506   :  { %v9440_v16 = vmax.f32 %v9438_v11, %v9439_v57  ;;  %v9446_v41 = vrot.slane %v9445_v48, 2  ;;  %v9453_v55 = vrot.slane %v9452_v15, 2  ;;  %v9460_v44 = vrot.slane %v9459_v3, 2 }
 0x507   :  { %v9365_v45 = vmax.f32 %v9363_v0, %v9364_v60  ;;  %v9372_v32 = vmax.f32 %v9370_v24, %v9371_v9  ;;  %v9378_v29 = vrot.slane %v9377_v52, 1  ;;  %v19924_v37 = vsel %vm141_vm3, %v9358_v58, -inf }
 0x508   :  { %v9441_v42 = vrot.slane %v9440_v16, 1  ;;  %v9447_v47 = vmax.f32 %v9445_v48, %v9446_v41  ;;  %v9454_v5 = vmax.f32 %v9452_v15, %v9453_v55  ;;  %v9461_v50 = vmax.f32 %v9459_v3, %v9460_v44 }
 0x509   :  { %v9379_v43 = vmax.f32 %v9377_v52, %v9378_v29  ;;  %v19927_v26 = vsel %vm141_vm3, %v9365_v45, -inf  ;;  %v19930_v1 = vsel %vm141_vm3, %v9372_v32, -inf  ;;  %v6629_v30 = vadd.f32 %v19874_v21, %v19880_v8  ;;  %v21449_v52 = vld [vmem:[#allocation43_spill] sm:$0xff] }
 0x50a   :  { %v9442_v22 = vmax.f32 %v9440_v16, %v9441_v42  ;;  %v9448_v14 = vrot.slane %v9447_v47, 1  ;;  %v9455_v23 = vrot.slane %v9454_v5, 1  ;;  %v9462_v13 = vrot.slane %v9461_v50, 1 }
 0x50b   :  { %v19935_v54 = vsel %vm141_vm3, %v9379_v43, -inf  ;;  %v6693_v6 = vmax.f32 %v6629_v30, 0.0  ;;  %v6561_v28 = vadd.f32 %v15213_v2, %v21447_v12  ;;  %v6560_v38 = vadd.f32 %v6433_v4, %v21448_v53  ;;  %v10607_v53 = vld [vmem:[#allocation3 + $0xc1] sm:$0xff] }
 0x50c   :  { %v9449_v59 = vmax.f32 %v9447_v47, %v9448_v14  ;;  %v9456_v46 = vmax.f32 %v9454_v5, %v9455_v23  ;;  %v9463_v31 = vmax.f32 %v9461_v50, %v9462_v13  ;;  %v19940_v19 = vsel %vm141_vm3, %v9442_v22, -inf  ;;  %15258 = vmatprep.mubr.msk.f32.mxu1 %vm141_vm3, %v10607_v53  ;;  %15384 = vmatmul.mubr.msk.f32.gmra.mxu0 %vm141_vm3, %v10607_v53  ;;  %v6443_v53 = vpop.f32.mrf.mxu0 }
 0x50d   :  { %v10191_v8 = vmax.f32 %v19902_v10, %v19940_v19  ;;  %v7557_v56 = vcombine.high %v6693_v6, %v6693_v6  ;;  %v7564_v61 = vrot.slane %v6693_v6, %v18372_v63  ;;  %v6632_v35 = vadd.f32 %v19874_v21, %v6561_v28 }
 0x50e   :  { %v19947_v11 = vsel %vm141_vm3, %v9449_v59, -inf  ;;  %v19950_v17 = vsel %vm141_vm3, %v9456_v46, -inf  ;;  %v19953_v62 = vsel %vm141_vm3, %v9463_v31, -inf  ;;  %v6631_v33 = vadd.f32 %v19874_v21, %v6560_v38 }
 0x50f   :  { %v10194_v0 = vmax.f32 %v19909_v27, %v19947_v11  ;;  %v10197_v24 = vmax.f32 %v19905_v20, %v19950_v17  ;;  %v10200_v7 = vmax.f32 %v19916_v51, %v19953_v62  ;;  %v7571_v57 = vrot.slane %v7557_v56, %v18372_v63  ;;  %v21452_v62 = vld [vmem:[#allocation57_spill] sm:$0xff] }
 0x510   :  { %v7572_v48 = vcombine.high %v7564_v61, %v7564_v61  ;;  %v9408_v15 = vsel %vm143_vm4, %v7564_v61, -inf  ;;  %v6696_v3 = vmax.f32 %v6632_v35, 0.0  ;;  %v19964_v2 = vmax.f32 %v6631_v33, 0.0 }
 0x511   :  { %v7573_v58 = vcombine.high %v7571_v57, %v7571_v57  ;;  %v9409_v60 = vrot.slane %v9408_v15, 4  ;;  %v9422_v9 = vsel %vm143_vm4, %v7571_v57, -inf  ;;  %v19968_v16 = vadd.f32 %v15216_v40, %v21449_v52 }
 0x512   :  { %v9415_v41 = vsel %vm143_vm4, %v7572_v48, -inf  ;;  %v9423_v55 = vrot.slane %v9422_v9, 4  ;;  %v7608_v44 = vcombine.high %v6696_v3, %v6696_v3  ;;  %v7615_v45 = vrot.slane %v6696_v3, %v18372_v63 }
 0x513   :  { %v9410_v32 = vmax.f32 %v9408_v15, %v9409_v60  ;;  %v9416_v29 = vrot.slane %v9415_v41, 4  ;;  %v9429_v42 = vsel %vm143_vm4, %v7573_v58, -inf  ;;  %v7591_v47 = vcombine.high %v19964_v2, %v19964_v2 }
 0x514   :  { %v9424_v5 = vmax.f32 %v9422_v9, %v9423_v55  ;;  %v9430_v50 = vrot.slane %v9429_v42, 4  ;;  %v7622_v4 = vrot.slane %v7608_v44, %v18372_v63  ;;  %v7623_v43 = vcombine.high %v7615_v45, %v7615_v45 }
 0x515   :  { %v9411_v30 = vrot.slane %v9410_v32, 2  ;;  %v9417_v22 = vmax.f32 %v9415_v41, %v9416_v29  ;;  %v9492_v14 = vsel %vm143_vm4, %v7615_v45, -inf  ;;  %v19979_v23 = vrot.slane %v19964_v2, %v18372_v63 }
 0x516   :  { %v9425_v13 = vrot.slane %v9424_v5, 2  ;;  %v9431_v6 = vmax.f32 %v9429_v42, %v9430_v50  ;;  %v7624_v12 = vcombine.high %v7622_v4, %v7622_v4  ;;  %v9493_v28 = vrot.slane %v9492_v14, 4 }
 0x517   :  { %v9412_v38 = vmax.f32 %v9410_v32, %v9411_v30  ;;  %v9418_v59 = vrot.slane %v9417_v22, 2  ;;  %v9499_v46 = vsel %vm143_vm4, %v7623_v43, -inf  ;;  %v9506_v31 = vsel %vm143_vm4, %v7622_v4, -inf }
 0x518   :  { %v9426_v56 = vmax.f32 %v9424_v5, %v9425_v13  ;;  %v9432_v61 = vrot.slane %v9431_v6, 2  ;;  %v9494_v35 = vmax.f32 %v9492_v14, %v9493_v28  ;;  %v9500_v33 = vrot.slane %v9499_v46, 4 }
 0x519   :  { %v9413_v40 = vrot.slane %v9412_v38, 1  ;;  %v9419_v57 = vmax.f32 %v9417_v22, %v9418_v59  ;;  %v9507_v48 = vrot.slane %v9506_v31, 4  ;;  %v9513_v15 = vsel %vm143_vm4, %v7624_v12, -inf }
 0x51a   :  { %v9427_v3 = vrot.slane %v9426_v56, 1  ;;  %v9433_v2 = vmax.f32 %v9431_v6, %v9432_v61  ;;  %v9495_v58 = vrot.slane %v9494_v35, 2  ;;  %v9501_v60 = vmax.f32 %v9499_v46, %v9500_v33 }
 0x51b   :  { %v9414_v9 = vmax.f32 %v9412_v38, %v9413_v40  ;;  %v9420_v52 = vrot.slane %v9419_v57, 1  ;;  %v9508_v41 = vmax.f32 %v9506_v31, %v9507_v48  ;;  %v9514_v55 = vrot.slane %v9513_v15, 4 }
 0x51c   :  { %v9428_v44 = vmax.f32 %v9426_v56, %v9427_v3  ;;  %v9434_v45 = vrot.slane %v9433_v2, 1  ;;  %v9496_v32 = vmax.f32 %v9494_v35, %v9495_v58  ;;  %v9502_v29 = vrot.slane %v9501_v60, 2 }
 0x51d   :  { %v9421_v42 = vmax.f32 %v9419_v57, %v9420_v52  ;;  %v10178_v5 = vsel %vm141_vm3, %v9414_v9, -inf  ;;  %v9509_v50 = vrot.slane %v9508_v41, 2  ;;  %v9515_v4 = vmax.f32 %v9513_v15, %v9514_v55 }
 0x51e   :  { %v9435_v43 = vmax.f32 %v9433_v2, %v9434_v45  ;;  %v10179_v30 = vmax.f32 %v19924_v37, %v10178_v5  ;;  %v10184_v22 = vsel %vm141_vm3, %v9428_v44, -inf  ;;  %v9497_v14 = vrot.slane %v9496_v32, 1  ;;  %v15219_v2 = vpop.f32.mrf.mxu0 }
 0x51f   :  { %v10181_v13 = vsel %vm141_vm3, %v9421_v42, -inf  ;;  %v10185_v6 = vmax.f32 %v19930_v1, %v10184_v22  ;;  %v9503_v12 = vmax.f32 %v9501_v60, %v9502_v29  ;;  %v9510_v28 = vmax.f32 %v9508_v41, %v9509_v50  ;;  %v21450_v50 = vld [vmem:[#allocation41_spill] sm:$0xff] }
 0x520   :  { %v10182_v38 = vmax.f32 %v19927_v26, %v10181_v13  ;;  %v10187_v59 = vsel %vm141_vm3, %v9435_v43, -inf  ;;  %v9498_v46 = vmax.f32 %v9496_v32, %v9497_v14  ;;  %v9516_v31 = vrot.slane %v9515_v4, 2  ;;  %v6453_v42 = vpop.f32.mrf.mxu0  ;;  %v21451_v22 = vld [vmem:[#allocation45_spill] sm:$0xff] }
 0x521   :  { %v10188_v56 = vmax.f32 %v19935_v54, %v10187_v59  ;;  %v9504_v61 = vrot.slane %v9503_v12, 1  ;;  %v9511_v37 = vrot.slane %v9510_v28, 1  ;;  %v7605_v35 = vrot.slane %v7591_v47, %v18372_v63 }
 0x522   :  { %v10509_v33 = vsel %vm10425_vm5, %v10182_v38, %v10179_v30  ;;  %v9517_v40 = vmax.f32 %v9515_v4, %v9516_v31  ;;  %v19997_v1 = vsel %vm141_vm3, %v9498_v46, -inf  ;;  %v7606_v57 = vcombine.high %v19979_v23, %v19979_v23 }
 0x523   :  { %v10510_v26 = vsel %vm10427_vm6, %v10185_v6, %v10509_v33  ;;  %v9505_v48 = vmax.f32 %v9503_v12, %v9504_v61  ;;  %v9512_v15 = vmax.f32 %v9510_v28, %v9511_v37  ;;  %v7607_v3 = vcombine.high %v7605_v35, %v7605_v35 }
 0x524   :  { %v10511_v54 = vsel %vm10429_vm7, %v10188_v56, %v10510_v26  ;;  %v9518_v58 = vrot.slane %v9517_v40, 1  ;;  %v9464_v47 = vsel %vm143_vm4, %v19979_v23, -inf  ;;  %v9471_v60 = vsel %vm143_vm4, %v7606_v57, -inf }
 0x525   :  { %v10512_v9 = vsel %vm10431_vm8, %v10191_v8, %v10511_v54  ;;  %v20011_v52 = vsel %vm141_vm3, %v9505_v48, -inf  ;;  %v20014_v41 = vsel %vm141_vm3, %v9512_v15, -inf  ;;  %v9465_v55 = vrot.slane %v9464_v47, 4 }
 0x526   :  { %v10513_v44 = vsel %vm10433_vm9, %v10194_v0, %v10512_v9  ;;  %v9519_v23 = vmax.f32 %v9517_v40, %v9518_v58  ;;  %v9472_v45 = vrot.slane %v9471_v60, 4  ;;  %v9478_v32 = vsel %vm143_vm4, %v7605_v35, -inf }
 0x527   :  { %v10514_v10 = vsel %vm10435_vm10, %v10197_v24, %v10513_v44  ;;  %v9466_v19 = vmax.f32 %v9464_v47, %v9465_v55  ;;  %v9479_v8 = vrot.slane %v9478_v32, 4  ;;  %v9485_v29 = vsel %vm143_vm4, %v7607_v3, -inf }
 0x528   :  { %v10515_v27 = vsel %vm10437_vm11, %v10200_v7, %v10514_v10  ;;  %v20031_v11 = vsel %vm141_vm3, %v9519_v23, -inf  ;;  %v9473_v0 = vmax.f32 %v9471_v60, %v9472_v45  ;;  %v9486_v5 = vrot.slane %v9485_v29, 4 }
 0x529   :  { %10572 = vst.msk [vmem:[#allocation3 + $0xe1] sm:$0xff] %vm141_vm3, %v10515_v27  ;;  %v9467_v20 = vrot.slane %v9466_v19, 2  ;;  %v9480_v17 = vmax.f32 %v9478_v32, %v9479_v8  ;;  %v6634_v24 = vadd.f32 %v19874_v21, %v19968_v16  ;;  %v6562_v4 = vadd.f32 %v6443_v53, %v21450_v50 }
 0x52a   :  { %v9474_v43 = vrot.slane %v9473_v0, 2  ;;  %v9487_v30 = vmax.f32 %v9485_v29, %v9486_v5  ;;  %v6565_v51 = vadd.f32 %v15219_v2, %v21451_v22  ;;  %v6564_v7 = vadd.f32 %v6453_v42, %v21452_v62  ;;  %v10608_v29 = vld [vmem:[#allocation3 + $0xd1] sm:$0xff] }
 0x52b   :  { %v9468_v14 = vmax.f32 %v9466_v19, %v9467_v20  ;;  %v9481_v13 = vrot.slane %v9480_v17, 2  ;;  %v6698_v6 = vmax.f32 %v6634_v24, 0.0  ;;  %v6633_v12 = vadd.f32 %v19874_v21, %v6562_v4  ;;  %15259 = vmatmul.mubr.msk.f32.gmra.mxu1 %vm141_vm3, %v10608_v29  ;;  %15386 = vmatprep.mubr.msk.f32.mxu0 %vm141_vm3, %v10608_v29 }
 0x52c   :  { %v9475_v28 = vmax.f32 %v9473_v0, %v9474_v43  ;;  %v9488_v38 = vrot.slane %v9487_v30, 2  ;;  %v6636_v59 = vadd.f32 %v19874_v21, %v6565_v51  ;;  %v20042_v46 = vadd.f32 %v19874_v21, %v6564_v7 }
 0x52d   :  { %v9469_v16 = vrot.slane %v9468_v14, 1  ;;  %v9482_v53 = vmax.f32 %v9480_v17, %v9481_v13  ;;  %v7642_v31 = vcombine.high %v6698_v6, %v6698_v6  ;;  %v7649_v56 = vrot.slane %v6698_v6, %v18372_v63 }
 0x52e   :  { %v9476_v61 = vrot.slane %v9475_v28, 1  ;;  %v9489_v37 = vmax.f32 %v9487_v30, %v9488_v38  ;;  %v6697_v35 = vmax.f32 %v6633_v12, 0.0  ;;  %v20045_v33 = vmax.f32 %v6636_v59, 0.0 }
 0x52f   :  { %v9470_v40 = vmax.f32 %v9468_v14, %v9469_v16  ;;  %v9483_v57 = vrot.slane %v9482_v53, 1  ;;  %v7656_v26 = vrot.slane %v7642_v31, %v18372_v63  ;;  %v7657_v48 = vcombine.high %v7649_v56, %v7649_v56 }
 0x530   :  { %v9477_v15 = vmax.f32 %v9475_v28, %v9476_v61  ;;  %v9490_v3 = vrot.slane %v9489_v37, 1  ;;  %v9548_v2 = vsel %vm143_vm4, %v7649_v56, -inf  ;;  %v7625_v54 = vcombine.high %v6697_v35, %v6697_v35 }
 0x531   :  { %v9484_v58 = vmax.f32 %v9482_v53, %v9483_v57  ;;  %v20050_v47 = vsel %vm141_vm3, %v9470_v40, -inf  ;;  %v7658_v60 = vcombine.high %v7656_v26, %v7656_v26  ;;  %v9549_v9 = vrot.slane %v9548_v2, 4 }
 0x532   :  { %v9491_v55 = vmax.f32 %v9489_v37, %v9490_v3  ;;  %v20053_v44 = vsel %vm141_vm3, %v9477_v15, -inf  ;;  %v9555_v23 = vsel %vm143_vm4, %v7657_v48, -inf  ;;  %v9562_v45 = vsel %vm143_vm4, %v7656_v26, -inf  ;;  %v10609_v48 = vld [vmem:[#allocation3 + $0xe1] sm:$0xff] }
 0x533   :  { %v20058_v32 = vsel %vm141_vm3, %v9484_v58, -inf  ;;  %v9550_v10 = vmax.f32 %v9548_v2, %v9549_v9  ;;  %v9556_v19 = vrot.slane %v9555_v23, 4  ;;  %v9563_v8 = vrot.slane %v9562_v45, 4  ;;  %15261 = vmatprep.mubr.msk.f32.mxu1 %vm141_vm3, %v10609_v48  ;;  %15387 = vmatmul.mubr.msk.f32.gmra.mxu0 %vm141_vm3, %v10609_v48  ;;  %v15222_v48 = vpop.f32.mrf.mxu0 }
 0x534   :  { %v20061_v42 = vsel %vm141_vm3, %v9491_v55, -inf  ;;  %v9569_v27 = vsel %vm143_vm4, %v7658_v60, -inf  ;;  %v7632_v0 = vrot.slane %v6697_v35, %v18372_v63  ;;  %v7639_v5 = vrot.slane %v7625_v54, %v18372_v63 }
 0x535   :  { %v9551_v20 = vrot.slane %v9550_v10, 2  ;;  %v9557_v17 = vmax.f32 %v9555_v23, %v9556_v19  ;;  %v9564_v24 = vmax.f32 %v9562_v45, %v9563_v8  ;;  %v9570_v50 = vrot.slane %v9569_v27, 4 }
 0x536   :  { %v7640_v4 = vcombine.high %v7632_v0, %v7632_v0  ;;  %v7641_v43 = vcombine.high %v7639_v5, %v7639_v5  ;;  %v9520_v30 = vsel %vm143_vm4, %v7632_v0, -inf  ;;  %v9534_v22 = vsel %vm143_vm4, %v7639_v5, -inf }
 0x537   :  { %v9552_v51 = vmax.f32 %v9550_v10, %v9551_v20  ;;  %v9558_v62 = vrot.slane %v9557_v17, 2  ;;  %v9565_v7 = vrot.slane %v9564_v24, 2  ;;  %v9571_v14 = vmax.f32 %v9569_v27, %v9570_v50 }
 0x538   :  { %v9521_v13 = vrot.slane %v9520_v30, 4  ;;  %v9527_v6 = vsel %vm143_vm4, %v7640_v4, -inf  ;;  %v9535_v12 = vrot.slane %v9534_v22, 4  ;;  %v9541_v28 = vsel %vm143_vm4, %v7641_v43, -inf }
 0x539   :  { %v9553_v38 = vrot.slane %v9552_v51, 1  ;;  %v9559_v59 = vmax.f32 %v9557_v17, %v9558_v62  ;;  %v9566_v16 = vmax.f32 %v9564_v24, %v9565_v7  ;;  %v9572_v53 = vrot.slane %v9571_v14, 2 }
 0x53a   :  { %v9522_v31 = vmax.f32 %v9520_v30, %v9521_v13  ;;  %v9528_v56 = vrot.slane %v9527_v6, 4  ;;  %v9536_v61 = vmax.f32 %v9534_v22, %v9535_v12  ;;  %v9542_v37 = vrot.slane %v9541_v28, 4 }
 0x53b   :  { %v9554_v35 = vmax.f32 %v9552_v51, %v9553_v38  ;;  %v9560_v40 = vrot.slane %v9559_v59, 1  ;;  %v9567_v57 = vrot.slane %v9566_v16, 1  ;;  %v9573_v26 = vmax.f32 %v9571_v14, %v9572_v53 }
 0x53c   :  { %v9523_v15 = vrot.slane %v9522_v31, 2  ;;  %v9529_v3 = vmax.f32 %v9527_v6, %v9528_v56  ;;  %v9537_v2 = vrot.slane %v9536_v61, 2  ;;  %v9543_v54 = vmax.f32 %v9541_v28, %v9542_v37 }
 0x53d   :  { %v9561_v58 = vmax.f32 %v9559_v59, %v9560_v40  ;;  %v9568_v60 = vmax.f32 %v9566_v16, %v9567_v57  ;;  %v9574_v9 = vrot.slane %v9573_v26, 1  ;;  %v10214_v55 = vsel %vm141_vm3, %v9554_v35, -inf }
 0x53e   :  { %v10215_v23 = vmax.f32 %v19997_v1, %v10214_v55  ;;  %v9524_v45 = vmax.f32 %v9522_v31, %v9523_v15  ;;  %v9530_v10 = vrot.slane %v9529_v3, 2  ;;  %v9538_v19 = vmax.f32 %v9536_v61, %v9537_v2 }
 0x53f   :  { %v9575_v8 = vmax.f32 %v9573_v26, %v9574_v9  ;;  %v10217_v29 = vsel %vm141_vm3, %v9561_v58, -inf  ;;  %v10220_v27 = vsel %vm141_vm3, %v9568_v60, -inf  ;;  %v9544_v0 = vrot.slane %v9543_v54, 2 }
 0x540   :  { %v10218_v5 = vmax.f32 %v20011_v52, %v10217_v29  ;;  %v10221_v20 = vmax.f32 %v20014_v41, %v10220_v27  ;;  %v9525_v17 = vrot.slane %v9524_v45, 1  ;;  %v9531_v24 = vmax.f32 %v9529_v3, %v9530_v10  ;;  %v6463_v27 = vpop.f32.mrf.mxu0 }
 0x541   :  { %v10223_v50 = vsel %vm141_vm3, %v9575_v8, -inf  ;;  %v9539_v4 = vrot.slane %v9538_v19, 1  ;;  %v9545_v43 = vmax.f32 %v9543_v54, %v9544_v0  ;;  %v7676_v1 = vcombine.high %v20045_v33, %v20045_v33 }
 0x542   :  { %v10224_v30 = vmax.f32 %v20031_v11, %v10223_v50  ;;  %v9526_v22 = vmax.f32 %v9524_v45, %v9525_v17  ;;  %v9532_v51 = vrot.slane %v9531_v24, 1  ;;  %v7683_v62 = vrot.slane %v20045_v33, %v18372_v63 }
 0x543   :  { %v9540_v7 = vmax.f32 %v9538_v19, %v9539_v4  ;;  %v9546_v52 = vrot.slane %v9545_v43, 1  ;;  %v7690_v41 = vrot.slane %v7676_v1, %v18372_v63  ;;  %v6699_v14 = vmax.f32 %v20042_v46, 0.0 }
 0x544   :  { %v9533_v13 = vmax.f32 %v9531_v24, %v9532_v51  ;;  %v10202_v6 = vsel %vm141_vm3, %v9526_v22, -inf  ;;  %v7691_v12 = vcombine.high %v7683_v62, %v7683_v62  ;;  %v9604_v28 = vsel %vm143_vm4, %v7683_v62, -inf  ;;  %v15136_v51 = vpop.f32.mrf.mxu1 }
 0x545   :  { %v9547_v38 = vmax.f32 %v9545_v43, %v9546_v52  ;;  %v10203_v11 = vmax.f32 %v20050_v47, %v10202_v6  ;;  %v10208_v59 = vsel %vm141_vm3, %v9540_v7, -inf  ;;  %v7692_v16 = vcombine.high %v7690_v41, %v7690_v41  ;;  %v15225_v6 = vpop.f32.mrf.mxu0 }
 0x546   :  { %v10205_v33 = vsel %vm141_vm3, %v9533_v13, -inf  ;;  %v10209_v53 = vmax.f32 %v20058_v32, %v10208_v59  ;;  %v9605_v31 = vrot.slane %v9604_v28, 4  ;;  %v9611_v56 = vsel %vm143_vm4, %v7691_v12, -inf  ;;  %v21453_v59 = vld [vmem:[#allocation38_spill] sm:$0xff] }
 0x547   :  { %v10206_v46 = vmax.f32 %v20053_v44, %v10205_v33  ;;  %v10211_v61 = vsel %vm141_vm3, %v9547_v38, -inf  ;;  %v9612_v37 = vrot.slane %v9611_v56, 4  ;;  %v9618_v35 = vsel %vm143_vm4, %v7690_v41, -inf  ;;  %v10596_v41 = vld [vmem:[%s21040_s3 + $0x18] sm:$0xff] }
 0x548   :  { %v10212_v40 = vmax.f32 %v20061_v42, %v10211_v61  ;;  %v9606_v47 = vmax.f32 %v9604_v28, %v9605_v31  ;;  %v9619_v57 = vrot.slane %v9618_v35, 4  ;;  %v9625_v26 = vsel %vm143_vm4, %v7692_v16, -inf  ;;  %15267 = vmatprep.subr.mxu1 %v10596_v41 }
 0x549   :  { %v10516_v15 = vsel %vm10425_vm5, %v10206_v46, %v10203_v11  ;;  %v9613_v32 = vmax.f32 %v9611_v56, %v9612_v37  ;;  %v9626_v3 = vrot.slane %v9625_v26, 4  ;;  %v7659_v2 = vcombine.high %v6699_v14, %v6699_v14  ;;  %15268 = vmatpush3.msra.mxu1 %v10596_v41  ;;  %v10595_v11 = vld [vmem:[%s21040_s3 + $0x10] sm:$0xff] }
 0x54a   :  { %v10517_v54 = vsel %vm10427_vm6, %v10209_v53, %v10516_v15  ;;  %v9607_v44 = vrot.slane %v9606_v47, 2  ;;  %v9620_v58 = vmax.f32 %v9618_v35, %v9619_v57  ;;  %v7666_v60 = vrot.slane %v6699_v14, %v18372_v63  ;;  %15269 = vmatprep.subr.mxu1 %v10595_v11  ;;  %v10594_v35 = vld [vmem:[%s21040_s3 + $0x8] sm:$0xff] }
 0x54b   :  { %v10518_v9 = vsel %vm10429_vm7, %v10212_v40, %v10517_v54  ;;  %v9614_v55 = vrot.slane %v9613_v32, 2  ;;  %v9627_v42 = vmax.f32 %v9625_v26, %v9626_v3  ;;  %v7673_v45 = vrot.slane %v7659_v2, %v18372_v63  ;;  %15270 = vmatpush3.msra.mxu1 %v10595_v11  ;;  %v21454_v26 = vld [vmem:[#allocation46_spill] sm:$0xff] }
 0x54c   :  { %v10519_v10 = vsel %vm10431_vm8, %v10215_v23, %v10518_v9  ;;  %v9608_v19 = vmax.f32 %v9606_v47, %v9607_v44  ;;  %v9621_v8 = vrot.slane %v9620_v58, 2  ;;  %v7674_v29 = vcombine.high %v7666_v60, %v7666_v60  ;;  %15271 = vmatprep.subr.mxu1 %v10594_v35  ;;  %v10593_v3 = vld [vmem:[%s21040_s3] sm:$0xff]  ;;  %v13519_v9 = vld [vmem:[%s21040_s3 + $0xd8] sm:$0xff] }
 0x54d   :  { %v10520_v0 = vsel %vm10433_vm9, %v10218_v5, %v10519_v10  ;;  %v9615_v17 = vmax.f32 %v9613_v32, %v9614_v55  ;;  %v9628_v24 = vrot.slane %v9627_v42, 2  ;;  %v7675_v50 = vcombine.high %v7673_v45, %v7673_v45  ;;  %v6473_v32 = vpop.f32.mrf.mxu0  ;;  %15272 = vmatpush3.msra.mxu1 %v10594_v35  ;;  %v20148_v10 = vld [vmem:[%s21040_s3 + $0x58] sm:$0xff]  ;;  %15427 = vmatprep.subr.mxu0 %v13519_v9 }
 0x54e   :  { %v10521_v4 = vsel %vm10435_vm10, %v10221_v20, %v10520_v0  ;;  %v9609_v43 = vrot.slane %v9608_v19, 1  ;;  %v9622_v1 = vmax.f32 %v9620_v58, %v9621_v8  ;;  %v9576_v22 = vsel %vm143_vm4, %v7666_v60, -inf  ;;  %v21455_v58 = vld [vmem:[#allocation59_spill] sm:$0xff]  ;;  %15273 = vmatprep.subr.mxu1 %v10593_v3  ;;  %15428 = vmatpush3.msra.mxu0 %v13519_v9 }
 0x54f   :  { %v10522_v62 = vsel %vm10437_vm11, %v10224_v30, %v10521_v4  ;;  %v9616_v7 = vrot.slane %v9615_v17, 1  ;;  %v9629_v23 = vmax.f32 %v9627_v42, %v9628_v24  ;;  %v9577_v52 = vrot.slane %v9576_v22, 4  ;;  %15274 = vmatpush3.msra.mxu1 %v10593_v3 }
 0x550   :  { %10573 = vst.msk [vmem:[#allocation3 + $0xf1] sm:$0xff] %vm141_vm3, %v10522_v62  ;;  %v9610_v5 = vmax.f32 %v9608_v19, %v9609_v43  ;;  %v9623_v14 = vrot.slane %v9622_v1, 1  ;;  %v9583_v20 = vsel %vm143_vm4, %v7674_v29, -inf  ;;  %v9590_v13 = vsel %vm143_vm4, %v7673_v45, -inf  ;;  %v13518_v19 = vld [vmem:[%s21040_s3 + $0xd0] sm:$0xff]  ;;  %15299 = vmatprep.subr.mxu1 %v20148_v10 }
 0x551   :  { %v9617_v12 = vmax.f32 %v9615_v17, %v9616_v7  ;;  %v9630_v28 = vrot.slane %v9629_v23, 1  ;;  %v9578_v30 = vmax.f32 %v9576_v22, %v9577_v52  ;;  %v9584_v38 = vrot.slane %v9583_v20, 4  ;;  %15429 = vmatprep.subr.mxu0 %v13518_v19 }
 0x552   :  { %v20120_v16 = vadd.f32 %v15136_v51, %v21453_v59  ;;  %v9624_v33 = vmax.f32 %v9622_v1, %v9623_v14  ;;  %v9591_v53 = vrot.slane %v9590_v13, 4  ;;  %v9597_v31 = vsel %vm143_vm4, %v7675_v50, -inf  ;;  %15430 = vmatpush3.msra.mxu0 %v13518_v19 }
 0x553   :  { %v9631_v56 = vmax.f32 %v9629_v23, %v9630_v28  ;;  %v20124_v46 = vsel %vm141_vm3, %v9610_v5, -inf  ;;  %v9579_v61 = vrot.slane %v9578_v30, 2  ;;  %v9585_v37 = vmax.f32 %v9583_v20, %v9584_v38  ;;  %v13517_v20 = vld [vmem:[%s21040_s3 + $0xc8] sm:$0xff] }
 0x554   :  { %v20130_v40 = vsel %vm141_vm3, %v9617_v12, -inf  ;;  %v9592_v47 = vmax.f32 %v9590_v13, %v9591_v53  ;;  %v9598_v57 = vrot.slane %v9597_v31, 4  ;;  %v6567_v15 = vadd.f32 %v15222_v48, %v21454_v26  ;;  %15431 = vmatprep.subr.mxu0 %v13517_v20 }
 0x555   :  { %v20137_v2 = vsel %vm141_vm3, %v9624_v33, -inf  ;;  %v9580_v54 = vmax.f32 %v9578_v30, %v9579_v61  ;;  %v9586_v44 = vrot.slane %v9585_v37, 2  ;;  %v6566_v60 = vadd.f32 %v6463_v27, %v21455_v58  ;;  %15432 = vmatpush3.msra.mxu0 %v13517_v20 }
 0x556   :  { %v9593_v55 = vrot.slane %v9592_v47, 2  ;;  %v9599_v48 = vmax.f32 %v9597_v31, %v9598_v57  ;;  %v6638_v42 = vadd.f32 %v19874_v21, %v6567_v15  ;;  %v6569_v45 = vadd.f32 %v15225_v6, %v18746_v25 }
 0x557   :  { %v9581_v8 = vrot.slane %v9580_v54, 1  ;;  %v9587_v29 = vmax.f32 %v9585_v37, %v9586_v44  ;;  %v6637_v27 = vadd.f32 %v19874_v21, %v6566_v60  ;;  %v6568_v0 = vadd.f32 %v6473_v32, %v18786_v34  ;;  %v10610_v17 = vld [vmem:[#allocation3 + $0xf1] sm:$0xff] }
 0x558   :  { %v20156_v25 = vsel %vm141_vm3, %v9631_v56, -inf  ;;  %v9594_v24 = vmax.f32 %v9592_v47, %v9593_v55  ;;  %v9600_v50 = vrot.slane %v9599_v48, 2  ;;  %v6702_v4 = vmax.f32 %v6638_v42, 0.0  ;;  %15262 = vmatmul.mubr.msk.f32.gmra.mxu1 %vm141_vm3, %v10610_v17  ;;  %15389 = vmatprep.mubr.msk.f32.mxu0 %vm141_vm3, %v10610_v17 }
 0x559   :  { %v9582_v43 = vmax.f32 %v9580_v54, %v9581_v8  ;;  %v9588_v1 = vrot.slane %v9587_v29, 1  ;;  %v6701_v22 = vmax.f32 %v6637_v27, 0.0  ;;  %v20161_v51 = vadd.f32 %v19874_v21, %v6569_v45 }
 0x55a   :  { %v9595_v34 = vrot.slane %v9594_v24, 1  ;;  %v9601_v62 = vmax.f32 %v9599_v48, %v9600_v50  ;;  %v7710_v7 = vcombine.high %v6702_v4, %v6702_v4  ;;  %v7717_v23 = vrot.slane %v6702_v4, %v18372_v63 }
 0x55b   :  { %v9589_v52 = vmax.f32 %v9587_v29, %v9588_v1  ;;  %v7693_v41 = vcombine.high %v6701_v22, %v6701_v22  ;;  %v7700_v5 = vrot.slane %v6701_v22, %v18372_v63  ;;  %v20167_v14 = vadd.f32 %v19874_v21, %v6568_v0  ;;  %v13516_v21 = vld [vmem:[%s21040_s3 + $0xc0] sm:$0xff] }
 0x55c   :  { %v9596_v13 = vmax.f32 %v9594_v24, %v9595_v34  ;;  %v9602_v6 = vrot.slane %v9601_v62, 1  ;;  %v7724_v12 = vrot.slane %v7710_v7, %v18372_v63  ;;  %v7725_v28 = vcombine.high %v7717_v23, %v7717_v23  ;;  %15433 = vmatprep.subr.mxu0 %v13516_v21 }
 0x55d   :  { %v20174_v30 = vsel %vm141_vm3, %v9582_v43, -inf  ;;  %v9660_v38 = vsel %vm143_vm4, %v7717_v23, -inf  ;;  %v7707_v11 = vrot.slane %v7693_v41, %v18372_v63  ;;  %v7708_v59 = vcombine.high %v7700_v5, %v7700_v5  ;;  %15434 = vmatpush3.msra.mxu0 %v13516_v21 }
 0x55e   :  { %v20181_v33 = vmax.f32 %v9601_v62, %v9602_v6  ;;  %v20184_v53 = vsel %vm141_vm3, %v9589_v52, -inf  ;;  %v7726_v31 = vcombine.high %v7724_v12, %v7724_v12  ;;  %v9661_v56 = vrot.slane %v9660_v38, 4 }
 0x55f   :  { %v9667_v61 = vsel %vm143_vm4, %v7725_v28, -inf  ;;  %v9674_v37 = vsel %vm143_vm4, %v7724_v12, -inf  ;;  %v7709_v35 = vcombine.high %v7707_v11, %v7707_v11  ;;  %v9632_v47 = vsel %vm143_vm4, %v7700_v5, -inf }
 0x560   :  { %v20190_v57 = vsel %vm141_vm3, %v9596_v13, -inf  ;;  %v9662_v26 = vmax.f32 %v9660_v38, %v9661_v56  ;;  %v9668_v15 = vrot.slane %v9667_v61, 4  ;;  %v9675_v32 = vrot.slane %v9674_v37, 4 }
 0x561   :  { %v9681_v3 = vsel %vm143_vm4, %v7726_v31, -inf  ;;  %v9633_v54 = vrot.slane %v9632_v47, 4  ;;  %v9639_v44 = vsel %vm143_vm4, %v7708_v59, -inf  ;;  %v9646_v58 = vsel %vm143_vm4, %v7707_v11, -inf }
 0x562   :  { %v9663_v60 = vrot.slane %v9662_v26, 2  ;;  %v9669_v9 = vmax.f32 %v9667_v61, %v9668_v15  ;;  %v9676_v55 = vmax.f32 %v9674_v37, %v9675_v32  ;;  %v9682_v48 = vrot.slane %v9681_v3, 4 }
 0x563   :  { %v9634_v42 = vmax.f32 %v9632_v47, %v9633_v54  ;;  %v9640_v45 = vrot.slane %v9639_v44, 4  ;;  %v9647_v19 = vrot.slane %v9646_v58, 4  ;;  %v9653_v8 = vsel %vm143_vm4, %v7709_v35, -inf }
 0x564   :  { %v9664_v29 = vmax.f32 %v9662_v26, %v9663_v60  ;;  %v9670_v27 = vrot.slane %v9669_v9, 2  ;;  %v9677_v0 = vrot.slane %v9676_v55, 2  ;;  %v9683_v17 = vmax.f32 %v9681_v3, %v9682_v48  ;;  %v15228_v26 = vpop.f32.mrf.mxu0 }
 0x565   :  { %v9635_v24 = vrot.slane %v9634_v42, 2  ;;  %v9641_v50 = vmax.f32 %v9639_v44, %v9640_v45  ;;  %v9648_v4 = vmax.f32 %v9646_v58, %v9647_v19  ;;  %v9654_v43 = vrot.slane %v9653_v8, 4 }
 0x566   :  { %v9665_v1 = vrot.slane %v9664_v29, 1  ;;  %v9671_v22 = vmax.f32 %v9669_v9, %v9670_v27  ;;  %v9678_v34 = vmax.f32 %v9676_v55, %v9677_v0  ;;  %v9684_v62 = vrot.slane %v9683_v17, 2 }
 0x567   :  { %v9636_v7 = vmax.f32 %v9634_v42, %v9635_v24  ;;  %v9642_v23 = vrot.slane %v9641_v50, 2  ;;  %v9649_v52 = vrot.slane %v9648_v4, 2  ;;  %v9655_v41 = vmax.f32 %v9653_v8, %v9654_v43 }
 0x568   :  { %v9666_v5 = vmax.f32 %v9664_v29, %v9665_v1  ;;  %v9672_v20 = vrot.slane %v9671_v22, 1  ;;  %v9679_v13 = vrot.slane %v9678_v34, 1  ;;  %v9685_v6 = vmax.f32 %v9683_v17, %v9684_v62 }
 0x569   :  { %v9637_v12 = vrot.slane %v9636_v7, 1  ;;  %v9643_v28 = vmax.f32 %v9641_v50, %v9642_v23  ;;  %v9650_v38 = vmax.f32 %v9648_v4, %v9649_v52  ;;  %v9656_v11 = vrot.slane %v9655_v41, 2 }
 0x56a   :  { %v9673_v59 = vmax.f32 %v9671_v22, %v9672_v20  ;;  %v9680_v21 = vmax.f32 %v9678_v34, %v9679_v13  ;;  %v9686_v31 = vrot.slane %v9685_v6, 1  ;;  %v10238_v56 = vsel %vm141_vm3, %v9666_v5, -inf }
 0x56b   :  { %v10239_v61 = vmax.f32 %v20124_v46, %v10238_v56  ;;  %v9638_v37 = vmax.f32 %v9636_v7, %v9637_v12  ;;  %v9644_v35 = vrot.slane %v9643_v28, 1  ;;  %v9651_v47 = vrot.slane %v9650_v38, 1 }
 0x56c   :  { %v9687_v15 = vmax.f32 %v9685_v6, %v9686_v31  ;;  %v10241_v32 = vsel %vm141_vm3, %v9673_v59, -inf  ;;  %v10244_v3 = vsel %vm141_vm3, %v9680_v21, -inf  ;;  %v9657_v54 = vmax.f32 %v9655_v41, %v9656_v11  ;;  %v20237_v11 = vld [vmem:[%s21040_s3 + $0x118] sm:$0xff] }
 0x56d   :  { %v10242_v44 = vmax.f32 %v20130_v40, %v10241_v32  ;;  %v10245_v58 = vmax.f32 %v20137_v2, %v10244_v3  ;;  %v9645_v60 = vmax.f32 %v9643_v28, %v9644_v35  ;;  %v9652_v9 = vmax.f32 %v9650_v38, %v9651_v47  ;;  %v6483_v40 = vpop.f32.mrf.mxu0  ;;  %15491 = vmatprep.subr.mxu0 %v20237_v11 }
 0x56e   :  { %v10247_v55 = vsel %vm141_vm3, %v9687_v15, -inf  ;;  %v9658_v48 = vrot.slane %v9657_v54, 1  ;;  %v10226_v46 = vsel %vm141_vm3, %v9638_v37, -inf  ;;  %v6704_v42 = vmax.f32 %v20161_v51, 0.0 }
 0x56f   :  { %v10248_v45 = vmax.f32 %v20156_v25, %v10247_v55  ;;  %v10227_v19 = vmax.f32 %v20174_v30, %v10226_v46  ;;  %v10229_v8 = vsel %vm141_vm3, %v9645_v60, -inf  ;;  %v10232_v29 = vsel %vm141_vm3, %v9652_v9, -inf }
 0x570   :  { %v9659_v27 = vmax.f32 %v9657_v54, %v9658_v48  ;;  %v10230_v2 = vmax.f32 %v20184_v53, %v10229_v8  ;;  %v10233_v0 = vmax.f32 %v20190_v57, %v10232_v29  ;;  %v7744_v17 = vcombine.high %v6704_v42, %v6704_v42  ;;  %v15231_v29 = vpop.f32.mrf.mxu0 }
 0x571   :  { %v10234_v24 = vsel %vm141_vm3, %v20181_v33, -inf  ;;  %v7751_v51 = vrot.slane %v6704_v42, %v18372_v63  ;;  %v6703_v25 = vmax.f32 %v20167_v14, 0.0  ;;  %v20216_v30 = vadd.f32 %v15228_v26, %v18789_v36 }
 0x572   :  { %v10235_v50 = vsel %vm141_vm3, %v9659_v27, -inf  ;;  %v10523_v4 = vsel %vm10425_vm5, %v10230_v2, %v10227_v19  ;;  %v7758_v43 = vrot.slane %v7744_v17, %v18372_v63  ;;  %v20222_v53 = vadd.f32 %v6483_v40, %v18813_v18 }
 0x573   :  { %v10236_v57 = vmax.f32 %v10234_v24, %v10235_v50  ;;  %v10524_v1 = vsel %vm10427_vm6, %v10233_v0, %v10523_v4  ;;  %v7759_v33 = vcombine.high %v7751_v51, %v7751_v51  ;;  %v9716_v22 = vsel %vm143_vm4, %v7751_v51, -inf }
 0x574   :  { %v7760_v34 = vcombine.high %v7758_v43, %v7758_v43  ;;  %v9717_v14 = vrot.slane %v9716_v22, 4  ;;  %v9730_v36 = vsel %vm143_vm4, %v7758_v43, -inf  ;;  %v7727_v62 = vcombine.high %v6703_v25, %v6703_v25 }
 0x575   :  { %v10525_v7 = vsel %vm10429_vm7, %v10236_v57, %v10524_v1  ;;  %v9723_v23 = vsel %vm143_vm4, %v7759_v33, -inf  ;;  %v9731_v52 = vrot.slane %v9730_v36, 4  ;;  %v7734_v41 = vrot.slane %v6703_v25, %v18372_v63 }
 0x576   :  { %v10526_v18 = vsel %vm10431_vm8, %v10239_v61, %v10525_v7  ;;  %v9718_v5 = vmax.f32 %v9716_v22, %v9717_v14  ;;  %v9724_v20 = vrot.slane %v9723_v23, 4  ;;  %v9737_v13 = vsel %vm143_vm4, %v7760_v34, -inf }
 0x577   :  { %v10527_v6 = vsel %vm10433_vm9, %v10242_v44, %v10526_v18  ;;  %v9732_v12 = vmax.f32 %v9730_v36, %v9731_v52  ;;  %v9738_v28 = vrot.slane %v9737_v13, 4  ;;  %v7741_v38 = vrot.slane %v7727_v62, %v18372_v63 }
 0x578   :  { %v10528_v59 = vsel %vm10435_vm10, %v10245_v58, %v10527_v6  ;;  %v9719_v21 = vrot.slane %v9718_v5, 2  ;;  %v9725_v31 = vmax.f32 %v9723_v23, %v9724_v20  ;;  %v7742_v56 = vcombine.high %v7734_v41, %v7734_v41  ;;  %v20257_v23 = vld [vmem:[%s21039_s2] ss:$0 sm:$0xff] }
 0x579   :  { %v10529_v61 = vsel %vm10437_vm11, %v10248_v45, %v10528_v59  ;;  %v9733_v37 = vrot.slane %v9732_v12, 2  ;;  %v9739_v35 = vmax.f32 %v9737_v13, %v9738_v28  ;;  %v7743_v47 = vcombine.high %v7741_v38, %v7741_v38  ;;  %v6493_v28 = vpop.f32.mrf.mxu0 }
 0x57a   :  { %10574 = vst.msk [vmem:[#allocation3 + $0x101] sm:$0xff] %vm141_vm3, %v10529_v61  ;;  %v9720_v26 = vmax.f32 %v9718_v5, %v9719_v21  ;;  %v9726_v15 = vrot.slane %v9725_v31, 2  ;;  %v9688_v32 = vsel %vm143_vm4, %v7734_v41, -inf  ;;  %v9695_v3 = vsel %vm143_vm4, %v7742_v56, -inf }
 0x57b   :  { %v9734_v54 = vmax.f32 %v9732_v12, %v9733_v37  ;;  %v9740_v44 = vrot.slane %v9739_v35, 2  ;;  %v9689_v58 = vrot.slane %v9688_v32, 4  ;;  %v9696_v60 = vrot.slane %v9695_v3, 4 }
 0x57c   :  { %v9721_v9 = vrot.slane %v9720_v26, 1  ;;  %v9727_v55 = vmax.f32 %v9725_v31, %v9726_v15  ;;  %v9702_v48 = vsel %vm143_vm4, %v7741_v38, -inf  ;;  %v9709_v46 = vsel %vm143_vm4, %v7743_v47, -inf }
 0x57d   :  { %v9735_v42 = vrot.slane %v9734_v54, 1  ;;  %v9741_v45 = vmax.f32 %v9739_v35, %v9740_v44  ;;  %v9690_v19 = vmax.f32 %v9688_v32, %v9689_v58  ;;  %v9697_v8 = vmax.f32 %v9695_v3, %v9696_v60 }
 0x57e   :  { %v9722_v40 = vmax.f32 %v9720_v26, %v9721_v9  ;;  %v9728_v27 = vrot.slane %v9727_v55, 1  ;;  %v9703_v2 = vrot.slane %v9702_v48, 4  ;;  %v9710_v0 = vrot.slane %v9709_v46, 4 }
 0x57f   :  { %v9736_v17 = vmax.f32 %v9734_v54, %v9735_v42  ;;  %v9742_v24 = vrot.slane %v9741_v45, 1  ;;  %v9691_v51 = vrot.slane %v9690_v19, 2  ;;  %v9698_v25 = vrot.slane %v9697_v8, 2 }
 0x580   :  { %v9729_v50 = vmax.f32 %v9727_v55, %v9728_v27  ;;  %v9704_v4 = vmax.f32 %v9702_v48, %v9703_v2  ;;  %v9711_v43 = vmax.f32 %v9709_v46, %v9710_v0  ;;  %v6573_v57 = vadd.f32 %v15231_v29, %v18857_v49 }
 0x581   :  { %v9743_v1 = vmax.f32 %v9741_v45, %v9742_v24  ;;  %v20249_v33 = vsel %vm141_vm3, %v9722_v40, -inf  ;;  %v9692_v22 = vmax.f32 %v9690_v19, %v9691_v51  ;;  %v9699_v34 = vmax.f32 %v9697_v8, %v9698_v25  ;;  %v10611_v14 = vld [vmem:[#allocation3 + $0x101] sm:$0xff] }
 0x582   :  { %v20252_v36 = vsel %vm141_vm3, %v9736_v17, -inf  ;;  %v9705_v62 = vrot.slane %v9704_v4, 2  ;;  %v9712_v7 = vrot.slane %v9711_v43, 2  ;;  %v6642_v49 = vadd.f32 %v20257_v23, %v20216_v30  ;;  %15264 = vmatprep.mubr.msk.f32.mxu1 %vm141_vm3, %v10611_v14  ;;  %15390 = vmatmul.mubr.msk.f32.gmra.mxu0 %vm141_vm3, %v10611_v14 }
 0x583   :  { %v20264_v52 = vsel %vm141_vm3, %v9729_v50, -inf  ;;  %v9693_v41 = vrot.slane %v9692_v22, 1  ;;  %v9700_v18 = vrot.slane %v9699_v34, 1  ;;  %v6641_v5 = vadd.f32 %v20257_v23, %v20222_v53 }
 0x584   :  { %v20269_v20 = vsel %vm141_vm3, %v9743_v1, -inf  ;;  %v9706_v13 = vmax.f32 %v9704_v4, %v9705_v62  ;;  %v9713_v6 = vmax.f32 %v9711_v43, %v9712_v7  ;;  %v6706_v12 = vmax.f32 %v6642_v49, 0.0 }
 0x585   :  { %v9694_v30 = vmax.f32 %v9692_v22, %v9693_v41  ;;  %v9701_v38 = vmax.f32 %v9699_v34, %v9700_v18  ;;  %v6705_v59 = vmax.f32 %v6641_v5, 0.0  ;;  %v20272_v21 = vadd.f32 %v20257_v23, %v6573_v57 }
 0x586   :  { %v9707_v31 = vrot.slane %v9706_v13, 1  ;;  %v9714_v56 = vrot.slane %v9713_v6, 1  ;;  %v7778_v61 = vcombine.high %v6706_v12, %v6706_v12  ;;  %v7785_v37 = vrot.slane %v6706_v12, %v18372_v63 }
 0x587   :  { %v20276_v53 = vsel %vm141_vm3, %v9694_v30, -inf  ;;  %v7761_v35 = vcombine.high %v6705_v59, %v6705_v59  ;;  %v7768_v47 = vrot.slane %v6705_v59, %v18372_v63  ;;  %v20280_v26 = vadd.f32 %v6493_v28, %v18866_v39 }
 0x588   :  { %v9708_v15 = vmax.f32 %v9706_v13, %v9707_v31  ;;  %v20283_v32 = vsel %vm141_vm3, %v9701_v38, -inf  ;;  %v7792_v3 = vrot.slane %v7778_v61, %v18372_v63  ;;  %v7793_v54 = vcombine.high %v7785_v37, %v7785_v37 }
 0x589   :  { %v9772_v44 = vsel %vm143_vm4, %v7785_v37, -inf  ;;  %v7775_v58 = vrot.slane %v7761_v35, %v18372_v63  ;;  %v7776_v60 = vcombine.high %v7768_v47, %v7768_v47  ;;  %v9744_v9 = vsel %vm143_vm4, %v7768_v47, -inf }
 0x58a   :  { %v20289_v55 = vmax.f32 %v9713_v6, %v9714_v56  ;;  %v20292_v48 = vsel %vm141_vm3, %v9708_v15, -inf  ;;  %v7794_v39 = vcombine.high %v7792_v3, %v7792_v3  ;;  %v9773_v46 = vrot.slane %v9772_v44, 4 }
 0x58b   :  { %v9779_v42 = vsel %vm143_vm4, %v7793_v54, -inf  ;;  %v9786_v45 = vsel %vm143_vm4, %v7792_v3, -inf  ;;  %v7777_v19 = vcombine.high %v7775_v58, %v7775_v58  ;;  %v9745_v8 = vrot.slane %v9744_v9, 4 }
 0x58c   :  { %v9774_v29 = vmax.f32 %v9772_v44, %v9773_v46  ;;  %v9780_v40 = vrot.slane %v9779_v42, 4  ;;  %v9787_v27 = vrot.slane %v9786_v45, 4  ;;  %v9793_v2 = vsel %vm143_vm4, %v7794_v39, -inf }
 0x58d   :  { %v9794_v0 = vrot.slane %v9793_v2, 4  ;;  %v9746_v17 = vmax.f32 %v9744_v9, %v9745_v8  ;;  %v9751_v24 = vsel %vm143_vm4, %v7776_v60, -inf  ;;  %v9758_v51 = vsel %vm143_vm4, %v7775_v58, -inf  ;;  %v15234_v8 = vpop.f32.mrf.mxu0 }
 0x58e   :  { %v9775_v25 = vrot.slane %v9774_v29, 2  ;;  %v9781_v50 = vmax.f32 %v9779_v42, %v9780_v40  ;;  %v9788_v4 = vmax.f32 %v9786_v45, %v9787_v27  ;;  %v9752_v43 = vrot.slane %v9751_v24, 4 }
 0x58f   :  { %v9795_v57 = vmax.f32 %v9793_v2, %v9794_v0  ;;  %v9747_v1 = vrot.slane %v9746_v17, 2  ;;  %v9759_v22 = vrot.slane %v9758_v51, 4  ;;  %v9765_v34 = vsel %vm143_vm4, %v7777_v19, -inf  ;;  %v5793_v0 = vpop.f32.mrf.mxu1 }
 0x590   :  { %v9776_v14 = vmax.f32 %v9774_v29, %v9775_v25  ;;  %v9782_v62 = vrot.slane %v9781_v50, 2  ;;  %v9789_v7 = vrot.slane %v9788_v4, 2  ;;  %v9753_v49 = vmax.f32 %v9751_v24, %v9752_v43 }
 0x591   :  { %v9796_v41 = vrot.slane %v9795_v57, 2  ;;  %v9748_v18 = vmax.f32 %v9746_v17, %v9747_v1  ;;  %v9760_v5 = vmax.f32 %v9758_v51, %v9759_v22  ;;  %v9766_v13 = vrot.slane %v9765_v34, 4 }
 0x592   :  { %v9777_v6 = vrot.slane %v9776_v14, 1  ;;  %v9783_v12 = vmax.f32 %v9781_v50, %v9782_v62  ;;  %v9790_v28 = vmax.f32 %v9788_v4, %v9789_v7  ;;  %v9754_v30 = vrot.slane %v9753_v49, 2 }
 0x593   :  { %v9797_v38 = vmax.f32 %v9795_v57, %v9796_v41  ;;  %v9749_v59 = vrot.slane %v9748_v18, 1  ;;  %v9761_v31 = vrot.slane %v9760_v5, 2  ;;  %v9767_v56 = vmax.f32 %v9765_v34, %v9766_v13  ;;  %v21456_v34 = vld [vmem:[#allocation56_spill] sm:$0xff] }
 0x594   :  { %v9778_v61 = vmax.f32 %v9776_v14, %v9777_v6  ;;  %v9784_v37 = vrot.slane %v9783_v12, 1  ;;  %v9791_v35 = vrot.slane %v9790_v28, 1  ;;  %v9755_v47 = vmax.f32 %v9753_v49, %v9754_v30 }
 0x595   :  { %v9798_v15 = vrot.slane %v9797_v38, 1  ;;  %v9750_v3 = vmax.f32 %v9748_v18, %v9749_v59  ;;  %v9762_v54 = vmax.f32 %v9760_v5, %v9761_v31  ;;  %v9768_v44 = vrot.slane %v9767_v56, 2 }
 0x596   :  { %v9785_v58 = vmax.f32 %v9783_v12, %v9784_v37  ;;  %v9792_v60 = vmax.f32 %v9790_v28, %v9791_v35  ;;  %v10262_v9 = vsel %vm141_vm3, %v9778_v61, -inf  ;;  %v9756_v39 = vrot.slane %v9755_v47, 1 }
 0x597   :  { %v9799_v46 = vmax.f32 %v9797_v38, %v9798_v15  ;;  %v10263_v42 = vmax.f32 %v20249_v33, %v10262_v9  ;;  %v9763_v45 = vrot.slane %v9762_v54, 1  ;;  %v9769_v19 = vmax.f32 %v9767_v56, %v9768_v44 }
 0x598   :  { %v10265_v29 = vsel %vm141_vm3, %v9785_v58, -inf  ;;  %v10268_v40 = vsel %vm141_vm3, %v9792_v60, -inf  ;;  %v9757_v27 = vmax.f32 %v9755_v47, %v9756_v39  ;;  %v10250_v2 = vsel %vm141_vm3, %v9750_v3, -inf }
 0x599   :  { %v10266_v17 = vmax.f32 %v20264_v52, %v10265_v29  ;;  %v10269_v24 = vmax.f32 %v20252_v36, %v10268_v40  ;;  %v10271_v51 = vsel %vm141_vm3, %v9799_v46, -inf  ;;  %v9764_v25 = vmax.f32 %v9762_v54, %v9763_v45  ;;  %v6503_v36 = vpop.f32.mrf.mxu0 }
 0x59a   :  { %v10272_v33 = vmax.f32 %v20269_v20, %v10271_v51  ;;  %v9770_v50 = vrot.slane %v9769_v19, 1  ;;  %v10251_v4 = vmax.f32 %v20276_v53, %v10250_v2  ;;  %v10253_v43 = vsel %vm141_vm3, %v9757_v27, -inf }
 0x59b   :  { %v10254_v57 = vmax.f32 %v20283_v32, %v10253_v43  ;;  %v10256_v1 = vsel %vm141_vm3, %v9764_v25, -inf  ;;  %v6708_v22 = vmax.f32 %v20272_v21, 0.0  ;;  %v6643_v52 = vadd.f32 %v20257_v23, %v20280_v26 }
 0x59c   :  { %v5864_v14 = vadd.f32 %v5793_v0, %v21456_v34  ;;  %v9771_v62 = vmax.f32 %v9769_v19, %v9770_v50  ;;  %v10257_v20 = vmax.f32 %v20292_v48, %v10256_v1  ;;  %v6575_v7 = vadd.f32 %v15234_v8, %v20120_v16 }
 0x59d   :  { %v10530_v53 = vsel %vm10425_vm5, %v10254_v57, %v10251_v4  ;;  %v7812_v49 = vcombine.high %v6708_v22, %v6708_v22  ;;  %v7819_v32 = vrot.slane %v6708_v22, %v18372_v63  ;;  %v6707_v41 = vmax.f32 %v6643_v52, 0.0 }
 0x59e   :  { %v10258_v21 = vsel %vm141_vm3, %v20289_v55, -inf  ;;  %v10259_v18 = vsel %vm141_vm3, %v9771_v62, -inf  ;;  %v10531_v26 = vsel %vm10427_vm6, %v10257_v20, %v10530_v53  ;;  %v6574_v5 = vadd.f32 %v6503_v36, %v5864_v14 }
 0x59f   :  { %v10260_v13 = vmax.f32 %v10258_v21, %v10259_v18  ;;  %v7826_v6 = vrot.slane %v7812_v49, %v18372_v63  ;;  %v7827_v48 = vcombine.high %v7819_v32, %v7819_v32  ;;  %v9828_v16 = vsel %vm143_vm4, %v7819_v32, -inf  ;;  %v10577_v49 = vld [vmem:[#allocation3] sm:$0xff] }
 0x5a0   :  { %v9829_v12 = vrot.slane %v9828_v16, 4  ;;  %v7795_v28 = vcombine.high %v6707_v41, %v6707_v41  ;;  %v7802_v30 = vrot.slane %v6707_v41, %v18372_v63  ;;  %v6646_v38 = vadd.f32 %v20257_v23, %v6575_v7 }
 0x5a1   :  { %v10532_v59 = vsel %vm10429_vm7, %v10260_v13, %v10531_v26  ;;  %v7828_v55 = vcombine.high %v7826_v6, %v7826_v6  ;;  %v9835_v31 = vsel %vm143_vm4, %v7827_v48, -inf  ;;  %v9842_v56 = vsel %vm143_vm4, %v7826_v6, -inf }
 0x5a2   :  { %v10533_v61 = vsel %vm10431_vm8, %v10263_v42, %v10532_v59  ;;  %v9830_v37 = vmax.f32 %v9828_v16, %v9829_v12  ;;  %v9836_v35 = vrot.slane %v9835_v31, 4  ;;  %v9843_v47 = vrot.slane %v9842_v56, 4 }
 0x5a3   :  { %v10534_v15 = vsel %vm10433_vm9, %v10266_v17, %v10533_v61  ;;  %v9849_v3 = vsel %vm143_vm4, %v7828_v55, -inf  ;;  %v7809_v54 = vrot.slane %v7795_v28, %v18372_v63  ;;  %v7810_v44 = vcombine.high %v7802_v30, %v7802_v30 }
 0x5a4   :  { %v10535_v58 = vsel %vm10435_vm10, %v10269_v24, %v10534_v15  ;;  %v9831_v60 = vrot.slane %v9830_v37, 2  ;;  %v9837_v9 = vmax.f32 %v9835_v31, %v9836_v35  ;;  %v9844_v39 = vmax.f32 %v9842_v56, %v9843_v47  ;;  %v20358_v31 = vld [vmem:[#allocation3 + $0x10] sm:$0xff]  ;;  %v20369_v15 = vld [vmem:[#allocation3 + $0x20] sm:$0xff] }
 0x5a5   :  { %v10536_v46 = vsel %vm10437_vm11, %v10272_v33, %v10535_v58  ;;  %v9850_v45 = vrot.slane %v9849_v3, 4  ;;  %v7811_v19 = vcombine.high %v7809_v54, %v7809_v54  ;;  %v9800_v42 = vsel %vm143_vm4, %v7802_v30, -inf  ;;  %v13438_v56 = vld [vmem:[%s21040_s3 + $0x50] sm:$0xff] }
 0x5a6   :  { %10575 = vst.msk [vmem:[#allocation3 + $0x111] sm:$0xff] %vm141_vm3, %v10536_v46  ;;  %v9832_v8 = vmax.f32 %v9830_v37, %v9831_v60  ;;  %v9838_v29 = vrot.slane %v9837_v9, 2  ;;  %v9845_v40 = vrot.slane %v9844_v39, 2  ;;  %v9801_v27 = vrot.slane %v9800_v42, 4  ;;  %v13437_v60 = vld [vmem:[%s21040_s3 + $0x48] sm:$0xff] }
 0x5a7   :  { %v9851_v2 = vmax.f32 %v9849_v3, %v9850_v45  ;;  %v9807_v0 = vsel %vm143_vm4, %v7810_v44, -inf  ;;  %v9814_v17 = vsel %vm143_vm4, %v7809_v54, -inf  ;;  %v9821_v24 = vsel %vm143_vm4, %v7811_v19, -inf }
 0x5a8   :  { %v9833_v51 = vrot.slane %v9832_v8, 1  ;;  %v9839_v25 = vmax.f32 %v9837_v9, %v9838_v29  ;;  %v9846_v33 = vmax.f32 %v9844_v39, %v9845_v40  ;;  %v9802_v50 = vmax.f32 %v9800_v42, %v9801_v27  ;;  %v20393_v29 = vld [vmem:[#allocation3 + $0x30] sm:$0xff]  ;;  %v13436_v40 = vld [vmem:[%s21040_s3 + $0x40] sm:$0xff] }
 0x5a9   :  { %v9852_v4 = vrot.slane %v9851_v2, 2  ;;  %v9808_v43 = vrot.slane %v9807_v0, 4  ;;  %v9815_v57 = vrot.slane %v9814_v17, 4  ;;  %v9822_v1 = vrot.slane %v9821_v24, 4 }
 0x5aa   :  { %v9840_v22 = vrot.slane %v9839_v25, 1  ;;  %v9847_v52 = vrot.slane %v9846_v33, 1  ;;  %v9803_v36 = vrot.slane %v9802_v50, 2  ;;  %v6710_v34 = vmax.f32 %v6646_v38, 0.0 }
 0x5ab   :  { %v9853_v14 = vmax.f32 %v9851_v2, %v9852_v4  ;;  %v9809_v62 = vmax.f32 %v9807_v0, %v9808_v43  ;;  %v9816_v20 = vmax.f32 %v9814_v17, %v9815_v57  ;;  %v9823_v7 = vmax.f32 %v9821_v24, %v9822_v1  ;;  %v20401_v24 = vld [vmem:[#allocation3 + $0x40] sm:$0xff]  ;;  %v20411_v4 = vld [vmem:[%s21040_s3 + $0x78] sm:$0xff] }
 0x5ac   :  { %v6645_v53 = vadd.f32 %v20257_v23, %v6574_v5  ;;  %v9834_v32 = vmax.f32 %v9832_v8, %v9833_v51  ;;  %v9804_v21 = vmax.f32 %v9802_v50, %v9803_v36  ;;  %v9841_v13 = vmax.f32 %v9839_v25, %v9840_v22 }
 0x5ad   :  { %v9854_v41 = vrot.slane %v9853_v14, 1  ;;  %v9810_v18 = vrot.slane %v9809_v62, 2  ;;  %v20344_v26 = vld [vmem:[#allocation3 + $0x111] sm:$0xff]  ;;  %v7846_v6 = vcombine.high %v6710_v34, %v6710_v34  ;;  %v9848_v48 = vmax.f32 %v9846_v33, %v9847_v52 }
 0x5ae   :  { %15265 = vmatmul.mubr.msk.f32.gmra.mxu1 %vm141_vm3, %v20344_v26  ;;  %15392 = vmatprep.mubr.msk.f32.mxu0 %vm141_vm3, %v20344_v26  ;;  %v9817_v16 = vrot.slane %v9816_v20, 2  ;;  %v9824_v12 = vrot.slane %v9823_v7, 2  ;;  %v7853_v23 = vrot.slane %v6710_v34, %v18372_v63  ;;  %v6709_v28 = vmax.f32 %v6645_v53, 0.0 }
 0x5af   :  { %15275 = vmatprep.mubr.msk.f32.mxu1 %vm141_vm3, %v10577_v49  ;;  %v7860_v5 = vrot.slane %v7846_v6, %v18372_v63  ;;  %v9855_v30 = vmax.f32 %v9853_v14, %v9854_v41  ;;  %v20354_v38 = vsel %vm141_vm3, %v9834_v32, -inf  ;;  %v9805_v59 = vrot.slane %v9804_v21, 1  ;;  %v20415_v14 = vld [vmem:[#allocation3 + $0x50] sm:$0xff]  ;;  %v20419_v49 = vld [vmem:[#allocation3 + $0x60] sm:$0xff] }
 0x5b0   :  { %v20356_v55 = vmax.f32 %v9809_v62, %v9810_v18  ;;  %v20364_v61 = vsel %vm141_vm3, %v9841_v13, -inf  ;;  %v7861_v37 = vcombine.high %v7853_v23, %v7853_v23  ;;  %v9884_v47 = vsel %vm143_vm4, %v7853_v23, -inf }
 0x5b1   :  { %v7862_v35 = vcombine.high %v7860_v5, %v7860_v5  ;;  %v20372_v3 = vsel %vm141_vm3, %v9848_v48, -inf  ;;  %v20374_v54 = vmax.f32 %v9816_v20, %v9817_v16  ;;  %v20376_v44 = vmax.f32 %v9823_v7, %v9824_v12  ;;  %v10585_v12 = vld [vmem:[#allocation3 + $0xa0] sm:$0xff] }
 0x5b2   :  { %15276 = vmatmul.mubr.msk.f32.vlgmr.msra.gmra.mxu1 %vm141_vm3, %v20358_v31  ;;  %v9885_v58 = vrot.slane %v9884_v47, 4  ;;  %v9891_v9 = vsel %vm143_vm4, %v7861_v37, -inf  ;;  %v9898_v39 = vsel %vm143_vm4, %v7860_v5, -inf  ;;  %v7829_v45 = vcombine.high %v6709_v28, %v6709_v28 }
 0x5b3   :  { %15300 = vmatpush3.msra.mxu1 %v20148_v10  ;;  %15278 = vmatprep.mubr.msk.f32.mxu1 %vm141_vm3, %v20369_v15  ;;  %v9905_v46 = vsel %vm143_vm4, %v7862_v35, -inf  ;;  %v20388_v19 = vsel %vm141_vm3, %v9855_v30, -inf  ;;  %v20390_v42 = vmax.f32 %v9804_v21, %v9805_v59  ;;  %v9812_v10 = vrot.slane %v20356_v55, 1  ;;  %v20426_v59 = vld [vmem:[#allocation3 + $0x70] sm:$0xff] }
 0x5b4   :  { %15301 = vmatprep.subr.mxu1 %v13438_v56  ;;  %v9886_v8 = vmax.f32 %v9884_v47, %v9885_v58  ;;  %v9892_v27 = vrot.slane %v9891_v9, 4  ;;  %v9899_v2 = vrot.slane %v9898_v39, 4  ;;  %v9906_v0 = vrot.slane %v9905_v46, 4 }
 0x5b5   :  { %15302 = vmatpush3.msra.mxu1 %v13438_v56  ;;  %v7836_v17 = vrot.slane %v6709_v28, %v18372_v63  ;;  %v9819_v51 = vrot.slane %v20374_v54, 1  ;;  %v9826_v25 = vrot.slane %v20376_v44, 1  ;;  %v7843_v50 = vrot.slane %v7829_v45, %v18372_v63 }
 0x5b6   :  { %15279 = vmatmul.mubr.msk.f32.gmra.mxu1 %vm141_vm3, %v20393_v29  ;;  %15303 = vmatprep.subr.mxu1 %v13437_v60  ;;  %v9887_v33 = vrot.slane %v9886_v8, 2  ;;  %v9893_v43 = vmax.f32 %v9891_v9, %v9892_v27  ;;  %v9900_v57 = vmax.f32 %v9898_v39, %v9899_v2  ;;  %v9907_v1 = vmax.f32 %v9905_v46, %v9906_v0 }
 0x5b7   :  { %15281 = vmatprep.mubr.msk.f32.mxu1 %vm141_vm3, %v20401_v24  ;;  %15304 = vmatpush3.msra.mxu1 %v13437_v60  ;;  %v7844_v22 = vcombine.high %v7836_v17, %v7836_v17  ;;  %v7845_v36 = vcombine.high %v7843_v50, %v7843_v50  ;;  %v9856_v34 = vsel %vm143_vm4, %v7836_v17, -inf  ;;  %v9870_v63 = vsel %vm143_vm4, %v7843_v50, -inf }
 0x5b8   :  { %15305 = vmatprep.subr.mxu1 %v13436_v40  ;;  %v9888_v52 = vmax.f32 %v9886_v8, %v9887_v33  ;;  %v9894_v62 = vrot.slane %v9893_v43, 2  ;;  %v9901_v20 = vrot.slane %v9900_v57, 2  ;;  %v9908_v7 = vrot.slane %v9907_v1, 2  ;;  %v20436_v33 = vld [vmem:[#allocation3 + $0xb0] sm:$0xff] }
 0x5b9   :  { %15306 = vmatpush3.msra.mxu1 %v13436_v40  ;;  %v9857_v53 = vrot.slane %v9856_v34, 4  ;;  %v9863_v41 = vsel %vm143_vm4, %v7844_v22, -inf  ;;  %v9871_v21 = vrot.slane %v9870_v63, 4  ;;  %v9877_v18 = vsel %vm143_vm4, %v7845_v36, -inf  ;;  %v20444_v22 = vld [vmem:[#allocation3 + $0xc0] sm:$0xff] }
 0x5ba   :  { %15282 = vmatmul.mubr.msk.f32.gmra.mxu1 %vm141_vm3, %v20415_v14  ;;  %15331 = vmatprep.subr.mxu1 %v20411_v4  ;;  %v9889_v32 = vrot.slane %v9888_v52, 1  ;;  %v9895_v13 = vmax.f32 %v9893_v43, %v9894_v62  ;;  %v9902_v6 = vmax.f32 %v9900_v57, %v9901_v20  ;;  %v9909_v48 = vmax.f32 %v9907_v1, %v9908_v7  ;;  %v20454_v7 = vld [vmem:[#allocation3 + $0xd0] sm:$0xff] }
 0x5bb   :  { %15284 = vmatprep.mubr.msk.f32.mxu1 %vm141_vm3, %v20419_v49  ;;  %v9858_v16 = vmax.f32 %v9856_v34, %v9857_v53  ;;  %v9864_v5 = vrot.slane %v9863_v41, 4  ;;  %v9872_v28 = vmax.f32 %v9870_v63, %v9871_v21  ;;  %v9878_v30 = vrot.slane %v9877_v18, 4 }
 0x5bc   :  { %v9890_v23 = vmax.f32 %v9888_v52, %v9889_v32  ;;  %v9896_v56 = vrot.slane %v9895_v13, 1  ;;  %v9903_v37 = vrot.slane %v9902_v6, 1  ;;  %v9910_v35 = vrot.slane %v9909_v48, 1  ;;  %v20461_v32 = vld [vmem:[#allocation3 + $0xe0] sm:$0xff] }
 0x5bd   :  { %v9859_v47 = vrot.slane %v9858_v16, 2  ;;  %v9865_v60 = vmax.f32 %v9863_v41, %v9864_v5  ;;  %v9873_v9 = vrot.slane %v9872_v28, 2  ;;  %v9879_v39 = vmax.f32 %v9877_v18, %v9878_v30  ;;  %v11004_v30 = vld [vmem:[#allocation3 + $0x2] sm:$0xff] }
 0x5be   :  { %15285 = vmatmul.mubr.msk.f32.gmra.mxu1 %vm141_vm3, %v20426_v59  ;;  %v20431_v58 = vsel %vm141_vm3, %v9890_v23, -inf  ;;  %v9897_v46 = vmax.f32 %v9895_v13, %v9896_v56  ;;  %v9904_v45 = vmax.f32 %v9902_v6, %v9903_v37  ;;  %v9911_v8 = vmax.f32 %v9909_v48, %v9910_v35  ;;  %v20470_v6 = vld [vmem:[#allocation3 + $0xf0] sm:$0xff]  ;;  %v20478_v23 = vld [vmem:[#allocation3 + $0x100] sm:$0xff] }
 0x5bf   :  { %15287 = vmatprep.mubr.msk.f32.mxu1 %vm141_vm3, %v10585_v12  ;;  %v10287_v40 = vmax.f32 %v20354_v38, %v20431_v58  ;;  %v9860_v27 = vmax.f32 %v9858_v16, %v9859_v47  ;;  %v9866_v2 = vrot.slane %v9865_v60, 2  ;;  %v9874_v0 = vmax.f32 %v9872_v28, %v9873_v9  ;;  %v20483_v37 = vld [vmem:[#allocation3 + $0x110] sm:$0xff] }
 0x5c0   :  { %v9880_v17 = vrot.slane %v9879_v39, 2  ;;  %v9820_v50 = vmax.f32 %v20374_v54, %v9819_v51  ;;  %v10289_v43 = vsel %vm141_vm3, %v9897_v46, -inf  ;;  %v10292_v57 = vsel %vm141_vm3, %v9904_v45, -inf  ;;  %v20492_v9 = vld [vmem:[#allocation3 + $0x12] sm:$0xff]  ;;  %v20500_v45 = vld [vmem:[#allocation3 + $0x22] sm:$0xff] }
 0x5c1   :  { %v10295_v1 = vsel %vm141_vm3, %v9911_v8, -inf  ;;  %v10290_v38 = vmax.f32 %v20364_v61, %v10289_v43  ;;  %v10293_v52 = vmax.f32 %v20372_v3, %v10292_v57  ;;  %v9861_v34 = vrot.slane %v9860_v27, 1  ;;  %v11012_v57 = vld [vmem:[#allocation3 + $0xa2] sm:$0xff] }
 0x5c2   :  { %15288 = vmatmul.mubr.msk.f32.gmra.mxu1 %vm141_vm3, %v20436_v33  ;;  %v10296_v36 = vmax.f32 %v20388_v19, %v10295_v1  ;;  %v9867_v54 = vmax.f32 %v9865_v60, %v9866_v2  ;;  %v9875_v51 = vrot.slane %v9874_v0, 1  ;;  %v9881_v63 = vmax.f32 %v9879_v39, %v9880_v17  ;;  %v13458_v39 = vld [vmem:[%s21040_s3 + $0x70] sm:$0xff]  ;;  %v13456_v2 = vld [vmem:[%s21040_s3 + $0x60] sm:$0xff] }
 0x5c3   :  { %15290 = vmatprep.mubr.msk.f32.mxu1 %vm141_vm3, %v20444_v22  ;;  %v9813_v62 = vmax.f32 %v20356_v55, %v9812_v10  ;;  %v9862_v20 = vmax.f32 %v9860_v27, %v9861_v34  ;;  %v9827_v61 = vmax.f32 %v20376_v44, %v9826_v25  ;;  %v10273_v41 = vsel %vm141_vm3, %v20390_v42, -inf  ;;  %v20510_v27 = vld [vmem:[#allocation3 + $0x32] sm:$0xff]  ;;  %v20558_v34 = vld [vmem:[#allocation3 + $0xc2] sm:$0xff] }
 0x5c4   :  { %v9868_v3 = vrot.slane %v9867_v54, 1  ;;  %v9876_v19 = vmax.f32 %v9874_v0, %v9875_v51  ;;  %v9882_v53 = vrot.slane %v9881_v63, 1  ;;  %v10279_v55 = vsel %vm141_vm3, %v9820_v50, -inf  ;;  %v13499_v0 = vld [vmem:[%s21040_s3 + $0xb8] sm:$0xff]  ;;  %v20528_v50 = vld [vmem:[#allocation3 + $0x62] sm:$0xff] }
 0x5c5   :  { %v10274_v10 = vsel %vm141_vm3, %v9862_v20, -inf  ;;  %v10276_v48 = vsel %vm141_vm3, %v9813_v62, -inf  ;;  %v10282_v16 = vsel %vm141_vm3, %v9827_v61, -inf  ;;  %v20524_v17 = vld [vmem:[#allocation3 + $0x52] sm:$0xff]  ;;  %v20573_v51 = vld [vmem:[#allocation3 + $0xe2] sm:$0xff] }
 0x5c6   :  { %15291 = vmatmul.mubr.msk.f32.gmra.mxu1 %vm141_vm3, %v20454_v7  ;;  %v9869_v21 = vmax.f32 %v9867_v54, %v9868_v3  ;;  %v9883_v44 = vmax.f32 %v9881_v63, %v9882_v53  ;;  %v10275_v25 = vmax.f32 %v10273_v41, %v10274_v10  ;;  %v10280_v18 = vsel %vm141_vm3, %v9876_v19, -inf  ;;  %v20538_v1 = vld [vmem:[#allocation3 + $0x72] sm:$0xff]  ;;  %v13556_v54 = vld [vmem:[%s21040_s3 + $0x100] sm:$0xff] }
 0x5c7   :  { %15293 = vmatprep.mubr.msk.f32.mxu1 %vm141_vm3, %v20461_v32  ;;  %v10281_v13 = vmax.f32 %v10279_v55, %v10280_v18  ;;  %v11931_v63 = vld [vmem:[#allocation3 + $0x80] sm:$0xff]  ;;  %v11932_v62 = vld [vmem:[#allocation3 + $0x90] sm:$0xff] }
 0x5c8   :  { %v10277_v42 = vsel %vm141_vm3, %v9869_v21, -inf  ;;  %v10283_v12 = vsel %vm141_vm3, %v9883_v44, -inf  ;;  %v20580_v20 = vld [vmem:[#allocation3 + $0xf2] sm:$0xff]  ;;  %v20584_v61 = vld [vmem:[#allocation3 + $0x102] sm:$0xff] }
 0x5c9   :  { %v10278_v5 = vmax.f32 %v10276_v48, %v10277_v42  ;;  %v10284_v28 = vmax.f32 %v10282_v16, %v10283_v12  ;;  %v20591_v3 = vld [vmem:[#allocation3 + $0x112] sm:$0xff]  ;;  %v12155_v55 = vld [vmem:[#allocation3 + $0x21] sm:$0xff]  ;;  %v15245_v12 = vpop.f32.mrf.mxu1 }
 0x5ca   :  { %15294 = vmatmul.mubr.msk.f32.gmra.mxu1 %vm141_vm3, %v20470_v6  ;;  %v13498_v19 = vld [vmem:[%s21040_s3 + $0xb0] sm:$0xff]  ;;  %v12157_v21 = vld [vmem:[#allocation3 + $0x41] sm:$0xff] }
 0x5cb   :  { %15296 = vmatprep.mubr.msk.f32.mxu1 %vm141_vm3, %v20478_v23  ;;  %v10537_v56 = vsel %vm10425_vm5, %v10278_v5, %v10275_v25  ;;  %v11940_v41 = vld [vmem:[#allocation3 + $0x130] sm:$0xff]  ;;  %v12159_v25 = vld [vmem:[#allocation3 + $0x61] sm:$0xff] }
 0x5cc   :  { %v10538_v35 = vsel %vm10427_vm6, %v10281_v13, %v10537_v56  ;;  %v12156_v10 = vld [vmem:[#allocation3 + $0x31] sm:$0xff]  ;;  %v12161_v13 = vld [vmem:[#allocation3 + $0x81] sm:$0xff] }
 0x5cd   :  { %v10539_v47 = vsel %vm10429_vm7, %v10284_v28, %v10538_v35  ;;  %v12158_v44 = vld [vmem:[#allocation3 + $0x51] sm:$0xff]  ;;  %v15553_v48 = vld [vmem:[#allocation3 + $0xc1] sm:$0xff]  ;;  %v10732_v28 = vpop.f32.mrf.mxu1 }
 0x5ce   :  { %15297 = vmatmul.mubr.msk.f32.gmra.mxu1 %vm141_vm3, %v20483_v37  ;;  %v10540_v58 = vsel %vm10431_vm8, %v10287_v40, %v10539_v47  ;;  %v13457_v40 = vld [vmem:[%s21040_s3 + $0x68] sm:$0xff]  ;;  %v12160_v18 = vld [vmem:[#allocation3 + $0x71] sm:$0xff] }
 0x5cf   :  { %15307 = vmatprep.mubr.msk.f32.mxu1 %vm141_vm3, %v11004_v30  ;;  %v10541_v60 = vsel %vm10433_vm9, %v10290_v38, %v10540_v58  ;;  %v13558_v38 = vld [vmem:[%s21040_s3 + $0x110] sm:$0xff]  ;;  %v15555_v42 = vld [vmem:[#allocation3 + $0xe1] sm:$0xff]  ;;  %v15248_v30 = vpop.f32.mrf.mxu1 }
 0x5d0   :  { %v10542_v46 = vsel %vm10435_vm10, %v10293_v52, %v10541_v60  ;;  %v13557_v52 = vld [vmem:[%s21040_s3 + $0x108] sm:$0xff]  ;;  %v15554_v16 = vld [vmem:[#allocation3 + $0xd1] sm:$0xff] }
 0x5d1   :  { %v10543_v8 = vsel %vm10437_vm11, %v10296_v36, %v10542_v46  ;;  %v20554_v36 = vld [vmem:[#allocation3 + $0xb2] sm:$0xff]  ;;  %v15557_v5 = vld [vmem:[#allocation3 + $0x101] sm:$0xff] }
 0x5d2   :  { %15308 = vmatmul.mubr.msk.f32.vlgmr.msra.gmra.mxu1 %vm141_vm3, %v20492_v9  ;;  %10576 = vst.msk [vmem:[#allocation3 + $0x121] sm:$0xff] %vm141_vm3, %v10543_v8  ;;  %v12170_v56 = vld [vmem:[#allocation3 + $0x131] sm:$0xff] }
 0x5d3   :  { %15332 = vmatpush3.msra.mxu1 %v20411_v4  ;;  %15310 = vmatprep.mubr.msk.f32.mxu1 %vm141_vm3, %v20500_v45  ;;  %v20517_v4 = vld [vmem:[#allocation3 + $0x42] sm:$0xff] }
 0x5d4   :  { %15333 = vmatprep.subr.mxu1 %v13458_v39 }
 0x5d5   :  { %15334 = vmatpush3.msra.mxu1 %v13458_v39 }
 0x5d6   :  { %15311 = vmatmul.mubr.msk.f32.gmra.mxu1 %vm141_vm3, %v20510_v27  ;;  %15335 = vmatprep.subr.mxu1 %v13457_v40 }
 0x5d7   :  { %15313 = vmatprep.mubr.msk.f32.mxu1 %vm141_vm3, %v20517_v4  ;;  %15336 = vmatpush3.msra.mxu1 %v13457_v40 }
 0x5d8   :  { %15337 = vmatprep.subr.mxu1 %v13456_v2 }
 0x5d9   :  { %15338 = vmatpush3.msra.mxu1 %v13456_v2  ;;  %v20530_v43 = vld [vmem:[#allocation3 + $0x121] sm:$0xff]  ;;  %v20749_v2 = vpop.f32.mrf.mxu0 }
 0x5da   :  { %15314 = vmatmul.mubr.msk.f32.gmra.mxu1 %vm141_vm3, %v20524_v17  ;;  %15395 = vmatprep.subr.mxu1 %v13499_v0  ;;  %v11939_v53 = vld [vmem:[#allocation3 + $0x120] sm:$0xff] }
 0x5db   :  { %15316 = vmatprep.mubr.msk.f32.mxu1 %vm141_vm3, %v20528_v50  ;;  %15393 = vmatmul.mubr.msk.f32.gmra.mxu0 %vm141_vm3, %v20530_v43 }
 0x5dc   :  { %15435 = vmatprep.mubr.msk.f32.mxu0 %vm141_vm3, %v20369_v15 }
 0x5de   :  { %15317 = vmatmul.mubr.msk.f32.gmra.mxu1 %vm141_vm3, %v20538_v1 }
 0x5df   :  { %15319 = vmatprep.mubr.msk.f32.mxu1 %vm141_vm3, %v11012_v57  ;;  %15436 = vmatmul.mubr.msk.f32.vlgmr.msra.gmra.mxu0 %vm141_vm3, %v20393_v29 }
 0x5e0   :  { %15438 = vmatprep.mubr.msk.f32.mxu0 %vm141_vm3, %v20401_v24  ;;  %15492 = vmatpush3.msra.mxu0 %v20237_v11  ;;  %v20569_v11 = vld [vmem:[#allocation3 + $0xd2] sm:$0xff] }
 0x5e1   :  { %15493 = vmatprep.subr.mxu0 %v13558_v38 }
 0x5e2   :  { %15320 = vmatmul.mubr.msk.f32.gmra.mxu1 %vm141_vm3, %v20554_v36  ;;  %15494 = vmatpush3.msra.mxu0 %v13558_v38 }
 0x5e3   :  { %15322 = vmatprep.mubr.msk.f32.mxu1 %vm141_vm3, %v20558_v34  ;;  %15439 = vmatmul.mubr.msk.f32.gmra.mxu0 %vm141_vm3, %v20415_v14 }
 0x5e4   :  { %15495 = vmatprep.subr.mxu0 %v13557_v52  ;;  %15441 = vmatprep.mubr.msk.f32.mxu0 %vm141_vm3, %v20419_v49 }
 0x5e5   :  { %15496 = vmatpush3.msra.mxu0 %v13557_v52 }
 0x5e6   :  { %15497 = vmatprep.subr.mxu0 %v13556_v54  ;;  %15323 = vmatmul.mubr.msk.f32.gmra.mxu1 %vm141_vm3, %v20569_v11 }
 0x5e7   :  { %15498 = vmatpush3.msra.mxu0 %v13556_v54  ;;  %15325 = vmatprep.mubr.msk.f32.mxu1 %vm141_vm3, %v20573_v51 }
 0x5e8   :  { %15442 = vmatmul.mubr.msk.f32.gmra.mxu0 %vm141_vm3, %v20426_v59 }
 0x5e9   :  { %15444 = vmatprep.mubr.msk.f32.mxu0 %vm141_vm3, %v11931_v63 }
 0x5ea   :  { %15326 = vmatmul.mubr.msk.f32.gmra.mxu1 %vm141_vm3, %v20580_v20 }
 0x5eb   :  { %15328 = vmatprep.mubr.msk.f32.mxu1 %vm141_vm3, %v20584_v61 }
 0x5ec   :  { %15445 = vmatmul.mubr.msk.f32.gmra.mxu0 %vm141_vm3, %v11932_v62 }
 0x5ed   :  { %15447 = vmatprep.mubr.msk.f32.mxu0 %vm141_vm3, %v20444_v22 }
 0x5ee   :  { %15329 = vmatmul.mubr.msk.f32.gmra.mxu1 %vm141_vm3, %v20591_v3 }
 0x5ef   :  { %15339 = vmatprep.mubr.msk.f32.mxu1 %vm141_vm3, %v20358_v31  ;;  %v13497_v31 = vld [vmem:[%s21040_s3 + $0xa8] sm:$0xff] }
 0x5f0   :  { %15448 = vmatmul.mubr.msk.f32.gmra.mxu0 %vm141_vm3, %v20454_v7 }
 0x5f1   :  { %15450 = vmatprep.mubr.msk.f32.mxu0 %vm141_vm3, %v20461_v32 }
 0x5f2   :  { %15340 = vmatmul.mubr.msk.f32.vlgmr.msra.gmra.mxu1 %vm141_vm3, %v20369_v15  ;;  %v13496_v15 = vld [vmem:[%s21040_s3 + $0xa0] sm:$0xff] }
 0x5f3   :  { %15396 = vmatpush3.msra.mxu1 %v13499_v0  ;;  %15342 = vmatprep.mubr.msk.f32.mxu1 %vm141_vm3, %v20393_v29  ;;  %v13539_v29 = vld [vmem:[%s21040_s3 + $0xf8] sm:$0xff] }
 0x5f4   :  { %15451 = vmatmul.mubr.msk.f32.gmra.mxu0 %vm141_vm3, %v20470_v6  ;;  %15397 = vmatprep.subr.mxu1 %v13498_v19 }
 0x5f5   :  { %15453 = vmatprep.mubr.msk.f32.mxu0 %vm141_vm3, %v20478_v23  ;;  %15398 = vmatpush3.msra.mxu1 %v13498_v19 }
 0x5f6   :  { %15343 = vmatmul.mubr.msk.f32.gmra.mxu1 %vm141_vm3, %v20401_v24  ;;  %15399 = vmatprep.subr.mxu1 %v13497_v31  ;;  %v12391_v24 = vld [vmem:[#allocation3 + $0x82] sm:$0xff] }
 0x5f7   :  { %15345 = vmatprep.mubr.msk.f32.mxu1 %vm141_vm3, %v20415_v14  ;;  %15400 = vmatpush3.msra.mxu1 %v13497_v31  ;;  %v12392_v14 = vld [vmem:[#allocation3 + $0x92] sm:$0xff] }
 0x5f8   :  { %15454 = vmatmul.mubr.msk.f32.gmra.mxu0 %vm141_vm3, %v20483_v37  ;;  %15401 = vmatprep.subr.mxu1 %v13496_v15 }
 0x5f9   :  { %15456 = vmatprep.mubr.msk.f32.mxu0 %vm141_vm3, %v11939_v53  ;;  %15402 = vmatpush3.msra.mxu1 %v13496_v15 }
 0x5fa   :  { %15346 = vmatmul.mubr.msk.f32.gmra.mxu1 %vm141_vm3, %v20419_v49  ;;  %15459 = vmatprep.subr.mxu1 %v13539_v29  ;;  %v13538_v49 = vld [vmem:[%s21040_s3 + $0xf0] sm:$0xff] }
 0x5fb   :  { %15348 = vmatprep.mubr.msk.f32.mxu1 %vm141_vm3, %v20426_v59  ;;  %v13537_v59 = vld [vmem:[%s21040_s3 + $0xe8] sm:$0xff] }
 0x5fc   :  { %15457 = vmatmul.mubr.msk.f32.gmra.mxu0 %vm141_vm3, %v11940_v41 }
 0x5fd   :  { %15499 = vmatprep.mubr.msk.f32.mxu0 %vm141_vm3, %v20500_v45 }
 0x5fe   :  { %15349 = vmatmul.mubr.msk.f32.gmra.mxu1 %vm141_vm3, %v11931_v63 }
 0x5ff   :  { %15351 = vmatprep.mubr.msk.f32.mxu1 %vm141_vm3, %v20436_v33  ;;  %v13536_v33 = vld [vmem:[%s21040_s3 + $0xe0] sm:$0xff] }
 0x600   :  { %15500 = vmatmul.mubr.msk.f32.vlgmr.msra.gmra.mxu0 %vm141_vm3, %v20510_v27 }
 0x601   :  { %15502 = vmatprep.mubr.msk.f32.mxu0 %vm141_vm3, %v20517_v4 }
 0x602   :  { %15352 = vmatmul.mubr.msk.f32.gmra.mxu1 %vm141_vm3, %v20444_v22  ;;  %v12399_v22 = vld [vmem:[#allocation3 + $0x122] sm:$0xff] }
 0x603   :  { %15354 = vmatprep.mubr.msk.f32.mxu1 %vm141_vm3, %v20454_v7  ;;  %v12400_v7 = vld [vmem:[#allocation3 + $0x132] sm:$0xff] }
 0x604   :  { %15503 = vmatmul.mubr.msk.f32.gmra.mxu0 %vm141_vm3, %v20524_v17 }
 0x605   :  { %15505 = vmatprep.mubr.msk.f32.mxu0 %vm141_vm3, %v20528_v50 }
 0x606   :  { %15355 = vmatmul.mubr.msk.f32.gmra.mxu1 %vm141_vm3, %v20461_v32  ;;  %v21457_v32 = vmov 0.0  }
 0x607   :  { %15357 = vmatprep.mubr.msk.f32.mxu1 %vm141_vm3, %v20470_v6  ;;  %v12162_v6 = vld [vmem:[#allocation3 + $0x91] sm:$0xff] }
 0x608   :  { %15506 = vmatmul.mubr.msk.f32.gmra.mxu0 %vm141_vm3, %v20538_v1 }
 0x609   :  { %15508 = vmatprep.mubr.msk.f32.mxu0 %vm141_vm3, %v12391_v24 }
 0x60a   :  { %15358 = vmatmul.mubr.msk.f32.gmra.mxu1 %vm141_vm3, %v20478_v23  ;;  %v15556_v23 = vld [vmem:[#allocation3 + $0xf1] sm:$0xff] }
 0x60b   :  { %15360 = vmatprep.mubr.msk.f32.mxu1 %vm141_vm3, %v20483_v37  ;;  %v10742_v37 = vpop.f32.mrf.mxu1 }
 0x60c   :  { %15509 = vmatmul.mubr.msk.f32.gmra.mxu0 %vm141_vm3, %v12392_v14 }
 0x60d   :  { %15511 = vmatprep.mubr.msk.f32.mxu0 %vm141_vm3, %v20558_v34  ;;  %v15251_v35 = vpop.f32.mrf.mxu1 }
 0x60e   :  { %15361 = vmatmul.mubr.msk.f32.gmra.mxu1 %vm141_vm3, %v11939_v53 }
 0x60f   :  { %15403 = vmatprep.mubr.msk.f32.mxu1 %vm141_vm3, %v20492_v9  ;;  %v10752_v47 = vpop.f32.mrf.mxu1 }
 0x610   :  { %15512 = vmatmul.mubr.msk.f32.gmra.mxu0 %vm141_vm3, %v20569_v11 }
 0x611   :  { %15514 = vmatprep.mubr.msk.f32.mxu0 %vm141_vm3, %v20573_v51  ;;  %v20735_v58 = vpop.f32.mrf.mxu1 }
 0x612   :  { %15404 = vmatmul.mubr.msk.f32.vlgmr.msra.gmra.mxu1 %vm141_vm3, %v20500_v45 }
 0x613   :  { %15460 = vmatpush3.msra.mxu1 %v13539_v29  ;;  %15406 = vmatprep.mubr.msk.f32.mxu1 %vm141_vm3, %v20510_v27  ;;  %v20737_v60 = vpop.f32.mrf.mxu1 }
 0x614   :  { %15515 = vmatmul.mubr.msk.f32.gmra.mxu0 %vm141_vm3, %v20580_v20  ;;  %15461 = vmatprep.subr.mxu1 %v13538_v49 }
 0x615   :  { %15517 = vmatprep.mubr.msk.f32.mxu0 %vm141_vm3, %v20584_v61  ;;  %15462 = vmatpush3.msra.mxu1 %v13538_v49  ;;  %v20739_v9 = vpop.f32.mrf.mxu1 }
 0x616   :  { %15407 = vmatmul.mubr.msk.f32.gmra.mxu1 %vm141_vm3, %v20517_v4  ;;  %15463 = vmatprep.subr.mxu1 %v13537_v59 }
 0x617   :  { %15409 = vmatprep.mubr.msk.f32.mxu1 %vm141_vm3, %v20524_v17  ;;  %15464 = vmatpush3.msra.mxu1 %v13537_v59  ;;  %v20741_v39 = vpop.f32.mrf.mxu1  ;;  %v20751_v17 = vpop.f32.mrf.mxu0 }
 0x618   :  { %15518 = vmatmul.mubr.msk.f32.gmra.mxu0 %vm141_vm3, %v20591_v3  ;;  %15465 = vmatprep.subr.mxu1 %v13536_v33 }
 0x619   :  { %15520 = vmatprep.mubr.msk.f32.mxu0 %vm141_vm3, %v12399_v22  ;;  %15466 = vmatpush3.msra.mxu1 %v13536_v33  ;;  %v20743_v46 = vpop.f32.mrf.mxu1 }
 0x61a   :  { %15410 = vmatmul.mubr.msk.f32.gmra.mxu1 %vm141_vm3, %v20528_v50  ;;  %15523 = vmatprep.subr.mxu1 %v21457_v32 }
 0x61b   :  { %15412 = vmatprep.mubr.msk.f32.mxu1 %vm141_vm3, %v20538_v1 }
 0x61c   :  { %15521 = vmatmul.mubr.msk.f32.gmra.mxu0 %vm141_vm3, %v12400_v7 }
 0x61e   :  { %15413 = vmatmul.mubr.msk.f32.gmra.mxu1 %vm141_vm3, %v12391_v24 }
 0x61f   :  { %15415 = vmatprep.mubr.msk.f32.mxu1 %vm141_vm3, %v20554_v36 }
 0x622   :  { %15416 = vmatmul.mubr.msk.f32.gmra.mxu1 %vm141_vm3, %v20558_v34 }
 0x623   :  { %15418 = vmatprep.mubr.msk.f32.mxu1 %vm141_vm3, %v20569_v11 }
 0x626   :  { %15419 = vmatmul.mubr.msk.f32.gmra.mxu1 %vm141_vm3, %v20573_v51 }
 0x627   :  { %15421 = vmatprep.mubr.msk.f32.mxu1 %vm141_vm3, %v20580_v20 }
 0x62a   :  { %15422 = vmatmul.mubr.msk.f32.gmra.mxu1 %vm141_vm3, %v20584_v61 }
 0x62b   :  { %15424 = vmatprep.mubr.msk.f32.mxu1 %vm141_vm3, %v20591_v3 }
 0x62e   :  { %15425 = vmatmul.mubr.msk.f32.gmra.mxu1 %vm141_vm3, %v12399_v22 }
 0x62f   :  { %15467 = vmatprep.mubr.msk.f32.mxu1 %vm141_vm3, %v12155_v55 }
 0x632   :  { %15468 = vmatmul.mubr.msk.f32.vlgmr.msra.gmra.mxu1 %vm141_vm3, %v12156_v10 }
 0x633   :  { %15470 = vmatprep.mubr.msk.f32.mxu1 %vm141_vm3, %v12157_v21 }
 0x636   :  { %15471 = vmatmul.mubr.msk.f32.gmra.mxu1 %vm141_vm3, %v12158_v44 }
 0x637   :  { %15473 = vmatprep.mubr.msk.f32.mxu1 %vm141_vm3, %v12159_v25 }
 0x63a   :  { %15474 = vmatmul.mubr.msk.f32.gmra.mxu1 %vm141_vm3, %v12160_v18 }
 0x63b   :  { %15476 = vmatprep.mubr.msk.f32.mxu1 %vm141_vm3, %v12161_v13 }
 0x63e   :  { %15477 = vmatmul.mubr.msk.f32.gmra.mxu1 %vm141_vm3, %v12162_v6 }
 0x63f   :  { %15479 = vmatprep.mubr.msk.f32.mxu1 %vm141_vm3, %v15553_v48 }
 0x642   :  { %15480 = vmatmul.mubr.msk.f32.gmra.mxu1 %vm141_vm3, %v15554_v16 }
 0x643   :  { %15482 = vmatprep.mubr.msk.f32.mxu1 %vm141_vm3, %v15555_v42  ;;  %v12707_v42 = vld [vmem:[%s21042_s5 + $0x38] sm:$0xff] }
 0x644   :  { %15524 = vmatpush3.msra.mxu1 %v12707_v42 }
 0x645   :  { %15525 = vmatprep.subr.mxu1 %v21457_v32 }
 0x646   :  { %15483 = vmatmul.mubr.msk.f32.gmra.mxu1 %vm141_vm3, %v15556_v23 }
 0x647   :  { %15485 = vmatprep.mubr.msk.f32.mxu1 %vm141_vm3, %v15557_v5 }
 0x64a   :  { %15486 = vmatmul.mubr.msk.f32.gmra.mxu1 %vm141_vm3, %v20344_v26  ;;  %v20745_v26 = vpop.f32.mrf.mxu1 }
 0x64b   :  { %15488 = vmatprep.mubr.msk.f32.mxu1 %vm141_vm3, %v20530_v43  ;;  %v20753_v43 = vpop.f32.mrf.mxu0 }
 0x64c   :  { %v20747_v45 = vpop.f32.mrf.mxu1 }
 0x64d   :  { %v20755_v38 = vpop.f32.mrf.mxu0 }
 0x64e   :  { %15489 = vmatmul.mubr.msk.f32.gmra.mxu1 %vm141_vm3, %v12170_v56  ;;  %v10792_v8 = vpop.f32.mrf.mxu1 }
 0x64f   :  { %v20757_v36 = vpop.f32.mrf.mxu0  ;;  %15539 = vmatprep.mubr.msk.f32.mxu1 %vm15582_vm12, %v21457_v32 }
 0x651   :  { %v20759_v11 = vpop.f32.mrf.mxu0 }
 0x653   :  { %v20761_v63 = vpop.f32.mrf.mxu0 }
 0x655   :  { %v20763_v61 = vpop.f32.mrf.mxu0 }
 0x657   :  { %v20765_v19 = vpop.f32.mrf.mxu0 }
 0x659   :  { %v20769_v53 = vpop.f32.mrf.mxu0 }
 0x65b   :  { %v20773_v14 = vpop.f32.mrf.mxu0 }
 0x65d   :  { %v20779_v10 = vpop.f32.mrf.mxu0 }
 0x65f   :  { %v20783_v18 = vpop.f32.mrf.mxu0 }
 0x661   :  { %v20792_v5 = vpop.f32.mrf.mxu0 }
 0x66e   :  { %v15266_v40 = vpop.f32.mrf.mxu1 }
 0x670   :  { %v10802_v27 = vpop.f32.mrf.mxu1 }
 0x672   :  { %v15277_v4 = vpop.f32.mrf.mxu1 }
 0x673   :  { %v10931_v59 = vadd.f32 %v15277_v4, %v15245_v12 }
 0x674   :  { %v10925_v0 = vpop.f32.mrf.mxu1 }
 0x675   :  { %v10926_v7 = vadd.f32 %v10925_v0, %v10732_v28 }
 0x676   :  { %v15280_v50 = vpop.f32.mrf.mxu1 }
 0x677   :  { %v10941_v44 = vadd.f32 %v15280_v50, %v15248_v30 }
 0x678   :  { %v10935_v57 = vpop.f32.mrf.mxu1 }
 0x679   :  { %v10936_v6 = vadd.f32 %v10935_v57, %v10742_v37 }
 0x67a   :  { %v15283_v1 = vpop.f32.mrf.mxu1 }
 0x67b   :  { %v10951_v12 = vadd.f32 %v15283_v1, %v15251_v35 }
 0x67c   :  { %v10945_v52 = vpop.f32.mrf.mxu1 }
 0x67d   :  { %v10946_v30 = vadd.f32 %v10945_v52, %v10752_v47 }
 0x67e   :  { %v15286_v34 = vpop.f32.mrf.mxu1 }
 0x680   :  { %v10955_v54 = vpop.f32.mrf.mxu1 }
 0x681   :  { %v10956_v0 = vadd.f32 %v10955_v54, %v20737_v60 }
 0x682   :  { %v15289_v51 = vpop.f32.mrf.mxu1 }
 0x683   :  { %v10971_v47 = vadd.f32 %v15289_v51, %v20739_v9 }
 0x684   :  { %v10965_v62 = vpop.f32.mrf.mxu1 }
 0x686   :  { %v15292_v20 = vpop.f32.mrf.mxu1 }
 0x687   :  { %v10981_v60 = vadd.f32 %v15292_v20, %v20743_v46  ;;  %v12706_v46 = vld [vmem:[%s21042_s5 + $0x30] sm:$0xff] }
 0x688   :  { %v10975_v3 = vpop.f32.mrf.mxu1  ;;  %15526 = vmatpush3.msra.mxu1 %v12706_v46 }
 0x689   :  { %v10976_v9 = vadd.f32 %v10975_v3, %v20745_v26  ;;  %v12705_v26 = vld [vmem:[%s21042_s5 + $0x28] sm:$0xff]  ;;  %15527 = vmatprep.subr.mxu1 %v21457_v32 }
 0x68a   :  { %v15295_v31 = vpop.f32.mrf.mxu1  ;;  %15528 = vmatpush3.msra.mxu1 %v12705_v26 }
 0x68b   :  { %15529 = vmatprep.subr.mxu1 %v21457_v32 }
 0x68c   :  { %v10985_v15 = vpop.f32.mrf.mxu1 }
 0x68d   :  { %v20767_v29 = vadd.f32 %v10985_v15, %v10792_v8 }
 0x68e   :  { %v15298_v41 = vpop.f32.mrf.mxu1 }
 0x68f   :  { %v20771_v24 = vadd.f32 %v15298_v41, %v15266_v40  ;;  %v10961_v40 = vadd.f32 %v15286_v34, %v20735_v58  ;;  %v10966_v58 = vadd.f32 %v10965_v62, %v20741_v39  ;;  %v10991_v39 = vadd.f32 %v15295_v31, %v20747_v45  ;;  %v12704_v31 = vld [vmem:[%s21042_s5 + $0x20] sm:$0xff] }
 0x690   :  { %v10995_v49 = vpop.f32.mrf.mxu1  ;;  %15530 = vmatpush3.msra.mxu1 %v12704_v31 }
 0x691   :  { %v20775_v33 = vadd.f32 %v10995_v49, %v10802_v27  ;;  %15531 = vmatprep.subr.mxu1 %v21457_v32 }
 0x692   :  { %v15309_v22 = vpop.f32.mrf.mxu1 }
 0x693   :  { %v20777_v55 = vadd.f32 %v15309_v22, %v10931_v59 }
 0x694   :  { %v11139_v21 = vpop.f32.mrf.mxu1 }
 0x695   :  { %v20781_v25 = vadd.f32 %v11139_v21, %v10926_v7 }
 0x696   :  { %v15312_v13 = vpop.f32.mrf.mxu1 }
 0x697   :  { %v20785_v48 = vadd.f32 %v15312_v13, %v10941_v44 }
 0x698   :  { %v11149_v16 = vpop.f32.mrf.mxu1 }
 0x699   :  { %v20790_v23 = vadd.f32 %v11149_v16, %v10936_v6 }
 0x69a   :  { %v15315_v28 = vpop.f32.mrf.mxu1 }
 0x69b   :  { %v20795_v56 = vadd.f32 %v15315_v28, %v10951_v12  ;;  %v20797_v37 = vpop.f32.mrf.mxu0  ;;  %v12703_v12 = vld [vmem:[%s21042_s5 + $0x18] sm:$0xff] }
 0x69c   :  { %21458 = vst [vmem:[#allocation47_spill] sm:$0xff] %v20797_v37  ;;  %v11159_v8 = vpop.f32.mrf.mxu1  ;;  %15532 = vmatpush3.msra.mxu1 %v12703_v12 }
 0x69d   :  { %v20800_v27 = vadd.f32 %v11159_v8, %v10946_v30  ;;  %v20802_v4 = vpop.f32.mrf.mxu0  ;;  %15533 = vmatprep.subr.mxu1 %v21457_v32 }
 0x69e   :  { %21459 = vst [vmem:[#allocation60_spill] sm:$0xff] %v20802_v4  ;;  %v15318_v35 = vpop.f32.mrf.mxu1 }
 0x69f   :  { %v20805_v50 = vadd.f32 %v15318_v35, %v10961_v40  ;;  %v20807_v57 = vpop.f32.mrf.mxu0  ;;  %v12701_v35 = vld [vmem:[%s21042_s5 + $0x8] sm:$0xff] }
 0x6a0   :  { %v11169_v1 = vpop.f32.mrf.mxu1 }
 0x6a1   :  { %v20810_v52 = vadd.f32 %v11169_v1, %v10956_v0  ;;  %v20812_v15 = vpop.f32.mrf.mxu0 }
 0x6a2   :  { %v15321_v41 = vpop.f32.mrf.mxu1 }
 0x6a3   :  { %v20815_v34 = vadd.f32 %v15321_v41, %v10971_v47  ;;  %v20817_v49 = vpop.f32.mrf.mxu0  ;;  %v12700_v47 = vld [vmem:[%s21042_s5] sm:$0xff] }
 0x6a4   :  { %v11179_v59 = vpop.f32.mrf.mxu1 }
 0x6a5   :  { %v20820_v54 = vadd.f32 %v11179_v59, %v10966_v58  ;;  %v20822_v22 = vpop.f32.mrf.mxu0 }
 0x6a6   :  { %v15324_v7 = vpop.f32.mrf.mxu1 }
 0x6a7   :  { %v20825_v51 = vadd.f32 %v15324_v7, %v10981_v60 }
 0x6a8   :  { %v20827_v21 = vpop.f32.mrf.mxu0  ;;  %v11189_v44 = vpop.f32.mrf.mxu1 }
 0x6a9   :  { %21460 = vst [vmem:[#allocation48_spill] sm:$0xff] %v20827_v21  ;;  %v20830_v62 = vadd.f32 %v11189_v44, %v10976_v9 }
 0x6aa   :  { %v15327_v13 = vpop.f32.mrf.mxu1  ;;  %v20840_v20 = vpop.f32.mrf.mxu0 }
 0x6ab   :  { %v20832_v6 = vadd.f32 %v15327_v13, %v10991_v39  ;;  %21461 = vst [vmem:[#allocation62_spill] sm:$0xff] %v20840_v20 }
 0x6ac   :  { %v11199_v3 = vpop.f32.mrf.mxu1  ;;  %v20857_v28 = vpop.f32.mrf.mxu0 }
 0x6ad   :  { %v20844_v45 = vadd.f32 %v11199_v3, %v20767_v29  ;;  %21462 = vst [vmem:[#allocation49_spill] sm:$0xff] %v20857_v28 }
 0x6ae   :  { %v15330_v16 = vpop.f32.mrf.mxu1  ;;  %v20871_v0 = vpop.f32.mrf.mxu0 }
 0x6af   :  { %v20851_v42 = vadd.f32 %v15330_v16, %v20771_v24  ;;  %v12702_v24 = vld [vmem:[%s21042_s5 + $0x10] sm:$0xff]  ;;  %21463 = vst [vmem:[#allocation63_spill] sm:$0xff] %v20871_v0 }
 0x6b0   :  { %v11209_v29 = vpop.f32.mrf.mxu1  ;;  %15534 = vmatpush3.msra.mxu1 %v12702_v24  ;;  %v20880_v58 = vpop.f32.mrf.mxu0 }
 0x6b1   :  { %v20860_v30 = vadd.f32 %v11209_v29, %v20775_v33  ;;  %15535 = vmatprep.subr.mxu1 %v21457_v32  ;;  %21464 = vst [vmem:[#allocation50_spill] sm:$0xff] %v20880_v58 }
 0x6b2   :  { %v15341_v8 = vpop.f32.mrf.mxu1  ;;  %15536 = vmatpush3.msra.mxu1 %v12701_v35  ;;  %v20884_v9 = vpop.f32.mrf.mxu0 }
 0x6b3   :  { %v11449_v40 = vadd.f32 %v15341_v8, %v20777_v55  ;;  %15537 = vmatprep.subr.mxu1 %v21457_v32  ;;  %21465 = vst [vmem:[#allocation65_spill] sm:$0xff] %v20884_v9 }
 0x6b4   :  { %v11369_v33 = vpop.f32.mrf.mxu1  ;;  %15538 = vmatpush3.msra.mxu1 %v12700_v47 }
 0x6b5   :  { %v11448_v1 = vadd.f32 %v11369_v33, %v20781_v25  ;;  %v11679_v28 = vadd.f32 %v20749_v2, %v11449_v40 }
 0x6b6   :  { %v15344_v41 = vpop.f32.mrf.mxu1 }
 0x6b7   :  { %v11451_v55 = vadd.f32 %v15344_v41, %v20785_v48  ;;  %v20888_v48 = vpop.f32.mrf.mxu0 }
 0x6b8   :  { %v11379_v59 = vpop.f32.mrf.mxu1  ;;  %21466 = vst [vmem:[#allocation66_spill] sm:$0xff] %v20888_v48 }
 0x6b9   :  { %v11450_v60 = vadd.f32 %v11379_v59, %v20790_v23  ;;  %v20891_v31 = vpop.f32.mrf.mxu0 }
 0x6ba   :  { %v15347_v7 = vpop.f32.mrf.mxu1  ;;  %21467 = vst [vmem:[#allocation51_spill] sm:$0xff] %v20891_v31 }
 0x6bb   :  { %v11453_v25 = vadd.f32 %v15347_v7, %v20795_v56  ;;  %v20893_v12 = vpop.f32.mrf.mxu0 }
 0x6bc   :  { %v11389_v44 = vpop.f32.mrf.mxu1  ;;  %21468 = vst [vmem:[#allocation68_spill] sm:$0xff] %v20893_v12 }
 0x6bd   :  { %v11452_v39 = vadd.f32 %v11389_v44, %v20800_v27  ;;  %v20895_v24 = vpop.f32.mrf.mxu0 }
 0x6be   :  { %v15350_v13 = vpop.f32.mrf.mxu1  ;;  %21469 = vst [vmem:[#allocation69_spill] sm:$0xff] %v20895_v24 }
 0x6bf   :  { %v11455_v46 = vadd.f32 %v15350_v13, %v20805_v50  ;;  %v20899_v50 = vpop.f32.mrf.mxu0 }
 0x6c0   :  { %v11399_v32 = vpop.f32.mrf.mxu1  ;;  %21470 = vst [vmem:[#allocation52_spill] sm:$0xff] %v20899_v50 }
 0x6c1   :  { %v11454_v26 = vadd.f32 %v11399_v32, %v20810_v52  ;;  %v20903_v52 = vpop.f32.mrf.mxu0 }
 0x6c2   :  { %v15353_v3 = vpop.f32.mrf.mxu1  ;;  %21471 = vst [vmem:[#allocation71_spill] sm:$0xff] %v20903_v52 }
 0x6c3   :  { %v15501_v59 = vpop.f32.mrf.mxu0 }
 0x6c4   :  { %v11409_v23 = vpop.f32.mrf.mxu1 }
 0x6c5   :  { %v12520_v13 = vpop.f32.mrf.mxu0  ;;  %v11456_v2 = vadd.f32 %v11409_v23, %v20820_v54 }
 0x6c6   :  { %v15356_v16 = vpop.f32.mrf.mxu1 }
 0x6c7   :  { %v15504_v31 = vpop.f32.mrf.mxu0 }
 0x6c8   :  { %v11419_v56 = vpop.f32.mrf.mxu1 }
 0x6c9   :  { %v20909_v9 = vpop.f32.mrf.mxu0 }
 0x6ca   :  { %v15359_v29 = vpop.f32.mrf.mxu1  ;;  %21474 = vst [vmem:[#allocation55_spill] sm:$0xff] %v20909_v9 }
 0x6cb   :  { %v20915_v52 = vpop.f32.mrf.mxu0 }
 0x6cc   :  { %v11429_v27 = vpop.f32.mrf.mxu1  ;;  %21477 = vst [vmem:[#allocation58_spill] sm:$0xff] %v20915_v52 }
 0x6cd   :  { %v20922_v37 = vpop.f32.mrf.mxu0 }
 0x6ce   :  { %v20897_v8 = vpop.f32.mrf.mxu1 }
 0x6cf   :  { %v20930_v21 = vpop.f32.mrf.mxu0 }
 0x6d0   :  { %v20901_v35 = vpop.f32.mrf.mxu1 }
 0x6d1   :  { %v20943_v54 = vpop.f32.mrf.mxu0 }
 0x6d2   :  { %v15405_v33 = vpop.f32.mrf.mxu1 }
 0x6d3   :  { %v20960_v23 = vpop.f32.mrf.mxu0 }
 0x6d4   :  { %v11829_v47 = vpop.f32.mrf.mxu1 }
 0x6d6   :  { %v15408_v41 = vpop.f32.mrf.mxu1 }
 0x6d8   :  { %v11839_v7 = vpop.f32.mrf.mxu1 }
 0x6da   :  { %v15411_v44 = vpop.f32.mrf.mxu1 }
 0x6dc   :  { %v11849_v32 = vpop.f32.mrf.mxu1 }
 0x6de   :  { %v15414_v12 = vpop.f32.mrf.mxu1 }
 0x6e0   :  { %v20905_v24 = vpop.f32.mrf.mxu1 }
 0x6e1   :  { %21472 = vst [vmem:[#allocation18_spill] sm:$0xff] %v20905_v24  ;;  %v11909_v24 = vadd.f32 %v15405_v33, %v11679_v28 }
 0x6e2   :  { %v20907_v48 = vpop.f32.mrf.mxu1 }
 0x6e3   :  { %21473 = vst [vmem:[#allocation72_spill] sm:$0xff] %v20907_v48  ;;  %v11678_v48 = vadd.f32 %v20751_v17, %v11448_v1  ;;  %v12140_v28 = vadd.f32 %v20807_v57, %v11909_v24  ;;  %v11459_v17 = vadd.f32 %v15356_v16, %v20825_v51  ;;  %v11683_v1 = vadd.f32 %v20757_v36, %v11453_v25 }
 0x6e4   :  { %v20911_v50 = vpop.f32.mrf.mxu1  ;;  %v11461_v57 = vadd.f32 %v15359_v29, %v20832_v6  ;;  %v11684_v51 = vadd.f32 %v20763_v61, %v11454_v26 }
 0x6e5   :  { %21475 = vst [vmem:[#allocation74_spill] sm:$0xff] %v20911_v50  ;;  %v11908_v50 = vadd.f32 %v11829_v47, %v11678_v48  ;;  %v11682_v48 = vadd.f32 %v20759_v11, %v11452_v39  ;;  %v20952_v11 = vld [vmem:[%s21041_s4] ss:$0 sm:$0xff]  ;;  %v11913_v25 = vadd.f32 %v15411_v44, %v11683_v1  ;;  %v11689_v61 = vadd.f32 %v20773_v14, %v11459_v17  ;;  %v21480_v47 = vld [vmem:[#allocation48_spill] sm:$0xff]  ;;  %v21483_v44 = vld [vmem:[#allocation55_spill] sm:$0xff] }
 0x6e6   :  { %v20913_v58 = vpop.f32.mrf.mxu1 }
 0x6e7   :  { %21476 = vst [vmem:[#allocation75_spill] sm:$0xff] %v20913_v58  ;;  %v11681_v58 = vadd.f32 %v20753_v43, %v11451_v55  ;;  %v12139_v33 = vadd.f32 %v20812_v15, %v11908_v50  ;;  %v11912_v6 = vadd.f32 %v11849_v32, %v11682_v48  ;;  %v11462_v50 = vadd.f32 %v20901_v35, %v20860_v30  ;;  %v12560_v32 = vpop.f32.mrf.mxu0 }
 0x6e8   :  { %v20917_v0 = vpop.f32.mrf.mxu1 }
 0x6e9   :  { %21478 = vst [vmem:[#allocation77_spill] sm:$0xff] %v20917_v0  ;;  %v11457_v0 = vadd.f32 %v15353_v3, %v20815_v34  ;;  %v11911_v40 = vadd.f32 %v15408_v41, %v11681_v58  ;;  %v11685_v34 = vadd.f32 %v20761_v63, %v11455_v46  ;;  %v11686_v63 = vadd.f32 %v20769_v53, %v11456_v2 }
 0x6ea   :  { %v20919_v4 = vpop.f32.mrf.mxu1  ;;  %v11463_v53 = vadd.f32 %v20897_v8, %v20851_v42  ;;  %v12144_v41 = vadd.f32 %v21480_v47, %v11913_v25  ;;  %v21481_v42 = vld [vmem:[#allocation62_spill] sm:$0xff]  ;;  %v15516_v25 = vpop.f32.mrf.mxu0 }
 0x6eb   :  { %21479 = vst [vmem:[#allocation78_spill] sm:$0xff] %v20919_v4  ;;  %v11680_v4 = vadd.f32 %v20755_v38, %v11450_v60  ;;  %v11458_v38 = vadd.f32 %v11419_v56, %v20830_v62  ;;  %v11687_v36 = vadd.f32 %v20765_v19, %v11457_v0  ;;  %v12142_v60 = vadd.f32 %v20817_v49, %v11911_v40  ;;  %v21482_v8 = vld [vmem:[#allocation18_spill] sm:$0xff]  ;;  %v21485_v40 = vld [vmem:[#allocation47_spill] sm:$0xff] }
 0x6ec   :  { %v20924_v20 = vpop.f32.mrf.mxu1  ;;  %v11460_v62 = vadd.f32 %v11429_v27, %v20844_v45  ;;  %v11915_v16 = vadd.f32 %v15414_v12, %v11685_v34  ;;  %v11691_v45 = vadd.f32 %v20783_v18, %v11461_v57  ;;  %v12143_v12 = vadd.f32 %v21481_v42, %v11912_v6  ;;  %v21487_v34 = vld [vmem:[#allocation60_spill] sm:$0xff]  ;;  %v21488_v57 = vld [vmem:[#allocation58_spill] sm:$0xff] }
 0x6ed   :  { %v11910_v55 = vadd.f32 %v11839_v7, %v11680_v4  ;;  %v11688_v49 = vadd.f32 %v20779_v10, %v11458_v38  ;;  %v11914_v10 = vadd.f32 %v21482_v8, %v11684_v51  ;;  %v21490_v6 = vld [vmem:[#allocation74_spill] sm:$0xff]  ;;  %v12570_v8 = vpop.f32.mrf.mxu0 }
 0x6ee   :  { %v20927_v9 = vpop.f32.mrf.mxu1 }
 0x6ef   :  { %v12141_v26 = vadd.f32 %v20822_v22, %v11910_v55  ;;  %v11690_v22 = vadd.f32 %v20792_v5, %v11460_v62  ;;  %v21486_v5 = vld [vmem:[#allocation49_spill] sm:$0xff] }
 0x6f0   :  { %v20933_v52 = vpop.f32.mrf.mxu1  ;;  %v12146_v17 = vadd.f32 %v21486_v5, %v11915_v16 }
 0x6f2   :  { %v15469_v43 = vpop.f32.mrf.mxu1 }
 0x6f3   :  { %v12370_v3 = vadd.f32 %v15469_v43, %v12140_v28  ;;  %v11693_v28 = vadd.f32 %v21485_v40, %v11463_v53  ;;  %v21492_v53 = vld [vmem:[#allocation50_spill] sm:$0xff] }
 0x6f4   :  { %v12290_v4 = vpop.f32.mrf.mxu1 }
 0x6f5   :  { %v12600_v58 = vadd.f32 %v15501_v59, %v12370_v3  ;;  %v12369_v15 = vadd.f32 %v12290_v4, %v12139_v33  ;;  %v11692_v3 = vadd.f32 %v21487_v34, %v11462_v50 }
 0x6f6   :  { %v15472_v39 = vpop.f32.mrf.mxu1 }
 0x6f7   :  { %v12623_v19 = vadd.f32 %v20952_v11, %v12600_v58  ;;  %v12599_v0 = vadd.f32 %v12520_v13, %v12369_v15  ;;  %v12372_v46 = vadd.f32 %v15472_v39, %v12142_v60  ;;  %v21489_v60 = vld [vmem:[#allocation63_spill] sm:$0xff]  ;;  %v11916_v39 = vadd.f32 %v21490_v6, %v11686_v63 }
 0x6f8   :  { %v12300_v56 = vpop.f32.mrf.mxu1  ;;  %v12145_v62 = vadd.f32 %v21489_v60, %v11914_v10  ;;  %v21494_v10 = vld [vmem:[#allocation78_spill] sm:$0xff]  ;;  %v21499_v60 = vld [vmem:[#allocation69_spill] sm:$0xff]  ;;  %v11922_v6 = vadd.f32 %v20933_v52, %v11692_v3 }
 0x6f9   :  { %v12639_v29 = vmax.f32 %v12623_v19, 0.0  ;;  %v12622_v14 = vadd.f32 %v20952_v11, %v12599_v0  ;;  %v12602_v24 = vadd.f32 %v15504_v31, %v12372_v46  ;;  %v12371_v27 = vadd.f32 %v12300_v56, %v12141_v26  ;;  %v21484_v31 = vld [vmem:[#allocation72_spill] sm:$0xff]  ;;  %v21491_v19 = vld [vmem:[#allocation75_spill] sm:$0xff] }
 0x6fa   :  { %v15475_v59 = vpop.f32.mrf.mxu1  ;;  %v11917_v2 = vadd.f32 %v21484_v31, %v11687_v36  ;;  %v11919_v0 = vadd.f32 %v21491_v19, %v11689_v61  ;;  %v21496_v31 = vld [vmem:[#allocation66_spill] sm:$0xff] }
 0x6fb   :  { %v12638_v7 = vmax.f32 %v12622_v14, 0.0  ;;  %v12625_v18 = vadd.f32 %v20952_v11, %v12602_v24  ;;  %v12601_v13 = vadd.f32 %v21483_v44, %v12371_v27  ;;  %v12374_v30 = vadd.f32 %v15475_v59, %v12144_v41  ;;  %v21493_v24 = vld [vmem:[#allocation77_spill] sm:$0xff] }
 0x6fc   :  { %v12310_v35 = vpop.f32.mrf.mxu1  ;;  %v12656_v1 = vsel %vm12654_vm13, %v12639_v29, 0.0  ;;  %v12148_v16 = vadd.f32 %v21492_v53, %v11917_v2  ;;  %v11918_v27 = vadd.f32 %v21493_v24, %v11688_v49  ;;  %v21495_v44 = vld [vmem:[#allocation65_spill] sm:$0xff]  ;;  %v12150_v49 = vadd.f32 %v21496_v31, %v11919_v0  ;;  %v21500_v24 = vld [vmem:[#allocation52_spill] sm:$0xff] }
 0x6fd   :  { %v12655_v48 = vsel %vm12654_vm13, %v12638_v7, 0.0  ;;  %v12624_v43 = vadd.f32 %v20952_v11, %v12601_v13  ;;  %v12373_v55 = vadd.f32 %v12310_v35, %v12143_v12  ;;  %v12641_v38 = vmax.f32 %v12625_v18, 0.0 }
 0x6fe   :  { %v12657_v33 = vadd.f32 %v12656_v1, %v12655_v48  ;;  %v12604_v51 = vadd.f32 %v21488_v57, %v12374_v30  ;;  %v15478_v36 = vpop.f32.mrf.mxu1  ;;  %v11921_v7 = vadd.f32 %v21494_v10, %v11691_v45  ;;  %v11920_v2 = vadd.f32 %v20924_v20, %v11690_v22  ;;  %v21497_v45 = vld [vmem:[#allocation51_spill] sm:$0xff] }
 0x6ff   :  { %v12640_v4 = vmax.f32 %v12624_v43, 0.0  ;;  %v12603_v58 = vadd.f32 %v20922_v37, %v12373_v55  ;;  %v12376_v15 = vadd.f32 %v15478_v36, %v12146_v17  ;;  %v12660_v50 = vsel %vm12654_vm13, %v12641_v38, 0.0  ;;  %v15519_v38 = vpop.f32.mrf.mxu0  ;;  %v21498_v36 = vld [vmem:[#allocation68_spill] sm:$0xff] }
 0x700   :  { %v12627_v46 = vadd.f32 %v20952_v11, %v12604_v51  ;;  %v12320_v26 = vpop.f32.mrf.mxu1  ;;  %v12149_v48 = vadd.f32 %v21497_v45, %v11918_v27  ;;  %v11923_v20 = vadd.f32 %v20927_v9, %v11693_v28 }
 0x701   :  { %v12658_v56 = vsel %vm12654_vm13, %v12640_v4, 0.0  ;;  %v12626_v29 = vadd.f32 %v20952_v11, %v12603_v58  ;;  %v12606_v14 = vadd.f32 %v20930_v21, %v12376_v15  ;;  %v12375_v37 = vadd.f32 %v12320_v26, %v12145_v62  ;;  %v12580_v53 = vpop.f32.mrf.mxu0 }
 0x702   :  { %v12659_v47 = vadd.f32 %v12658_v56, %v12657_v33  ;;  %v12643_v63 = vmax.f32 %v12627_v46, 0.0  ;;  %v15481_v41 = vpop.f32.mrf.mxu1  ;;  %v12147_v21 = vadd.f32 %v21495_v44, %v11916_v39  ;;  %v12151_v62 = vadd.f32 %v21499_v60, %v11920_v2 }
 0x703   :  { %v12642_v61 = vmax.f32 %v12626_v29, 0.0  ;;  %v12629_v59 = vadd.f32 %v20952_v11, %v12606_v14  ;;  %v12605_v42 = vadd.f32 %v20943_v54, %v12375_v37  ;;  %v12378_v12 = vadd.f32 %v15481_v41, %v12148_v16 }
 0x704   :  { %v12661_v18 = vadd.f32 %v12660_v50, %v12659_v47  ;;  %v12330_v13 = vpop.f32.mrf.mxu1  ;;  %v12664_v54 = vsel %vm12654_vm13, %v12643_v63, 0.0  ;;  %v12154_v27 = vadd.f32 %v21500_v24, %v11923_v20  ;;  %v15522_v47 = vpop.f32.mrf.mxu0 }
 0x705   :  { %v12662_v40 = vsel %vm12654_vm13, %v12642_v61, 0.0  ;;  %v12628_v30 = vadd.f32 %v20952_v11, %v12605_v42  ;;  %v12608_v35 = vadd.f32 %v20960_v23, %v12378_v12  ;;  %v12377_v17 = vadd.f32 %v12330_v13, %v12147_v21 }
 0x706   :  { %v12663_v5 = vadd.f32 %v12662_v40, %v12661_v18  ;;  %v15484_v1 = vpop.f32.mrf.mxu1  ;;  %v12645_v43 = vmax.f32 %v12629_v59, 0.0  ;;  %v12152_v23 = vadd.f32 %v21498_v36, %v11921_v7  ;;  %v21501_v59 = vld [vmem:[#allocation71_spill] sm:$0xff] }
 0x707   :  { %v12644_v55 = vmax.f32 %v12628_v30, 0.0  ;;  %v12631_v34 = vadd.f32 %v20952_v11, %v12608_v35  ;;  %v12380_v33 = vadd.f32 %v15484_v1, %v12150_v49  ;;  %v12607_v57 = vadd.f32 %v12560_v32, %v12377_v17  ;;  %v12590_v49 = vpop.f32.mrf.mxu0 }
 0x708   :  { %v12665_v22 = vadd.f32 %v12664_v54, %v12663_v5  ;;  %v12340_v51 = vpop.f32.mrf.mxu1  ;;  %v12668_v9 = vsel %vm12654_vm13, %v12645_v43, 0.0  ;;  %v12153_v42 = vadd.f32 %v21501_v59, %v11922_v6 }
 0x709   :  { %v12666_v4 = vsel %vm12654_vm13, %v12644_v55, 0.0  ;;  %v12610_v58 = vadd.f32 %v15516_v25, %v12380_v33  ;;  %v12379_v15 = vadd.f32 %v12340_v51, %v12149_v48  ;;  %v12647_v19 = vmax.f32 %v12631_v34, 0.0 }
 0x70a   :  { %v12667_v39 = vadd.f32 %v12666_v4, %v12665_v22  ;;  %v12630_v0 = vadd.f32 %v20952_v11, %v12607_v57  ;;  %v15487_v46 = vpop.f32.mrf.mxu1 }
 0x70b   :  { %v12633_v32 = vadd.f32 %v20952_v11, %v12610_v58  ;;  %v12609_v28 = vadd.f32 %v12570_v8, %v12379_v15  ;;  %v12382_v26 = vadd.f32 %v15487_v46, %v12152_v23  ;;  %v12677_v52 = vsel %vm12654_vm13, %v12647_v19, 0.0 }
 0x70c   :  { %v12669_v16 = vadd.f32 %v12668_v9, %v12667_v39  ;;  %v12646_v56 = vmax.f32 %v12630_v0, 0.0  ;;  %v12350_v25 = vpop.f32.mrf.mxu1  ;;  %v13577_v9 = vld [vmem:[%s21043_s6] ss:$0 sm:$0xff] }
 0x70d   :  { %v12632_v29 = vadd.f32 %v20952_v11, %v12609_v28  ;;  %v12612_v14 = vadd.f32 %v15519_v38, %v12382_v26  ;;  %v12381_v37 = vadd.f32 %v12350_v25, %v12151_v62  ;;  %v12649_v41 = vmax.f32 %v12633_v32, 0.0 }
 0x70e   :  { %v12676_v3 = vsel %vm12654_vm13, %v12646_v56, 0.0  ;;  %v15490_v50 = vpop.f32.mrf.mxu1  ;;  %v12670_v2 = vrot.slane %v12669_v16, 4 }
 0x70f   :  { %v12678_v63 = vadd.f32 %v12677_v52, %v12676_v3  ;;  %v12648_v61 = vmax.f32 %v12632_v29, 0.0  ;;  %v12635_v12 = vadd.f32 %v20952_v11, %v12612_v14  ;;  %v12611_v8 = vadd.f32 %v12580_v53, %v12381_v37 }
 0x710   :  { %v12384_v10 = vadd.f32 %v15490_v50, %v12154_v27  ;;  %v12360_v7 = vpop.f32.mrf.mxu1  ;;  %v12681_v40 = vsel %vm12654_vm13, %v12649_v41, 0.0  ;;  %v12671_v48 = vadd.f32 %v12670_v2, %v12669_v16 }
 0x711   :  { %v12679_v18 = vsel %vm12654_vm13, %v12648_v61, 0.0  ;;  %v12383_v44 = vadd.f32 %v12360_v7, %v12153_v42  ;;  %v12634_v13 = vadd.f32 %v20952_v11, %v12611_v8  ;;  %v12651_v35 = vmax.f32 %v12635_v12, 0.0 }
 0x712   :  { %v12680_v21 = vadd.f32 %v12679_v18, %v12678_v63  ;;  %v12614_v31 = vadd.f32 %v15522_v47, %v12384_v10  ;;  %v12672_v22 = vrot.slane %v12671_v48, 2 }
 0x713   :  { %v12613_v30 = vadd.f32 %v12590_v49, %v12383_v44  ;;  %v12650_v54 = vmax.f32 %v12634_v13, 0.0  ;;  %v12685_v34 = vsel %vm12654_vm13, %v12651_v35, 0.0 }
 0x714   :  { %v12682_v5 = vadd.f32 %v12681_v40, %v12680_v21  ;;  %v12637_v17 = vadd.f32 %v20952_v11, %v12614_v31  ;;  %v12673_v23 = vadd.f32 %v12672_v22, %v12671_v48 }
 0x715   :  { %v12636_v1 = vadd.f32 %v20952_v11, %v12613_v30  ;;  %v12683_v45 = vsel %vm12654_vm13, %v12650_v54, 0.0 }
 0x716   :  { %v12684_v43 = vadd.f32 %v12683_v45, %v12682_v5  ;;  %v12653_v33 = vmax.f32 %v12637_v17, 0.0  ;;  %v12674_v11 = vrot.slane %v12673_v23, 1 }
 0x717   :  { %v12652_v55 = vmax.f32 %v12636_v1, 0.0 }
 0x718   :  { %v12686_v38 = vadd.f32 %v12685_v34, %v12684_v43  ;;  %v12689_v51 = vsel %vm12654_vm13, %v12653_v33, 0.0  ;;  %v12675_v62 = vadd.f32 %v12674_v11, %v12673_v23 }
 0x719   :  { %v12687_v20 = vsel %vm12654_vm13, %v12652_v55, 0.0 }
 0x71a   :  { %v12688_v57 = vadd.f32 %v12687_v20, %v12686_v38  ;;  %v12698_v0 = vmul.f32 0.015625, %v12675_v62 }
 0x71c   :  { %v12690_v36 = vadd.f32 %v12689_v51, %v12688_v57 }
 0x71e   :  { %v12691_v4 = vrot.slane %v12690_v36, 4 }
 0x720   :  { %v12692_v58 = vadd.f32 %v12691_v4, %v12690_v36 }
 0x722   :  { %v12693_v15 = vrot.slane %v12692_v58, 2 }
 0x724   :  { %v12694_v60 = vadd.f32 %v12693_v15, %v12692_v58 }
 0x726   :  { %v12695_v6 = vrot.slane %v12694_v60, 1 }
 0x728   :  { %v12696_v39 = vadd.f32 %v12695_v6, %v12694_v60 }
 0x72a   :  { %v12699_v19 = vmul.f32 0.015625, %v12696_v39 }
 0x72c   :  { %v12717_v46 = vsel %vm10425_vm5, %v12699_v19, %v12698_v0 }
 0x72d   :  { %15540 = vmatmul.mubr.msk.f32.vlgmr.msra.gmra.mxu1 %vm12654_vm13, %v12717_v46 }
 0x7ed   :  { %v12786_v32 = vpop.f32.mrf.mxu1 }
 0x7ee   :  { %v12787_v28 = vadd.f32 %v13577_v9, %v12786_v32 }
 0x7ef   :  { %v15541_v26 = vpop.f32.mrf.mxu1 }
 0x7f0   :  { %12791 = vst.msk [vmem:[#allocation4] sm:$0x3] %vm12790_vm14, %v12787_v28 }
 0x7f1   :  { %15569 = shalt.err (!%p15566_p4)
}
 0x7f2   :  { %12801 = dma.vmem_to_hbm [thread:$0]  %s12799_s30, 32, %s21044_s7, [#allocation5]  }
 0x7f3   :  { %15578 = dma.done.wait [#allocation5], 32  }
 0x7f4   :  { %15579 = vsyncadd [#allocation5], 4294967264 }
 0x7f5   :  { %12805 = vsyncpa [#allocation5], 1 }

</bundles_post_ra>
